<compile_context>
chip_gen: v5e
topology: v5e:2x2
jax: 0.10.0
libtpu: 0.0.40
codegen_flags: <defaults>
</compile_context>

<pallas_src>
import functools

import jax
import jax.numpy as jnp
from jax.experimental import pallas as pl
from jax.experimental.pallas import tpu as pltpu


# ------------------------------- fused kernel ------------------------------- #

def _rdb_kernel(*refs, num_layers, num_features, H, W):
    """One batch element: all dense layers + LFF + residual, activations on-chip.

    refs = (x_ref,                      # (1, F, H*W)
            w_ref_0 ... w_ref_{L-1},    # (9, l+1, F_out, F_in)   3x3 weights, chunked along Cin
            lff_ref,                    # (L+1, F_out, F_in)      1x1 LFF weights, chunked along Cin
            b_ref,                      # (L+1, F, 1)             layer biases + LFF bias
            o_ref)                      # (1, F, H*W)
    """
    L, F = num_layers, num_features
    HW = H * W
    PAD = W + 1                       # zero halo (one row + one pixel) on each side

    x_ref = refs[0]
    w_refs = refs[1:1 + L]
    lff_ref = refs[1 + L]
    b_ref = refs[2 + L]
    o_ref = refs[3 + L]

    # Column index of every flattened pixel -> edge masks for the +/-1 x-shifts.
    xcol = jax.lax.broadcasted_iota(jnp.int32, (1, HW), 1) % W
    not_left_edge = xcol > 0          # tap looks one pixel to the left
    not_right_edge = xcol < (W - 1)   # tap looks one pixel to the right

    zpad = jnp.zeros((F, PAD), jnp.float32)

    def lane_pad(v):                  # (F, HW) -> (F, HW + 2*PAD) with zero halo
        return jnp.concatenate([zpad, v, zpad], axis=1)

    x0 = x_ref[0].astype(jnp.float32)            # (F, HW)
    chunks = [x0]                                # unpadded chunks (for LFF / residual)
    chunks_padded = [lane_pad(x0)]               # halo-padded chunks (for 3x3 taps)

    # ---- dense 3x3 + ReLU layers (fully unrolled; L, F are static) ----
    for l in range(L):
        acc = jnp.zeros((F, HW), jnp.float32)
        w_l = w_refs[l]                          # (9, l+1, F_out, F_in)
        for j in range(l + 1):                   # one F-wide chunk per earlier output
            src = chunks_padded[j]               # (F, HW + 2*PAD)
            for dy in range(3):
                for dx in range(3):
                    s = (dy - 1) * W + (dx - 1)
                    win = src[:, PAD + s: PAD + s + HW]          # (F, HW) shifted tap
                    if dx == 0:
                        win = jnp.where(not_left_edge, win, 0.0)
                    elif dx == 2:
                        win = jnp.where(not_right_edge, win, 0.0)
                    w_tap = w_l[dy * 3 + dx, j]                  # (F_out, F_in)
                    for ci in range(F):          # VPU broadcast-MACs (no MXU)
                        acc = acc + w_tap[:, ci:ci + 1] * win[ci:ci + 1, :]
        out = jnp.maximum(acc + b_ref[l], 0.0)                   # bias (F,1) + ReLU
        chunks.append(out)
        chunks_padded.append(lane_pad(out))

    # ---- 1x1 LFF over the whole dense stack + residual (last layer output) ----
    acc = jnp.zeros((F, HW), jnp.float32)
    for j in range(L + 1):
        w_j = lff_ref[j]                         # (F_out, F_in)
        src = chunks[j]
        for ci in range(F):
            acc = acc + w_j[:, ci:ci + 1] * src[ci:ci + 1, :]
    y = acc + b_ref[L] + chunks[-1]
    o_ref[0] = y.astype(o_ref.dtype)


# --------------------------------- wrapper ---------------------------------- #

def rdb_pallas(x_nchw, params):
    N, F, H, W = x_nchw.shape
    L = len(params["layers"])
    HW = H * W

    x_flat = x_nchw.reshape(N, F, HW)            # metadata-only reshape (stays NCHW)

    # Re-layout weights for per-chunk VPU access: [tap, chunk, c_out, c_in].
    w_list, b_list = [], []
    for l, (w, b) in enumerate(params["layers"]):            # w: (3,3,Cin,F), HWIO
        wk = w.reshape(3, 3, l + 1, F, F)                     # [dy,dx,j,ci,co]
        wk = jnp.transpose(wk, (0, 1, 2, 4, 3)).reshape(9, l + 1, F, F)
        w_list.append(wk)
        b_list.append(b)
    lff = jnp.transpose(params["lff_w"].reshape(L + 1, F, F), (0, 2, 1))  # [j,co,ci]
    biases = jnp.stack(b_list + [params["lff_b"]], axis=0).reshape(L + 1, F, 1)

    kernel = functools.partial(
        _rdb_kernel, num_layers=L, num_features=F, H=H, W=W)

    in_specs = [pl.BlockSpec((1, F, HW), lambda n: (n, 0, 0))]
    for l in range(L):
        in_specs.append(pl.BlockSpec((9, l + 1, F, F), lambda n: (0, 0, 0, 0)))
    in_specs.append(pl.BlockSpec((L + 1, F, F), lambda n: (0, 0, 0)))
    in_specs.append(pl.BlockSpec((L + 1, F, 1), lambda n: (0, 0, 0)))

    y_flat = pl.pallas_call(
        kernel,
        out_shape=jax.ShapeDtypeStruct((N, F, HW), x_nchw.dtype),
        grid=(N,),
        in_specs=in_specs,
        out_specs=pl.BlockSpec((1, F, HW), lambda n: (n, 0, 0)),
        compiler_params=pltpu.CompilerParams(
            dimension_semantics=("parallel",)),        # N=2 keeps both v7x TCs busy
    )(x_flat, *w_list, lff, biases)

    return y_flat.reshape(N, F, H, W)


rdb_forward = jax.jit(rdb_pallas)


# ---------------------------- parameter creation ---------------------------- #

def init_rdb_params(key, num_features, num_layers):
    """Deterministic synthetic parameters matching the PyTorch module shapes."""
    params = {"layers": []}
    for i in range(num_layers):
        cin = (i + 1) * num_features
        key, kw, kb = jax.random.split(key, 3)
        w = jax.random.normal(kw, (3, 3, cin, num_features), jnp.float32) * 0.05
        b = jax.random.normal(kb, (num_features,), jnp.float32) * 0.01
        params["layers"].append((w, b))
    cin = (num_layers + 1) * num_features
    key, kw, kb = jax.random.split(key, 3)
    params["lff_w"] = jax.random.normal(kw, (cin, num_features), jnp.float32) * 0.05
    params["lff_b"] = jax.random.normal(kb, (num_features,), jnp.float32) * 0.01
    return params


# ----------------------------- pure-JAX reference ---------------------------- #

def _ref_conv3x3_relu(x, w, b):
    y = jax.lax.conv_general_dilated(
        x, w, window_strides=(1, 1), padding="SAME",
        dimension_numbers=("NHWC", "HWIO", "NHWC"))
    return jnp.maximum(y + b[None, None, None, :], 0.0)


def rdb_forward_ref(x_nchw, params):
    x = jnp.transpose(x_nchw, (0, 2, 3, 1))
    out = [x]
    for (w, b) in params["layers"]:
        x = _ref_conv3x3_relu(jnp.concatenate(out, axis=-1), w, b)
        out.append(x)
    cat = jnp.concatenate(out, axis=-1)
    y = jnp.einsum("nhwc,co->nhwo", cat, params["lff_w"]) + params["lff_b"] + x
    return jnp.transpose(y, (0, 3, 1, 2))


# ----------------------------------- main ------------------------------------ #

if __name__ == "__main__":
    num_features = 4
    num_layers = 3
    N, H, W = 2, 16, 16

    key = jax.random.PRNGKey(0)
    key, kx = jax.random.split(key)
    x = jax.random.normal(kx, (N, num_features, H, W), jnp.float32)
    params = init_rdb_params(key, num_features, num_layers)

    y = rdb_forward(x, params)
    y = jax.block_until_ready(y)

    y_ref = rdb_forward_ref(x, params)
    assert y.shape == (N, num_features, H, W)
    assert jnp.allclose(y, y_ref, rtol=1e-4, atol=1e-4), \
        f"max abs err {jnp.max(jnp.abs(y - y_ref))}"

    print("KERNEL_OK")
</pallas_src>

<mosaic_0001>
module attributes {stable_mosaic.version = 11 : i64} {
  func.func @_rdb_kernel(%arg0: i32, %arg1: memref<1x4x256xf32, #tpu.memory_space<vmem>>, %arg2: memref<9x1x4x4xf32, #tpu.memory_space<vmem>>, %arg3: memref<9x2x4x4xf32, #tpu.memory_space<vmem>>, %arg4: memref<9x3x4x4xf32, #tpu.memory_space<vmem>>, %arg5: memref<4x4x4xf32, #tpu.memory_space<vmem>>, %arg6: memref<4x4x1xf32, #tpu.memory_space<vmem>>, %arg7: memref<1x4x256xf32, #tpu.memory_space<vmem>>) attributes {dimension_semantics = [#tpu.dimension_semantics<parallel>], iteration_bounds = array<i64: 2>, scalar_prefetch = 0 : i64, scratch_operands = 0 : i64, tpu.core_type = #tpu.core_type<tc>, window_params = [{transform_indices = @transform_0, window_bounds = array<i64: 1, 4, 256>}, {pipeline_mode = #tpu.pipeline_mode<synchronous>, transform_indices = @transform_1, window_bounds = array<i64: 9, 1, 4, 4>}, {pipeline_mode = #tpu.pipeline_mode<synchronous>, transform_indices = @transform_2, window_bounds = array<i64: 9, 2, 4, 4>}, {pipeline_mode = #tpu.pipeline_mode<synchronous>, transform_indices = @transform_3, window_bounds = array<i64: 9, 3, 4, 4>}, {pipeline_mode = #tpu.pipeline_mode<synchronous>, transform_indices = @transform_4, window_bounds = array<i64: 4, 4, 4>}, {pipeline_mode = #tpu.pipeline_mode<synchronous>, transform_indices = @transform_5, window_bounds = array<i64: 4, 4, 1>}, {transform_indices = @transform_6, window_bounds = array<i64: 1, 4, 256>}]} {
    %0 = tpu.iota {dimensions = array<i32: 1>} : vector<1x256xi32>
    %c16_i32 = arith.constant 16 : i32
    %c0_i32 = arith.constant 0 : i32
    %1 = arith.cmpi eq, %c16_i32, %c0_i32 : i32
    %c1_i32 = arith.constant 1 : i32
    %2 = arith.select %1, %c1_i32, %c16_i32 : i32
    %3 = vector.broadcast %2 : i32 to vector<1x256xi32>
    %4 = arith.remsi %0, %3 : vector<1x256xi32>
    %c0_i32_0 = arith.constant 0 : i32
    %5 = vector.broadcast %c0_i32_0 : i32 to vector<1x256xi32>
    %6 = arith.cmpi ne, %4, %5 : vector<1x256xi32>
    %c0_i32_1 = arith.constant 0 : i32
    %7 = vector.broadcast %c0_i32_1 : i32 to vector<1x256xi32>
    %8 = arith.cmpi slt, %4, %7 : vector<1x256xi32>
    %c0_i32_2 = arith.constant 0 : i32
    %9 = arith.cmpi slt, %2, %c0_i32_2 : i32
    %10 = vector.broadcast %9 : i1 to vector<1x256xi1>
    %11 = vector.broadcast %10 : vector<1x256xi1> to vector<1x256xi1>
    %12 = arith.xori %8, %11 : vector<1x256xi1>
    %13 = arith.andi %12, %6 : vector<1x256xi1>
    %14 = vector.broadcast %2 : i32 to vector<1x256xi32>
    %15 = arith.addi %4, %14 : vector<1x256xi32>
    %16 = arith.select %13, %15, %4 : vector<1x256xi1>, vector<1x256xi32>
    %c0_i32_3 = arith.constant 0 : i32
    %17 = vector.broadcast %c0_i32_3 : i32 to vector<1x256xi32>
    %18 = arith.cmpi sgt, %16, %17 : vector<1x256xi32>
    %c15_i32 = arith.constant 15 : i32
    %19 = vector.broadcast %c15_i32 : i32 to vector<1x256xi32>
    %20 = arith.cmpi slt, %16, %19 : vector<1x256xi32>
    %cst = arith.constant 0.000000e+00 : f32
    %21 = vector.broadcast %cst : f32 to vector<4x17xf32>
    %c0 = arith.constant 0 : index
    %c0_4 = arith.constant 0 : index
    %c0_5 = arith.constant 0 : index
    %22 = vector.load %arg1[%c0, %c0_4, %c0_5] : memref<1x4x256xf32, #tpu.memory_space<vmem>>, vector<1x4x256xf32>
    %23 = vector.shape_cast %22 : vector<1x4x256xf32> to vector<4x256xf32>
    %24 = tpu.concatenate %21, %23, %21 in 1 : vector<4x17xf32>, vector<4x256xf32>, vector<4x17xf32> -> vector<4x290xf32>
    %cst_6 = arith.constant 0.000000e+00 : f32
    %25 = vector.broadcast %cst_6 : f32 to vector<4x256xf32>
    %26 = vector.extract_strided_slice %24 {offsets = [0, 0], sizes = [4, 256], strides = [1, 1]} : vector<4x290xf32> to vector<4x256xf32>
    %cst_7 = arith.constant 0.000000e+00 : f32
    %27 = vector.shape_cast %18 : vector<1x256xi1> to vector<1x256xi1>
    %28 = vector.broadcast %27 : vector<1x256xi1> to vector<4x256xi1>
    %29 = vector.broadcast %cst_7 : f32 to vector<4x256xf32>
    %30 = arith.select %28, %26, %29 : vector<4x256xi1>, vector<4x256xf32>
    %c0_8 = arith.constant 0 : index
    %c0_9 = arith.constant 0 : index
    %c0_10 = arith.constant 0 : index
    %c0_11 = arith.constant 0 : index
    %31 = vector.load %arg2[%c0_8, %c0_9, %c0_10, %c0_11] : memref<9x1x4x4xf32, #tpu.memory_space<vmem>>, vector<1x1x4x4xf32>
    %32 = vector.shape_cast %31 : vector<1x1x4x4xf32> to vector<4x4xf32>
    %33 = vector.extract_strided_slice %32 {offsets = [0, 0], sizes = [4, 1], strides = [1, 1]} : vector<4x4xf32> to vector<4x1xf32>
    %34 = vector.extract_strided_slice %30 {offsets = [0, 0], sizes = [1, 256], strides = [1, 1]} : vector<4x256xf32> to vector<1x256xf32>
    %35 = vector.broadcast %33 : vector<4x1xf32> to vector<4x256xf32>
    %36 = vector.broadcast %34 : vector<1x256xf32> to vector<4x256xf32>
    %37 = arith.mulf %35, %36 : vector<4x256xf32>
    %38 = arith.addf %25, %37 : vector<4x256xf32>
    %39 = vector.extract_strided_slice %32 {offsets = [0, 1], sizes = [4, 1], strides = [1, 1]} : vector<4x4xf32> to vector<4x1xf32>
    %40 = vector.extract_strided_slice %30 {offsets = [1, 0], sizes = [1, 256], strides = [1, 1]} : vector<4x256xf32> to vector<1x256xf32>
    %41 = vector.broadcast %39 : vector<4x1xf32> to vector<4x256xf32>
    %42 = vector.broadcast %40 : vector<1x256xf32> to vector<4x256xf32>
    %43 = arith.mulf %41, %42 : vector<4x256xf32>
    %44 = arith.addf %38, %43 : vector<4x256xf32>
    %45 = vector.extract_strided_slice %32 {offsets = [0, 2], sizes = [4, 1], strides = [1, 1]} : vector<4x4xf32> to vector<4x1xf32>
    %46 = vector.extract_strided_slice %30 {offsets = [2, 0], sizes = [1, 256], strides = [1, 1]} : vector<4x256xf32> to vector<1x256xf32>
    %47 = vector.broadcast %45 : vector<4x1xf32> to vector<4x256xf32>
    %48 = vector.broadcast %46 : vector<1x256xf32> to vector<4x256xf32>
    %49 = arith.mulf %47, %48 : vector<4x256xf32>
    %50 = arith.addf %44, %49 : vector<4x256xf32>
    %51 = vector.extract_strided_slice %32 {offsets = [0, 3], sizes = [4, 1], strides = [1, 1]} : vector<4x4xf32> to vector<4x1xf32>
    %52 = vector.extract_strided_slice %30 {offsets = [3, 0], sizes = [1, 256], strides = [1, 1]} : vector<4x256xf32> to vector<1x256xf32>
    %53 = vector.broadcast %51 : vector<4x1xf32> to vector<4x256xf32>
    %54 = vector.broadcast %52 : vector<1x256xf32> to vector<4x256xf32>
    %55 = arith.mulf %53, %54 : vector<4x256xf32>
    %56 = arith.addf %50, %55 : vector<4x256xf32>
    %57 = vector.extract_strided_slice %24 {offsets = [0, 1], sizes = [4, 256], strides = [1, 1]} : vector<4x290xf32> to vector<4x256xf32>
    %c1 = arith.constant 1 : index
    %c0_12 = arith.constant 0 : index
    %c0_13 = arith.constant 0 : index
    %c0_14 = arith.constant 0 : index
    %58 = vector.load %arg2[%c1, %c0_12, %c0_13, %c0_14] : memref<9x1x4x4xf32, #tpu.memory_space<vmem>>, vector<1x1x4x4xf32>
    %59 = vector.shape_cast %58 : vector<1x1x4x4xf32> to vector<4x4xf32>
    %60 = vector.extract_strided_slice %59 {offsets = [0, 0], sizes = [4, 1], strides = [1, 1]} : vector<4x4xf32> to vector<4x1xf32>
    %61 = vector.extract_strided_slice %57 {offsets = [0, 0], sizes = [1, 256], strides = [1, 1]} : vector<4x256xf32> to vector<1x256xf32>
    %62 = vector.broadcast %60 : vector<4x1xf32> to vector<4x256xf32>
    %63 = vector.broadcast %61 : vector<1x256xf32> to vector<4x256xf32>
    %64 = arith.mulf %62, %63 : vector<4x256xf32>
    %65 = arith.addf %56, %64 : vector<4x256xf32>
    %66 = vector.extract_strided_slice %59 {offsets = [0, 1], sizes = [4, 1], strides = [1, 1]} : vector<4x4xf32> to vector<4x1xf32>
    %67 = vector.extract_strided_slice %57 {offsets = [1, 0], sizes = [1, 256], strides = [1, 1]} : vector<4x256xf32> to vector<1x256xf32>
    %68 = vector.broadcast %66 : vector<4x1xf32> to vector<4x256xf32>
    %69 = vector.broadcast %67 : vector<1x256xf32> to vector<4x256xf32>
    %70 = arith.mulf %68, %69 : vector<4x256xf32>
    %71 = arith.addf %65, %70 : vector<4x256xf32>
    %72 = vector.extract_strided_slice %59 {offsets = [0, 2], sizes = [4, 1], strides = [1, 1]} : vector<4x4xf32> to vector<4x1xf32>
    %73 = vector.extract_strided_slice %57 {offsets = [2, 0], sizes = [1, 256], strides = [1, 1]} : vector<4x256xf32> to vector<1x256xf32>
    %74 = vector.broadcast %72 : vector<4x1xf32> to vector<4x256xf32>
    %75 = vector.broadcast %73 : vector<1x256xf32> to vector<4x256xf32>
    %76 = arith.mulf %74, %75 : vector<4x256xf32>
    %77 = arith.addf %71, %76 : vector<4x256xf32>
    %78 = vector.extract_strided_slice %59 {offsets = [0, 3], sizes = [4, 1], strides = [1, 1]} : vector<4x4xf32> to vector<4x1xf32>
    %79 = vector.extract_strided_slice %57 {offsets = [3, 0], sizes = [1, 256], strides = [1, 1]} : vector<4x256xf32> to vector<1x256xf32>
    %80 = vector.broadcast %78 : vector<4x1xf32> to vector<4x256xf32>
    %81 = vector.broadcast %79 : vector<1x256xf32> to vector<4x256xf32>
    %82 = arith.mulf %80, %81 : vector<4x256xf32>
    %83 = arith.addf %77, %82 : vector<4x256xf32>
    %84 = vector.extract_strided_slice %24 {offsets = [0, 2], sizes = [4, 256], strides = [1, 1]} : vector<4x290xf32> to vector<4x256xf32>
    %cst_15 = arith.constant 0.000000e+00 : f32
    %85 = vector.shape_cast %20 : vector<1x256xi1> to vector<1x256xi1>
    %86 = vector.broadcast %85 : vector<1x256xi1> to vector<4x256xi1>
    %87 = vector.broadcast %cst_15 : f32 to vector<4x256xf32>
    %88 = arith.select %86, %84, %87 : vector<4x256xi1>, vector<4x256xf32>
    %c2 = arith.constant 2 : index
    %c0_16 = arith.constant 0 : index
    %c0_17 = arith.constant 0 : index
    %c0_18 = arith.constant 0 : index
    %89 = vector.load %arg2[%c2, %c0_16, %c0_17, %c0_18] : memref<9x1x4x4xf32, #tpu.memory_space<vmem>>, vector<1x1x4x4xf32>
    %90 = vector.shape_cast %89 : vector<1x1x4x4xf32> to vector<4x4xf32>
    %91 = vector.extract_strided_slice %90 {offsets = [0, 0], sizes = [4, 1], strides = [1, 1]} : vector<4x4xf32> to vector<4x1xf32>
    %92 = vector.extract_strided_slice %88 {offsets = [0, 0], sizes = [1, 256], strides = [1, 1]} : vector<4x256xf32> to vector<1x256xf32>
    %93 = vector.broadcast %91 : vector<4x1xf32> to vector<4x256xf32>
    %94 = vector.broadcast %92 : vector<1x256xf32> to vector<4x256xf32>
    %95 = arith.mulf %93, %94 : vector<4x256xf32>
    %96 = arith.addf %83, %95 : vector<4x256xf32>
    %97 = vector.extract_strided_slice %90 {offsets = [0, 1], sizes = [4, 1], strides = [1, 1]} : vector<4x4xf32> to vector<4x1xf32>
    %98 = vector.extract_strided_slice %88 {offsets = [1, 0], sizes = [1, 256], strides = [1, 1]} : vector<4x256xf32> to vector<1x256xf32>
    %99 = vector.broadcast %97 : vector<4x1xf32> to vector<4x256xf32>
    %100 = vector.broadcast %98 : vector<1x256xf32> to vector<4x256xf32>
    %101 = arith.mulf %99, %100 : vector<4x256xf32>
    %102 = arith.addf %96, %101 : vector<4x256xf32>
    %103 = vector.extract_strided_slice %90 {offsets = [0, 2], sizes = [4, 1], strides = [1, 1]} : vector<4x4xf32> to vector<4x1xf32>
    %104 = vector.extract_strided_slice %88 {offsets = [2, 0], sizes = [1, 256], strides = [1, 1]} : vector<4x256xf32> to vector<1x256xf32>
    %105 = vector.broadcast %103 : vector<4x1xf32> to vector<4x256xf32>
    %106 = vector.broadcast %104 : vector<1x256xf32> to vector<4x256xf32>
    %107 = arith.mulf %105, %106 : vector<4x256xf32>
    %108 = arith.addf %102, %107 : vector<4x256xf32>
    %109 = vector.extract_strided_slice %90 {offsets = [0, 3], sizes = [4, 1], strides = [1, 1]} : vector<4x4xf32> to vector<4x1xf32>
    %110 = vector.extract_strided_slice %88 {offsets = [3, 0], sizes = [1, 256], strides = [1, 1]} : vector<4x256xf32> to vector<1x256xf32>
    %111 = vector.broadcast %109 : vector<4x1xf32> to vector<4x256xf32>
    %112 = vector.broadcast %110 : vector<1x256xf32> to vector<4x256xf32>
    %113 = arith.mulf %111, %112 : vector<4x256xf32>
    %114 = arith.addf %108, %113 : vector<4x256xf32>
    %115 = vector.extract_strided_slice %24 {offsets = [0, 16], sizes = [4, 256], strides = [1, 1]} : vector<4x290xf32> to vector<4x256xf32>
    %cst_19 = arith.constant 0.000000e+00 : f32
    %116 = vector.shape_cast %18 : vector<1x256xi1> to vector<1x256xi1>
    %117 = vector.broadcast %116 : vector<1x256xi1> to vector<4x256xi1>
    %118 = vector.broadcast %cst_19 : f32 to vector<4x256xf32>
    %119 = arith.select %117, %115, %118 : vector<4x256xi1>, vector<4x256xf32>
    %c3 = arith.constant 3 : index
    %c0_20 = arith.constant 0 : index
    %c0_21 = arith.constant 0 : index
    %c0_22 = arith.constant 0 : index
    %120 = vector.load %arg2[%c3, %c0_20, %c0_21, %c0_22] : memref<9x1x4x4xf32, #tpu.memory_space<vmem>>, vector<1x1x4x4xf32>
    %121 = vector.shape_cast %120 : vector<1x1x4x4xf32> to vector<4x4xf32>
    %122 = vector.extract_strided_slice %121 {offsets = [0, 0], sizes = [4, 1], strides = [1, 1]} : vector<4x4xf32> to vector<4x1xf32>
    %123 = vector.extract_strided_slice %119 {offsets = [0, 0], sizes = [1, 256], strides = [1, 1]} : vector<4x256xf32> to vector<1x256xf32>
    %124 = vector.broadcast %122 : vector<4x1xf32> to vector<4x256xf32>
    %125 = vector.broadcast %123 : vector<1x256xf32> to vector<4x256xf32>
    %126 = arith.mulf %124, %125 : vector<4x256xf32>
    %127 = arith.addf %114, %126 : vector<4x256xf32>
    %128 = vector.extract_strided_slice %121 {offsets = [0, 1], sizes = [4, 1], strides = [1, 1]} : vector<4x4xf32> to vector<4x1xf32>
    %129 = vector.extract_strided_slice %119 {offsets = [1, 0], sizes = [1, 256], strides = [1, 1]} : vector<4x256xf32> to vector<1x256xf32>
    %130 = vector.broadcast %128 : vector<4x1xf32> to vector<4x256xf32>
    %131 = vector.broadcast %129 : vector<1x256xf32> to vector<4x256xf32>
    %132 = arith.mulf %130, %131 : vector<4x256xf32>
    %133 = arith.addf %127, %132 : vector<4x256xf32>
    %134 = vector.extract_strided_slice %121 {offsets = [0, 2], sizes = [4, 1], strides = [1, 1]} : vector<4x4xf32> to vector<4x1xf32>
    %135 = vector.extract_strided_slice %119 {offsets = [2, 0], sizes = [1, 256], strides = [1, 1]} : vector<4x256xf32> to vector<1x256xf32>
    %136 = vector.broadcast %134 : vector<4x1xf32> to vector<4x256xf32>
    %137 = vector.broadcast %135 : vector<1x256xf32> to vector<4x256xf32>
    %138 = arith.mulf %136, %137 : vector<4x256xf32>
    %139 = arith.addf %133, %138 : vector<4x256xf32>
    %140 = vector.extract_strided_slice %121 {offsets = [0, 3], sizes = [4, 1], strides = [1, 1]} : vector<4x4xf32> to vector<4x1xf32>
    %141 = vector.extract_strided_slice %119 {offsets = [3, 0], sizes = [1, 256], strides = [1, 1]} : vector<4x256xf32> to vector<1x256xf32>
    %142 = vector.broadcast %140 : vector<4x1xf32> to vector<4x256xf32>
    %143 = vector.broadcast %141 : vector<1x256xf32> to vector<4x256xf32>
    %144 = arith.mulf %142, %143 : vector<4x256xf32>
    %145 = arith.addf %139, %144 : vector<4x256xf32>
    %146 = vector.extract_strided_slice %24 {offsets = [0, 17], sizes = [4, 256], strides = [1, 1]} : vector<4x290xf32> to vector<4x256xf32>
    %c4 = arith.constant 4 : index
    %c0_23 = arith.constant 0 : index
    %c0_24 = arith.constant 0 : index
    %c0_25 = arith.constant 0 : index
    %147 = vector.load %arg2[%c4, %c0_23, %c0_24, %c0_25] : memref<9x1x4x4xf32, #tpu.memory_space<vmem>>, vector<1x1x4x4xf32>
    %148 = vector.shape_cast %147 : vector<1x1x4x4xf32> to vector<4x4xf32>
    %149 = vector.extract_strided_slice %148 {offsets = [0, 0], sizes = [4, 1], strides = [1, 1]} : vector<4x4xf32> to vector<4x1xf32>
    %150 = vector.extract_strided_slice %146 {offsets = [0, 0], sizes = [1, 256], strides = [1, 1]} : vector<4x256xf32> to vector<1x256xf32>
    %151 = vector.broadcast %149 : vector<4x1xf32> to vector<4x256xf32>
    %152 = vector.broadcast %150 : vector<1x256xf32> to vector<4x256xf32>
    %153 = arith.mulf %151, %152 : vector<4x256xf32>
    %154 = arith.addf %145, %153 : vector<4x256xf32>
    %155 = vector.extract_strided_slice %148 {offsets = [0, 1], sizes = [4, 1], strides = [1, 1]} : vector<4x4xf32> to vector<4x1xf32>
    %156 = vector.extract_strided_slice %146 {offsets = [1, 0], sizes = [1, 256], strides = [1, 1]} : vector<4x256xf32> to vector<1x256xf32>
    %157 = vector.broadcast %155 : vector<4x1xf32> to vector<4x256xf32>
    %158 = vector.broadcast %156 : vector<1x256xf32> to vector<4x256xf32>
    %159 = arith.mulf %157, %158 : vector<4x256xf32>
    %160 = arith.addf %154, %159 : vector<4x256xf32>
    %161 = vector.extract_strided_slice %148 {offsets = [0, 2], sizes = [4, 1], strides = [1, 1]} : vector<4x4xf32> to vector<4x1xf32>
    %162 = vector.extract_strided_slice %146 {offsets = [2, 0], sizes = [1, 256], strides = [1, 1]} : vector<4x256xf32> to vector<1x256xf32>
    %163 = vector.broadcast %161 : vector<4x1xf32> to vector<4x256xf32>
    %164 = vector.broadcast %162 : vector<1x256xf32> to vector<4x256xf32>
    %165 = arith.mulf %163, %164 : vector<4x256xf32>
    %166 = arith.addf %160, %165 : vector<4x256xf32>
    %167 = vector.extract_strided_slice %148 {offsets = [0, 3], sizes = [4, 1], strides = [1, 1]} : vector<4x4xf32> to vector<4x1xf32>
    %168 = vector.extract_strided_slice %146 {offsets = [3, 0], sizes = [1, 256], strides = [1, 1]} : vector<4x256xf32> to vector<1x256xf32>
    %169 = vector.broadcast %167 : vector<4x1xf32> to vector<4x256xf32>
    %170 = vector.broadcast %168 : vector<1x256xf32> to vector<4x256xf32>
    %171 = arith.mulf %169, %170 : vector<4x256xf32>
    %172 = arith.addf %166, %171 : vector<4x256xf32>
    %173 = vector.extract_strided_slice %24 {offsets = [0, 18], sizes = [4, 256], strides = [1, 1]} : vector<4x290xf32> to vector<4x256xf32>
    %cst_26 = arith.constant 0.000000e+00 : f32
    %174 = vector.shape_cast %20 : vector<1x256xi1> to vector<1x256xi1>
    %175 = vector.broadcast %174 : vector<1x256xi1> to vector<4x256xi1>
    %176 = vector.broadcast %cst_26 : f32 to vector<4x256xf32>
    %177 = arith.select %175, %173, %176 : vector<4x256xi1>, vector<4x256xf32>
    %c5 = arith.constant 5 : index
    %c0_27 = arith.constant 0 : index
    %c0_28 = arith.constant 0 : index
    %c0_29 = arith.constant 0 : index
    %178 = vector.load %arg2[%c5, %c0_27, %c0_28, %c0_29] : memref<9x1x4x4xf32, #tpu.memory_space<vmem>>, vector<1x1x4x4xf32>
    %179 = vector.shape_cast %178 : vector<1x1x4x4xf32> to vector<4x4xf32>
    %180 = vector.extract_strided_slice %179 {offsets = [0, 0], sizes = [4, 1], strides = [1, 1]} : vector<4x4xf32> to vector<4x1xf32>
    %181 = vector.extract_strided_slice %177 {offsets = [0, 0], sizes = [1, 256], strides = [1, 1]} : vector<4x256xf32> to vector<1x256xf32>
    %182 = vector.broadcast %180 : vector<4x1xf32> to vector<4x256xf32>
    %183 = vector.broadcast %181 : vector<1x256xf32> to vector<4x256xf32>
    %184 = arith.mulf %182, %183 : vector<4x256xf32>
    %185 = arith.addf %172, %184 : vector<4x256xf32>
    %186 = vector.extract_strided_slice %179 {offsets = [0, 1], sizes = [4, 1], strides = [1, 1]} : vector<4x4xf32> to vector<4x1xf32>
    %187 = vector.extract_strided_slice %177 {offsets = [1, 0], sizes = [1, 256], strides = [1, 1]} : vector<4x256xf32> to vector<1x256xf32>
    %188 = vector.broadcast %186 : vector<4x1xf32> to vector<4x256xf32>
    %189 = vector.broadcast %187 : vector<1x256xf32> to vector<4x256xf32>
    %190 = arith.mulf %188, %189 : vector<4x256xf32>
    %191 = arith.addf %185, %190 : vector<4x256xf32>
    %192 = vector.extract_strided_slice %179 {offsets = [0, 2], sizes = [4, 1], strides = [1, 1]} : vector<4x4xf32> to vector<4x1xf32>
    %193 = vector.extract_strided_slice %177 {offsets = [2, 0], sizes = [1, 256], strides = [1, 1]} : vector<4x256xf32> to vector<1x256xf32>
    %194 = vector.broadcast %192 : vector<4x1xf32> to vector<4x256xf32>
    %195 = vector.broadcast %193 : vector<1x256xf32> to vector<4x256xf32>
    %196 = arith.mulf %194, %195 : vector<4x256xf32>
    %197 = arith.addf %191, %196 : vector<4x256xf32>
    %198 = vector.extract_strided_slice %179 {offsets = [0, 3], sizes = [4, 1], strides = [1, 1]} : vector<4x4xf32> to vector<4x1xf32>
    %199 = vector.extract_strided_slice %177 {offsets = [3, 0], sizes = [1, 256], strides = [1, 1]} : vector<4x256xf32> to vector<1x256xf32>
    %200 = vector.broadcast %198 : vector<4x1xf32> to vector<4x256xf32>
    %201 = vector.broadcast %199 : vector<1x256xf32> to vector<4x256xf32>
    %202 = arith.mulf %200, %201 : vector<4x256xf32>
    %203 = arith.addf %197, %202 : vector<4x256xf32>
    %204 = vector.extract_strided_slice %24 {offsets = [0, 32], sizes = [4, 256], strides = [1, 1]} : vector<4x290xf32> to vector<4x256xf32>
    %cst_30 = arith.constant 0.000000e+00 : f32
    %205 = vector.shape_cast %18 : vector<1x256xi1> to vector<1x256xi1>
    %206 = vector.broadcast %205 : vector<1x256xi1> to vector<4x256xi1>
    %207 = vector.broadcast %cst_30 : f32 to vector<4x256xf32>
    %208 = arith.select %206, %204, %207 : vector<4x256xi1>, vector<4x256xf32>
    %c6 = arith.constant 6 : index
    %c0_31 = arith.constant 0 : index
    %c0_32 = arith.constant 0 : index
    %c0_33 = arith.constant 0 : index
    %209 = vector.load %arg2[%c6, %c0_31, %c0_32, %c0_33] : memref<9x1x4x4xf32, #tpu.memory_space<vmem>>, vector<1x1x4x4xf32>
    %210 = vector.shape_cast %209 : vector<1x1x4x4xf32> to vector<4x4xf32>
    %211 = vector.extract_strided_slice %210 {offsets = [0, 0], sizes = [4, 1], strides = [1, 1]} : vector<4x4xf32> to vector<4x1xf32>
    %212 = vector.extract_strided_slice %208 {offsets = [0, 0], sizes = [1, 256], strides = [1, 1]} : vector<4x256xf32> to vector<1x256xf32>
    %213 = vector.broadcast %211 : vector<4x1xf32> to vector<4x256xf32>
    %214 = vector.broadcast %212 : vector<1x256xf32> to vector<4x256xf32>
    %215 = arith.mulf %213, %214 : vector<4x256xf32>
    %216 = arith.addf %203, %215 : vector<4x256xf32>
    %217 = vector.extract_strided_slice %210 {offsets = [0, 1], sizes = [4, 1], strides = [1, 1]} : vector<4x4xf32> to vector<4x1xf32>
    %218 = vector.extract_strided_slice %208 {offsets = [1, 0], sizes = [1, 256], strides = [1, 1]} : vector<4x256xf32> to vector<1x256xf32>
    %219 = vector.broadcast %217 : vector<4x1xf32> to vector<4x256xf32>
    %220 = vector.broadcast %218 : vector<1x256xf32> to vector<4x256xf32>
    %221 = arith.mulf %219, %220 : vector<4x256xf32>
    %222 = arith.addf %216, %221 : vector<4x256xf32>
    %223 = vector.extract_strided_slice %210 {offsets = [0, 2], sizes = [4, 1], strides = [1, 1]} : vector<4x4xf32> to vector<4x1xf32>
    %224 = vector.extract_strided_slice %208 {offsets = [2, 0], sizes = [1, 256], strides = [1, 1]} : vector<4x256xf32> to vector<1x256xf32>
    %225 = vector.broadcast %223 : vector<4x1xf32> to vector<4x256xf32>
    %226 = vector.broadcast %224 : vector<1x256xf32> to vector<4x256xf32>
    %227 = arith.mulf %225, %226 : vector<4x256xf32>
    %228 = arith.addf %222, %227 : vector<4x256xf32>
    %229 = vector.extract_strided_slice %210 {offsets = [0, 3], sizes = [4, 1], strides = [1, 1]} : vector<4x4xf32> to vector<4x1xf32>
    %230 = vector.extract_strided_slice %208 {offsets = [3, 0], sizes = [1, 256], strides = [1, 1]} : vector<4x256xf32> to vector<1x256xf32>
    %231 = vector.broadcast %229 : vector<4x1xf32> to vector<4x256xf32>
    %232 = vector.broadcast %230 : vector<1x256xf32> to vector<4x256xf32>
    %233 = arith.mulf %231, %232 : vector<4x256xf32>
    %234 = arith.addf %228, %233 : vector<4x256xf32>
    %235 = vector.extract_strided_slice %24 {offsets = [0, 33], sizes = [4, 256], strides = [1, 1]} : vector<4x290xf32> to vector<4x256xf32>
    %c7 = arith.constant 7 : index
    %c0_34 = arith.constant 0 : index
    %c0_35 = arith.constant 0 : index
    %c0_36 = arith.constant 0 : index
    %236 = vector.load %arg2[%c7, %c0_34, %c0_35, %c0_36] : memref<9x1x4x4xf32, #tpu.memory_space<vmem>>, vector<1x1x4x4xf32>
    %237 = vector.shape_cast %236 : vector<1x1x4x4xf32> to vector<4x4xf32>
    %238 = vector.extract_strided_slice %237 {offsets = [0, 0], sizes = [4, 1], strides = [1, 1]} : vector<4x4xf32> to vector<4x1xf32>
    %239 = vector.extract_strided_slice %235 {offsets = [0, 0], sizes = [1, 256], strides = [1, 1]} : vector<4x256xf32> to vector<1x256xf32>
    %240 = vector.broadcast %238 : vector<4x1xf32> to vector<4x256xf32>
    %241 = vector.broadcast %239 : vector<1x256xf32> to vector<4x256xf32>
    %242 = arith.mulf %240, %241 : vector<4x256xf32>
    %243 = arith.addf %234, %242 : vector<4x256xf32>
    %244 = vector.extract_strided_slice %237 {offsets = [0, 1], sizes = [4, 1], strides = [1, 1]} : vector<4x4xf32> to vector<4x1xf32>
    %245 = vector.extract_strided_slice %235 {offsets = [1, 0], sizes = [1, 256], strides = [1, 1]} : vector<4x256xf32> to vector<1x256xf32>
    %246 = vector.broadcast %244 : vector<4x1xf32> to vector<4x256xf32>
    %247 = vector.broadcast %245 : vector<1x256xf32> to vector<4x256xf32>
    %248 = arith.mulf %246, %247 : vector<4x256xf32>
    %249 = arith.addf %243, %248 : vector<4x256xf32>
    %250 = vector.extract_strided_slice %237 {offsets = [0, 2], sizes = [4, 1], strides = [1, 1]} : vector<4x4xf32> to vector<4x1xf32>
    %251 = vector.extract_strided_slice %235 {offsets = [2, 0], sizes = [1, 256], strides = [1, 1]} : vector<4x256xf32> to vector<1x256xf32>
    %252 = vector.broadcast %250 : vector<4x1xf32> to vector<4x256xf32>
    %253 = vector.broadcast %251 : vector<1x256xf32> to vector<4x256xf32>
    %254 = arith.mulf %252, %253 : vector<4x256xf32>
    %255 = arith.addf %249, %254 : vector<4x256xf32>
    %256 = vector.extract_strided_slice %237 {offsets = [0, 3], sizes = [4, 1], strides = [1, 1]} : vector<4x4xf32> to vector<4x1xf32>
    %257 = vector.extract_strided_slice %235 {offsets = [3, 0], sizes = [1, 256], strides = [1, 1]} : vector<4x256xf32> to vector<1x256xf32>
    %258 = vector.broadcast %256 : vector<4x1xf32> to vector<4x256xf32>
    %259 = vector.broadcast %257 : vector<1x256xf32> to vector<4x256xf32>
    %260 = arith.mulf %258, %259 : vector<4x256xf32>
    %261 = arith.addf %255, %260 : vector<4x256xf32>
    %262 = vector.extract_strided_slice %24 {offsets = [0, 34], sizes = [4, 256], strides = [1, 1]} : vector<4x290xf32> to vector<4x256xf32>
    %cst_37 = arith.constant 0.000000e+00 : f32
    %263 = vector.shape_cast %20 : vector<1x256xi1> to vector<1x256xi1>
    %264 = vector.broadcast %263 : vector<1x256xi1> to vector<4x256xi1>
    %265 = vector.broadcast %cst_37 : f32 to vector<4x256xf32>
    %266 = arith.select %264, %262, %265 : vector<4x256xi1>, vector<4x256xf32>
    %c8 = arith.constant 8 : index
    %c0_38 = arith.constant 0 : index
    %c0_39 = arith.constant 0 : index
    %c0_40 = arith.constant 0 : index
    %267 = vector.load %arg2[%c8, %c0_38, %c0_39, %c0_40] : memref<9x1x4x4xf32, #tpu.memory_space<vmem>>, vector<1x1x4x4xf32>
    %268 = vector.shape_cast %267 : vector<1x1x4x4xf32> to vector<4x4xf32>
    %269 = vector.extract_strided_slice %268 {offsets = [0, 0], sizes = [4, 1], strides = [1, 1]} : vector<4x4xf32> to vector<4x1xf32>
    %270 = vector.extract_strided_slice %266 {offsets = [0, 0], sizes = [1, 256], strides = [1, 1]} : vector<4x256xf32> to vector<1x256xf32>
    %271 = vector.broadcast %269 : vector<4x1xf32> to vector<4x256xf32>
    %272 = vector.broadcast %270 : vector<1x256xf32> to vector<4x256xf32>
    %273 = arith.mulf %271, %272 : vector<4x256xf32>
    %274 = arith.addf %261, %273 : vector<4x256xf32>
    %275 = vector.extract_strided_slice %268 {offsets = [0, 1], sizes = [4, 1], strides = [1, 1]} : vector<4x4xf32> to vector<4x1xf32>
    %276 = vector.extract_strided_slice %266 {offsets = [1, 0], sizes = [1, 256], strides = [1, 1]} : vector<4x256xf32> to vector<1x256xf32>
    %277 = vector.broadcast %275 : vector<4x1xf32> to vector<4x256xf32>
    %278 = vector.broadcast %276 : vector<1x256xf32> to vector<4x256xf32>
    %279 = arith.mulf %277, %278 : vector<4x256xf32>
    %280 = arith.addf %274, %279 : vector<4x256xf32>
    %281 = vector.extract_strided_slice %268 {offsets = [0, 2], sizes = [4, 1], strides = [1, 1]} : vector<4x4xf32> to vector<4x1xf32>
    %282 = vector.extract_strided_slice %266 {offsets = [2, 0], sizes = [1, 256], strides = [1, 1]} : vector<4x256xf32> to vector<1x256xf32>
    %283 = vector.broadcast %281 : vector<4x1xf32> to vector<4x256xf32>
    %284 = vector.broadcast %282 : vector<1x256xf32> to vector<4x256xf32>
    %285 = arith.mulf %283, %284 : vector<4x256xf32>
    %286 = arith.addf %280, %285 : vector<4x256xf32>
    %287 = vector.extract_strided_slice %268 {offsets = [0, 3], sizes = [4, 1], strides = [1, 1]} : vector<4x4xf32> to vector<4x1xf32>
    %288 = vector.extract_strided_slice %266 {offsets = [3, 0], sizes = [1, 256], strides = [1, 1]} : vector<4x256xf32> to vector<1x256xf32>
    %289 = vector.broadcast %287 : vector<4x1xf32> to vector<4x256xf32>
    %290 = vector.broadcast %288 : vector<1x256xf32> to vector<4x256xf32>
    %291 = arith.mulf %289, %290 : vector<4x256xf32>
    %292 = arith.addf %286, %291 : vector<4x256xf32>
    %c0_41 = arith.constant 0 : index
    %c0_42 = arith.constant 0 : index
    %c0_43 = arith.constant 0 : index
    %293 = vector.load %arg6[%c0_41, %c0_42, %c0_43] : memref<4x4x1xf32, #tpu.memory_space<vmem>>, vector<1x4x1xf32>
    %294 = vector.shape_cast %293 : vector<1x4x1xf32> to vector<4x1xf32>
    %295 = vector.broadcast %294 : vector<4x1xf32> to vector<4x256xf32>
    %296 = arith.addf %292, %295 : vector<4x256xf32>
    %cst_44 = arith.constant 0.000000e+00 : f32
    %297 = vector.broadcast %cst_44 : f32 to vector<4x256xf32>
    %298 = arith.maximumf %296, %297 : vector<4x256xf32>
    %299 = tpu.concatenate %21, %298, %21 in 1 : vector<4x17xf32>, vector<4x256xf32>, vector<4x17xf32> -> vector<4x290xf32>
    %cst_45 = arith.constant 0.000000e+00 : f32
    %300 = vector.broadcast %cst_45 : f32 to vector<4x256xf32>
    %301 = vector.extract_strided_slice %24 {offsets = [0, 0], sizes = [4, 256], strides = [1, 1]} : vector<4x290xf32> to vector<4x256xf32>
    %cst_46 = arith.constant 0.000000e+00 : f32
    %302 = vector.shape_cast %18 : vector<1x256xi1> to vector<1x256xi1>
    %303 = vector.broadcast %302 : vector<1x256xi1> to vector<4x256xi1>
    %304 = vector.broadcast %cst_46 : f32 to vector<4x256xf32>
    %305 = arith.select %303, %301, %304 : vector<4x256xi1>, vector<4x256xf32>
    %c0_47 = arith.constant 0 : index
    %c0_48 = arith.constant 0 : index
    %c0_49 = arith.constant 0 : index
    %c0_50 = arith.constant 0 : index
    %306 = vector.load %arg3[%c0_47, %c0_48, %c0_49, %c0_50] : memref<9x2x4x4xf32, #tpu.memory_space<vmem>>, vector<1x1x4x4xf32>
    %307 = vector.shape_cast %306 : vector<1x1x4x4xf32> to vector<4x4xf32>
    %308 = vector.extract_strided_slice %307 {offsets = [0, 0], sizes = [4, 1], strides = [1, 1]} : vector<4x4xf32> to vector<4x1xf32>
    %309 = vector.extract_strided_slice %305 {offsets = [0, 0], sizes = [1, 256], strides = [1, 1]} : vector<4x256xf32> to vector<1x256xf32>
    %310 = vector.broadcast %308 : vector<4x1xf32> to vector<4x256xf32>
    %311 = vector.broadcast %309 : vector<1x256xf32> to vector<4x256xf32>
    %312 = arith.mulf %310, %311 : vector<4x256xf32>
    %313 = arith.addf %300, %312 : vector<4x256xf32>
    %314 = vector.extract_strided_slice %307 {offsets = [0, 1], sizes = [4, 1], strides = [1, 1]} : vector<4x4xf32> to vector<4x1xf32>
    %315 = vector.extract_strided_slice %305 {offsets = [1, 0], sizes = [1, 256], strides = [1, 1]} : vector<4x256xf32> to vector<1x256xf32>
    %316 = vector.broadcast %314 : vector<4x1xf32> to vector<4x256xf32>
    %317 = vector.broadcast %315 : vector<1x256xf32> to vector<4x256xf32>
    %318 = arith.mulf %316, %317 : vector<4x256xf32>
    %319 = arith.addf %313, %318 : vector<4x256xf32>
    %320 = vector.extract_strided_slice %307 {offsets = [0, 2], sizes = [4, 1], strides = [1, 1]} : vector<4x4xf32> to vector<4x1xf32>
    %321 = vector.extract_strided_slice %305 {offsets = [2, 0], sizes = [1, 256], strides = [1, 1]} : vector<4x256xf32> to vector<1x256xf32>
    %322 = vector.broadcast %320 : vector<4x1xf32> to vector<4x256xf32>
    %323 = vector.broadcast %321 : vector<1x256xf32> to vector<4x256xf32>
    %324 = arith.mulf %322, %323 : vector<4x256xf32>
    %325 = arith.addf %319, %324 : vector<4x256xf32>
    %326 = vector.extract_strided_slice %307 {offsets = [0, 3], sizes = [4, 1], strides = [1, 1]} : vector<4x4xf32> to vector<4x1xf32>
    %327 = vector.extract_strided_slice %305 {offsets = [3, 0], sizes = [1, 256], strides = [1, 1]} : vector<4x256xf32> to vector<1x256xf32>
    %328 = vector.broadcast %326 : vector<4x1xf32> to vector<4x256xf32>
    %329 = vector.broadcast %327 : vector<1x256xf32> to vector<4x256xf32>
    %330 = arith.mulf %328, %329 : vector<4x256xf32>
    %331 = arith.addf %325, %330 : vector<4x256xf32>
    %332 = vector.extract_strided_slice %24 {offsets = [0, 1], sizes = [4, 256], strides = [1, 1]} : vector<4x290xf32> to vector<4x256xf32>
    %c1_51 = arith.constant 1 : index
    %c0_52 = arith.constant 0 : index
    %c0_53 = arith.constant 0 : index
    %c0_54 = arith.constant 0 : index
    %333 = vector.load %arg3[%c1_51, %c0_52, %c0_53, %c0_54] : memref<9x2x4x4xf32, #tpu.memory_space<vmem>>, vector<1x1x4x4xf32>
    %334 = vector.shape_cast %333 : vector<1x1x4x4xf32> to vector<4x4xf32>
    %335 = vector.extract_strided_slice %334 {offsets = [0, 0], sizes = [4, 1], strides = [1, 1]} : vector<4x4xf32> to vector<4x1xf32>
    %336 = vector.extract_strided_slice %332 {offsets = [0, 0], sizes = [1, 256], strides = [1, 1]} : vector<4x256xf32> to vector<1x256xf32>
    %337 = vector.broadcast %335 : vector<4x1xf32> to vector<4x256xf32>
    %338 = vector.broadcast %336 : vector<1x256xf32> to vector<4x256xf32>
    %339 = arith.mulf %337, %338 : vector<4x256xf32>
    %340 = arith.addf %331, %339 : vector<4x256xf32>
    %341 = vector.extract_strided_slice %334 {offsets = [0, 1], sizes = [4, 1], strides = [1, 1]} : vector<4x4xf32> to vector<4x1xf32>
    %342 = vector.extract_strided_slice %332 {offsets = [1, 0], sizes = [1, 256], strides = [1, 1]} : vector<4x256xf32> to vector<1x256xf32>
    %343 = vector.broadcast %341 : vector<4x1xf32> to vector<4x256xf32>
    %344 = vector.broadcast %342 : vector<1x256xf32> to vector<4x256xf32>
    %345 = arith.mulf %343, %344 : vector<4x256xf32>
    %346 = arith.addf %340, %345 : vector<4x256xf32>
    %347 = vector.extract_strided_slice %334 {offsets = [0, 2], sizes = [4, 1], strides = [1, 1]} : vector<4x4xf32> to vector<4x1xf32>
    %348 = vector.extract_strided_slice %332 {offsets = [2, 0], sizes = [1, 256], strides = [1, 1]} : vector<4x256xf32> to vector<1x256xf32>
    %349 = vector.broadcast %347 : vector<4x1xf32> to vector<4x256xf32>
    %350 = vector.broadcast %348 : vector<1x256xf32> to vector<4x256xf32>
    %351 = arith.mulf %349, %350 : vector<4x256xf32>
    %352 = arith.addf %346, %351 : vector<4x256xf32>
    %353 = vector.extract_strided_slice %334 {offsets = [0, 3], sizes = [4, 1], strides = [1, 1]} : vector<4x4xf32> to vector<4x1xf32>
    %354 = vector.extract_strided_slice %332 {offsets = [3, 0], sizes = [1, 256], strides = [1, 1]} : vector<4x256xf32> to vector<1x256xf32>
    %355 = vector.broadcast %353 : vector<4x1xf32> to vector<4x256xf32>
    %356 = vector.broadcast %354 : vector<1x256xf32> to vector<4x256xf32>
    %357 = arith.mulf %355, %356 : vector<4x256xf32>
    %358 = arith.addf %352, %357 : vector<4x256xf32>
    %359 = vector.extract_strided_slice %24 {offsets = [0, 2], sizes = [4, 256], strides = [1, 1]} : vector<4x290xf32> to vector<4x256xf32>
    %cst_55 = arith.constant 0.000000e+00 : f32
    %360 = vector.shape_cast %20 : vector<1x256xi1> to vector<1x256xi1>
    %361 = vector.broadcast %360 : vector<1x256xi1> to vector<4x256xi1>
    %362 = vector.broadcast %cst_55 : f32 to vector<4x256xf32>
    %363 = arith.select %361, %359, %362 : vector<4x256xi1>, vector<4x256xf32>
    %c2_56 = arith.constant 2 : index
    %c0_57 = arith.constant 0 : index
    %c0_58 = arith.constant 0 : index
    %c0_59 = arith.constant 0 : index
    %364 = vector.load %arg3[%c2_56, %c0_57, %c0_58, %c0_59] : memref<9x2x4x4xf32, #tpu.memory_space<vmem>>, vector<1x1x4x4xf32>
    %365 = vector.shape_cast %364 : vector<1x1x4x4xf32> to vector<4x4xf32>
    %366 = vector.extract_strided_slice %365 {offsets = [0, 0], sizes = [4, 1], strides = [1, 1]} : vector<4x4xf32> to vector<4x1xf32>
    %367 = vector.extract_strided_slice %363 {offsets = [0, 0], sizes = [1, 256], strides = [1, 1]} : vector<4x256xf32> to vector<1x256xf32>
    %368 = vector.broadcast %366 : vector<4x1xf32> to vector<4x256xf32>
    %369 = vector.broadcast %367 : vector<1x256xf32> to vector<4x256xf32>
    %370 = arith.mulf %368, %369 : vector<4x256xf32>
    %371 = arith.addf %358, %370 : vector<4x256xf32>
    %372 = vector.extract_strided_slice %365 {offsets = [0, 1], sizes = [4, 1], strides = [1, 1]} : vector<4x4xf32> to vector<4x1xf32>
    %373 = vector.extract_strided_slice %363 {offsets = [1, 0], sizes = [1, 256], strides = [1, 1]} : vector<4x256xf32> to vector<1x256xf32>
    %374 = vector.broadcast %372 : vector<4x1xf32> to vector<4x256xf32>
    %375 = vector.broadcast %373 : vector<1x256xf32> to vector<4x256xf32>
    %376 = arith.mulf %374, %375 : vector<4x256xf32>
    %377 = arith.addf %371, %376 : vector<4x256xf32>
    %378 = vector.extract_strided_slice %365 {offsets = [0, 2], sizes = [4, 1], strides = [1, 1]} : vector<4x4xf32> to vector<4x1xf32>
    %379 = vector.extract_strided_slice %363 {offsets = [2, 0], sizes = [1, 256], strides = [1, 1]} : vector<4x256xf32> to vector<1x256xf32>
    %380 = vector.broadcast %378 : vector<4x1xf32> to vector<4x256xf32>
    %381 = vector.broadcast %379 : vector<1x256xf32> to vector<4x256xf32>
    %382 = arith.mulf %380, %381 : vector<4x256xf32>
    %383 = arith.addf %377, %382 : vector<4x256xf32>
    %384 = vector.extract_strided_slice %365 {offsets = [0, 3], sizes = [4, 1], strides = [1, 1]} : vector<4x4xf32> to vector<4x1xf32>
    %385 = vector.extract_strided_slice %363 {offsets = [3, 0], sizes = [1, 256], strides = [1, 1]} : vector<4x256xf32> to vector<1x256xf32>
    %386 = vector.broadcast %384 : vector<4x1xf32> to vector<4x256xf32>
    %387 = vector.broadcast %385 : vector<1x256xf32> to vector<4x256xf32>
    %388 = arith.mulf %386, %387 : vector<4x256xf32>
    %389 = arith.addf %383, %388 : vector<4x256xf32>
    %390 = vector.extract_strided_slice %24 {offsets = [0, 16], sizes = [4, 256], strides = [1, 1]} : vector<4x290xf32> to vector<4x256xf32>
    %cst_60 = arith.constant 0.000000e+00 : f32
    %391 = vector.shape_cast %18 : vector<1x256xi1> to vector<1x256xi1>
    %392 = vector.broadcast %391 : vector<1x256xi1> to vector<4x256xi1>
    %393 = vector.broadcast %cst_60 : f32 to vector<4x256xf32>
    %394 = arith.select %392, %390, %393 : vector<4x256xi1>, vector<4x256xf32>
    %c3_61 = arith.constant 3 : index
    %c0_62 = arith.constant 0 : index
    %c0_63 = arith.constant 0 : index
    %c0_64 = arith.constant 0 : index
    %395 = vector.load %arg3[%c3_61, %c0_62, %c0_63, %c0_64] : memref<9x2x4x4xf32, #tpu.memory_space<vmem>>, vector<1x1x4x4xf32>
    %396 = vector.shape_cast %395 : vector<1x1x4x4xf32> to vector<4x4xf32>
    %397 = vector.extract_strided_slice %396 {offsets = [0, 0], sizes = [4, 1], strides = [1, 1]} : vector<4x4xf32> to vector<4x1xf32>
    %398 = vector.extract_strided_slice %394 {offsets = [0, 0], sizes = [1, 256], strides = [1, 1]} : vector<4x256xf32> to vector<1x256xf32>
    %399 = vector.broadcast %397 : vector<4x1xf32> to vector<4x256xf32>
    %400 = vector.broadcast %398 : vector<1x256xf32> to vector<4x256xf32>
    %401 = arith.mulf %399, %400 : vector<4x256xf32>
    %402 = arith.addf %389, %401 : vector<4x256xf32>
    %403 = vector.extract_strided_slice %396 {offsets = [0, 1], sizes = [4, 1], strides = [1, 1]} : vector<4x4xf32> to vector<4x1xf32>
    %404 = vector.extract_strided_slice %394 {offsets = [1, 0], sizes = [1, 256], strides = [1, 1]} : vector<4x256xf32> to vector<1x256xf32>
    %405 = vector.broadcast %403 : vector<4x1xf32> to vector<4x256xf32>
    %406 = vector.broadcast %404 : vector<1x256xf32> to vector<4x256xf32>
    %407 = arith.mulf %405, %406 : vector<4x256xf32>
    %408 = arith.addf %402, %407 : vector<4x256xf32>
    %409 = vector.extract_strided_slice %396 {offsets = [0, 2], sizes = [4, 1], strides = [1, 1]} : vector<4x4xf32> to vector<4x1xf32>
    %410 = vector.extract_strided_slice %394 {offsets = [2, 0], sizes = [1, 256], strides = [1, 1]} : vector<4x256xf32> to vector<1x256xf32>
    %411 = vector.broadcast %409 : vector<4x1xf32> to vector<4x256xf32>
    %412 = vector.broadcast %410 : vector<1x256xf32> to vector<4x256xf32>
    %413 = arith.mulf %411, %412 : vector<4x256xf32>
    %414 = arith.addf %408, %413 : vector<4x256xf32>
    %415 = vector.extract_strided_slice %396 {offsets = [0, 3], sizes = [4, 1], strides = [1, 1]} : vector<4x4xf32> to vector<4x1xf32>
    %416 = vector.extract_strided_slice %394 {offsets = [3, 0], sizes = [1, 256], strides = [1, 1]} : vector<4x256xf32> to vector<1x256xf32>
    %417 = vector.broadcast %415 : vector<4x1xf32> to vector<4x256xf32>
    %418 = vector.broadcast %416 : vector<1x256xf32> to vector<4x256xf32>
    %419 = arith.mulf %417, %418 : vector<4x256xf32>
    %420 = arith.addf %414, %419 : vector<4x256xf32>
    %421 = vector.extract_strided_slice %24 {offsets = [0, 17], sizes = [4, 256], strides = [1, 1]} : vector<4x290xf32> to vector<4x256xf32>
    %c4_65 = arith.constant 4 : index
    %c0_66 = arith.constant 0 : index
    %c0_67 = arith.constant 0 : index
    %c0_68 = arith.constant 0 : index
    %422 = vector.load %arg3[%c4_65, %c0_66, %c0_67, %c0_68] : memref<9x2x4x4xf32, #tpu.memory_space<vmem>>, vector<1x1x4x4xf32>
    %423 = vector.shape_cast %422 : vector<1x1x4x4xf32> to vector<4x4xf32>
    %424 = vector.extract_strided_slice %423 {offsets = [0, 0], sizes = [4, 1], strides = [1, 1]} : vector<4x4xf32> to vector<4x1xf32>
    %425 = vector.extract_strided_slice %421 {offsets = [0, 0], sizes = [1, 256], strides = [1, 1]} : vector<4x256xf32> to vector<1x256xf32>
    %426 = vector.broadcast %424 : vector<4x1xf32> to vector<4x256xf32>
    %427 = vector.broadcast %425 : vector<1x256xf32> to vector<4x256xf32>
    %428 = arith.mulf %426, %427 : vector<4x256xf32>
    %429 = arith.addf %420, %428 : vector<4x256xf32>
    %430 = vector.extract_strided_slice %423 {offsets = [0, 1], sizes = [4, 1], strides = [1, 1]} : vector<4x4xf32> to vector<4x1xf32>
    %431 = vector.extract_strided_slice %421 {offsets = [1, 0], sizes = [1, 256], strides = [1, 1]} : vector<4x256xf32> to vector<1x256xf32>
    %432 = vector.broadcast %430 : vector<4x1xf32> to vector<4x256xf32>
    %433 = vector.broadcast %431 : vector<1x256xf32> to vector<4x256xf32>
    %434 = arith.mulf %432, %433 : vector<4x256xf32>
    %435 = arith.addf %429, %434 : vector<4x256xf32>
    %436 = vector.extract_strided_slice %423 {offsets = [0, 2], sizes = [4, 1], strides = [1, 1]} : vector<4x4xf32> to vector<4x1xf32>
    %437 = vector.extract_strided_slice %421 {offsets = [2, 0], sizes = [1, 256], strides = [1, 1]} : vector<4x256xf32> to vector<1x256xf32>
    %438 = vector.broadcast %436 : vector<4x1xf32> to vector<4x256xf32>
    %439 = vector.broadcast %437 : vector<1x256xf32> to vector<4x256xf32>
    %440 = arith.mulf %438, %439 : vector<4x256xf32>
    %441 = arith.addf %435, %440 : vector<4x256xf32>
    %442 = vector.extract_strided_slice %423 {offsets = [0, 3], sizes = [4, 1], strides = [1, 1]} : vector<4x4xf32> to vector<4x1xf32>
    %443 = vector.extract_strided_slice %421 {offsets = [3, 0], sizes = [1, 256], strides = [1, 1]} : vector<4x256xf32> to vector<1x256xf32>
    %444 = vector.broadcast %442 : vector<4x1xf32> to vector<4x256xf32>
    %445 = vector.broadcast %443 : vector<1x256xf32> to vector<4x256xf32>
    %446 = arith.mulf %444, %445 : vector<4x256xf32>
    %447 = arith.addf %441, %446 : vector<4x256xf32>
    %448 = vector.extract_strided_slice %24 {offsets = [0, 18], sizes = [4, 256], strides = [1, 1]} : vector<4x290xf32> to vector<4x256xf32>
    %cst_69 = arith.constant 0.000000e+00 : f32
    %449 = vector.shape_cast %20 : vector<1x256xi1> to vector<1x256xi1>
    %450 = vector.broadcast %449 : vector<1x256xi1> to vector<4x256xi1>
    %451 = vector.broadcast %cst_69 : f32 to vector<4x256xf32>
    %452 = arith.select %450, %448, %451 : vector<4x256xi1>, vector<4x256xf32>
    %c5_70 = arith.constant 5 : index
    %c0_71 = arith.constant 0 : index
    %c0_72 = arith.constant 0 : index
    %c0_73 = arith.constant 0 : index
    %453 = vector.load %arg3[%c5_70, %c0_71, %c0_72, %c0_73] : memref<9x2x4x4xf32, #tpu.memory_space<vmem>>, vector<1x1x4x4xf32>
    %454 = vector.shape_cast %453 : vector<1x1x4x4xf32> to vector<4x4xf32>
    %455 = vector.extract_strided_slice %454 {offsets = [0, 0], sizes = [4, 1], strides = [1, 1]} : vector<4x4xf32> to vector<4x1xf32>
    %456 = vector.extract_strided_slice %452 {offsets = [0, 0], sizes = [1, 256], strides = [1, 1]} : vector<4x256xf32> to vector<1x256xf32>
    %457 = vector.broadcast %455 : vector<4x1xf32> to vector<4x256xf32>
    %458 = vector.broadcast %456 : vector<1x256xf32> to vector<4x256xf32>
    %459 = arith.mulf %457, %458 : vector<4x256xf32>
    %460 = arith.addf %447, %459 : vector<4x256xf32>
    %461 = vector.extract_strided_slice %454 {offsets = [0, 1], sizes = [4, 1], strides = [1, 1]} : vector<4x4xf32> to vector<4x1xf32>
    %462 = vector.extract_strided_slice %452 {offsets = [1, 0], sizes = [1, 256], strides = [1, 1]} : vector<4x256xf32> to vector<1x256xf32>
    %463 = vector.broadcast %461 : vector<4x1xf32> to vector<4x256xf32>
    %464 = vector.broadcast %462 : vector<1x256xf32> to vector<4x256xf32>
    %465 = arith.mulf %463, %464 : vector<4x256xf32>
    %466 = arith.addf %460, %465 : vector<4x256xf32>
    %467 = vector.extract_strided_slice %454 {offsets = [0, 2], sizes = [4, 1], strides = [1, 1]} : vector<4x4xf32> to vector<4x1xf32>
    %468 = vector.extract_strided_slice %452 {offsets = [2, 0], sizes = [1, 256], strides = [1, 1]} : vector<4x256xf32> to vector<1x256xf32>
    %469 = vector.broadcast %467 : vector<4x1xf32> to vector<4x256xf32>
    %470 = vector.broadcast %468 : vector<1x256xf32> to vector<4x256xf32>
    %471 = arith.mulf %469, %470 : vector<4x256xf32>
    %472 = arith.addf %466, %471 : vector<4x256xf32>
    %473 = vector.extract_strided_slice %454 {offsets = [0, 3], sizes = [4, 1], strides = [1, 1]} : vector<4x4xf32> to vector<4x1xf32>
    %474 = vector.extract_strided_slice %452 {offsets = [3, 0], sizes = [1, 256], strides = [1, 1]} : vector<4x256xf32> to vector<1x256xf32>
    %475 = vector.broadcast %473 : vector<4x1xf32> to vector<4x256xf32>
    %476 = vector.broadcast %474 : vector<1x256xf32> to vector<4x256xf32>
    %477 = arith.mulf %475, %476 : vector<4x256xf32>
    %478 = arith.addf %472, %477 : vector<4x256xf32>
    %479 = vector.extract_strided_slice %24 {offsets = [0, 32], sizes = [4, 256], strides = [1, 1]} : vector<4x290xf32> to vector<4x256xf32>
    %cst_74 = arith.constant 0.000000e+00 : f32
    %480 = vector.shape_cast %18 : vector<1x256xi1> to vector<1x256xi1>
    %481 = vector.broadcast %480 : vector<1x256xi1> to vector<4x256xi1>
    %482 = vector.broadcast %cst_74 : f32 to vector<4x256xf32>
    %483 = arith.select %481, %479, %482 : vector<4x256xi1>, vector<4x256xf32>
    %c6_75 = arith.constant 6 : index
    %c0_76 = arith.constant 0 : index
    %c0_77 = arith.constant 0 : index
    %c0_78 = arith.constant 0 : index
    %484 = vector.load %arg3[%c6_75, %c0_76, %c0_77, %c0_78] : memref<9x2x4x4xf32, #tpu.memory_space<vmem>>, vector<1x1x4x4xf32>
    %485 = vector.shape_cast %484 : vector<1x1x4x4xf32> to vector<4x4xf32>
    %486 = vector.extract_strided_slice %485 {offsets = [0, 0], sizes = [4, 1], strides = [1, 1]} : vector<4x4xf32> to vector<4x1xf32>
    %487 = vector.extract_strided_slice %483 {offsets = [0, 0], sizes = [1, 256], strides = [1, 1]} : vector<4x256xf32> to vector<1x256xf32>
    %488 = vector.broadcast %486 : vector<4x1xf32> to vector<4x256xf32>
    %489 = vector.broadcast %487 : vector<1x256xf32> to vector<4x256xf32>
    %490 = arith.mulf %488, %489 : vector<4x256xf32>
    %491 = arith.addf %478, %490 : vector<4x256xf32>
    %492 = vector.extract_strided_slice %485 {offsets = [0, 1], sizes = [4, 1], strides = [1, 1]} : vector<4x4xf32> to vector<4x1xf32>
    %493 = vector.extract_strided_slice %483 {offsets = [1, 0], sizes = [1, 256], strides = [1, 1]} : vector<4x256xf32> to vector<1x256xf32>
    %494 = vector.broadcast %492 : vector<4x1xf32> to vector<4x256xf32>
    %495 = vector.broadcast %493 : vector<1x256xf32> to vector<4x256xf32>
    %496 = arith.mulf %494, %495 : vector<4x256xf32>
    %497 = arith.addf %491, %496 : vector<4x256xf32>
    %498 = vector.extract_strided_slice %485 {offsets = [0, 2], sizes = [4, 1], strides = [1, 1]} : vector<4x4xf32> to vector<4x1xf32>
    %499 = vector.extract_strided_slice %483 {offsets = [2, 0], sizes = [1, 256], strides = [1, 1]} : vector<4x256xf32> to vector<1x256xf32>
    %500 = vector.broadcast %498 : vector<4x1xf32> to vector<4x256xf32>
    %501 = vector.broadcast %499 : vector<1x256xf32> to vector<4x256xf32>
    %502 = arith.mulf %500, %501 : vector<4x256xf32>
    %503 = arith.addf %497, %502 : vector<4x256xf32>
    %504 = vector.extract_strided_slice %485 {offsets = [0, 3], sizes = [4, 1], strides = [1, 1]} : vector<4x4xf32> to vector<4x1xf32>
    %505 = vector.extract_strided_slice %483 {offsets = [3, 0], sizes = [1, 256], strides = [1, 1]} : vector<4x256xf32> to vector<1x256xf32>
    %506 = vector.broadcast %504 : vector<4x1xf32> to vector<4x256xf32>
    %507 = vector.broadcast %505 : vector<1x256xf32> to vector<4x256xf32>
    %508 = arith.mulf %506, %507 : vector<4x256xf32>
    %509 = arith.addf %503, %508 : vector<4x256xf32>
    %510 = vector.extract_strided_slice %24 {offsets = [0, 33], sizes = [4, 256], strides = [1, 1]} : vector<4x290xf32> to vector<4x256xf32>
    %c7_79 = arith.constant 7 : index
    %c0_80 = arith.constant 0 : index
    %c0_81 = arith.constant 0 : index
    %c0_82 = arith.constant 0 : index
    %511 = vector.load %arg3[%c7_79, %c0_80, %c0_81, %c0_82] : memref<9x2x4x4xf32, #tpu.memory_space<vmem>>, vector<1x1x4x4xf32>
    %512 = vector.shape_cast %511 : vector<1x1x4x4xf32> to vector<4x4xf32>
    %513 = vector.extract_strided_slice %512 {offsets = [0, 0], sizes = [4, 1], strides = [1, 1]} : vector<4x4xf32> to vector<4x1xf32>
    %514 = vector.extract_strided_slice %510 {offsets = [0, 0], sizes = [1, 256], strides = [1, 1]} : vector<4x256xf32> to vector<1x256xf32>
    %515 = vector.broadcast %513 : vector<4x1xf32> to vector<4x256xf32>
    %516 = vector.broadcast %514 : vector<1x256xf32> to vector<4x256xf32>
    %517 = arith.mulf %515, %516 : vector<4x256xf32>
    %518 = arith.addf %509, %517 : vector<4x256xf32>
    %519 = vector.extract_strided_slice %512 {offsets = [0, 1], sizes = [4, 1], strides = [1, 1]} : vector<4x4xf32> to vector<4x1xf32>
    %520 = vector.extract_strided_slice %510 {offsets = [1, 0], sizes = [1, 256], strides = [1, 1]} : vector<4x256xf32> to vector<1x256xf32>
    %521 = vector.broadcast %519 : vector<4x1xf32> to vector<4x256xf32>
    %522 = vector.broadcast %520 : vector<1x256xf32> to vector<4x256xf32>
    %523 = arith.mulf %521, %522 : vector<4x256xf32>
    %524 = arith.addf %518, %523 : vector<4x256xf32>
    %525 = vector.extract_strided_slice %512 {offsets = [0, 2], sizes = [4, 1], strides = [1, 1]} : vector<4x4xf32> to vector<4x1xf32>
    %526 = vector.extract_strided_slice %510 {offsets = [2, 0], sizes = [1, 256], strides = [1, 1]} : vector<4x256xf32> to vector<1x256xf32>
    %527 = vector.broadcast %525 : vector<4x1xf32> to vector<4x256xf32>
    %528 = vector.broadcast %526 : vector<1x256xf32> to vector<4x256xf32>
    %529 = arith.mulf %527, %528 : vector<4x256xf32>
    %530 = arith.addf %524, %529 : vector<4x256xf32>
    %531 = vector.extract_strided_slice %512 {offsets = [0, 3], sizes = [4, 1], strides = [1, 1]} : vector<4x4xf32> to vector<4x1xf32>
    %532 = vector.extract_strided_slice %510 {offsets = [3, 0], sizes = [1, 256], strides = [1, 1]} : vector<4x256xf32> to vector<1x256xf32>
    %533 = vector.broadcast %531 : vector<4x1xf32> to vector<4x256xf32>
    %534 = vector.broadcast %532 : vector<1x256xf32> to vector<4x256xf32>
    %535 = arith.mulf %533, %534 : vector<4x256xf32>
    %536 = arith.addf %530, %535 : vector<4x256xf32>
    %537 = vector.extract_strided_slice %24 {offsets = [0, 34], sizes = [4, 256], strides = [1, 1]} : vector<4x290xf32> to vector<4x256xf32>
    %cst_83 = arith.constant 0.000000e+00 : f32
    %538 = vector.shape_cast %20 : vector<1x256xi1> to vector<1x256xi1>
    %539 = vector.broadcast %538 : vector<1x256xi1> to vector<4x256xi1>
    %540 = vector.broadcast %cst_83 : f32 to vector<4x256xf32>
    %541 = arith.select %539, %537, %540 : vector<4x256xi1>, vector<4x256xf32>
    %c8_84 = arith.constant 8 : index
    %c0_85 = arith.constant 0 : index
    %c0_86 = arith.constant 0 : index
    %c0_87 = arith.constant 0 : index
    %542 = vector.load %arg3[%c8_84, %c0_85, %c0_86, %c0_87] : memref<9x2x4x4xf32, #tpu.memory_space<vmem>>, vector<1x1x4x4xf32>
    %543 = vector.shape_cast %542 : vector<1x1x4x4xf32> to vector<4x4xf32>
    %544 = vector.extract_strided_slice %543 {offsets = [0, 0], sizes = [4, 1], strides = [1, 1]} : vector<4x4xf32> to vector<4x1xf32>
    %545 = vector.extract_strided_slice %541 {offsets = [0, 0], sizes = [1, 256], strides = [1, 1]} : vector<4x256xf32> to vector<1x256xf32>
    %546 = vector.broadcast %544 : vector<4x1xf32> to vector<4x256xf32>
    %547 = vector.broadcast %545 : vector<1x256xf32> to vector<4x256xf32>
    %548 = arith.mulf %546, %547 : vector<4x256xf32>
    %549 = arith.addf %536, %548 : vector<4x256xf32>
    %550 = vector.extract_strided_slice %543 {offsets = [0, 1], sizes = [4, 1], strides = [1, 1]} : vector<4x4xf32> to vector<4x1xf32>
    %551 = vector.extract_strided_slice %541 {offsets = [1, 0], sizes = [1, 256], strides = [1, 1]} : vector<4x256xf32> to vector<1x256xf32>
    %552 = vector.broadcast %550 : vector<4x1xf32> to vector<4x256xf32>
    %553 = vector.broadcast %551 : vector<1x256xf32> to vector<4x256xf32>
    %554 = arith.mulf %552, %553 : vector<4x256xf32>
    %555 = arith.addf %549, %554 : vector<4x256xf32>
    %556 = vector.extract_strided_slice %543 {offsets = [0, 2], sizes = [4, 1], strides = [1, 1]} : vector<4x4xf32> to vector<4x1xf32>
    %557 = vector.extract_strided_slice %541 {offsets = [2, 0], sizes = [1, 256], strides = [1, 1]} : vector<4x256xf32> to vector<1x256xf32>
    %558 = vector.broadcast %556 : vector<4x1xf32> to vector<4x256xf32>
    %559 = vector.broadcast %557 : vector<1x256xf32> to vector<4x256xf32>
    %560 = arith.mulf %558, %559 : vector<4x256xf32>
    %561 = arith.addf %555, %560 : vector<4x256xf32>
    %562 = vector.extract_strided_slice %543 {offsets = [0, 3], sizes = [4, 1], strides = [1, 1]} : vector<4x4xf32> to vector<4x1xf32>
    %563 = vector.extract_strided_slice %541 {offsets = [3, 0], sizes = [1, 256], strides = [1, 1]} : vector<4x256xf32> to vector<1x256xf32>
    %564 = vector.broadcast %562 : vector<4x1xf32> to vector<4x256xf32>
    %565 = vector.broadcast %563 : vector<1x256xf32> to vector<4x256xf32>
    %566 = arith.mulf %564, %565 : vector<4x256xf32>
    %567 = arith.addf %561, %566 : vector<4x256xf32>
    %568 = vector.extract_strided_slice %299 {offsets = [0, 0], sizes = [4, 256], strides = [1, 1]} : vector<4x290xf32> to vector<4x256xf32>
    %cst_88 = arith.constant 0.000000e+00 : f32
    %569 = vector.shape_cast %18 : vector<1x256xi1> to vector<1x256xi1>
    %570 = vector.broadcast %569 : vector<1x256xi1> to vector<4x256xi1>
    %571 = vector.broadcast %cst_88 : f32 to vector<4x256xf32>
    %572 = arith.select %570, %568, %571 : vector<4x256xi1>, vector<4x256xf32>
    %c0_89 = arith.constant 0 : index
    %c1_90 = arith.constant 1 : index
    %c0_91 = arith.constant 0 : index
    %c0_92 = arith.constant 0 : index
    %573 = vector.load %arg3[%c0_89, %c1_90, %c0_91, %c0_92] : memref<9x2x4x4xf32, #tpu.memory_space<vmem>>, vector<1x1x4x4xf32>
    %574 = vector.shape_cast %573 : vector<1x1x4x4xf32> to vector<4x4xf32>
    %575 = vector.extract_strided_slice %574 {offsets = [0, 0], sizes = [4, 1], strides = [1, 1]} : vector<4x4xf32> to vector<4x1xf32>
    %576 = vector.extract_strided_slice %572 {offsets = [0, 0], sizes = [1, 256], strides = [1, 1]} : vector<4x256xf32> to vector<1x256xf32>
    %577 = vector.broadcast %575 : vector<4x1xf32> to vector<4x256xf32>
    %578 = vector.broadcast %576 : vector<1x256xf32> to vector<4x256xf32>
    %579 = arith.mulf %577, %578 : vector<4x256xf32>
    %580 = arith.addf %567, %579 : vector<4x256xf32>
    %581 = vector.extract_strided_slice %574 {offsets = [0, 1], sizes = [4, 1], strides = [1, 1]} : vector<4x4xf32> to vector<4x1xf32>
    %582 = vector.extract_strided_slice %572 {offsets = [1, 0], sizes = [1, 256], strides = [1, 1]} : vector<4x256xf32> to vector<1x256xf32>
    %583 = vector.broadcast %581 : vector<4x1xf32> to vector<4x256xf32>
    %584 = vector.broadcast %582 : vector<1x256xf32> to vector<4x256xf32>
    %585 = arith.mulf %583, %584 : vector<4x256xf32>
    %586 = arith.addf %580, %585 : vector<4x256xf32>
    %587 = vector.extract_strided_slice %574 {offsets = [0, 2], sizes = [4, 1], strides = [1, 1]} : vector<4x4xf32> to vector<4x1xf32>
    %588 = vector.extract_strided_slice %572 {offsets = [2, 0], sizes = [1, 256], strides = [1, 1]} : vector<4x256xf32> to vector<1x256xf32>
    %589 = vector.broadcast %587 : vector<4x1xf32> to vector<4x256xf32>
    %590 = vector.broadcast %588 : vector<1x256xf32> to vector<4x256xf32>
    %591 = arith.mulf %589, %590 : vector<4x256xf32>
    %592 = arith.addf %586, %591 : vector<4x256xf32>
    %593 = vector.extract_strided_slice %574 {offsets = [0, 3], sizes = [4, 1], strides = [1, 1]} : vector<4x4xf32> to vector<4x1xf32>
    %594 = vector.extract_strided_slice %572 {offsets = [3, 0], sizes = [1, 256], strides = [1, 1]} : vector<4x256xf32> to vector<1x256xf32>
    %595 = vector.broadcast %593 : vector<4x1xf32> to vector<4x256xf32>
    %596 = vector.broadcast %594 : vector<1x256xf32> to vector<4x256xf32>
    %597 = arith.mulf %595, %596 : vector<4x256xf32>
    %598 = arith.addf %592, %597 : vector<4x256xf32>
    %599 = vector.extract_strided_slice %299 {offsets = [0, 1], sizes = [4, 256], strides = [1, 1]} : vector<4x290xf32> to vector<4x256xf32>
    %c1_93 = arith.constant 1 : index
    %c1_94 = arith.constant 1 : index
    %c0_95 = arith.constant 0 : index
    %c0_96 = arith.constant 0 : index
    %600 = vector.load %arg3[%c1_93, %c1_94, %c0_95, %c0_96] : memref<9x2x4x4xf32, #tpu.memory_space<vmem>>, vector<1x1x4x4xf32>
    %601 = vector.shape_cast %600 : vector<1x1x4x4xf32> to vector<4x4xf32>
    %602 = vector.extract_strided_slice %601 {offsets = [0, 0], sizes = [4, 1], strides = [1, 1]} : vector<4x4xf32> to vector<4x1xf32>
    %603 = vector.extract_strided_slice %599 {offsets = [0, 0], sizes = [1, 256], strides = [1, 1]} : vector<4x256xf32> to vector<1x256xf32>
    %604 = vector.broadcast %602 : vector<4x1xf32> to vector<4x256xf32>
    %605 = vector.broadcast %603 : vector<1x256xf32> to vector<4x256xf32>
    %606 = arith.mulf %604, %605 : vector<4x256xf32>
    %607 = arith.addf %598, %606 : vector<4x256xf32>
    %608 = vector.extract_strided_slice %601 {offsets = [0, 1], sizes = [4, 1], strides = [1, 1]} : vector<4x4xf32> to vector<4x1xf32>
    %609 = vector.extract_strided_slice %599 {offsets = [1, 0], sizes = [1, 256], strides = [1, 1]} : vector<4x256xf32> to vector<1x256xf32>
    %610 = vector.broadcast %608 : vector<4x1xf32> to vector<4x256xf32>
    %611 = vector.broadcast %609 : vector<1x256xf32> to vector<4x256xf32>
    %612 = arith.mulf %610, %611 : vector<4x256xf32>
    %613 = arith.addf %607, %612 : vector<4x256xf32>
    %614 = vector.extract_strided_slice %601 {offsets = [0, 2], sizes = [4, 1], strides = [1, 1]} : vector<4x4xf32> to vector<4x1xf32>
    %615 = vector.extract_strided_slice %599 {offsets = [2, 0], sizes = [1, 256], strides = [1, 1]} : vector<4x256xf32> to vector<1x256xf32>
    %616 = vector.broadcast %614 : vector<4x1xf32> to vector<4x256xf32>
    %617 = vector.broadcast %615 : vector<1x256xf32> to vector<4x256xf32>
    %618 = arith.mulf %616, %617 : vector<4x256xf32>
    %619 = arith.addf %613, %618 : vector<4x256xf32>
    %620 = vector.extract_strided_slice %601 {offsets = [0, 3], sizes = [4, 1], strides = [1, 1]} : vector<4x4xf32> to vector<4x1xf32>
    %621 = vector.extract_strided_slice %599 {offsets = [3, 0], sizes = [1, 256], strides = [1, 1]} : vector<4x256xf32> to vector<1x256xf32>
    %622 = vector.broadcast %620 : vector<4x1xf32> to vector<4x256xf32>
    %623 = vector.broadcast %621 : vector<1x256xf32> to vector<4x256xf32>
    %624 = arith.mulf %622, %623 : vector<4x256xf32>
    %625 = arith.addf %619, %624 : vector<4x256xf32>
    %626 = vector.extract_strided_slice %299 {offsets = [0, 2], sizes = [4, 256], strides = [1, 1]} : vector<4x290xf32> to vector<4x256xf32>
    %cst_97 = arith.constant 0.000000e+00 : f32
    %627 = vector.shape_cast %20 : vector<1x256xi1> to vector<1x256xi1>
    %628 = vector.broadcast %627 : vector<1x256xi1> to vector<4x256xi1>
    %629 = vector.broadcast %cst_97 : f32 to vector<4x256xf32>
    %630 = arith.select %628, %626, %629 : vector<4x256xi1>, vector<4x256xf32>
    %c2_98 = arith.constant 2 : index
    %c1_99 = arith.constant 1 : index
    %c0_100 = arith.constant 0 : index
    %c0_101 = arith.constant 0 : index
    %631 = vector.load %arg3[%c2_98, %c1_99, %c0_100, %c0_101] : memref<9x2x4x4xf32, #tpu.memory_space<vmem>>, vector<1x1x4x4xf32>
    %632 = vector.shape_cast %631 : vector<1x1x4x4xf32> to vector<4x4xf32>
    %633 = vector.extract_strided_slice %632 {offsets = [0, 0], sizes = [4, 1], strides = [1, 1]} : vector<4x4xf32> to vector<4x1xf32>
    %634 = vector.extract_strided_slice %630 {offsets = [0, 0], sizes = [1, 256], strides = [1, 1]} : vector<4x256xf32> to vector<1x256xf32>
    %635 = vector.broadcast %633 : vector<4x1xf32> to vector<4x256xf32>
    %636 = vector.broadcast %634 : vector<1x256xf32> to vector<4x256xf32>
    %637 = arith.mulf %635, %636 : vector<4x256xf32>
    %638 = arith.addf %625, %637 : vector<4x256xf32>
    %639 = vector.extract_strided_slice %632 {offsets = [0, 1], sizes = [4, 1], strides = [1, 1]} : vector<4x4xf32> to vector<4x1xf32>
    %640 = vector.extract_strided_slice %630 {offsets = [1, 0], sizes = [1, 256], strides = [1, 1]} : vector<4x256xf32> to vector<1x256xf32>
    %641 = vector.broadcast %639 : vector<4x1xf32> to vector<4x256xf32>
    %642 = vector.broadcast %640 : vector<1x256xf32> to vector<4x256xf32>
    %643 = arith.mulf %641, %642 : vector<4x256xf32>
    %644 = arith.addf %638, %643 : vector<4x256xf32>
    %645 = vector.extract_strided_slice %632 {offsets = [0, 2], sizes = [4, 1], strides = [1, 1]} : vector<4x4xf32> to vector<4x1xf32>
    %646 = vector.extract_strided_slice %630 {offsets = [2, 0], sizes = [1, 256], strides = [1, 1]} : vector<4x256xf32> to vector<1x256xf32>
    %647 = vector.broadcast %645 : vector<4x1xf32> to vector<4x256xf32>
    %648 = vector.broadcast %646 : vector<1x256xf32> to vector<4x256xf32>
    %649 = arith.mulf %647, %648 : vector<4x256xf32>
    %650 = arith.addf %644, %649 : vector<4x256xf32>
    %651 = vector.extract_strided_slice %632 {offsets = [0, 3], sizes = [4, 1], strides = [1, 1]} : vector<4x4xf32> to vector<4x1xf32>
    %652 = vector.extract_strided_slice %630 {offsets = [3, 0], sizes = [1, 256], strides = [1, 1]} : vector<4x256xf32> to vector<1x256xf32>
    %653 = vector.broadcast %651 : vector<4x1xf32> to vector<4x256xf32>
    %654 = vector.broadcast %652 : vector<1x256xf32> to vector<4x256xf32>
    %655 = arith.mulf %653, %654 : vector<4x256xf32>
    %656 = arith.addf %650, %655 : vector<4x256xf32>
    %657 = vector.extract_strided_slice %299 {offsets = [0, 16], sizes = [4, 256], strides = [1, 1]} : vector<4x290xf32> to vector<4x256xf32>
    %cst_102 = arith.constant 0.000000e+00 : f32
    %658 = vector.shape_cast %18 : vector<1x256xi1> to vector<1x256xi1>
    %659 = vector.broadcast %658 : vector<1x256xi1> to vector<4x256xi1>
    %660 = vector.broadcast %cst_102 : f32 to vector<4x256xf32>
    %661 = arith.select %659, %657, %660 : vector<4x256xi1>, vector<4x256xf32>
    %c3_103 = arith.constant 3 : index
    %c1_104 = arith.constant 1 : index
    %c0_105 = arith.constant 0 : index
    %c0_106 = arith.constant 0 : index
    %662 = vector.load %arg3[%c3_103, %c1_104, %c0_105, %c0_106] : memref<9x2x4x4xf32, #tpu.memory_space<vmem>>, vector<1x1x4x4xf32>
    %663 = vector.shape_cast %662 : vector<1x1x4x4xf32> to vector<4x4xf32>
    %664 = vector.extract_strided_slice %663 {offsets = [0, 0], sizes = [4, 1], strides = [1, 1]} : vector<4x4xf32> to vector<4x1xf32>
    %665 = vector.extract_strided_slice %661 {offsets = [0, 0], sizes = [1, 256], strides = [1, 1]} : vector<4x256xf32> to vector<1x256xf32>
    %666 = vector.broadcast %664 : vector<4x1xf32> to vector<4x256xf32>
    %667 = vector.broadcast %665 : vector<1x256xf32> to vector<4x256xf32>
    %668 = arith.mulf %666, %667 : vector<4x256xf32>
    %669 = arith.addf %656, %668 : vector<4x256xf32>
    %670 = vector.extract_strided_slice %663 {offsets = [0, 1], sizes = [4, 1], strides = [1, 1]} : vector<4x4xf32> to vector<4x1xf32>
    %671 = vector.extract_strided_slice %661 {offsets = [1, 0], sizes = [1, 256], strides = [1, 1]} : vector<4x256xf32> to vector<1x256xf32>
    %672 = vector.broadcast %670 : vector<4x1xf32> to vector<4x256xf32>
    %673 = vector.broadcast %671 : vector<1x256xf32> to vector<4x256xf32>
    %674 = arith.mulf %672, %673 : vector<4x256xf32>
    %675 = arith.addf %669, %674 : vector<4x256xf32>
    %676 = vector.extract_strided_slice %663 {offsets = [0, 2], sizes = [4, 1], strides = [1, 1]} : vector<4x4xf32> to vector<4x1xf32>
    %677 = vector.extract_strided_slice %661 {offsets = [2, 0], sizes = [1, 256], strides = [1, 1]} : vector<4x256xf32> to vector<1x256xf32>
    %678 = vector.broadcast %676 : vector<4x1xf32> to vector<4x256xf32>
    %679 = vector.broadcast %677 : vector<1x256xf32> to vector<4x256xf32>
    %680 = arith.mulf %678, %679 : vector<4x256xf32>
    %681 = arith.addf %675, %680 : vector<4x256xf32>
    %682 = vector.extract_strided_slice %663 {offsets = [0, 3], sizes = [4, 1], strides = [1, 1]} : vector<4x4xf32> to vector<4x1xf32>
    %683 = vector.extract_strided_slice %661 {offsets = [3, 0], sizes = [1, 256], strides = [1, 1]} : vector<4x256xf32> to vector<1x256xf32>
    %684 = vector.broadcast %682 : vector<4x1xf32> to vector<4x256xf32>
    %685 = vector.broadcast %683 : vector<1x256xf32> to vector<4x256xf32>
    %686 = arith.mulf %684, %685 : vector<4x256xf32>
    %687 = arith.addf %681, %686 : vector<4x256xf32>
    %688 = vector.extract_strided_slice %299 {offsets = [0, 17], sizes = [4, 256], strides = [1, 1]} : vector<4x290xf32> to vector<4x256xf32>
    %c4_107 = arith.constant 4 : index
    %c1_108 = arith.constant 1 : index
    %c0_109 = arith.constant 0 : index
    %c0_110 = arith.constant 0 : index
    %689 = vector.load %arg3[%c4_107, %c1_108, %c0_109, %c0_110] : memref<9x2x4x4xf32, #tpu.memory_space<vmem>>, vector<1x1x4x4xf32>
    %690 = vector.shape_cast %689 : vector<1x1x4x4xf32> to vector<4x4xf32>
    %691 = vector.extract_strided_slice %690 {offsets = [0, 0], sizes = [4, 1], strides = [1, 1]} : vector<4x4xf32> to vector<4x1xf32>
    %692 = vector.extract_strided_slice %688 {offsets = [0, 0], sizes = [1, 256], strides = [1, 1]} : vector<4x256xf32> to vector<1x256xf32>
    %693 = vector.broadcast %691 : vector<4x1xf32> to vector<4x256xf32>
    %694 = vector.broadcast %692 : vector<1x256xf32> to vector<4x256xf32>
    %695 = arith.mulf %693, %694 : vector<4x256xf32>
    %696 = arith.addf %687, %695 : vector<4x256xf32>
    %697 = vector.extract_strided_slice %690 {offsets = [0, 1], sizes = [4, 1], strides = [1, 1]} : vector<4x4xf32> to vector<4x1xf32>
    %698 = vector.extract_strided_slice %688 {offsets = [1, 0], sizes = [1, 256], strides = [1, 1]} : vector<4x256xf32> to vector<1x256xf32>
    %699 = vector.broadcast %697 : vector<4x1xf32> to vector<4x256xf32>
    %700 = vector.broadcast %698 : vector<1x256xf32> to vector<4x256xf32>
    %701 = arith.mulf %699, %700 : vector<4x256xf32>
    %702 = arith.addf %696, %701 : vector<4x256xf32>
    %703 = vector.extract_strided_slice %690 {offsets = [0, 2], sizes = [4, 1], strides = [1, 1]} : vector<4x4xf32> to vector<4x1xf32>
    %704 = vector.extract_strided_slice %688 {offsets = [2, 0], sizes = [1, 256], strides = [1, 1]} : vector<4x256xf32> to vector<1x256xf32>
    %705 = vector.broadcast %703 : vector<4x1xf32> to vector<4x256xf32>
    %706 = vector.broadcast %704 : vector<1x256xf32> to vector<4x256xf32>
    %707 = arith.mulf %705, %706 : vector<4x256xf32>
    %708 = arith.addf %702, %707 : vector<4x256xf32>
    %709 = vector.extract_strided_slice %690 {offsets = [0, 3], sizes = [4, 1], strides = [1, 1]} : vector<4x4xf32> to vector<4x1xf32>
    %710 = vector.extract_strided_slice %688 {offsets = [3, 0], sizes = [1, 256], strides = [1, 1]} : vector<4x256xf32> to vector<1x256xf32>
    %711 = vector.broadcast %709 : vector<4x1xf32> to vector<4x256xf32>
    %712 = vector.broadcast %710 : vector<1x256xf32> to vector<4x256xf32>
    %713 = arith.mulf %711, %712 : vector<4x256xf32>
    %714 = arith.addf %708, %713 : vector<4x256xf32>
    %715 = vector.extract_strided_slice %299 {offsets = [0, 18], sizes = [4, 256], strides = [1, 1]} : vector<4x290xf32> to vector<4x256xf32>
    %cst_111 = arith.constant 0.000000e+00 : f32
    %716 = vector.shape_cast %20 : vector<1x256xi1> to vector<1x256xi1>
    %717 = vector.broadcast %716 : vector<1x256xi1> to vector<4x256xi1>
    %718 = vector.broadcast %cst_111 : f32 to vector<4x256xf32>
    %719 = arith.select %717, %715, %718 : vector<4x256xi1>, vector<4x256xf32>
    %c5_112 = arith.constant 5 : index
    %c1_113 = arith.constant 1 : index
    %c0_114 = arith.constant 0 : index
    %c0_115 = arith.constant 0 : index
    %720 = vector.load %arg3[%c5_112, %c1_113, %c0_114, %c0_115] : memref<9x2x4x4xf32, #tpu.memory_space<vmem>>, vector<1x1x4x4xf32>
    %721 = vector.shape_cast %720 : vector<1x1x4x4xf32> to vector<4x4xf32>
    %722 = vector.extract_strided_slice %721 {offsets = [0, 0], sizes = [4, 1], strides = [1, 1]} : vector<4x4xf32> to vector<4x1xf32>
    %723 = vector.extract_strided_slice %719 {offsets = [0, 0], sizes = [1, 256], strides = [1, 1]} : vector<4x256xf32> to vector<1x256xf32>
    %724 = vector.broadcast %722 : vector<4x1xf32> to vector<4x256xf32>
    %725 = vector.broadcast %723 : vector<1x256xf32> to vector<4x256xf32>
    %726 = arith.mulf %724, %725 : vector<4x256xf32>
    %727 = arith.addf %714, %726 : vector<4x256xf32>
    %728 = vector.extract_strided_slice %721 {offsets = [0, 1], sizes = [4, 1], strides = [1, 1]} : vector<4x4xf32> to vector<4x1xf32>
    %729 = vector.extract_strided_slice %719 {offsets = [1, 0], sizes = [1, 256], strides = [1, 1]} : vector<4x256xf32> to vector<1x256xf32>
    %730 = vector.broadcast %728 : vector<4x1xf32> to vector<4x256xf32>
    %731 = vector.broadcast %729 : vector<1x256xf32> to vector<4x256xf32>
    %732 = arith.mulf %730, %731 : vector<4x256xf32>
    %733 = arith.addf %727, %732 : vector<4x256xf32>
    %734 = vector.extract_strided_slice %721 {offsets = [0, 2], sizes = [4, 1], strides = [1, 1]} : vector<4x4xf32> to vector<4x1xf32>
    %735 = vector.extract_strided_slice %719 {offsets = [2, 0], sizes = [1, 256], strides = [1, 1]} : vector<4x256xf32> to vector<1x256xf32>
    %736 = vector.broadcast %734 : vector<4x1xf32> to vector<4x256xf32>
    %737 = vector.broadcast %735 : vector<1x256xf32> to vector<4x256xf32>
    %738 = arith.mulf %736, %737 : vector<4x256xf32>
    %739 = arith.addf %733, %738 : vector<4x256xf32>
    %740 = vector.extract_strided_slice %721 {offsets = [0, 3], sizes = [4, 1], strides = [1, 1]} : vector<4x4xf32> to vector<4x1xf32>
    %741 = vector.extract_strided_slice %719 {offsets = [3, 0], sizes = [1, 256], strides = [1, 1]} : vector<4x256xf32> to vector<1x256xf32>
    %742 = vector.broadcast %740 : vector<4x1xf32> to vector<4x256xf32>
    %743 = vector.broadcast %741 : vector<1x256xf32> to vector<4x256xf32>
    %744 = arith.mulf %742, %743 : vector<4x256xf32>
    %745 = arith.addf %739, %744 : vector<4x256xf32>
    %746 = vector.extract_strided_slice %299 {offsets = [0, 32], sizes = [4, 256], strides = [1, 1]} : vector<4x290xf32> to vector<4x256xf32>
    %cst_116 = arith.constant 0.000000e+00 : f32
    %747 = vector.shape_cast %18 : vector<1x256xi1> to vector<1x256xi1>
    %748 = vector.broadcast %747 : vector<1x256xi1> to vector<4x256xi1>
    %749 = vector.broadcast %cst_116 : f32 to vector<4x256xf32>
    %750 = arith.select %748, %746, %749 : vector<4x256xi1>, vector<4x256xf32>
    %c6_117 = arith.constant 6 : index
    %c1_118 = arith.constant 1 : index
    %c0_119 = arith.constant 0 : index
    %c0_120 = arith.constant 0 : index
    %751 = vector.load %arg3[%c6_117, %c1_118, %c0_119, %c0_120] : memref<9x2x4x4xf32, #tpu.memory_space<vmem>>, vector<1x1x4x4xf32>
    %752 = vector.shape_cast %751 : vector<1x1x4x4xf32> to vector<4x4xf32>
    %753 = vector.extract_strided_slice %752 {offsets = [0, 0], sizes = [4, 1], strides = [1, 1]} : vector<4x4xf32> to vector<4x1xf32>
    %754 = vector.extract_strided_slice %750 {offsets = [0, 0], sizes = [1, 256], strides = [1, 1]} : vector<4x256xf32> to vector<1x256xf32>
    %755 = vector.broadcast %753 : vector<4x1xf32> to vector<4x256xf32>
    %756 = vector.broadcast %754 : vector<1x256xf32> to vector<4x256xf32>
    %757 = arith.mulf %755, %756 : vector<4x256xf32>
    %758 = arith.addf %745, %757 : vector<4x256xf32>
    %759 = vector.extract_strided_slice %752 {offsets = [0, 1], sizes = [4, 1], strides = [1, 1]} : vector<4x4xf32> to vector<4x1xf32>
    %760 = vector.extract_strided_slice %750 {offsets = [1, 0], sizes = [1, 256], strides = [1, 1]} : vector<4x256xf32> to vector<1x256xf32>
    %761 = vector.broadcast %759 : vector<4x1xf32> to vector<4x256xf32>
    %762 = vector.broadcast %760 : vector<1x256xf32> to vector<4x256xf32>
    %763 = arith.mulf %761, %762 : vector<4x256xf32>
    %764 = arith.addf %758, %763 : vector<4x256xf32>
    %765 = vector.extract_strided_slice %752 {offsets = [0, 2], sizes = [4, 1], strides = [1, 1]} : vector<4x4xf32> to vector<4x1xf32>
    %766 = vector.extract_strided_slice %750 {offsets = [2, 0], sizes = [1, 256], strides = [1, 1]} : vector<4x256xf32> to vector<1x256xf32>
    %767 = vector.broadcast %765 : vector<4x1xf32> to vector<4x256xf32>
    %768 = vector.broadcast %766 : vector<1x256xf32> to vector<4x256xf32>
    %769 = arith.mulf %767, %768 : vector<4x256xf32>
    %770 = arith.addf %764, %769 : vector<4x256xf32>
    %771 = vector.extract_strided_slice %752 {offsets = [0, 3], sizes = [4, 1], strides = [1, 1]} : vector<4x4xf32> to vector<4x1xf32>
    %772 = vector.extract_strided_slice %750 {offsets = [3, 0], sizes = [1, 256], strides = [1, 1]} : vector<4x256xf32> to vector<1x256xf32>
    %773 = vector.broadcast %771 : vector<4x1xf32> to vector<4x256xf32>
    %774 = vector.broadcast %772 : vector<1x256xf32> to vector<4x256xf32>
    %775 = arith.mulf %773, %774 : vector<4x256xf32>
    %776 = arith.addf %770, %775 : vector<4x256xf32>
    %777 = vector.extract_strided_slice %299 {offsets = [0, 33], sizes = [4, 256], strides = [1, 1]} : vector<4x290xf32> to vector<4x256xf32>
    %c7_121 = arith.constant 7 : index
    %c1_122 = arith.constant 1 : index
    %c0_123 = arith.constant 0 : index
    %c0_124 = arith.constant 0 : index
    %778 = vector.load %arg3[%c7_121, %c1_122, %c0_123, %c0_124] : memref<9x2x4x4xf32, #tpu.memory_space<vmem>>, vector<1x1x4x4xf32>
    %779 = vector.shape_cast %778 : vector<1x1x4x4xf32> to vector<4x4xf32>
    %780 = vector.extract_strided_slice %779 {offsets = [0, 0], sizes = [4, 1], strides = [1, 1]} : vector<4x4xf32> to vector<4x1xf32>
    %781 = vector.extract_strided_slice %777 {offsets = [0, 0], sizes = [1, 256], strides = [1, 1]} : vector<4x256xf32> to vector<1x256xf32>
    %782 = vector.broadcast %780 : vector<4x1xf32> to vector<4x256xf32>
    %783 = vector.broadcast %781 : vector<1x256xf32> to vector<4x256xf32>
    %784 = arith.mulf %782, %783 : vector<4x256xf32>
    %785 = arith.addf %776, %784 : vector<4x256xf32>
    %786 = vector.extract_strided_slice %779 {offsets = [0, 1], sizes = [4, 1], strides = [1, 1]} : vector<4x4xf32> to vector<4x1xf32>
    %787 = vector.extract_strided_slice %777 {offsets = [1, 0], sizes = [1, 256], strides = [1, 1]} : vector<4x256xf32> to vector<1x256xf32>
    %788 = vector.broadcast %786 : vector<4x1xf32> to vector<4x256xf32>
    %789 = vector.broadcast %787 : vector<1x256xf32> to vector<4x256xf32>
    %790 = arith.mulf %788, %789 : vector<4x256xf32>
    %791 = arith.addf %785, %790 : vector<4x256xf32>
    %792 = vector.extract_strided_slice %779 {offsets = [0, 2], sizes = [4, 1], strides = [1, 1]} : vector<4x4xf32> to vector<4x1xf32>
    %793 = vector.extract_strided_slice %777 {offsets = [2, 0], sizes = [1, 256], strides = [1, 1]} : vector<4x256xf32> to vector<1x256xf32>
    %794 = vector.broadcast %792 : vector<4x1xf32> to vector<4x256xf32>
    %795 = vector.broadcast %793 : vector<1x256xf32> to vector<4x256xf32>
    %796 = arith.mulf %794, %795 : vector<4x256xf32>
    %797 = arith.addf %791, %796 : vector<4x256xf32>
    %798 = vector.extract_strided_slice %779 {offsets = [0, 3], sizes = [4, 1], strides = [1, 1]} : vector<4x4xf32> to vector<4x1xf32>
    %799 = vector.extract_strided_slice %777 {offsets = [3, 0], sizes = [1, 256], strides = [1, 1]} : vector<4x256xf32> to vector<1x256xf32>
    %800 = vector.broadcast %798 : vector<4x1xf32> to vector<4x256xf32>
    %801 = vector.broadcast %799 : vector<1x256xf32> to vector<4x256xf32>
    %802 = arith.mulf %800, %801 : vector<4x256xf32>
    %803 = arith.addf %797, %802 : vector<4x256xf32>
    %804 = vector.extract_strided_slice %299 {offsets = [0, 34], sizes = [4, 256], strides = [1, 1]} : vector<4x290xf32> to vector<4x256xf32>
    %cst_125 = arith.constant 0.000000e+00 : f32
    %805 = vector.shape_cast %20 : vector<1x256xi1> to vector<1x256xi1>
    %806 = vector.broadcast %805 : vector<1x256xi1> to vector<4x256xi1>
    %807 = vector.broadcast %cst_125 : f32 to vector<4x256xf32>
    %808 = arith.select %806, %804, %807 : vector<4x256xi1>, vector<4x256xf32>
    %c8_126 = arith.constant 8 : index
    %c1_127 = arith.constant 1 : index
    %c0_128 = arith.constant 0 : index
    %c0_129 = arith.constant 0 : index
    %809 = vector.load %arg3[%c8_126, %c1_127, %c0_128, %c0_129] : memref<9x2x4x4xf32, #tpu.memory_space<vmem>>, vector<1x1x4x4xf32>
    %810 = vector.shape_cast %809 : vector<1x1x4x4xf32> to vector<4x4xf32>
    %811 = vector.extract_strided_slice %810 {offsets = [0, 0], sizes = [4, 1], strides = [1, 1]} : vector<4x4xf32> to vector<4x1xf32>
    %812 = vector.extract_strided_slice %808 {offsets = [0, 0], sizes = [1, 256], strides = [1, 1]} : vector<4x256xf32> to vector<1x256xf32>
    %813 = vector.broadcast %811 : vector<4x1xf32> to vector<4x256xf32>
    %814 = vector.broadcast %812 : vector<1x256xf32> to vector<4x256xf32>
    %815 = arith.mulf %813, %814 : vector<4x256xf32>
    %816 = arith.addf %803, %815 : vector<4x256xf32>
    %817 = vector.extract_strided_slice %810 {offsets = [0, 1], sizes = [4, 1], strides = [1, 1]} : vector<4x4xf32> to vector<4x1xf32>
    %818 = vector.extract_strided_slice %808 {offsets = [1, 0], sizes = [1, 256], strides = [1, 1]} : vector<4x256xf32> to vector<1x256xf32>
    %819 = vector.broadcast %817 : vector<4x1xf32> to vector<4x256xf32>
    %820 = vector.broadcast %818 : vector<1x256xf32> to vector<4x256xf32>
    %821 = arith.mulf %819, %820 : vector<4x256xf32>
    %822 = arith.addf %816, %821 : vector<4x256xf32>
    %823 = vector.extract_strided_slice %810 {offsets = [0, 2], sizes = [4, 1], strides = [1, 1]} : vector<4x4xf32> to vector<4x1xf32>
    %824 = vector.extract_strided_slice %808 {offsets = [2, 0], sizes = [1, 256], strides = [1, 1]} : vector<4x256xf32> to vector<1x256xf32>
    %825 = vector.broadcast %823 : vector<4x1xf32> to vector<4x256xf32>
    %826 = vector.broadcast %824 : vector<1x256xf32> to vector<4x256xf32>
    %827 = arith.mulf %825, %826 : vector<4x256xf32>
    %828 = arith.addf %822, %827 : vector<4x256xf32>
    %829 = vector.extract_strided_slice %810 {offsets = [0, 3], sizes = [4, 1], strides = [1, 1]} : vector<4x4xf32> to vector<4x1xf32>
    %830 = vector.extract_strided_slice %808 {offsets = [3, 0], sizes = [1, 256], strides = [1, 1]} : vector<4x256xf32> to vector<1x256xf32>
    %831 = vector.broadcast %829 : vector<4x1xf32> to vector<4x256xf32>
    %832 = vector.broadcast %830 : vector<1x256xf32> to vector<4x256xf32>
    %833 = arith.mulf %831, %832 : vector<4x256xf32>
    %834 = arith.addf %828, %833 : vector<4x256xf32>
    %c1_130 = arith.constant 1 : index
    %c0_131 = arith.constant 0 : index
    %c0_132 = arith.constant 0 : index
    %835 = vector.load %arg6[%c1_130, %c0_131, %c0_132] : memref<4x4x1xf32, #tpu.memory_space<vmem>>, vector<1x4x1xf32>
    %836 = vector.shape_cast %835 : vector<1x4x1xf32> to vector<4x1xf32>
    %837 = vector.broadcast %836 : vector<4x1xf32> to vector<4x256xf32>
    %838 = arith.addf %834, %837 : vector<4x256xf32>
    %cst_133 = arith.constant 0.000000e+00 : f32
    %839 = vector.broadcast %cst_133 : f32 to vector<4x256xf32>
    %840 = arith.maximumf %838, %839 : vector<4x256xf32>
    %841 = tpu.concatenate %21, %840, %21 in 1 : vector<4x17xf32>, vector<4x256xf32>, vector<4x17xf32> -> vector<4x290xf32>
    %cst_134 = arith.constant 0.000000e+00 : f32
    %842 = vector.broadcast %cst_134 : f32 to vector<4x256xf32>
    %843 = vector.extract_strided_slice %24 {offsets = [0, 0], sizes = [4, 256], strides = [1, 1]} : vector<4x290xf32> to vector<4x256xf32>
    %cst_135 = arith.constant 0.000000e+00 : f32
    %844 = vector.shape_cast %18 : vector<1x256xi1> to vector<1x256xi1>
    %845 = vector.broadcast %844 : vector<1x256xi1> to vector<4x256xi1>
    %846 = vector.broadcast %cst_135 : f32 to vector<4x256xf32>
    %847 = arith.select %845, %843, %846 : vector<4x256xi1>, vector<4x256xf32>
    %c0_136 = arith.constant 0 : index
    %c0_137 = arith.constant 0 : index
    %c0_138 = arith.constant 0 : index
    %c0_139 = arith.constant 0 : index
    %848 = vector.load %arg4[%c0_136, %c0_137, %c0_138, %c0_139] : memref<9x3x4x4xf32, #tpu.memory_space<vmem>>, vector<1x1x4x4xf32>
    %849 = vector.shape_cast %848 : vector<1x1x4x4xf32> to vector<4x4xf32>
    %850 = vector.extract_strided_slice %849 {offsets = [0, 0], sizes = [4, 1], strides = [1, 1]} : vector<4x4xf32> to vector<4x1xf32>
    %851 = vector.extract_strided_slice %847 {offsets = [0, 0], sizes = [1, 256], strides = [1, 1]} : vector<4x256xf32> to vector<1x256xf32>
    %852 = vector.broadcast %850 : vector<4x1xf32> to vector<4x256xf32>
    %853 = vector.broadcast %851 : vector<1x256xf32> to vector<4x256xf32>
    %854 = arith.mulf %852, %853 : vector<4x256xf32>
    %855 = arith.addf %842, %854 : vector<4x256xf32>
    %856 = vector.extract_strided_slice %849 {offsets = [0, 1], sizes = [4, 1], strides = [1, 1]} : vector<4x4xf32> to vector<4x1xf32>
    %857 = vector.extract_strided_slice %847 {offsets = [1, 0], sizes = [1, 256], strides = [1, 1]} : vector<4x256xf32> to vector<1x256xf32>
    %858 = vector.broadcast %856 : vector<4x1xf32> to vector<4x256xf32>
    %859 = vector.broadcast %857 : vector<1x256xf32> to vector<4x256xf32>
    %860 = arith.mulf %858, %859 : vector<4x256xf32>
    %861 = arith.addf %855, %860 : vector<4x256xf32>
    %862 = vector.extract_strided_slice %849 {offsets = [0, 2], sizes = [4, 1], strides = [1, 1]} : vector<4x4xf32> to vector<4x1xf32>
    %863 = vector.extract_strided_slice %847 {offsets = [2, 0], sizes = [1, 256], strides = [1, 1]} : vector<4x256xf32> to vector<1x256xf32>
    %864 = vector.broadcast %862 : vector<4x1xf32> to vector<4x256xf32>
    %865 = vector.broadcast %863 : vector<1x256xf32> to vector<4x256xf32>
    %866 = arith.mulf %864, %865 : vector<4x256xf32>
    %867 = arith.addf %861, %866 : vector<4x256xf32>
    %868 = vector.extract_strided_slice %849 {offsets = [0, 3], sizes = [4, 1], strides = [1, 1]} : vector<4x4xf32> to vector<4x1xf32>
    %869 = vector.extract_strided_slice %847 {offsets = [3, 0], sizes = [1, 256], strides = [1, 1]} : vector<4x256xf32> to vector<1x256xf32>
    %870 = vector.broadcast %868 : vector<4x1xf32> to vector<4x256xf32>
    %871 = vector.broadcast %869 : vector<1x256xf32> to vector<4x256xf32>
    %872 = arith.mulf %870, %871 : vector<4x256xf32>
    %873 = arith.addf %867, %872 : vector<4x256xf32>
    %874 = vector.extract_strided_slice %24 {offsets = [0, 1], sizes = [4, 256], strides = [1, 1]} : vector<4x290xf32> to vector<4x256xf32>
    %c1_140 = arith.constant 1 : index
    %c0_141 = arith.constant 0 : index
    %c0_142 = arith.constant 0 : index
    %c0_143 = arith.constant 0 : index
    %875 = vector.load %arg4[%c1_140, %c0_141, %c0_142, %c0_143] : memref<9x3x4x4xf32, #tpu.memory_space<vmem>>, vector<1x1x4x4xf32>
    %876 = vector.shape_cast %875 : vector<1x1x4x4xf32> to vector<4x4xf32>
    %877 = vector.extract_strided_slice %876 {offsets = [0, 0], sizes = [4, 1], strides = [1, 1]} : vector<4x4xf32> to vector<4x1xf32>
    %878 = vector.extract_strided_slice %874 {offsets = [0, 0], sizes = [1, 256], strides = [1, 1]} : vector<4x256xf32> to vector<1x256xf32>
    %879 = vector.broadcast %877 : vector<4x1xf32> to vector<4x256xf32>
    %880 = vector.broadcast %878 : vector<1x256xf32> to vector<4x256xf32>
    %881 = arith.mulf %879, %880 : vector<4x256xf32>
    %882 = arith.addf %873, %881 : vector<4x256xf32>
    %883 = vector.extract_strided_slice %876 {offsets = [0, 1], sizes = [4, 1], strides = [1, 1]} : vector<4x4xf32> to vector<4x1xf32>
    %884 = vector.extract_strided_slice %874 {offsets = [1, 0], sizes = [1, 256], strides = [1, 1]} : vector<4x256xf32> to vector<1x256xf32>
    %885 = vector.broadcast %883 : vector<4x1xf32> to vector<4x256xf32>
    %886 = vector.broadcast %884 : vector<1x256xf32> to vector<4x256xf32>
    %887 = arith.mulf %885, %886 : vector<4x256xf32>
    %888 = arith.addf %882, %887 : vector<4x256xf32>
    %889 = vector.extract_strided_slice %876 {offsets = [0, 2], sizes = [4, 1], strides = [1, 1]} : vector<4x4xf32> to vector<4x1xf32>
    %890 = vector.extract_strided_slice %874 {offsets = [2, 0], sizes = [1, 256], strides = [1, 1]} : vector<4x256xf32> to vector<1x256xf32>
    %891 = vector.broadcast %889 : vector<4x1xf32> to vector<4x256xf32>
    %892 = vector.broadcast %890 : vector<1x256xf32> to vector<4x256xf32>
    %893 = arith.mulf %891, %892 : vector<4x256xf32>
    %894 = arith.addf %888, %893 : vector<4x256xf32>
    %895 = vector.extract_strided_slice %876 {offsets = [0, 3], sizes = [4, 1], strides = [1, 1]} : vector<4x4xf32> to vector<4x1xf32>
    %896 = vector.extract_strided_slice %874 {offsets = [3, 0], sizes = [1, 256], strides = [1, 1]} : vector<4x256xf32> to vector<1x256xf32>
    %897 = vector.broadcast %895 : vector<4x1xf32> to vector<4x256xf32>
    %898 = vector.broadcast %896 : vector<1x256xf32> to vector<4x256xf32>
    %899 = arith.mulf %897, %898 : vector<4x256xf32>
    %900 = arith.addf %894, %899 : vector<4x256xf32>
    %901 = vector.extract_strided_slice %24 {offsets = [0, 2], sizes = [4, 256], strides = [1, 1]} : vector<4x290xf32> to vector<4x256xf32>
    %cst_144 = arith.constant 0.000000e+00 : f32
    %902 = vector.shape_cast %20 : vector<1x256xi1> to vector<1x256xi1>
    %903 = vector.broadcast %902 : vector<1x256xi1> to vector<4x256xi1>
    %904 = vector.broadcast %cst_144 : f32 to vector<4x256xf32>
    %905 = arith.select %903, %901, %904 : vector<4x256xi1>, vector<4x256xf32>
    %c2_145 = arith.constant 2 : index
    %c0_146 = arith.constant 0 : index
    %c0_147 = arith.constant 0 : index
    %c0_148 = arith.constant 0 : index
    %906 = vector.load %arg4[%c2_145, %c0_146, %c0_147, %c0_148] : memref<9x3x4x4xf32, #tpu.memory_space<vmem>>, vector<1x1x4x4xf32>
    %907 = vector.shape_cast %906 : vector<1x1x4x4xf32> to vector<4x4xf32>
    %908 = vector.extract_strided_slice %907 {offsets = [0, 0], sizes = [4, 1], strides = [1, 1]} : vector<4x4xf32> to vector<4x1xf32>
    %909 = vector.extract_strided_slice %905 {offsets = [0, 0], sizes = [1, 256], strides = [1, 1]} : vector<4x256xf32> to vector<1x256xf32>
    %910 = vector.broadcast %908 : vector<4x1xf32> to vector<4x256xf32>
    %911 = vector.broadcast %909 : vector<1x256xf32> to vector<4x256xf32>
    %912 = arith.mulf %910, %911 : vector<4x256xf32>
    %913 = arith.addf %900, %912 : vector<4x256xf32>
    %914 = vector.extract_strided_slice %907 {offsets = [0, 1], sizes = [4, 1], strides = [1, 1]} : vector<4x4xf32> to vector<4x1xf32>
    %915 = vector.extract_strided_slice %905 {offsets = [1, 0], sizes = [1, 256], strides = [1, 1]} : vector<4x256xf32> to vector<1x256xf32>
    %916 = vector.broadcast %914 : vector<4x1xf32> to vector<4x256xf32>
    %917 = vector.broadcast %915 : vector<1x256xf32> to vector<4x256xf32>
    %918 = arith.mulf %916, %917 : vector<4x256xf32>
    %919 = arith.addf %913, %918 : vector<4x256xf32>
    %920 = vector.extract_strided_slice %907 {offsets = [0, 2], sizes = [4, 1], strides = [1, 1]} : vector<4x4xf32> to vector<4x1xf32>
    %921 = vector.extract_strided_slice %905 {offsets = [2, 0], sizes = [1, 256], strides = [1, 1]} : vector<4x256xf32> to vector<1x256xf32>
    %922 = vector.broadcast %920 : vector<4x1xf32> to vector<4x256xf32>
    %923 = vector.broadcast %921 : vector<1x256xf32> to vector<4x256xf32>
    %924 = arith.mulf %922, %923 : vector<4x256xf32>
    %925 = arith.addf %919, %924 : vector<4x256xf32>
    %926 = vector.extract_strided_slice %907 {offsets = [0, 3], sizes = [4, 1], strides = [1, 1]} : vector<4x4xf32> to vector<4x1xf32>
    %927 = vector.extract_strided_slice %905 {offsets = [3, 0], sizes = [1, 256], strides = [1, 1]} : vector<4x256xf32> to vector<1x256xf32>
    %928 = vector.broadcast %926 : vector<4x1xf32> to vector<4x256xf32>
    %929 = vector.broadcast %927 : vector<1x256xf32> to vector<4x256xf32>
    %930 = arith.mulf %928, %929 : vector<4x256xf32>
    %931 = arith.addf %925, %930 : vector<4x256xf32>
    %932 = vector.extract_strided_slice %24 {offsets = [0, 16], sizes = [4, 256], strides = [1, 1]} : vector<4x290xf32> to vector<4x256xf32>
    %cst_149 = arith.constant 0.000000e+00 : f32
    %933 = vector.shape_cast %18 : vector<1x256xi1> to vector<1x256xi1>
    %934 = vector.broadcast %933 : vector<1x256xi1> to vector<4x256xi1>
    %935 = vector.broadcast %cst_149 : f32 to vector<4x256xf32>
    %936 = arith.select %934, %932, %935 : vector<4x256xi1>, vector<4x256xf32>
    %c3_150 = arith.constant 3 : index
    %c0_151 = arith.constant 0 : index
    %c0_152 = arith.constant 0 : index
    %c0_153 = arith.constant 0 : index
    %937 = vector.load %arg4[%c3_150, %c0_151, %c0_152, %c0_153] : memref<9x3x4x4xf32, #tpu.memory_space<vmem>>, vector<1x1x4x4xf32>
    %938 = vector.shape_cast %937 : vector<1x1x4x4xf32> to vector<4x4xf32>
    %939 = vector.extract_strided_slice %938 {offsets = [0, 0], sizes = [4, 1], strides = [1, 1]} : vector<4x4xf32> to vector<4x1xf32>
    %940 = vector.extract_strided_slice %936 {offsets = [0, 0], sizes = [1, 256], strides = [1, 1]} : vector<4x256xf32> to vector<1x256xf32>
    %941 = vector.broadcast %939 : vector<4x1xf32> to vector<4x256xf32>
    %942 = vector.broadcast %940 : vector<1x256xf32> to vector<4x256xf32>
    %943 = arith.mulf %941, %942 : vector<4x256xf32>
    %944 = arith.addf %931, %943 : vector<4x256xf32>
    %945 = vector.extract_strided_slice %938 {offsets = [0, 1], sizes = [4, 1], strides = [1, 1]} : vector<4x4xf32> to vector<4x1xf32>
    %946 = vector.extract_strided_slice %936 {offsets = [1, 0], sizes = [1, 256], strides = [1, 1]} : vector<4x256xf32> to vector<1x256xf32>
    %947 = vector.broadcast %945 : vector<4x1xf32> to vector<4x256xf32>
    %948 = vector.broadcast %946 : vector<1x256xf32> to vector<4x256xf32>
    %949 = arith.mulf %947, %948 : vector<4x256xf32>
    %950 = arith.addf %944, %949 : vector<4x256xf32>
    %951 = vector.extract_strided_slice %938 {offsets = [0, 2], sizes = [4, 1], strides = [1, 1]} : vector<4x4xf32> to vector<4x1xf32>
    %952 = vector.extract_strided_slice %936 {offsets = [2, 0], sizes = [1, 256], strides = [1, 1]} : vector<4x256xf32> to vector<1x256xf32>
    %953 = vector.broadcast %951 : vector<4x1xf32> to vector<4x256xf32>
    %954 = vector.broadcast %952 : vector<1x256xf32> to vector<4x256xf32>
    %955 = arith.mulf %953, %954 : vector<4x256xf32>
    %956 = arith.addf %950, %955 : vector<4x256xf32>
    %957 = vector.extract_strided_slice %938 {offsets = [0, 3], sizes = [4, 1], strides = [1, 1]} : vector<4x4xf32> to vector<4x1xf32>
    %958 = vector.extract_strided_slice %936 {offsets = [3, 0], sizes = [1, 256], strides = [1, 1]} : vector<4x256xf32> to vector<1x256xf32>
    %959 = vector.broadcast %957 : vector<4x1xf32> to vector<4x256xf32>
    %960 = vector.broadcast %958 : vector<1x256xf32> to vector<4x256xf32>
    %961 = arith.mulf %959, %960 : vector<4x256xf32>
    %962 = arith.addf %956, %961 : vector<4x256xf32>
    %963 = vector.extract_strided_slice %24 {offsets = [0, 17], sizes = [4, 256], strides = [1, 1]} : vector<4x290xf32> to vector<4x256xf32>
    %c4_154 = arith.constant 4 : index
    %c0_155 = arith.constant 0 : index
    %c0_156 = arith.constant 0 : index
    %c0_157 = arith.constant 0 : index
    %964 = vector.load %arg4[%c4_154, %c0_155, %c0_156, %c0_157] : memref<9x3x4x4xf32, #tpu.memory_space<vmem>>, vector<1x1x4x4xf32>
    %965 = vector.shape_cast %964 : vector<1x1x4x4xf32> to vector<4x4xf32>
    %966 = vector.extract_strided_slice %965 {offsets = [0, 0], sizes = [4, 1], strides = [1, 1]} : vector<4x4xf32> to vector<4x1xf32>
    %967 = vector.extract_strided_slice %963 {offsets = [0, 0], sizes = [1, 256], strides = [1, 1]} : vector<4x256xf32> to vector<1x256xf32>
    %968 = vector.broadcast %966 : vector<4x1xf32> to vector<4x256xf32>
    %969 = vector.broadcast %967 : vector<1x256xf32> to vector<4x256xf32>
    %970 = arith.mulf %968, %969 : vector<4x256xf32>
    %971 = arith.addf %962, %970 : vector<4x256xf32>
    %972 = vector.extract_strided_slice %965 {offsets = [0, 1], sizes = [4, 1], strides = [1, 1]} : vector<4x4xf32> to vector<4x1xf32>
    %973 = vector.extract_strided_slice %963 {offsets = [1, 0], sizes = [1, 256], strides = [1, 1]} : vector<4x256xf32> to vector<1x256xf32>
    %974 = vector.broadcast %972 : vector<4x1xf32> to vector<4x256xf32>
    %975 = vector.broadcast %973 : vector<1x256xf32> to vector<4x256xf32>
    %976 = arith.mulf %974, %975 : vector<4x256xf32>
    %977 = arith.addf %971, %976 : vector<4x256xf32>
    %978 = vector.extract_strided_slice %965 {offsets = [0, 2], sizes = [4, 1], strides = [1, 1]} : vector<4x4xf32> to vector<4x1xf32>
    %979 = vector.extract_strided_slice %963 {offsets = [2, 0], sizes = [1, 256], strides = [1, 1]} : vector<4x256xf32> to vector<1x256xf32>
    %980 = vector.broadcast %978 : vector<4x1xf32> to vector<4x256xf32>
    %981 = vector.broadcast %979 : vector<1x256xf32> to vector<4x256xf32>
    %982 = arith.mulf %980, %981 : vector<4x256xf32>
    %983 = arith.addf %977, %982 : vector<4x256xf32>
    %984 = vector.extract_strided_slice %965 {offsets = [0, 3], sizes = [4, 1], strides = [1, 1]} : vector<4x4xf32> to vector<4x1xf32>
    %985 = vector.extract_strided_slice %963 {offsets = [3, 0], sizes = [1, 256], strides = [1, 1]} : vector<4x256xf32> to vector<1x256xf32>
    %986 = vector.broadcast %984 : vector<4x1xf32> to vector<4x256xf32>
    %987 = vector.broadcast %985 : vector<1x256xf32> to vector<4x256xf32>
    %988 = arith.mulf %986, %987 : vector<4x256xf32>
    %989 = arith.addf %983, %988 : vector<4x256xf32>
    %990 = vector.extract_strided_slice %24 {offsets = [0, 18], sizes = [4, 256], strides = [1, 1]} : vector<4x290xf32> to vector<4x256xf32>
    %cst_158 = arith.constant 0.000000e+00 : f32
    %991 = vector.shape_cast %20 : vector<1x256xi1> to vector<1x256xi1>
    %992 = vector.broadcast %991 : vector<1x256xi1> to vector<4x256xi1>
    %993 = vector.broadcast %cst_158 : f32 to vector<4x256xf32>
    %994 = arith.select %992, %990, %993 : vector<4x256xi1>, vector<4x256xf32>
    %c5_159 = arith.constant 5 : index
    %c0_160 = arith.constant 0 : index
    %c0_161 = arith.constant 0 : index
    %c0_162 = arith.constant 0 : index
    %995 = vector.load %arg4[%c5_159, %c0_160, %c0_161, %c0_162] : memref<9x3x4x4xf32, #tpu.memory_space<vmem>>, vector<1x1x4x4xf32>
    %996 = vector.shape_cast %995 : vector<1x1x4x4xf32> to vector<4x4xf32>
    %997 = vector.extract_strided_slice %996 {offsets = [0, 0], sizes = [4, 1], strides = [1, 1]} : vector<4x4xf32> to vector<4x1xf32>
    %998 = vector.extract_strided_slice %994 {offsets = [0, 0], sizes = [1, 256], strides = [1, 1]} : vector<4x256xf32> to vector<1x256xf32>
    %999 = vector.broadcast %997 : vector<4x1xf32> to vector<4x256xf32>
    %1000 = vector.broadcast %998 : vector<1x256xf32> to vector<4x256xf32>
    %1001 = arith.mulf %999, %1000 : vector<4x256xf32>
    %1002 = arith.addf %989, %1001 : vector<4x256xf32>
    %1003 = vector.extract_strided_slice %996 {offsets = [0, 1], sizes = [4, 1], strides = [1, 1]} : vector<4x4xf32> to vector<4x1xf32>
    %1004 = vector.extract_strided_slice %994 {offsets = [1, 0], sizes = [1, 256], strides = [1, 1]} : vector<4x256xf32> to vector<1x256xf32>
    %1005 = vector.broadcast %1003 : vector<4x1xf32> to vector<4x256xf32>
    %1006 = vector.broadcast %1004 : vector<1x256xf32> to vector<4x256xf32>
    %1007 = arith.mulf %1005, %1006 : vector<4x256xf32>
    %1008 = arith.addf %1002, %1007 : vector<4x256xf32>
    %1009 = vector.extract_strided_slice %996 {offsets = [0, 2], sizes = [4, 1], strides = [1, 1]} : vector<4x4xf32> to vector<4x1xf32>
    %1010 = vector.extract_strided_slice %994 {offsets = [2, 0], sizes = [1, 256], strides = [1, 1]} : vector<4x256xf32> to vector<1x256xf32>
    %1011 = vector.broadcast %1009 : vector<4x1xf32> to vector<4x256xf32>
    %1012 = vector.broadcast %1010 : vector<1x256xf32> to vector<4x256xf32>
    %1013 = arith.mulf %1011, %1012 : vector<4x256xf32>
    %1014 = arith.addf %1008, %1013 : vector<4x256xf32>
    %1015 = vector.extract_strided_slice %996 {offsets = [0, 3], sizes = [4, 1], strides = [1, 1]} : vector<4x4xf32> to vector<4x1xf32>
    %1016 = vector.extract_strided_slice %994 {offsets = [3, 0], sizes = [1, 256], strides = [1, 1]} : vector<4x256xf32> to vector<1x256xf32>
    %1017 = vector.broadcast %1015 : vector<4x1xf32> to vector<4x256xf32>
    %1018 = vector.broadcast %1016 : vector<1x256xf32> to vector<4x256xf32>
    %1019 = arith.mulf %1017, %1018 : vector<4x256xf32>
    %1020 = arith.addf %1014, %1019 : vector<4x256xf32>
    %1021 = vector.extract_strided_slice %24 {offsets = [0, 32], sizes = [4, 256], strides = [1, 1]} : vector<4x290xf32> to vector<4x256xf32>
    %cst_163 = arith.constant 0.000000e+00 : f32
    %1022 = vector.shape_cast %18 : vector<1x256xi1> to vector<1x256xi1>
    %1023 = vector.broadcast %1022 : vector<1x256xi1> to vector<4x256xi1>
    %1024 = vector.broadcast %cst_163 : f32 to vector<4x256xf32>
    %1025 = arith.select %1023, %1021, %1024 : vector<4x256xi1>, vector<4x256xf32>
    %c6_164 = arith.constant 6 : index
    %c0_165 = arith.constant 0 : index
    %c0_166 = arith.constant 0 : index
    %c0_167 = arith.constant 0 : index
    %1026 = vector.load %arg4[%c6_164, %c0_165, %c0_166, %c0_167] : memref<9x3x4x4xf32, #tpu.memory_space<vmem>>, vector<1x1x4x4xf32>
    %1027 = vector.shape_cast %1026 : vector<1x1x4x4xf32> to vector<4x4xf32>
    %1028 = vector.extract_strided_slice %1027 {offsets = [0, 0], sizes = [4, 1], strides = [1, 1]} : vector<4x4xf32> to vector<4x1xf32>
    %1029 = vector.extract_strided_slice %1025 {offsets = [0, 0], sizes = [1, 256], strides = [1, 1]} : vector<4x256xf32> to vector<1x256xf32>
    %1030 = vector.broadcast %1028 : vector<4x1xf32> to vector<4x256xf32>
    %1031 = vector.broadcast %1029 : vector<1x256xf32> to vector<4x256xf32>
    %1032 = arith.mulf %1030, %1031 : vector<4x256xf32>
    %1033 = arith.addf %1020, %1032 : vector<4x256xf32>
    %1034 = vector.extract_strided_slice %1027 {offsets = [0, 1], sizes = [4, 1], strides = [1, 1]} : vector<4x4xf32> to vector<4x1xf32>
    %1035 = vector.extract_strided_slice %1025 {offsets = [1, 0], sizes = [1, 256], strides = [1, 1]} : vector<4x256xf32> to vector<1x256xf32>
    %1036 = vector.broadcast %1034 : vector<4x1xf32> to vector<4x256xf32>
    %1037 = vector.broadcast %1035 : vector<1x256xf32> to vector<4x256xf32>
    %1038 = arith.mulf %1036, %1037 : vector<4x256xf32>
    %1039 = arith.addf %1033, %1038 : vector<4x256xf32>
    %1040 = vector.extract_strided_slice %1027 {offsets = [0, 2], sizes = [4, 1], strides = [1, 1]} : vector<4x4xf32> to vector<4x1xf32>
    %1041 = vector.extract_strided_slice %1025 {offsets = [2, 0], sizes = [1, 256], strides = [1, 1]} : vector<4x256xf32> to vector<1x256xf32>
    %1042 = vector.broadcast %1040 : vector<4x1xf32> to vector<4x256xf32>
    %1043 = vector.broadcast %1041 : vector<1x256xf32> to vector<4x256xf32>
    %1044 = arith.mulf %1042, %1043 : vector<4x256xf32>
    %1045 = arith.addf %1039, %1044 : vector<4x256xf32>
    %1046 = vector.extract_strided_slice %1027 {offsets = [0, 3], sizes = [4, 1], strides = [1, 1]} : vector<4x4xf32> to vector<4x1xf32>
    %1047 = vector.extract_strided_slice %1025 {offsets = [3, 0], sizes = [1, 256], strides = [1, 1]} : vector<4x256xf32> to vector<1x256xf32>
    %1048 = vector.broadcast %1046 : vector<4x1xf32> to vector<4x256xf32>
    %1049 = vector.broadcast %1047 : vector<1x256xf32> to vector<4x256xf32>
    %1050 = arith.mulf %1048, %1049 : vector<4x256xf32>
    %1051 = arith.addf %1045, %1050 : vector<4x256xf32>
    %1052 = vector.extract_strided_slice %24 {offsets = [0, 33], sizes = [4, 256], strides = [1, 1]} : vector<4x290xf32> to vector<4x256xf32>
    %c7_168 = arith.constant 7 : index
    %c0_169 = arith.constant 0 : index
    %c0_170 = arith.constant 0 : index
    %c0_171 = arith.constant 0 : index
    %1053 = vector.load %arg4[%c7_168, %c0_169, %c0_170, %c0_171] : memref<9x3x4x4xf32, #tpu.memory_space<vmem>>, vector<1x1x4x4xf32>
    %1054 = vector.shape_cast %1053 : vector<1x1x4x4xf32> to vector<4x4xf32>
    %1055 = vector.extract_strided_slice %1054 {offsets = [0, 0], sizes = [4, 1], strides = [1, 1]} : vector<4x4xf32> to vector<4x1xf32>
    %1056 = vector.extract_strided_slice %1052 {offsets = [0, 0], sizes = [1, 256], strides = [1, 1]} : vector<4x256xf32> to vector<1x256xf32>
    %1057 = vector.broadcast %1055 : vector<4x1xf32> to vector<4x256xf32>
    %1058 = vector.broadcast %1056 : vector<1x256xf32> to vector<4x256xf32>
    %1059 = arith.mulf %1057, %1058 : vector<4x256xf32>
    %1060 = arith.addf %1051, %1059 : vector<4x256xf32>
    %1061 = vector.extract_strided_slice %1054 {offsets = [0, 1], sizes = [4, 1], strides = [1, 1]} : vector<4x4xf32> to vector<4x1xf32>
    %1062 = vector.extract_strided_slice %1052 {offsets = [1, 0], sizes = [1, 256], strides = [1, 1]} : vector<4x256xf32> to vector<1x256xf32>
    %1063 = vector.broadcast %1061 : vector<4x1xf32> to vector<4x256xf32>
    %1064 = vector.broadcast %1062 : vector<1x256xf32> to vector<4x256xf32>
    %1065 = arith.mulf %1063, %1064 : vector<4x256xf32>
    %1066 = arith.addf %1060, %1065 : vector<4x256xf32>
    %1067 = vector.extract_strided_slice %1054 {offsets = [0, 2], sizes = [4, 1], strides = [1, 1]} : vector<4x4xf32> to vector<4x1xf32>
    %1068 = vector.extract_strided_slice %1052 {offsets = [2, 0], sizes = [1, 256], strides = [1, 1]} : vector<4x256xf32> to vector<1x256xf32>
    %1069 = vector.broadcast %1067 : vector<4x1xf32> to vector<4x256xf32>
    %1070 = vector.broadcast %1068 : vector<1x256xf32> to vector<4x256xf32>
    %1071 = arith.mulf %1069, %1070 : vector<4x256xf32>
    %1072 = arith.addf %1066, %1071 : vector<4x256xf32>
    %1073 = vector.extract_strided_slice %1054 {offsets = [0, 3], sizes = [4, 1], strides = [1, 1]} : vector<4x4xf32> to vector<4x1xf32>
    %1074 = vector.extract_strided_slice %1052 {offsets = [3, 0], sizes = [1, 256], strides = [1, 1]} : vector<4x256xf32> to vector<1x256xf32>
    %1075 = vector.broadcast %1073 : vector<4x1xf32> to vector<4x256xf32>
    %1076 = vector.broadcast %1074 : vector<1x256xf32> to vector<4x256xf32>
    %1077 = arith.mulf %1075, %1076 : vector<4x256xf32>
    %1078 = arith.addf %1072, %1077 : vector<4x256xf32>
    %1079 = vector.extract_strided_slice %24 {offsets = [0, 34], sizes = [4, 256], strides = [1, 1]} : vector<4x290xf32> to vector<4x256xf32>
    %cst_172 = arith.constant 0.000000e+00 : f32
    %1080 = vector.shape_cast %20 : vector<1x256xi1> to vector<1x256xi1>
    %1081 = vector.broadcast %1080 : vector<1x256xi1> to vector<4x256xi1>
    %1082 = vector.broadcast %cst_172 : f32 to vector<4x256xf32>
    %1083 = arith.select %1081, %1079, %1082 : vector<4x256xi1>, vector<4x256xf32>
    %c8_173 = arith.constant 8 : index
    %c0_174 = arith.constant 0 : index
    %c0_175 = arith.constant 0 : index
    %c0_176 = arith.constant 0 : index
    %1084 = vector.load %arg4[%c8_173, %c0_174, %c0_175, %c0_176] : memref<9x3x4x4xf32, #tpu.memory_space<vmem>>, vector<1x1x4x4xf32>
    %1085 = vector.shape_cast %1084 : vector<1x1x4x4xf32> to vector<4x4xf32>
    %1086 = vector.extract_strided_slice %1085 {offsets = [0, 0], sizes = [4, 1], strides = [1, 1]} : vector<4x4xf32> to vector<4x1xf32>
    %1087 = vector.extract_strided_slice %1083 {offsets = [0, 0], sizes = [1, 256], strides = [1, 1]} : vector<4x256xf32> to vector<1x256xf32>
    %1088 = vector.broadcast %1086 : vector<4x1xf32> to vector<4x256xf32>
    %1089 = vector.broadcast %1087 : vector<1x256xf32> to vector<4x256xf32>
    %1090 = arith.mulf %1088, %1089 : vector<4x256xf32>
    %1091 = arith.addf %1078, %1090 : vector<4x256xf32>
    %1092 = vector.extract_strided_slice %1085 {offsets = [0, 1], sizes = [4, 1], strides = [1, 1]} : vector<4x4xf32> to vector<4x1xf32>
    %1093 = vector.extract_strided_slice %1083 {offsets = [1, 0], sizes = [1, 256], strides = [1, 1]} : vector<4x256xf32> to vector<1x256xf32>
    %1094 = vector.broadcast %1092 : vector<4x1xf32> to vector<4x256xf32>
    %1095 = vector.broadcast %1093 : vector<1x256xf32> to vector<4x256xf32>
    %1096 = arith.mulf %1094, %1095 : vector<4x256xf32>
    %1097 = arith.addf %1091, %1096 : vector<4x256xf32>
    %1098 = vector.extract_strided_slice %1085 {offsets = [0, 2], sizes = [4, 1], strides = [1, 1]} : vector<4x4xf32> to vector<4x1xf32>
    %1099 = vector.extract_strided_slice %1083 {offsets = [2, 0], sizes = [1, 256], strides = [1, 1]} : vector<4x256xf32> to vector<1x256xf32>
    %1100 = vector.broadcast %1098 : vector<4x1xf32> to vector<4x256xf32>
    %1101 = vector.broadcast %1099 : vector<1x256xf32> to vector<4x256xf32>
    %1102 = arith.mulf %1100, %1101 : vector<4x256xf32>
    %1103 = arith.addf %1097, %1102 : vector<4x256xf32>
    %1104 = vector.extract_strided_slice %1085 {offsets = [0, 3], sizes = [4, 1], strides = [1, 1]} : vector<4x4xf32> to vector<4x1xf32>
    %1105 = vector.extract_strided_slice %1083 {offsets = [3, 0], sizes = [1, 256], strides = [1, 1]} : vector<4x256xf32> to vector<1x256xf32>
    %1106 = vector.broadcast %1104 : vector<4x1xf32> to vector<4x256xf32>
    %1107 = vector.broadcast %1105 : vector<1x256xf32> to vector<4x256xf32>
    %1108 = arith.mulf %1106, %1107 : vector<4x256xf32>
    %1109 = arith.addf %1103, %1108 : vector<4x256xf32>
    %1110 = vector.extract_strided_slice %299 {offsets = [0, 0], sizes = [4, 256], strides = [1, 1]} : vector<4x290xf32> to vector<4x256xf32>
    %cst_177 = arith.constant 0.000000e+00 : f32
    %1111 = vector.shape_cast %18 : vector<1x256xi1> to vector<1x256xi1>
    %1112 = vector.broadcast %1111 : vector<1x256xi1> to vector<4x256xi1>
    %1113 = vector.broadcast %cst_177 : f32 to vector<4x256xf32>
    %1114 = arith.select %1112, %1110, %1113 : vector<4x256xi1>, vector<4x256xf32>
    %c0_178 = arith.constant 0 : index
    %c1_179 = arith.constant 1 : index
    %c0_180 = arith.constant 0 : index
    %c0_181 = arith.constant 0 : index
    %1115 = vector.load %arg4[%c0_178, %c1_179, %c0_180, %c0_181] : memref<9x3x4x4xf32, #tpu.memory_space<vmem>>, vector<1x1x4x4xf32>
    %1116 = vector.shape_cast %1115 : vector<1x1x4x4xf32> to vector<4x4xf32>
    %1117 = vector.extract_strided_slice %1116 {offsets = [0, 0], sizes = [4, 1], strides = [1, 1]} : vector<4x4xf32> to vector<4x1xf32>
    %1118 = vector.extract_strided_slice %1114 {offsets = [0, 0], sizes = [1, 256], strides = [1, 1]} : vector<4x256xf32> to vector<1x256xf32>
    %1119 = vector.broadcast %1117 : vector<4x1xf32> to vector<4x256xf32>
    %1120 = vector.broadcast %1118 : vector<1x256xf32> to vector<4x256xf32>
    %1121 = arith.mulf %1119, %1120 : vector<4x256xf32>
    %1122 = arith.addf %1109, %1121 : vector<4x256xf32>
    %1123 = vector.extract_strided_slice %1116 {offsets = [0, 1], sizes = [4, 1], strides = [1, 1]} : vector<4x4xf32> to vector<4x1xf32>
    %1124 = vector.extract_strided_slice %1114 {offsets = [1, 0], sizes = [1, 256], strides = [1, 1]} : vector<4x256xf32> to vector<1x256xf32>
    %1125 = vector.broadcast %1123 : vector<4x1xf32> to vector<4x256xf32>
    %1126 = vector.broadcast %1124 : vector<1x256xf32> to vector<4x256xf32>
    %1127 = arith.mulf %1125, %1126 : vector<4x256xf32>
    %1128 = arith.addf %1122, %1127 : vector<4x256xf32>
    %1129 = vector.extract_strided_slice %1116 {offsets = [0, 2], sizes = [4, 1], strides = [1, 1]} : vector<4x4xf32> to vector<4x1xf32>
    %1130 = vector.extract_strided_slice %1114 {offsets = [2, 0], sizes = [1, 256], strides = [1, 1]} : vector<4x256xf32> to vector<1x256xf32>
    %1131 = vector.broadcast %1129 : vector<4x1xf32> to vector<4x256xf32>
    %1132 = vector.broadcast %1130 : vector<1x256xf32> to vector<4x256xf32>
    %1133 = arith.mulf %1131, %1132 : vector<4x256xf32>
    %1134 = arith.addf %1128, %1133 : vector<4x256xf32>
    %1135 = vector.extract_strided_slice %1116 {offsets = [0, 3], sizes = [4, 1], strides = [1, 1]} : vector<4x4xf32> to vector<4x1xf32>
    %1136 = vector.extract_strided_slice %1114 {offsets = [3, 0], sizes = [1, 256], strides = [1, 1]} : vector<4x256xf32> to vector<1x256xf32>
    %1137 = vector.broadcast %1135 : vector<4x1xf32> to vector<4x256xf32>
    %1138 = vector.broadcast %1136 : vector<1x256xf32> to vector<4x256xf32>
    %1139 = arith.mulf %1137, %1138 : vector<4x256xf32>
    %1140 = arith.addf %1134, %1139 : vector<4x256xf32>
    %1141 = vector.extract_strided_slice %299 {offsets = [0, 1], sizes = [4, 256], strides = [1, 1]} : vector<4x290xf32> to vector<4x256xf32>
    %c1_182 = arith.constant 1 : index
    %c1_183 = arith.constant 1 : index
    %c0_184 = arith.constant 0 : index
    %c0_185 = arith.constant 0 : index
    %1142 = vector.load %arg4[%c1_182, %c1_183, %c0_184, %c0_185] : memref<9x3x4x4xf32, #tpu.memory_space<vmem>>, vector<1x1x4x4xf32>
    %1143 = vector.shape_cast %1142 : vector<1x1x4x4xf32> to vector<4x4xf32>
    %1144 = vector.extract_strided_slice %1143 {offsets = [0, 0], sizes = [4, 1], strides = [1, 1]} : vector<4x4xf32> to vector<4x1xf32>
    %1145 = vector.extract_strided_slice %1141 {offsets = [0, 0], sizes = [1, 256], strides = [1, 1]} : vector<4x256xf32> to vector<1x256xf32>
    %1146 = vector.broadcast %1144 : vector<4x1xf32> to vector<4x256xf32>
    %1147 = vector.broadcast %1145 : vector<1x256xf32> to vector<4x256xf32>
    %1148 = arith.mulf %1146, %1147 : vector<4x256xf32>
    %1149 = arith.addf %1140, %1148 : vector<4x256xf32>
    %1150 = vector.extract_strided_slice %1143 {offsets = [0, 1], sizes = [4, 1], strides = [1, 1]} : vector<4x4xf32> to vector<4x1xf32>
    %1151 = vector.extract_strided_slice %1141 {offsets = [1, 0], sizes = [1, 256], strides = [1, 1]} : vector<4x256xf32> to vector<1x256xf32>
    %1152 = vector.broadcast %1150 : vector<4x1xf32> to vector<4x256xf32>
    %1153 = vector.broadcast %1151 : vector<1x256xf32> to vector<4x256xf32>
    %1154 = arith.mulf %1152, %1153 : vector<4x256xf32>
    %1155 = arith.addf %1149, %1154 : vector<4x256xf32>
    %1156 = vector.extract_strided_slice %1143 {offsets = [0, 2], sizes = [4, 1], strides = [1, 1]} : vector<4x4xf32> to vector<4x1xf32>
    %1157 = vector.extract_strided_slice %1141 {offsets = [2, 0], sizes = [1, 256], strides = [1, 1]} : vector<4x256xf32> to vector<1x256xf32>
    %1158 = vector.broadcast %1156 : vector<4x1xf32> to vector<4x256xf32>
    %1159 = vector.broadcast %1157 : vector<1x256xf32> to vector<4x256xf32>
    %1160 = arith.mulf %1158, %1159 : vector<4x256xf32>
    %1161 = arith.addf %1155, %1160 : vector<4x256xf32>
    %1162 = vector.extract_strided_slice %1143 {offsets = [0, 3], sizes = [4, 1], strides = [1, 1]} : vector<4x4xf32> to vector<4x1xf32>
    %1163 = vector.extract_strided_slice %1141 {offsets = [3, 0], sizes = [1, 256], strides = [1, 1]} : vector<4x256xf32> to vector<1x256xf32>
    %1164 = vector.broadcast %1162 : vector<4x1xf32> to vector<4x256xf32>
    %1165 = vector.broadcast %1163 : vector<1x256xf32> to vector<4x256xf32>
    %1166 = arith.mulf %1164, %1165 : vector<4x256xf32>
    %1167 = arith.addf %1161, %1166 : vector<4x256xf32>
    %1168 = vector.extract_strided_slice %299 {offsets = [0, 2], sizes = [4, 256], strides = [1, 1]} : vector<4x290xf32> to vector<4x256xf32>
    %cst_186 = arith.constant 0.000000e+00 : f32
    %1169 = vector.shape_cast %20 : vector<1x256xi1> to vector<1x256xi1>
    %1170 = vector.broadcast %1169 : vector<1x256xi1> to vector<4x256xi1>
    %1171 = vector.broadcast %cst_186 : f32 to vector<4x256xf32>
    %1172 = arith.select %1170, %1168, %1171 : vector<4x256xi1>, vector<4x256xf32>
    %c2_187 = arith.constant 2 : index
    %c1_188 = arith.constant 1 : index
    %c0_189 = arith.constant 0 : index
    %c0_190 = arith.constant 0 : index
    %1173 = vector.load %arg4[%c2_187, %c1_188, %c0_189, %c0_190] : memref<9x3x4x4xf32, #tpu.memory_space<vmem>>, vector<1x1x4x4xf32>
    %1174 = vector.shape_cast %1173 : vector<1x1x4x4xf32> to vector<4x4xf32>
    %1175 = vector.extract_strided_slice %1174 {offsets = [0, 0], sizes = [4, 1], strides = [1, 1]} : vector<4x4xf32> to vector<4x1xf32>
    %1176 = vector.extract_strided_slice %1172 {offsets = [0, 0], sizes = [1, 256], strides = [1, 1]} : vector<4x256xf32> to vector<1x256xf32>
    %1177 = vector.broadcast %1175 : vector<4x1xf32> to vector<4x256xf32>
    %1178 = vector.broadcast %1176 : vector<1x256xf32> to vector<4x256xf32>
    %1179 = arith.mulf %1177, %1178 : vector<4x256xf32>
    %1180 = arith.addf %1167, %1179 : vector<4x256xf32>
    %1181 = vector.extract_strided_slice %1174 {offsets = [0, 1], sizes = [4, 1], strides = [1, 1]} : vector<4x4xf32> to vector<4x1xf32>
    %1182 = vector.extract_strided_slice %1172 {offsets = [1, 0], sizes = [1, 256], strides = [1, 1]} : vector<4x256xf32> to vector<1x256xf32>
    %1183 = vector.broadcast %1181 : vector<4x1xf32> to vector<4x256xf32>
    %1184 = vector.broadcast %1182 : vector<1x256xf32> to vector<4x256xf32>
    %1185 = arith.mulf %1183, %1184 : vector<4x256xf32>
    %1186 = arith.addf %1180, %1185 : vector<4x256xf32>
    %1187 = vector.extract_strided_slice %1174 {offsets = [0, 2], sizes = [4, 1], strides = [1, 1]} : vector<4x4xf32> to vector<4x1xf32>
    %1188 = vector.extract_strided_slice %1172 {offsets = [2, 0], sizes = [1, 256], strides = [1, 1]} : vector<4x256xf32> to vector<1x256xf32>
    %1189 = vector.broadcast %1187 : vector<4x1xf32> to vector<4x256xf32>
    %1190 = vector.broadcast %1188 : vector<1x256xf32> to vector<4x256xf32>
    %1191 = arith.mulf %1189, %1190 : vector<4x256xf32>
    %1192 = arith.addf %1186, %1191 : vector<4x256xf32>
    %1193 = vector.extract_strided_slice %1174 {offsets = [0, 3], sizes = [4, 1], strides = [1, 1]} : vector<4x4xf32> to vector<4x1xf32>
    %1194 = vector.extract_strided_slice %1172 {offsets = [3, 0], sizes = [1, 256], strides = [1, 1]} : vector<4x256xf32> to vector<1x256xf32>
    %1195 = vector.broadcast %1193 : vector<4x1xf32> to vector<4x256xf32>
    %1196 = vector.broadcast %1194 : vector<1x256xf32> to vector<4x256xf32>
    %1197 = arith.mulf %1195, %1196 : vector<4x256xf32>
    %1198 = arith.addf %1192, %1197 : vector<4x256xf32>
    %1199 = vector.extract_strided_slice %299 {offsets = [0, 16], sizes = [4, 256], strides = [1, 1]} : vector<4x290xf32> to vector<4x256xf32>
    %cst_191 = arith.constant 0.000000e+00 : f32
    %1200 = vector.shape_cast %18 : vector<1x256xi1> to vector<1x256xi1>
    %1201 = vector.broadcast %1200 : vector<1x256xi1> to vector<4x256xi1>
    %1202 = vector.broadcast %cst_191 : f32 to vector<4x256xf32>
    %1203 = arith.select %1201, %1199, %1202 : vector<4x256xi1>, vector<4x256xf32>
    %c3_192 = arith.constant 3 : index
    %c1_193 = arith.constant 1 : index
    %c0_194 = arith.constant 0 : index
    %c0_195 = arith.constant 0 : index
    %1204 = vector.load %arg4[%c3_192, %c1_193, %c0_194, %c0_195] : memref<9x3x4x4xf32, #tpu.memory_space<vmem>>, vector<1x1x4x4xf32>
    %1205 = vector.shape_cast %1204 : vector<1x1x4x4xf32> to vector<4x4xf32>
    %1206 = vector.extract_strided_slice %1205 {offsets = [0, 0], sizes = [4, 1], strides = [1, 1]} : vector<4x4xf32> to vector<4x1xf32>
    %1207 = vector.extract_strided_slice %1203 {offsets = [0, 0], sizes = [1, 256], strides = [1, 1]} : vector<4x256xf32> to vector<1x256xf32>
    %1208 = vector.broadcast %1206 : vector<4x1xf32> to vector<4x256xf32>
    %1209 = vector.broadcast %1207 : vector<1x256xf32> to vector<4x256xf32>
    %1210 = arith.mulf %1208, %1209 : vector<4x256xf32>
    %1211 = arith.addf %1198, %1210 : vector<4x256xf32>
    %1212 = vector.extract_strided_slice %1205 {offsets = [0, 1], sizes = [4, 1], strides = [1, 1]} : vector<4x4xf32> to vector<4x1xf32>
    %1213 = vector.extract_strided_slice %1203 {offsets = [1, 0], sizes = [1, 256], strides = [1, 1]} : vector<4x256xf32> to vector<1x256xf32>
    %1214 = vector.broadcast %1212 : vector<4x1xf32> to vector<4x256xf32>
    %1215 = vector.broadcast %1213 : vector<1x256xf32> to vector<4x256xf32>
    %1216 = arith.mulf %1214, %1215 : vector<4x256xf32>
    %1217 = arith.addf %1211, %1216 : vector<4x256xf32>
    %1218 = vector.extract_strided_slice %1205 {offsets = [0, 2], sizes = [4, 1], strides = [1, 1]} : vector<4x4xf32> to vector<4x1xf32>
    %1219 = vector.extract_strided_slice %1203 {offsets = [2, 0], sizes = [1, 256], strides = [1, 1]} : vector<4x256xf32> to vector<1x256xf32>
    %1220 = vector.broadcast %1218 : vector<4x1xf32> to vector<4x256xf32>
    %1221 = vector.broadcast %1219 : vector<1x256xf32> to vector<4x256xf32>
    %1222 = arith.mulf %1220, %1221 : vector<4x256xf32>
    %1223 = arith.addf %1217, %1222 : vector<4x256xf32>
    %1224 = vector.extract_strided_slice %1205 {offsets = [0, 3], sizes = [4, 1], strides = [1, 1]} : vector<4x4xf32> to vector<4x1xf32>
    %1225 = vector.extract_strided_slice %1203 {offsets = [3, 0], sizes = [1, 256], strides = [1, 1]} : vector<4x256xf32> to vector<1x256xf32>
    %1226 = vector.broadcast %1224 : vector<4x1xf32> to vector<4x256xf32>
    %1227 = vector.broadcast %1225 : vector<1x256xf32> to vector<4x256xf32>
    %1228 = arith.mulf %1226, %1227 : vector<4x256xf32>
    %1229 = arith.addf %1223, %1228 : vector<4x256xf32>
    %1230 = vector.extract_strided_slice %299 {offsets = [0, 17], sizes = [4, 256], strides = [1, 1]} : vector<4x290xf32> to vector<4x256xf32>
    %c4_196 = arith.constant 4 : index
    %c1_197 = arith.constant 1 : index
    %c0_198 = arith.constant 0 : index
    %c0_199 = arith.constant 0 : index
    %1231 = vector.load %arg4[%c4_196, %c1_197, %c0_198, %c0_199] : memref<9x3x4x4xf32, #tpu.memory_space<vmem>>, vector<1x1x4x4xf32>
    %1232 = vector.shape_cast %1231 : vector<1x1x4x4xf32> to vector<4x4xf32>
    %1233 = vector.extract_strided_slice %1232 {offsets = [0, 0], sizes = [4, 1], strides = [1, 1]} : vector<4x4xf32> to vector<4x1xf32>
    %1234 = vector.extract_strided_slice %1230 {offsets = [0, 0], sizes = [1, 256], strides = [1, 1]} : vector<4x256xf32> to vector<1x256xf32>
    %1235 = vector.broadcast %1233 : vector<4x1xf32> to vector<4x256xf32>
    %1236 = vector.broadcast %1234 : vector<1x256xf32> to vector<4x256xf32>
    %1237 = arith.mulf %1235, %1236 : vector<4x256xf32>
    %1238 = arith.addf %1229, %1237 : vector<4x256xf32>
    %1239 = vector.extract_strided_slice %1232 {offsets = [0, 1], sizes = [4, 1], strides = [1, 1]} : vector<4x4xf32> to vector<4x1xf32>
    %1240 = vector.extract_strided_slice %1230 {offsets = [1, 0], sizes = [1, 256], strides = [1, 1]} : vector<4x256xf32> to vector<1x256xf32>
    %1241 = vector.broadcast %1239 : vector<4x1xf32> to vector<4x256xf32>
    %1242 = vector.broadcast %1240 : vector<1x256xf32> to vector<4x256xf32>
    %1243 = arith.mulf %1241, %1242 : vector<4x256xf32>
    %1244 = arith.addf %1238, %1243 : vector<4x256xf32>
    %1245 = vector.extract_strided_slice %1232 {offsets = [0, 2], sizes = [4, 1], strides = [1, 1]} : vector<4x4xf32> to vector<4x1xf32>
    %1246 = vector.extract_strided_slice %1230 {offsets = [2, 0], sizes = [1, 256], strides = [1, 1]} : vector<4x256xf32> to vector<1x256xf32>
    %1247 = vector.broadcast %1245 : vector<4x1xf32> to vector<4x256xf32>
    %1248 = vector.broadcast %1246 : vector<1x256xf32> to vector<4x256xf32>
    %1249 = arith.mulf %1247, %1248 : vector<4x256xf32>
    %1250 = arith.addf %1244, %1249 : vector<4x256xf32>
    %1251 = vector.extract_strided_slice %1232 {offsets = [0, 3], sizes = [4, 1], strides = [1, 1]} : vector<4x4xf32> to vector<4x1xf32>
    %1252 = vector.extract_strided_slice %1230 {offsets = [3, 0], sizes = [1, 256], strides = [1, 1]} : vector<4x256xf32> to vector<1x256xf32>
    %1253 = vector.broadcast %1251 : vector<4x1xf32> to vector<4x256xf32>
    %1254 = vector.broadcast %1252 : vector<1x256xf32> to vector<4x256xf32>
    %1255 = arith.mulf %1253, %1254 : vector<4x256xf32>
    %1256 = arith.addf %1250, %1255 : vector<4x256xf32>
    %1257 = vector.extract_strided_slice %299 {offsets = [0, 18], sizes = [4, 256], strides = [1, 1]} : vector<4x290xf32> to vector<4x256xf32>
    %cst_200 = arith.constant 0.000000e+00 : f32
    %1258 = vector.shape_cast %20 : vector<1x256xi1> to vector<1x256xi1>
    %1259 = vector.broadcast %1258 : vector<1x256xi1> to vector<4x256xi1>
    %1260 = vector.broadcast %cst_200 : f32 to vector<4x256xf32>
    %1261 = arith.select %1259, %1257, %1260 : vector<4x256xi1>, vector<4x256xf32>
    %c5_201 = arith.constant 5 : index
    %c1_202 = arith.constant 1 : index
    %c0_203 = arith.constant 0 : index
    %c0_204 = arith.constant 0 : index
    %1262 = vector.load %arg4[%c5_201, %c1_202, %c0_203, %c0_204] : memref<9x3x4x4xf32, #tpu.memory_space<vmem>>, vector<1x1x4x4xf32>
    %1263 = vector.shape_cast %1262 : vector<1x1x4x4xf32> to vector<4x4xf32>
    %1264 = vector.extract_strided_slice %1263 {offsets = [0, 0], sizes = [4, 1], strides = [1, 1]} : vector<4x4xf32> to vector<4x1xf32>
    %1265 = vector.extract_strided_slice %1261 {offsets = [0, 0], sizes = [1, 256], strides = [1, 1]} : vector<4x256xf32> to vector<1x256xf32>
    %1266 = vector.broadcast %1264 : vector<4x1xf32> to vector<4x256xf32>
    %1267 = vector.broadcast %1265 : vector<1x256xf32> to vector<4x256xf32>
    %1268 = arith.mulf %1266, %1267 : vector<4x256xf32>
    %1269 = arith.addf %1256, %1268 : vector<4x256xf32>
    %1270 = vector.extract_strided_slice %1263 {offsets = [0, 1], sizes = [4, 1], strides = [1, 1]} : vector<4x4xf32> to vector<4x1xf32>
    %1271 = vector.extract_strided_slice %1261 {offsets = [1, 0], sizes = [1, 256], strides = [1, 1]} : vector<4x256xf32> to vector<1x256xf32>
    %1272 = vector.broadcast %1270 : vector<4x1xf32> to vector<4x256xf32>
    %1273 = vector.broadcast %1271 : vector<1x256xf32> to vector<4x256xf32>
    %1274 = arith.mulf %1272, %1273 : vector<4x256xf32>
    %1275 = arith.addf %1269, %1274 : vector<4x256xf32>
    %1276 = vector.extract_strided_slice %1263 {offsets = [0, 2], sizes = [4, 1], strides = [1, 1]} : vector<4x4xf32> to vector<4x1xf32>
    %1277 = vector.extract_strided_slice %1261 {offsets = [2, 0], sizes = [1, 256], strides = [1, 1]} : vector<4x256xf32> to vector<1x256xf32>
    %1278 = vector.broadcast %1276 : vector<4x1xf32> to vector<4x256xf32>
    %1279 = vector.broadcast %1277 : vector<1x256xf32> to vector<4x256xf32>
    %1280 = arith.mulf %1278, %1279 : vector<4x256xf32>
    %1281 = arith.addf %1275, %1280 : vector<4x256xf32>
    %1282 = vector.extract_strided_slice %1263 {offsets = [0, 3], sizes = [4, 1], strides = [1, 1]} : vector<4x4xf32> to vector<4x1xf32>
    %1283 = vector.extract_strided_slice %1261 {offsets = [3, 0], sizes = [1, 256], strides = [1, 1]} : vector<4x256xf32> to vector<1x256xf32>
    %1284 = vector.broadcast %1282 : vector<4x1xf32> to vector<4x256xf32>
    %1285 = vector.broadcast %1283 : vector<1x256xf32> to vector<4x256xf32>
    %1286 = arith.mulf %1284, %1285 : vector<4x256xf32>
    %1287 = arith.addf %1281, %1286 : vector<4x256xf32>
    %1288 = vector.extract_strided_slice %299 {offsets = [0, 32], sizes = [4, 256], strides = [1, 1]} : vector<4x290xf32> to vector<4x256xf32>
    %cst_205 = arith.constant 0.000000e+00 : f32
    %1289 = vector.shape_cast %18 : vector<1x256xi1> to vector<1x256xi1>
    %1290 = vector.broadcast %1289 : vector<1x256xi1> to vector<4x256xi1>
    %1291 = vector.broadcast %cst_205 : f32 to vector<4x256xf32>
    %1292 = arith.select %1290, %1288, %1291 : vector<4x256xi1>, vector<4x256xf32>
    %c6_206 = arith.constant 6 : index
    %c1_207 = arith.constant 1 : index
    %c0_208 = arith.constant 0 : index
    %c0_209 = arith.constant 0 : index
    %1293 = vector.load %arg4[%c6_206, %c1_207, %c0_208, %c0_209] : memref<9x3x4x4xf32, #tpu.memory_space<vmem>>, vector<1x1x4x4xf32>
    %1294 = vector.shape_cast %1293 : vector<1x1x4x4xf32> to vector<4x4xf32>
    %1295 = vector.extract_strided_slice %1294 {offsets = [0, 0], sizes = [4, 1], strides = [1, 1]} : vector<4x4xf32> to vector<4x1xf32>
    %1296 = vector.extract_strided_slice %1292 {offsets = [0, 0], sizes = [1, 256], strides = [1, 1]} : vector<4x256xf32> to vector<1x256xf32>
    %1297 = vector.broadcast %1295 : vector<4x1xf32> to vector<4x256xf32>
    %1298 = vector.broadcast %1296 : vector<1x256xf32> to vector<4x256xf32>
    %1299 = arith.mulf %1297, %1298 : vector<4x256xf32>
    %1300 = arith.addf %1287, %1299 : vector<4x256xf32>
    %1301 = vector.extract_strided_slice %1294 {offsets = [0, 1], sizes = [4, 1], strides = [1, 1]} : vector<4x4xf32> to vector<4x1xf32>
    %1302 = vector.extract_strided_slice %1292 {offsets = [1, 0], sizes = [1, 256], strides = [1, 1]} : vector<4x256xf32> to vector<1x256xf32>
    %1303 = vector.broadcast %1301 : vector<4x1xf32> to vector<4x256xf32>
    %1304 = vector.broadcast %1302 : vector<1x256xf32> to vector<4x256xf32>
    %1305 = arith.mulf %1303, %1304 : vector<4x256xf32>
    %1306 = arith.addf %1300, %1305 : vector<4x256xf32>
    %1307 = vector.extract_strided_slice %1294 {offsets = [0, 2], sizes = [4, 1], strides = [1, 1]} : vector<4x4xf32> to vector<4x1xf32>
    %1308 = vector.extract_strided_slice %1292 {offsets = [2, 0], sizes = [1, 256], strides = [1, 1]} : vector<4x256xf32> to vector<1x256xf32>
    %1309 = vector.broadcast %1307 : vector<4x1xf32> to vector<4x256xf32>
    %1310 = vector.broadcast %1308 : vector<1x256xf32> to vector<4x256xf32>
    %1311 = arith.mulf %1309, %1310 : vector<4x256xf32>
    %1312 = arith.addf %1306, %1311 : vector<4x256xf32>
    %1313 = vector.extract_strided_slice %1294 {offsets = [0, 3], sizes = [4, 1], strides = [1, 1]} : vector<4x4xf32> to vector<4x1xf32>
    %1314 = vector.extract_strided_slice %1292 {offsets = [3, 0], sizes = [1, 256], strides = [1, 1]} : vector<4x256xf32> to vector<1x256xf32>
    %1315 = vector.broadcast %1313 : vector<4x1xf32> to vector<4x256xf32>
    %1316 = vector.broadcast %1314 : vector<1x256xf32> to vector<4x256xf32>
    %1317 = arith.mulf %1315, %1316 : vector<4x256xf32>
    %1318 = arith.addf %1312, %1317 : vector<4x256xf32>
    %1319 = vector.extract_strided_slice %299 {offsets = [0, 33], sizes = [4, 256], strides = [1, 1]} : vector<4x290xf32> to vector<4x256xf32>
    %c7_210 = arith.constant 7 : index
    %c1_211 = arith.constant 1 : index
    %c0_212 = arith.constant 0 : index
    %c0_213 = arith.constant 0 : index
    %1320 = vector.load %arg4[%c7_210, %c1_211, %c0_212, %c0_213] : memref<9x3x4x4xf32, #tpu.memory_space<vmem>>, vector<1x1x4x4xf32>
    %1321 = vector.shape_cast %1320 : vector<1x1x4x4xf32> to vector<4x4xf32>
    %1322 = vector.extract_strided_slice %1321 {offsets = [0, 0], sizes = [4, 1], strides = [1, 1]} : vector<4x4xf32> to vector<4x1xf32>
    %1323 = vector.extract_strided_slice %1319 {offsets = [0, 0], sizes = [1, 256], strides = [1, 1]} : vector<4x256xf32> to vector<1x256xf32>
    %1324 = vector.broadcast %1322 : vector<4x1xf32> to vector<4x256xf32>
    %1325 = vector.broadcast %1323 : vector<1x256xf32> to vector<4x256xf32>
    %1326 = arith.mulf %1324, %1325 : vector<4x256xf32>
    %1327 = arith.addf %1318, %1326 : vector<4x256xf32>
    %1328 = vector.extract_strided_slice %1321 {offsets = [0, 1], sizes = [4, 1], strides = [1, 1]} : vector<4x4xf32> to vector<4x1xf32>
    %1329 = vector.extract_strided_slice %1319 {offsets = [1, 0], sizes = [1, 256], strides = [1, 1]} : vector<4x256xf32> to vector<1x256xf32>
    %1330 = vector.broadcast %1328 : vector<4x1xf32> to vector<4x256xf32>
    %1331 = vector.broadcast %1329 : vector<1x256xf32> to vector<4x256xf32>
    %1332 = arith.mulf %1330, %1331 : vector<4x256xf32>
    %1333 = arith.addf %1327, %1332 : vector<4x256xf32>
    %1334 = vector.extract_strided_slice %1321 {offsets = [0, 2], sizes = [4, 1], strides = [1, 1]} : vector<4x4xf32> to vector<4x1xf32>
    %1335 = vector.extract_strided_slice %1319 {offsets = [2, 0], sizes = [1, 256], strides = [1, 1]} : vector<4x256xf32> to vector<1x256xf32>
    %1336 = vector.broadcast %1334 : vector<4x1xf32> to vector<4x256xf32>
    %1337 = vector.broadcast %1335 : vector<1x256xf32> to vector<4x256xf32>
    %1338 = arith.mulf %1336, %1337 : vector<4x256xf32>
    %1339 = arith.addf %1333, %1338 : vector<4x256xf32>
    %1340 = vector.extract_strided_slice %1321 {offsets = [0, 3], sizes = [4, 1], strides = [1, 1]} : vector<4x4xf32> to vector<4x1xf32>
    %1341 = vector.extract_strided_slice %1319 {offsets = [3, 0], sizes = [1, 256], strides = [1, 1]} : vector<4x256xf32> to vector<1x256xf32>
    %1342 = vector.broadcast %1340 : vector<4x1xf32> to vector<4x256xf32>
    %1343 = vector.broadcast %1341 : vector<1x256xf32> to vector<4x256xf32>
    %1344 = arith.mulf %1342, %1343 : vector<4x256xf32>
    %1345 = arith.addf %1339, %1344 : vector<4x256xf32>
    %1346 = vector.extract_strided_slice %299 {offsets = [0, 34], sizes = [4, 256], strides = [1, 1]} : vector<4x290xf32> to vector<4x256xf32>
    %cst_214 = arith.constant 0.000000e+00 : f32
    %1347 = vector.shape_cast %20 : vector<1x256xi1> to vector<1x256xi1>
    %1348 = vector.broadcast %1347 : vector<1x256xi1> to vector<4x256xi1>
    %1349 = vector.broadcast %cst_214 : f32 to vector<4x256xf32>
    %1350 = arith.select %1348, %1346, %1349 : vector<4x256xi1>, vector<4x256xf32>
    %c8_215 = arith.constant 8 : index
    %c1_216 = arith.constant 1 : index
    %c0_217 = arith.constant 0 : index
    %c0_218 = arith.constant 0 : index
    %1351 = vector.load %arg4[%c8_215, %c1_216, %c0_217, %c0_218] : memref<9x3x4x4xf32, #tpu.memory_space<vmem>>, vector<1x1x4x4xf32>
    %1352 = vector.shape_cast %1351 : vector<1x1x4x4xf32> to vector<4x4xf32>
    %1353 = vector.extract_strided_slice %1352 {offsets = [0, 0], sizes = [4, 1], strides = [1, 1]} : vector<4x4xf32> to vector<4x1xf32>
    %1354 = vector.extract_strided_slice %1350 {offsets = [0, 0], sizes = [1, 256], strides = [1, 1]} : vector<4x256xf32> to vector<1x256xf32>
    %1355 = vector.broadcast %1353 : vector<4x1xf32> to vector<4x256xf32>
    %1356 = vector.broadcast %1354 : vector<1x256xf32> to vector<4x256xf32>
    %1357 = arith.mulf %1355, %1356 : vector<4x256xf32>
    %1358 = arith.addf %1345, %1357 : vector<4x256xf32>
    %1359 = vector.extract_strided_slice %1352 {offsets = [0, 1], sizes = [4, 1], strides = [1, 1]} : vector<4x4xf32> to vector<4x1xf32>
    %1360 = vector.extract_strided_slice %1350 {offsets = [1, 0], sizes = [1, 256], strides = [1, 1]} : vector<4x256xf32> to vector<1x256xf32>
    %1361 = vector.broadcast %1359 : vector<4x1xf32> to vector<4x256xf32>
    %1362 = vector.broadcast %1360 : vector<1x256xf32> to vector<4x256xf32>
    %1363 = arith.mulf %1361, %1362 : vector<4x256xf32>
    %1364 = arith.addf %1358, %1363 : vector<4x256xf32>
    %1365 = vector.extract_strided_slice %1352 {offsets = [0, 2], sizes = [4, 1], strides = [1, 1]} : vector<4x4xf32> to vector<4x1xf32>
    %1366 = vector.extract_strided_slice %1350 {offsets = [2, 0], sizes = [1, 256], strides = [1, 1]} : vector<4x256xf32> to vector<1x256xf32>
    %1367 = vector.broadcast %1365 : vector<4x1xf32> to vector<4x256xf32>
    %1368 = vector.broadcast %1366 : vector<1x256xf32> to vector<4x256xf32>
    %1369 = arith.mulf %1367, %1368 : vector<4x256xf32>
    %1370 = arith.addf %1364, %1369 : vector<4x256xf32>
    %1371 = vector.extract_strided_slice %1352 {offsets = [0, 3], sizes = [4, 1], strides = [1, 1]} : vector<4x4xf32> to vector<4x1xf32>
    %1372 = vector.extract_strided_slice %1350 {offsets = [3, 0], sizes = [1, 256], strides = [1, 1]} : vector<4x256xf32> to vector<1x256xf32>
    %1373 = vector.broadcast %1371 : vector<4x1xf32> to vector<4x256xf32>
    %1374 = vector.broadcast %1372 : vector<1x256xf32> to vector<4x256xf32>
    %1375 = arith.mulf %1373, %1374 : vector<4x256xf32>
    %1376 = arith.addf %1370, %1375 : vector<4x256xf32>
    %1377 = vector.extract_strided_slice %841 {offsets = [0, 0], sizes = [4, 256], strides = [1, 1]} : vector<4x290xf32> to vector<4x256xf32>
    %cst_219 = arith.constant 0.000000e+00 : f32
    %1378 = vector.shape_cast %18 : vector<1x256xi1> to vector<1x256xi1>
    %1379 = vector.broadcast %1378 : vector<1x256xi1> to vector<4x256xi1>
    %1380 = vector.broadcast %cst_219 : f32 to vector<4x256xf32>
    %1381 = arith.select %1379, %1377, %1380 : vector<4x256xi1>, vector<4x256xf32>
    %c0_220 = arith.constant 0 : index
    %c2_221 = arith.constant 2 : index
    %c0_222 = arith.constant 0 : index
    %c0_223 = arith.constant 0 : index
    %1382 = vector.load %arg4[%c0_220, %c2_221, %c0_222, %c0_223] : memref<9x3x4x4xf32, #tpu.memory_space<vmem>>, vector<1x1x4x4xf32>
    %1383 = vector.shape_cast %1382 : vector<1x1x4x4xf32> to vector<4x4xf32>
    %1384 = vector.extract_strided_slice %1383 {offsets = [0, 0], sizes = [4, 1], strides = [1, 1]} : vector<4x4xf32> to vector<4x1xf32>
    %1385 = vector.extract_strided_slice %1381 {offsets = [0, 0], sizes = [1, 256], strides = [1, 1]} : vector<4x256xf32> to vector<1x256xf32>
    %1386 = vector.broadcast %1384 : vector<4x1xf32> to vector<4x256xf32>
    %1387 = vector.broadcast %1385 : vector<1x256xf32> to vector<4x256xf32>
    %1388 = arith.mulf %1386, %1387 : vector<4x256xf32>
    %1389 = arith.addf %1376, %1388 : vector<4x256xf32>
    %1390 = vector.extract_strided_slice %1383 {offsets = [0, 1], sizes = [4, 1], strides = [1, 1]} : vector<4x4xf32> to vector<4x1xf32>
    %1391 = vector.extract_strided_slice %1381 {offsets = [1, 0], sizes = [1, 256], strides = [1, 1]} : vector<4x256xf32> to vector<1x256xf32>
    %1392 = vector.broadcast %1390 : vector<4x1xf32> to vector<4x256xf32>
    %1393 = vector.broadcast %1391 : vector<1x256xf32> to vector<4x256xf32>
    %1394 = arith.mulf %1392, %1393 : vector<4x256xf32>
    %1395 = arith.addf %1389, %1394 : vector<4x256xf32>
    %1396 = vector.extract_strided_slice %1383 {offsets = [0, 2], sizes = [4, 1], strides = [1, 1]} : vector<4x4xf32> to vector<4x1xf32>
    %1397 = vector.extract_strided_slice %1381 {offsets = [2, 0], sizes = [1, 256], strides = [1, 1]} : vector<4x256xf32> to vector<1x256xf32>
    %1398 = vector.broadcast %1396 : vector<4x1xf32> to vector<4x256xf32>
    %1399 = vector.broadcast %1397 : vector<1x256xf32> to vector<4x256xf32>
    %1400 = arith.mulf %1398, %1399 : vector<4x256xf32>
    %1401 = arith.addf %1395, %1400 : vector<4x256xf32>
    %1402 = vector.extract_strided_slice %1383 {offsets = [0, 3], sizes = [4, 1], strides = [1, 1]} : vector<4x4xf32> to vector<4x1xf32>
    %1403 = vector.extract_strided_slice %1381 {offsets = [3, 0], sizes = [1, 256], strides = [1, 1]} : vector<4x256xf32> to vector<1x256xf32>
    %1404 = vector.broadcast %1402 : vector<4x1xf32> to vector<4x256xf32>
    %1405 = vector.broadcast %1403 : vector<1x256xf32> to vector<4x256xf32>
    %1406 = arith.mulf %1404, %1405 : vector<4x256xf32>
    %1407 = arith.addf %1401, %1406 : vector<4x256xf32>
    %1408 = vector.extract_strided_slice %841 {offsets = [0, 1], sizes = [4, 256], strides = [1, 1]} : vector<4x290xf32> to vector<4x256xf32>
    %c1_224 = arith.constant 1 : index
    %c2_225 = arith.constant 2 : index
    %c0_226 = arith.constant 0 : index
    %c0_227 = arith.constant 0 : index
    %1409 = vector.load %arg4[%c1_224, %c2_225, %c0_226, %c0_227] : memref<9x3x4x4xf32, #tpu.memory_space<vmem>>, vector<1x1x4x4xf32>
    %1410 = vector.shape_cast %1409 : vector<1x1x4x4xf32> to vector<4x4xf32>
    %1411 = vector.extract_strided_slice %1410 {offsets = [0, 0], sizes = [4, 1], strides = [1, 1]} : vector<4x4xf32> to vector<4x1xf32>
    %1412 = vector.extract_strided_slice %1408 {offsets = [0, 0], sizes = [1, 256], strides = [1, 1]} : vector<4x256xf32> to vector<1x256xf32>
    %1413 = vector.broadcast %1411 : vector<4x1xf32> to vector<4x256xf32>
    %1414 = vector.broadcast %1412 : vector<1x256xf32> to vector<4x256xf32>
    %1415 = arith.mulf %1413, %1414 : vector<4x256xf32>
    %1416 = arith.addf %1407, %1415 : vector<4x256xf32>
    %1417 = vector.extract_strided_slice %1410 {offsets = [0, 1], sizes = [4, 1], strides = [1, 1]} : vector<4x4xf32> to vector<4x1xf32>
    %1418 = vector.extract_strided_slice %1408 {offsets = [1, 0], sizes = [1, 256], strides = [1, 1]} : vector<4x256xf32> to vector<1x256xf32>
    %1419 = vector.broadcast %1417 : vector<4x1xf32> to vector<4x256xf32>
    %1420 = vector.broadcast %1418 : vector<1x256xf32> to vector<4x256xf32>
    %1421 = arith.mulf %1419, %1420 : vector<4x256xf32>
    %1422 = arith.addf %1416, %1421 : vector<4x256xf32>
    %1423 = vector.extract_strided_slice %1410 {offsets = [0, 2], sizes = [4, 1], strides = [1, 1]} : vector<4x4xf32> to vector<4x1xf32>
    %1424 = vector.extract_strided_slice %1408 {offsets = [2, 0], sizes = [1, 256], strides = [1, 1]} : vector<4x256xf32> to vector<1x256xf32>
    %1425 = vector.broadcast %1423 : vector<4x1xf32> to vector<4x256xf32>
    %1426 = vector.broadcast %1424 : vector<1x256xf32> to vector<4x256xf32>
    %1427 = arith.mulf %1425, %1426 : vector<4x256xf32>
    %1428 = arith.addf %1422, %1427 : vector<4x256xf32>
    %1429 = vector.extract_strided_slice %1410 {offsets = [0, 3], sizes = [4, 1], strides = [1, 1]} : vector<4x4xf32> to vector<4x1xf32>
    %1430 = vector.extract_strided_slice %1408 {offsets = [3, 0], sizes = [1, 256], strides = [1, 1]} : vector<4x256xf32> to vector<1x256xf32>
    %1431 = vector.broadcast %1429 : vector<4x1xf32> to vector<4x256xf32>
    %1432 = vector.broadcast %1430 : vector<1x256xf32> to vector<4x256xf32>
    %1433 = arith.mulf %1431, %1432 : vector<4x256xf32>
    %1434 = arith.addf %1428, %1433 : vector<4x256xf32>
    %1435 = vector.extract_strided_slice %841 {offsets = [0, 2], sizes = [4, 256], strides = [1, 1]} : vector<4x290xf32> to vector<4x256xf32>
    %cst_228 = arith.constant 0.000000e+00 : f32
    %1436 = vector.shape_cast %20 : vector<1x256xi1> to vector<1x256xi1>
    %1437 = vector.broadcast %1436 : vector<1x256xi1> to vector<4x256xi1>
    %1438 = vector.broadcast %cst_228 : f32 to vector<4x256xf32>
    %1439 = arith.select %1437, %1435, %1438 : vector<4x256xi1>, vector<4x256xf32>
    %c2_229 = arith.constant 2 : index
    %c2_230 = arith.constant 2 : index
    %c0_231 = arith.constant 0 : index
    %c0_232 = arith.constant 0 : index
    %1440 = vector.load %arg4[%c2_229, %c2_230, %c0_231, %c0_232] : memref<9x3x4x4xf32, #tpu.memory_space<vmem>>, vector<1x1x4x4xf32>
    %1441 = vector.shape_cast %1440 : vector<1x1x4x4xf32> to vector<4x4xf32>
    %1442 = vector.extract_strided_slice %1441 {offsets = [0, 0], sizes = [4, 1], strides = [1, 1]} : vector<4x4xf32> to vector<4x1xf32>
    %1443 = vector.extract_strided_slice %1439 {offsets = [0, 0], sizes = [1, 256], strides = [1, 1]} : vector<4x256xf32> to vector<1x256xf32>
    %1444 = vector.broadcast %1442 : vector<4x1xf32> to vector<4x256xf32>
    %1445 = vector.broadcast %1443 : vector<1x256xf32> to vector<4x256xf32>
    %1446 = arith.mulf %1444, %1445 : vector<4x256xf32>
    %1447 = arith.addf %1434, %1446 : vector<4x256xf32>
    %1448 = vector.extract_strided_slice %1441 {offsets = [0, 1], sizes = [4, 1], strides = [1, 1]} : vector<4x4xf32> to vector<4x1xf32>
    %1449 = vector.extract_strided_slice %1439 {offsets = [1, 0], sizes = [1, 256], strides = [1, 1]} : vector<4x256xf32> to vector<1x256xf32>
    %1450 = vector.broadcast %1448 : vector<4x1xf32> to vector<4x256xf32>
    %1451 = vector.broadcast %1449 : vector<1x256xf32> to vector<4x256xf32>
    %1452 = arith.mulf %1450, %1451 : vector<4x256xf32>
    %1453 = arith.addf %1447, %1452 : vector<4x256xf32>
    %1454 = vector.extract_strided_slice %1441 {offsets = [0, 2], sizes = [4, 1], strides = [1, 1]} : vector<4x4xf32> to vector<4x1xf32>
    %1455 = vector.extract_strided_slice %1439 {offsets = [2, 0], sizes = [1, 256], strides = [1, 1]} : vector<4x256xf32> to vector<1x256xf32>
    %1456 = vector.broadcast %1454 : vector<4x1xf32> to vector<4x256xf32>
    %1457 = vector.broadcast %1455 : vector<1x256xf32> to vector<4x256xf32>
    %1458 = arith.mulf %1456, %1457 : vector<4x256xf32>
    %1459 = arith.addf %1453, %1458 : vector<4x256xf32>
    %1460 = vector.extract_strided_slice %1441 {offsets = [0, 3], sizes = [4, 1], strides = [1, 1]} : vector<4x4xf32> to vector<4x1xf32>
    %1461 = vector.extract_strided_slice %1439 {offsets = [3, 0], sizes = [1, 256], strides = [1, 1]} : vector<4x256xf32> to vector<1x256xf32>
    %1462 = vector.broadcast %1460 : vector<4x1xf32> to vector<4x256xf32>
    %1463 = vector.broadcast %1461 : vector<1x256xf32> to vector<4x256xf32>
    %1464 = arith.mulf %1462, %1463 : vector<4x256xf32>
    %1465 = arith.addf %1459, %1464 : vector<4x256xf32>
    %1466 = vector.extract_strided_slice %841 {offsets = [0, 16], sizes = [4, 256], strides = [1, 1]} : vector<4x290xf32> to vector<4x256xf32>
    %cst_233 = arith.constant 0.000000e+00 : f32
    %1467 = vector.shape_cast %18 : vector<1x256xi1> to vector<1x256xi1>
    %1468 = vector.broadcast %1467 : vector<1x256xi1> to vector<4x256xi1>
    %1469 = vector.broadcast %cst_233 : f32 to vector<4x256xf32>
    %1470 = arith.select %1468, %1466, %1469 : vector<4x256xi1>, vector<4x256xf32>
    %c3_234 = arith.constant 3 : index
    %c2_235 = arith.constant 2 : index
    %c0_236 = arith.constant 0 : index
    %c0_237 = arith.constant 0 : index
    %1471 = vector.load %arg4[%c3_234, %c2_235, %c0_236, %c0_237] : memref<9x3x4x4xf32, #tpu.memory_space<vmem>>, vector<1x1x4x4xf32>
    %1472 = vector.shape_cast %1471 : vector<1x1x4x4xf32> to vector<4x4xf32>
    %1473 = vector.extract_strided_slice %1472 {offsets = [0, 0], sizes = [4, 1], strides = [1, 1]} : vector<4x4xf32> to vector<4x1xf32>
    %1474 = vector.extract_strided_slice %1470 {offsets = [0, 0], sizes = [1, 256], strides = [1, 1]} : vector<4x256xf32> to vector<1x256xf32>
    %1475 = vector.broadcast %1473 : vector<4x1xf32> to vector<4x256xf32>
    %1476 = vector.broadcast %1474 : vector<1x256xf32> to vector<4x256xf32>
    %1477 = arith.mulf %1475, %1476 : vector<4x256xf32>
    %1478 = arith.addf %1465, %1477 : vector<4x256xf32>
    %1479 = vector.extract_strided_slice %1472 {offsets = [0, 1], sizes = [4, 1], strides = [1, 1]} : vector<4x4xf32> to vector<4x1xf32>
    %1480 = vector.extract_strided_slice %1470 {offsets = [1, 0], sizes = [1, 256], strides = [1, 1]} : vector<4x256xf32> to vector<1x256xf32>
    %1481 = vector.broadcast %1479 : vector<4x1xf32> to vector<4x256xf32>
    %1482 = vector.broadcast %1480 : vector<1x256xf32> to vector<4x256xf32>
    %1483 = arith.mulf %1481, %1482 : vector<4x256xf32>
    %1484 = arith.addf %1478, %1483 : vector<4x256xf32>
    %1485 = vector.extract_strided_slice %1472 {offsets = [0, 2], sizes = [4, 1], strides = [1, 1]} : vector<4x4xf32> to vector<4x1xf32>
    %1486 = vector.extract_strided_slice %1470 {offsets = [2, 0], sizes = [1, 256], strides = [1, 1]} : vector<4x256xf32> to vector<1x256xf32>
    %1487 = vector.broadcast %1485 : vector<4x1xf32> to vector<4x256xf32>
    %1488 = vector.broadcast %1486 : vector<1x256xf32> to vector<4x256xf32>
    %1489 = arith.mulf %1487, %1488 : vector<4x256xf32>
    %1490 = arith.addf %1484, %1489 : vector<4x256xf32>
    %1491 = vector.extract_strided_slice %1472 {offsets = [0, 3], sizes = [4, 1], strides = [1, 1]} : vector<4x4xf32> to vector<4x1xf32>
    %1492 = vector.extract_strided_slice %1470 {offsets = [3, 0], sizes = [1, 256], strides = [1, 1]} : vector<4x256xf32> to vector<1x256xf32>
    %1493 = vector.broadcast %1491 : vector<4x1xf32> to vector<4x256xf32>
    %1494 = vector.broadcast %1492 : vector<1x256xf32> to vector<4x256xf32>
    %1495 = arith.mulf %1493, %1494 : vector<4x256xf32>
    %1496 = arith.addf %1490, %1495 : vector<4x256xf32>
    %1497 = vector.extract_strided_slice %841 {offsets = [0, 17], sizes = [4, 256], strides = [1, 1]} : vector<4x290xf32> to vector<4x256xf32>
    %c4_238 = arith.constant 4 : index
    %c2_239 = arith.constant 2 : index
    %c0_240 = arith.constant 0 : index
    %c0_241 = arith.constant 0 : index
    %1498 = vector.load %arg4[%c4_238, %c2_239, %c0_240, %c0_241] : memref<9x3x4x4xf32, #tpu.memory_space<vmem>>, vector<1x1x4x4xf32>
    %1499 = vector.shape_cast %1498 : vector<1x1x4x4xf32> to vector<4x4xf32>
    %1500 = vector.extract_strided_slice %1499 {offsets = [0, 0], sizes = [4, 1], strides = [1, 1]} : vector<4x4xf32> to vector<4x1xf32>
    %1501 = vector.extract_strided_slice %1497 {offsets = [0, 0], sizes = [1, 256], strides = [1, 1]} : vector<4x256xf32> to vector<1x256xf32>
    %1502 = vector.broadcast %1500 : vector<4x1xf32> to vector<4x256xf32>
    %1503 = vector.broadcast %1501 : vector<1x256xf32> to vector<4x256xf32>
    %1504 = arith.mulf %1502, %1503 : vector<4x256xf32>
    %1505 = arith.addf %1496, %1504 : vector<4x256xf32>
    %1506 = vector.extract_strided_slice %1499 {offsets = [0, 1], sizes = [4, 1], strides = [1, 1]} : vector<4x4xf32> to vector<4x1xf32>
    %1507 = vector.extract_strided_slice %1497 {offsets = [1, 0], sizes = [1, 256], strides = [1, 1]} : vector<4x256xf32> to vector<1x256xf32>
    %1508 = vector.broadcast %1506 : vector<4x1xf32> to vector<4x256xf32>
    %1509 = vector.broadcast %1507 : vector<1x256xf32> to vector<4x256xf32>
    %1510 = arith.mulf %1508, %1509 : vector<4x256xf32>
    %1511 = arith.addf %1505, %1510 : vector<4x256xf32>
    %1512 = vector.extract_strided_slice %1499 {offsets = [0, 2], sizes = [4, 1], strides = [1, 1]} : vector<4x4xf32> to vector<4x1xf32>
    %1513 = vector.extract_strided_slice %1497 {offsets = [2, 0], sizes = [1, 256], strides = [1, 1]} : vector<4x256xf32> to vector<1x256xf32>
    %1514 = vector.broadcast %1512 : vector<4x1xf32> to vector<4x256xf32>
    %1515 = vector.broadcast %1513 : vector<1x256xf32> to vector<4x256xf32>
    %1516 = arith.mulf %1514, %1515 : vector<4x256xf32>
    %1517 = arith.addf %1511, %1516 : vector<4x256xf32>
    %1518 = vector.extract_strided_slice %1499 {offsets = [0, 3], sizes = [4, 1], strides = [1, 1]} : vector<4x4xf32> to vector<4x1xf32>
    %1519 = vector.extract_strided_slice %1497 {offsets = [3, 0], sizes = [1, 256], strides = [1, 1]} : vector<4x256xf32> to vector<1x256xf32>
    %1520 = vector.broadcast %1518 : vector<4x1xf32> to vector<4x256xf32>
    %1521 = vector.broadcast %1519 : vector<1x256xf32> to vector<4x256xf32>
    %1522 = arith.mulf %1520, %1521 : vector<4x256xf32>
    %1523 = arith.addf %1517, %1522 : vector<4x256xf32>
    %1524 = vector.extract_strided_slice %841 {offsets = [0, 18], sizes = [4, 256], strides = [1, 1]} : vector<4x290xf32> to vector<4x256xf32>
    %cst_242 = arith.constant 0.000000e+00 : f32
    %1525 = vector.shape_cast %20 : vector<1x256xi1> to vector<1x256xi1>
    %1526 = vector.broadcast %1525 : vector<1x256xi1> to vector<4x256xi1>
    %1527 = vector.broadcast %cst_242 : f32 to vector<4x256xf32>
    %1528 = arith.select %1526, %1524, %1527 : vector<4x256xi1>, vector<4x256xf32>
    %c5_243 = arith.constant 5 : index
    %c2_244 = arith.constant 2 : index
    %c0_245 = arith.constant 0 : index
    %c0_246 = arith.constant 0 : index
    %1529 = vector.load %arg4[%c5_243, %c2_244, %c0_245, %c0_246] : memref<9x3x4x4xf32, #tpu.memory_space<vmem>>, vector<1x1x4x4xf32>
    %1530 = vector.shape_cast %1529 : vector<1x1x4x4xf32> to vector<4x4xf32>
    %1531 = vector.extract_strided_slice %1530 {offsets = [0, 0], sizes = [4, 1], strides = [1, 1]} : vector<4x4xf32> to vector<4x1xf32>
    %1532 = vector.extract_strided_slice %1528 {offsets = [0, 0], sizes = [1, 256], strides = [1, 1]} : vector<4x256xf32> to vector<1x256xf32>
    %1533 = vector.broadcast %1531 : vector<4x1xf32> to vector<4x256xf32>
    %1534 = vector.broadcast %1532 : vector<1x256xf32> to vector<4x256xf32>
    %1535 = arith.mulf %1533, %1534 : vector<4x256xf32>
    %1536 = arith.addf %1523, %1535 : vector<4x256xf32>
    %1537 = vector.extract_strided_slice %1530 {offsets = [0, 1], sizes = [4, 1], strides = [1, 1]} : vector<4x4xf32> to vector<4x1xf32>
    %1538 = vector.extract_strided_slice %1528 {offsets = [1, 0], sizes = [1, 256], strides = [1, 1]} : vector<4x256xf32> to vector<1x256xf32>
    %1539 = vector.broadcast %1537 : vector<4x1xf32> to vector<4x256xf32>
    %1540 = vector.broadcast %1538 : vector<1x256xf32> to vector<4x256xf32>
    %1541 = arith.mulf %1539, %1540 : vector<4x256xf32>
    %1542 = arith.addf %1536, %1541 : vector<4x256xf32>
    %1543 = vector.extract_strided_slice %1530 {offsets = [0, 2], sizes = [4, 1], strides = [1, 1]} : vector<4x4xf32> to vector<4x1xf32>
    %1544 = vector.extract_strided_slice %1528 {offsets = [2, 0], sizes = [1, 256], strides = [1, 1]} : vector<4x256xf32> to vector<1x256xf32>
    %1545 = vector.broadcast %1543 : vector<4x1xf32> to vector<4x256xf32>
    %1546 = vector.broadcast %1544 : vector<1x256xf32> to vector<4x256xf32>
    %1547 = arith.mulf %1545, %1546 : vector<4x256xf32>
    %1548 = arith.addf %1542, %1547 : vector<4x256xf32>
    %1549 = vector.extract_strided_slice %1530 {offsets = [0, 3], sizes = [4, 1], strides = [1, 1]} : vector<4x4xf32> to vector<4x1xf32>
    %1550 = vector.extract_strided_slice %1528 {offsets = [3, 0], sizes = [1, 256], strides = [1, 1]} : vector<4x256xf32> to vector<1x256xf32>
    %1551 = vector.broadcast %1549 : vector<4x1xf32> to vector<4x256xf32>
    %1552 = vector.broadcast %1550 : vector<1x256xf32> to vector<4x256xf32>
    %1553 = arith.mulf %1551, %1552 : vector<4x256xf32>
    %1554 = arith.addf %1548, %1553 : vector<4x256xf32>
    %1555 = vector.extract_strided_slice %841 {offsets = [0, 32], sizes = [4, 256], strides = [1, 1]} : vector<4x290xf32> to vector<4x256xf32>
    %cst_247 = arith.constant 0.000000e+00 : f32
    %1556 = vector.shape_cast %18 : vector<1x256xi1> to vector<1x256xi1>
    %1557 = vector.broadcast %1556 : vector<1x256xi1> to vector<4x256xi1>
    %1558 = vector.broadcast %cst_247 : f32 to vector<4x256xf32>
    %1559 = arith.select %1557, %1555, %1558 : vector<4x256xi1>, vector<4x256xf32>
    %c6_248 = arith.constant 6 : index
    %c2_249 = arith.constant 2 : index
    %c0_250 = arith.constant 0 : index
    %c0_251 = arith.constant 0 : index
    %1560 = vector.load %arg4[%c6_248, %c2_249, %c0_250, %c0_251] : memref<9x3x4x4xf32, #tpu.memory_space<vmem>>, vector<1x1x4x4xf32>
    %1561 = vector.shape_cast %1560 : vector<1x1x4x4xf32> to vector<4x4xf32>
    %1562 = vector.extract_strided_slice %1561 {offsets = [0, 0], sizes = [4, 1], strides = [1, 1]} : vector<4x4xf32> to vector<4x1xf32>
    %1563 = vector.extract_strided_slice %1559 {offsets = [0, 0], sizes = [1, 256], strides = [1, 1]} : vector<4x256xf32> to vector<1x256xf32>
    %1564 = vector.broadcast %1562 : vector<4x1xf32> to vector<4x256xf32>
    %1565 = vector.broadcast %1563 : vector<1x256xf32> to vector<4x256xf32>
    %1566 = arith.mulf %1564, %1565 : vector<4x256xf32>
    %1567 = arith.addf %1554, %1566 : vector<4x256xf32>
    %1568 = vector.extract_strided_slice %1561 {offsets = [0, 1], sizes = [4, 1], strides = [1, 1]} : vector<4x4xf32> to vector<4x1xf32>
    %1569 = vector.extract_strided_slice %1559 {offsets = [1, 0], sizes = [1, 256], strides = [1, 1]} : vector<4x256xf32> to vector<1x256xf32>
    %1570 = vector.broadcast %1568 : vector<4x1xf32> to vector<4x256xf32>
    %1571 = vector.broadcast %1569 : vector<1x256xf32> to vector<4x256xf32>
    %1572 = arith.mulf %1570, %1571 : vector<4x256xf32>
    %1573 = arith.addf %1567, %1572 : vector<4x256xf32>
    %1574 = vector.extract_strided_slice %1561 {offsets = [0, 2], sizes = [4, 1], strides = [1, 1]} : vector<4x4xf32> to vector<4x1xf32>
    %1575 = vector.extract_strided_slice %1559 {offsets = [2, 0], sizes = [1, 256], strides = [1, 1]} : vector<4x256xf32> to vector<1x256xf32>
    %1576 = vector.broadcast %1574 : vector<4x1xf32> to vector<4x256xf32>
    %1577 = vector.broadcast %1575 : vector<1x256xf32> to vector<4x256xf32>
    %1578 = arith.mulf %1576, %1577 : vector<4x256xf32>
    %1579 = arith.addf %1573, %1578 : vector<4x256xf32>
    %1580 = vector.extract_strided_slice %1561 {offsets = [0, 3], sizes = [4, 1], strides = [1, 1]} : vector<4x4xf32> to vector<4x1xf32>
    %1581 = vector.extract_strided_slice %1559 {offsets = [3, 0], sizes = [1, 256], strides = [1, 1]} : vector<4x256xf32> to vector<1x256xf32>
    %1582 = vector.broadcast %1580 : vector<4x1xf32> to vector<4x256xf32>
    %1583 = vector.broadcast %1581 : vector<1x256xf32> to vector<4x256xf32>
    %1584 = arith.mulf %1582, %1583 : vector<4x256xf32>
    %1585 = arith.addf %1579, %1584 : vector<4x256xf32>
    %1586 = vector.extract_strided_slice %841 {offsets = [0, 33], sizes = [4, 256], strides = [1, 1]} : vector<4x290xf32> to vector<4x256xf32>
    %c7_252 = arith.constant 7 : index
    %c2_253 = arith.constant 2 : index
    %c0_254 = arith.constant 0 : index
    %c0_255 = arith.constant 0 : index
    %1587 = vector.load %arg4[%c7_252, %c2_253, %c0_254, %c0_255] : memref<9x3x4x4xf32, #tpu.memory_space<vmem>>, vector<1x1x4x4xf32>
    %1588 = vector.shape_cast %1587 : vector<1x1x4x4xf32> to vector<4x4xf32>
    %1589 = vector.extract_strided_slice %1588 {offsets = [0, 0], sizes = [4, 1], strides = [1, 1]} : vector<4x4xf32> to vector<4x1xf32>
    %1590 = vector.extract_strided_slice %1586 {offsets = [0, 0], sizes = [1, 256], strides = [1, 1]} : vector<4x256xf32> to vector<1x256xf32>
    %1591 = vector.broadcast %1589 : vector<4x1xf32> to vector<4x256xf32>
    %1592 = vector.broadcast %1590 : vector<1x256xf32> to vector<4x256xf32>
    %1593 = arith.mulf %1591, %1592 : vector<4x256xf32>
    %1594 = arith.addf %1585, %1593 : vector<4x256xf32>
    %1595 = vector.extract_strided_slice %1588 {offsets = [0, 1], sizes = [4, 1], strides = [1, 1]} : vector<4x4xf32> to vector<4x1xf32>
    %1596 = vector.extract_strided_slice %1586 {offsets = [1, 0], sizes = [1, 256], strides = [1, 1]} : vector<4x256xf32> to vector<1x256xf32>
    %1597 = vector.broadcast %1595 : vector<4x1xf32> to vector<4x256xf32>
    %1598 = vector.broadcast %1596 : vector<1x256xf32> to vector<4x256xf32>
    %1599 = arith.mulf %1597, %1598 : vector<4x256xf32>
    %1600 = arith.addf %1594, %1599 : vector<4x256xf32>
    %1601 = vector.extract_strided_slice %1588 {offsets = [0, 2], sizes = [4, 1], strides = [1, 1]} : vector<4x4xf32> to vector<4x1xf32>
    %1602 = vector.extract_strided_slice %1586 {offsets = [2, 0], sizes = [1, 256], strides = [1, 1]} : vector<4x256xf32> to vector<1x256xf32>
    %1603 = vector.broadcast %1601 : vector<4x1xf32> to vector<4x256xf32>
    %1604 = vector.broadcast %1602 : vector<1x256xf32> to vector<4x256xf32>
    %1605 = arith.mulf %1603, %1604 : vector<4x256xf32>
    %1606 = arith.addf %1600, %1605 : vector<4x256xf32>
    %1607 = vector.extract_strided_slice %1588 {offsets = [0, 3], sizes = [4, 1], strides = [1, 1]} : vector<4x4xf32> to vector<4x1xf32>
    %1608 = vector.extract_strided_slice %1586 {offsets = [3, 0], sizes = [1, 256], strides = [1, 1]} : vector<4x256xf32> to vector<1x256xf32>
    %1609 = vector.broadcast %1607 : vector<4x1xf32> to vector<4x256xf32>
    %1610 = vector.broadcast %1608 : vector<1x256xf32> to vector<4x256xf32>
    %1611 = arith.mulf %1609, %1610 : vector<4x256xf32>
    %1612 = arith.addf %1606, %1611 : vector<4x256xf32>
    %1613 = vector.extract_strided_slice %841 {offsets = [0, 34], sizes = [4, 256], strides = [1, 1]} : vector<4x290xf32> to vector<4x256xf32>
    %cst_256 = arith.constant 0.000000e+00 : f32
    %1614 = vector.shape_cast %20 : vector<1x256xi1> to vector<1x256xi1>
    %1615 = vector.broadcast %1614 : vector<1x256xi1> to vector<4x256xi1>
    %1616 = vector.broadcast %cst_256 : f32 to vector<4x256xf32>
    %1617 = arith.select %1615, %1613, %1616 : vector<4x256xi1>, vector<4x256xf32>
    %c8_257 = arith.constant 8 : index
    %c2_258 = arith.constant 2 : index
    %c0_259 = arith.constant 0 : index
    %c0_260 = arith.constant 0 : index
    %1618 = vector.load %arg4[%c8_257, %c2_258, %c0_259, %c0_260] : memref<9x3x4x4xf32, #tpu.memory_space<vmem>>, vector<1x1x4x4xf32>
    %1619 = vector.shape_cast %1618 : vector<1x1x4x4xf32> to vector<4x4xf32>
    %1620 = vector.extract_strided_slice %1619 {offsets = [0, 0], sizes = [4, 1], strides = [1, 1]} : vector<4x4xf32> to vector<4x1xf32>
    %1621 = vector.extract_strided_slice %1617 {offsets = [0, 0], sizes = [1, 256], strides = [1, 1]} : vector<4x256xf32> to vector<1x256xf32>
    %1622 = vector.broadcast %1620 : vector<4x1xf32> to vector<4x256xf32>
    %1623 = vector.broadcast %1621 : vector<1x256xf32> to vector<4x256xf32>
    %1624 = arith.mulf %1622, %1623 : vector<4x256xf32>
    %1625 = arith.addf %1612, %1624 : vector<4x256xf32>
    %1626 = vector.extract_strided_slice %1619 {offsets = [0, 1], sizes = [4, 1], strides = [1, 1]} : vector<4x4xf32> to vector<4x1xf32>
    %1627 = vector.extract_strided_slice %1617 {offsets = [1, 0], sizes = [1, 256], strides = [1, 1]} : vector<4x256xf32> to vector<1x256xf32>
    %1628 = vector.broadcast %1626 : vector<4x1xf32> to vector<4x256xf32>
    %1629 = vector.broadcast %1627 : vector<1x256xf32> to vector<4x256xf32>
    %1630 = arith.mulf %1628, %1629 : vector<4x256xf32>
    %1631 = arith.addf %1625, %1630 : vector<4x256xf32>
    %1632 = vector.extract_strided_slice %1619 {offsets = [0, 2], sizes = [4, 1], strides = [1, 1]} : vector<4x4xf32> to vector<4x1xf32>
    %1633 = vector.extract_strided_slice %1617 {offsets = [2, 0], sizes = [1, 256], strides = [1, 1]} : vector<4x256xf32> to vector<1x256xf32>
    %1634 = vector.broadcast %1632 : vector<4x1xf32> to vector<4x256xf32>
    %1635 = vector.broadcast %1633 : vector<1x256xf32> to vector<4x256xf32>
    %1636 = arith.mulf %1634, %1635 : vector<4x256xf32>
    %1637 = arith.addf %1631, %1636 : vector<4x256xf32>
    %1638 = vector.extract_strided_slice %1619 {offsets = [0, 3], sizes = [4, 1], strides = [1, 1]} : vector<4x4xf32> to vector<4x1xf32>
    %1639 = vector.extract_strided_slice %1617 {offsets = [3, 0], sizes = [1, 256], strides = [1, 1]} : vector<4x256xf32> to vector<1x256xf32>
    %1640 = vector.broadcast %1638 : vector<4x1xf32> to vector<4x256xf32>
    %1641 = vector.broadcast %1639 : vector<1x256xf32> to vector<4x256xf32>
    %1642 = arith.mulf %1640, %1641 : vector<4x256xf32>
    %1643 = arith.addf %1637, %1642 : vector<4x256xf32>
    %c2_261 = arith.constant 2 : index
    %c0_262 = arith.constant 0 : index
    %c0_263 = arith.constant 0 : index
    %1644 = vector.load %arg6[%c2_261, %c0_262, %c0_263] : memref<4x4x1xf32, #tpu.memory_space<vmem>>, vector<1x4x1xf32>
    %1645 = vector.shape_cast %1644 : vector<1x4x1xf32> to vector<4x1xf32>
    %1646 = vector.broadcast %1645 : vector<4x1xf32> to vector<4x256xf32>
    %1647 = arith.addf %1643, %1646 : vector<4x256xf32>
    %cst_264 = arith.constant 0.000000e+00 : f32
    %1648 = vector.broadcast %cst_264 : f32 to vector<4x256xf32>
    %1649 = arith.maximumf %1647, %1648 : vector<4x256xf32>
    %cst_265 = arith.constant 0.000000e+00 : f32
    %1650 = vector.broadcast %cst_265 : f32 to vector<4x256xf32>
    %c0_266 = arith.constant 0 : index
    %c0_267 = arith.constant 0 : index
    %c0_268 = arith.constant 0 : index
    %1651 = vector.load %arg5[%c0_266, %c0_267, %c0_268] : memref<4x4x4xf32, #tpu.memory_space<vmem>>, vector<1x4x4xf32>
    %1652 = vector.shape_cast %1651 : vector<1x4x4xf32> to vector<4x4xf32>
    %1653 = vector.extract_strided_slice %1652 {offsets = [0, 0], sizes = [4, 1], strides = [1, 1]} : vector<4x4xf32> to vector<4x1xf32>
    %1654 = vector.extract_strided_slice %23 {offsets = [0, 0], sizes = [1, 256], strides = [1, 1]} : vector<4x256xf32> to vector<1x256xf32>
    %1655 = vector.broadcast %1653 : vector<4x1xf32> to vector<4x256xf32>
    %1656 = vector.broadcast %1654 : vector<1x256xf32> to vector<4x256xf32>
    %1657 = arith.mulf %1655, %1656 : vector<4x256xf32>
    %1658 = arith.addf %1650, %1657 : vector<4x256xf32>
    %1659 = vector.extract_strided_slice %1652 {offsets = [0, 1], sizes = [4, 1], strides = [1, 1]} : vector<4x4xf32> to vector<4x1xf32>
    %1660 = vector.extract_strided_slice %23 {offsets = [1, 0], sizes = [1, 256], strides = [1, 1]} : vector<4x256xf32> to vector<1x256xf32>
    %1661 = vector.broadcast %1659 : vector<4x1xf32> to vector<4x256xf32>
    %1662 = vector.broadcast %1660 : vector<1x256xf32> to vector<4x256xf32>
    %1663 = arith.mulf %1661, %1662 : vector<4x256xf32>
    %1664 = arith.addf %1658, %1663 : vector<4x256xf32>
    %1665 = vector.extract_strided_slice %1652 {offsets = [0, 2], sizes = [4, 1], strides = [1, 1]} : vector<4x4xf32> to vector<4x1xf32>
    %1666 = vector.extract_strided_slice %23 {offsets = [2, 0], sizes = [1, 256], strides = [1, 1]} : vector<4x256xf32> to vector<1x256xf32>
    %1667 = vector.broadcast %1665 : vector<4x1xf32> to vector<4x256xf32>
    %1668 = vector.broadcast %1666 : vector<1x256xf32> to vector<4x256xf32>
    %1669 = arith.mulf %1667, %1668 : vector<4x256xf32>
    %1670 = arith.addf %1664, %1669 : vector<4x256xf32>
    %1671 = vector.extract_strided_slice %1652 {offsets = [0, 3], sizes = [4, 1], strides = [1, 1]} : vector<4x4xf32> to vector<4x1xf32>
    %1672 = vector.extract_strided_slice %23 {offsets = [3, 0], sizes = [1, 256], strides = [1, 1]} : vector<4x256xf32> to vector<1x256xf32>
    %1673 = vector.broadcast %1671 : vector<4x1xf32> to vector<4x256xf32>
    %1674 = vector.broadcast %1672 : vector<1x256xf32> to vector<4x256xf32>
    %1675 = arith.mulf %1673, %1674 : vector<4x256xf32>
    %1676 = arith.addf %1670, %1675 : vector<4x256xf32>
    %c1_269 = arith.constant 1 : index
    %c0_270 = arith.constant 0 : index
    %c0_271 = arith.constant 0 : index
    %1677 = vector.load %arg5[%c1_269, %c0_270, %c0_271] : memref<4x4x4xf32, #tpu.memory_space<vmem>>, vector<1x4x4xf32>
    %1678 = vector.shape_cast %1677 : vector<1x4x4xf32> to vector<4x4xf32>
    %1679 = vector.extract_strided_slice %1678 {offsets = [0, 0], sizes = [4, 1], strides = [1, 1]} : vector<4x4xf32> to vector<4x1xf32>
    %1680 = vector.extract_strided_slice %298 {offsets = [0, 0], sizes = [1, 256], strides = [1, 1]} : vector<4x256xf32> to vector<1x256xf32>
    %1681 = vector.broadcast %1679 : vector<4x1xf32> to vector<4x256xf32>
    %1682 = vector.broadcast %1680 : vector<1x256xf32> to vector<4x256xf32>
    %1683 = arith.mulf %1681, %1682 : vector<4x256xf32>
    %1684 = arith.addf %1676, %1683 : vector<4x256xf32>
    %1685 = vector.extract_strided_slice %1678 {offsets = [0, 1], sizes = [4, 1], strides = [1, 1]} : vector<4x4xf32> to vector<4x1xf32>
    %1686 = vector.extract_strided_slice %298 {offsets = [1, 0], sizes = [1, 256], strides = [1, 1]} : vector<4x256xf32> to vector<1x256xf32>
    %1687 = vector.broadcast %1685 : vector<4x1xf32> to vector<4x256xf32>
    %1688 = vector.broadcast %1686 : vector<1x256xf32> to vector<4x256xf32>
    %1689 = arith.mulf %1687, %1688 : vector<4x256xf32>
    %1690 = arith.addf %1684, %1689 : vector<4x256xf32>
    %1691 = vector.extract_strided_slice %1678 {offsets = [0, 2], sizes = [4, 1], strides = [1, 1]} : vector<4x4xf32> to vector<4x1xf32>
    %1692 = vector.extract_strided_slice %298 {offsets = [2, 0], sizes = [1, 256], strides = [1, 1]} : vector<4x256xf32> to vector<1x256xf32>
    %1693 = vector.broadcast %1691 : vector<4x1xf32> to vector<4x256xf32>
    %1694 = vector.broadcast %1692 : vector<1x256xf32> to vector<4x256xf32>
    %1695 = arith.mulf %1693, %1694 : vector<4x256xf32>
    %1696 = arith.addf %1690, %1695 : vector<4x256xf32>
    %1697 = vector.extract_strided_slice %1678 {offsets = [0, 3], sizes = [4, 1], strides = [1, 1]} : vector<4x4xf32> to vector<4x1xf32>
    %1698 = vector.extract_strided_slice %298 {offsets = [3, 0], sizes = [1, 256], strides = [1, 1]} : vector<4x256xf32> to vector<1x256xf32>
    %1699 = vector.broadcast %1697 : vector<4x1xf32> to vector<4x256xf32>
    %1700 = vector.broadcast %1698 : vector<1x256xf32> to vector<4x256xf32>
    %1701 = arith.mulf %1699, %1700 : vector<4x256xf32>
    %1702 = arith.addf %1696, %1701 : vector<4x256xf32>
    %c2_272 = arith.constant 2 : index
    %c0_273 = arith.constant 0 : index
    %c0_274 = arith.constant 0 : index
    %1703 = vector.load %arg5[%c2_272, %c0_273, %c0_274] : memref<4x4x4xf32, #tpu.memory_space<vmem>>, vector<1x4x4xf32>
    %1704 = vector.shape_cast %1703 : vector<1x4x4xf32> to vector<4x4xf32>
    %1705 = vector.extract_strided_slice %1704 {offsets = [0, 0], sizes = [4, 1], strides = [1, 1]} : vector<4x4xf32> to vector<4x1xf32>
    %1706 = vector.extract_strided_slice %840 {offsets = [0, 0], sizes = [1, 256], strides = [1, 1]} : vector<4x256xf32> to vector<1x256xf32>
    %1707 = vector.broadcast %1705 : vector<4x1xf32> to vector<4x256xf32>
    %1708 = vector.broadcast %1706 : vector<1x256xf32> to vector<4x256xf32>
    %1709 = arith.mulf %1707, %1708 : vector<4x256xf32>
    %1710 = arith.addf %1702, %1709 : vector<4x256xf32>
    %1711 = vector.extract_strided_slice %1704 {offsets = [0, 1], sizes = [4, 1], strides = [1, 1]} : vector<4x4xf32> to vector<4x1xf32>
    %1712 = vector.extract_strided_slice %840 {offsets = [1, 0], sizes = [1, 256], strides = [1, 1]} : vector<4x256xf32> to vector<1x256xf32>
    %1713 = vector.broadcast %1711 : vector<4x1xf32> to vector<4x256xf32>
    %1714 = vector.broadcast %1712 : vector<1x256xf32> to vector<4x256xf32>
    %1715 = arith.mulf %1713, %1714 : vector<4x256xf32>
    %1716 = arith.addf %1710, %1715 : vector<4x256xf32>
    %1717 = vector.extract_strided_slice %1704 {offsets = [0, 2], sizes = [4, 1], strides = [1, 1]} : vector<4x4xf32> to vector<4x1xf32>
    %1718 = vector.extract_strided_slice %840 {offsets = [2, 0], sizes = [1, 256], strides = [1, 1]} : vector<4x256xf32> to vector<1x256xf32>
    %1719 = vector.broadcast %1717 : vector<4x1xf32> to vector<4x256xf32>
    %1720 = vector.broadcast %1718 : vector<1x256xf32> to vector<4x256xf32>
    %1721 = arith.mulf %1719, %1720 : vector<4x256xf32>
    %1722 = arith.addf %1716, %1721 : vector<4x256xf32>
    %1723 = vector.extract_strided_slice %1704 {offsets = [0, 3], sizes = [4, 1], strides = [1, 1]} : vector<4x4xf32> to vector<4x1xf32>
    %1724 = vector.extract_strided_slice %840 {offsets = [3, 0], sizes = [1, 256], strides = [1, 1]} : vector<4x256xf32> to vector<1x256xf32>
    %1725 = vector.broadcast %1723 : vector<4x1xf32> to vector<4x256xf32>
    %1726 = vector.broadcast %1724 : vector<1x256xf32> to vector<4x256xf32>
    %1727 = arith.mulf %1725, %1726 : vector<4x256xf32>
    %1728 = arith.addf %1722, %1727 : vector<4x256xf32>
    %c3_275 = arith.constant 3 : index
    %c0_276 = arith.constant 0 : index
    %c0_277 = arith.constant 0 : index
    %1729 = vector.load %arg5[%c3_275, %c0_276, %c0_277] : memref<4x4x4xf32, #tpu.memory_space<vmem>>, vector<1x4x4xf32>
    %1730 = vector.shape_cast %1729 : vector<1x4x4xf32> to vector<4x4xf32>
    %1731 = vector.extract_strided_slice %1730 {offsets = [0, 0], sizes = [4, 1], strides = [1, 1]} : vector<4x4xf32> to vector<4x1xf32>
    %1732 = vector.extract_strided_slice %1649 {offsets = [0, 0], sizes = [1, 256], strides = [1, 1]} : vector<4x256xf32> to vector<1x256xf32>
    %1733 = vector.broadcast %1731 : vector<4x1xf32> to vector<4x256xf32>
    %1734 = vector.broadcast %1732 : vector<1x256xf32> to vector<4x256xf32>
    %1735 = arith.mulf %1733, %1734 : vector<4x256xf32>
    %1736 = arith.addf %1728, %1735 : vector<4x256xf32>
    %1737 = vector.extract_strided_slice %1730 {offsets = [0, 1], sizes = [4, 1], strides = [1, 1]} : vector<4x4xf32> to vector<4x1xf32>
    %1738 = vector.extract_strided_slice %1649 {offsets = [1, 0], sizes = [1, 256], strides = [1, 1]} : vector<4x256xf32> to vector<1x256xf32>
    %1739 = vector.broadcast %1737 : vector<4x1xf32> to vector<4x256xf32>
    %1740 = vector.broadcast %1738 : vector<1x256xf32> to vector<4x256xf32>
    %1741 = arith.mulf %1739, %1740 : vector<4x256xf32>
    %1742 = arith.addf %1736, %1741 : vector<4x256xf32>
    %1743 = vector.extract_strided_slice %1730 {offsets = [0, 2], sizes = [4, 1], strides = [1, 1]} : vector<4x4xf32> to vector<4x1xf32>
    %1744 = vector.extract_strided_slice %1649 {offsets = [2, 0], sizes = [1, 256], strides = [1, 1]} : vector<4x256xf32> to vector<1x256xf32>
    %1745 = vector.broadcast %1743 : vector<4x1xf32> to vector<4x256xf32>
    %1746 = vector.broadcast %1744 : vector<1x256xf32> to vector<4x256xf32>
    %1747 = arith.mulf %1745, %1746 : vector<4x256xf32>
    %1748 = arith.addf %1742, %1747 : vector<4x256xf32>
    %1749 = vector.extract_strided_slice %1730 {offsets = [0, 3], sizes = [4, 1], strides = [1, 1]} : vector<4x4xf32> to vector<4x1xf32>
    %1750 = vector.extract_strided_slice %1649 {offsets = [3, 0], sizes = [1, 256], strides = [1, 1]} : vector<4x256xf32> to vector<1x256xf32>
    %1751 = vector.broadcast %1749 : vector<4x1xf32> to vector<4x256xf32>
    %1752 = vector.broadcast %1750 : vector<1x256xf32> to vector<4x256xf32>
    %1753 = arith.mulf %1751, %1752 : vector<4x256xf32>
    %1754 = arith.addf %1748, %1753 : vector<4x256xf32>
    %c3_278 = arith.constant 3 : index
    %c0_279 = arith.constant 0 : index
    %c0_280 = arith.constant 0 : index
    %1755 = vector.load %arg6[%c3_278, %c0_279, %c0_280] : memref<4x4x1xf32, #tpu.memory_space<vmem>>, vector<1x4x1xf32>
    %1756 = vector.shape_cast %1755 : vector<1x4x1xf32> to vector<4x1xf32>
    %1757 = vector.broadcast %1756 : vector<4x1xf32> to vector<4x256xf32>
    %1758 = arith.addf %1754, %1757 : vector<4x256xf32>
    %1759 = arith.addf %1758, %1649 : vector<4x256xf32>
    %c0_281 = arith.constant 0 : index
    %c0_282 = arith.constant 0 : index
    %c0_283 = arith.constant 0 : index
    %1760 = vector.load %arg7[%c0_281, %c0_282, %c0_283] : memref<1x4x256xf32, #tpu.memory_space<vmem>>, vector<1x4x256xf32>
    %1761 = vector.shape_cast %1760 : vector<1x4x256xf32> to vector<4x256xf32>
    %1762 = vector.shape_cast %1759 : vector<4x256xf32> to vector<1x4x256xf32>
    tpu.vector_store %arg7[%c0_281, %c0_282, %c0_283], %1762 {strides = array<i32>} : memref<1x4x256xf32, #tpu.memory_space<vmem>>, vector<1x4x256xf32>,
    return
  }
  func.func @transform_0(%arg0: i32) -> (i32, i32, i32) {
    %c0_i32 = arith.constant 0 : i32
    %c0_i32_0 = arith.constant 0 : i32
    %c0_i32_1 = arith.constant 0 : i32
    return %arg0, %c0_i32, %c0_i32_0 : i32, i32, i32
  }
  func.func @transform_1(%arg0: i32) -> (i32, i32, i32, i32) {
    %c0_i32 = arith.constant 0 : i32
    %c0_i32_0 = arith.constant 0 : i32
    %c0_i32_1 = arith.constant 0 : i32
    %c0_i32_2 = arith.constant 0 : i32
    %c0_i32_3 = arith.constant 0 : i32
    return %c0_i32, %c0_i32_0, %c0_i32_1, %c0_i32_2 : i32, i32, i32, i32
  }
  func.func @transform_2(%arg0: i32) -> (i32, i32, i32, i32) {
    %c0_i32 = arith.constant 0 : i32
    %c0_i32_0 = arith.constant 0 : i32
    %c0_i32_1 = arith.constant 0 : i32
    %c0_i32_2 = arith.constant 0 : i32
    %c0_i32_3 = arith.constant 0 : i32
    return %c0_i32, %c0_i32_0, %c0_i32_1, %c0_i32_2 : i32, i32, i32, i32
  }
  func.func @transform_3(%arg0: i32) -> (i32, i32, i32, i32) {
    %c0_i32 = arith.constant 0 : i32
    %c0_i32_0 = arith.constant 0 : i32
    %c0_i32_1 = arith.constant 0 : i32
    %c0_i32_2 = arith.constant 0 : i32
    %c0_i32_3 = arith.constant 0 : i32
    return %c0_i32, %c0_i32_0, %c0_i32_1, %c0_i32_2 : i32, i32, i32, i32
  }
  func.func @transform_4(%arg0: i32) -> (i32, i32, i32) {
    %c0_i32 = arith.constant 0 : i32
    %c0_i32_0 = arith.constant 0 : i32
    %c0_i32_1 = arith.constant 0 : i32
    %c0_i32_2 = arith.constant 0 : i32
    return %c0_i32, %c0_i32_0, %c0_i32_1 : i32, i32, i32
  }
  func.func @transform_5(%arg0: i32) -> (i32, i32, i32) {
    %c0_i32 = arith.constant 0 : i32
    %c0_i32_0 = arith.constant 0 : i32
    %c0_i32_1 = arith.constant 0 : i32
    %c0_i32_2 = arith.constant 0 : i32
    return %c0_i32, %c0_i32_0, %c0_i32_1 : i32, i32, i32
  }
  func.func @transform_6(%arg0: i32) -> (i32, i32, i32) {
    %c0_i32 = arith.constant 0 : i32
    %c0_i32_0 = arith.constant 0 : i32
    %c0_i32_1 = arith.constant 0 : i32
    return %arg0, %c0_i32, %c0_i32_0 : i32, i32, i32
  }
}

</mosaic_0001>

<bundles_post_ra>
// kernel: rdb_pallas.1
= control target key start
LH: loop header
LB: loop body
LE: loop exit
PB: predicated region body
PF: predicated region fallthrough
CT: control target
= control target key end

     0   :  { %s4242_s21 = smov 0   ;;  %s7661_s0 = inlined_call_operand.vmem [shape: f32[2,4,256], index: 0, kind: input, shape index: {}]   ;;  %s7662_s1 = inlined_call_operand.vmem [shape: f32[9,1,4,4], index: 1, kind: input, shape index: {}]   ;;  %s7663_s2 = inlined_call_operand.vmem [shape: f32[9,2,4,4], index: 2, kind: input, shape index: {}]   ;;  %s7664_s3 = inlined_call_operand.vmem [shape: f32[9,3,4,4], index: 3, kind: input, shape index: {}]   ;;  %s7665_s4 = inlined_call_operand.vmem [shape: f32[4,4,4], index: 4, kind: input, shape index: {}]   ;;  %s7666_s5 = inlined_call_operand.vmem [shape: f32[4,4,1], index: 5, kind: input, shape index: {}]   ;;  %s7667_s6 = inlined_call_operand.vmem [shape: f32[2,4,256], index: 6, kind: output, shape index: {}]  }
   0x1 LB: > { %s3898_s22 = sadd.s32 4294967295, %s4192_s21   ;;  %p3902_p0 = scmp.ge.s32.totalorder %s4192_s21, 1  ;;  %s4192_s21 = sphi %s4242_s21, %s16_s21  }
   0x2   : > { %p212_p1 = scmp.lt.s32.totalorder %s4192_s21, 3 }
   0x4   : > { %p213_p2 = pnand %p3902_p0, %p212_p1 }
   0x6   : > { %216 = sbr.rel (%p213_p2) target bundleno = 8448 (0x2100), region = 44 }
   0xb   : > { %v305_v0 = vld [vmem:[%s7662_s1] sm:$0xf]  ;;  %v7670_v1 = vmov 2   ;;  %v7672_v2 = vmov 0   ;;  %p242_p3 = scmp.lt.s32.totalorder %s3898_s22, 1  ;;  %v7676_v4 = vmov 3  }
   0xc   : > { %3991 = vset.pattern.permute.xlu2 %v7670_v1  ;;  %3989 = vset.pattern.permute.xlu1 %v7672_v2  ;;  %v7668_v5 = vmov 1   ;;  %s4198_s29 = smov 17   ;;  %v4273_v7 = vld [vmem:[%s7662_s1 + $0x8] sm:$0xf]  ;;  %v3907_v8 = vld [vmem:[%s7662_s1 + $0x4] sm:$0xf] }
   0xd   : > { %328 = vperm.xlu2 %3991, %v305_v0   ;;  %308 = vperm.xlu1 %3989, %v305_v0   ;;  %s8833_s22 = smov (!%p242_p3, %s3898_s22), 1  ;;  %v3909_v10 = vld [vmem:[%s7662_s1 + $0xc] sm:$0xf]  ;;  %v4294_v11 = vld [vmem:[%s7662_s1 + $0x10] sm:$0xf]  ;;  %vm292_vm0 = vcmask 138240  }
   0xe   : > { %3993 = vset.pattern.permute.xlu0 %v7672_v2  ;;  %s3966_s25 = sshll.u32 %s8833_s22, 3  ;;  %s4199_s14 = smov 126   ;;  %vm463_vm2 = vcmask 1031168   ;;  %vm369_vm4 = vcmask 1039360   ;;  %vm519_vm5 = vcmask 916480   ;;  %vm588_vm6 = vcmask 908288  }
   0xf   : > { %s246_s28 = scalar_lea.vmem %s7661_s0, %s3966_s25  ;;  %s4200_s15 = smov 112   ;;  %vm667_vm7 = vcmask 900096   ;;  %vm723_vm8 = vcmask 785408   ;;  %vm871_vm10 = vcmask 769024   ;;  %vm792_vm11 = vcmask 777216  }
  0x10   : > { %v4264_v3 = vld [vmem:[%s246_s28] sm:$0xff]  ;;  %s4201_s16 = smov 127   ;;  %s4202_s17 = smov 111   ;;  %vm3839_vm13 = vcmask 1043456  }
  0x11   : > { %8046 = vst [vmem:[#allocation2_spill] sm:$0xff] %v4264_v3  ;;  %s4203_s18 = smov 110   ;;  %s4204_s23 = smov 96  }
  0x12   : > { %285 = vst [vmem:[#allocation1] ss:$2 sm:$0xff] %v4264_v3  ;;  %s4205_s30 = smov 95   ;;  %s4206_s7 = smov 94  }
  0x15   : > { %3992 = vset.pattern.permute.xlu2 %v7676_v4  ;;  %3990 = vset.pattern.permute.xlu1 %v7668_v5 }
  0x16   : > { %338 = vperm.xlu2 %3992, %v305_v0   ;;  %318 = vperm.xlu1 %3990, %v305_v0  }
  0x19   : > { %v286_v6 = vld.sshfl [vmem:[#allocation1] sm:$0xff pattern:$0x75316420]  ;;  %v287_v9 = vld.sshfl [vmem:[#allocation1 + $0x8] sm:$0xff pattern:$0x75316420] }
  0x1a   : > { %288 = vrot.lane.b32.xlu0 %v286_v6, %s4198_s29 }
  0x1e   : > { %3994 = vset.pattern.permute.xlu2 %v7668_v5  ;;  %484 = vperm.xlu1 %3990, %v4273_v7  }
  0x1f   : > { %377 = vperm.xlu2 %3994, %v3907_v8  }
  0x22   : > { %290 = vrot.lane.b32.xlu0 %v287_v9, %s4198_s29 }
  0x26   : > { %3998 = vset.pattern.permute.xlu1 %v7676_v4 }
  0x27   : > { %3996 = vset.pattern.permute.xlu2 %v7676_v4  ;;  %504 = vperm.xlu1 %3998, %v4273_v7  }
  0x28   : > { %427 = vperm.xlu2 %3996, %v3907_v8  }
  0x2a   : > { %351 = vperm.xlu0 %3993, %v3907_v8  }
  0x2f   : > { %4000 = vset.pattern.permute.xlu1 %v7670_v1 }
  0x30   : > { %3997 = vset.pattern.permute.xlu2 %v7670_v1  ;;  %550 = vperm.xlu1 %4000, %v3909_v10  }
  0x31   : > { %494 = vperm.xlu2 %3997, %v4273_v7  }
  0x32   : > { %3995 = vset.pattern.permute.xlu0 %v7670_v1 }
  0x33   : > { %402 = vperm.xlu0 %3995, %v3907_v8  }
  0x38   : > { %4002 = vset.pattern.permute.xlu1 %v7672_v2 }
  0x39   : > { %3999 = vset.pattern.permute.xlu2 %v7672_v2  ;;  %573 = vperm.xlu1 %4002, %v4294_v11  }
  0x3a   : > { %530 = vperm.xlu2 %3999, %v3909_v10  }
  0x3b   : > { %618 = vperm.xlu0 %3995, %v4294_v11  }
  0x41   : > { %4006 = vset.pattern.permute.xlu1 %v7668_v5 }
  0x42   : > { %4001 = vset.pattern.permute.xlu2 %v7676_v4 }
  0x43   : > { %560 = vperm.xlu2 %4001, %v3909_v10   ;;  %4004 = vset.pattern.permute.xlu0 %v7668_v5 }
  0x44   : > { %540 = vperm.xlu0 %4004, %v3909_v10  }
  0x4b   : > { %4003 = vset.pattern.permute.xlu2 %v7668_v5 }
  0x4c   : > { %596 = vperm.xlu2 %4003, %v4294_v11  }
  0x54   : > { %4005 = vset.pattern.permute.xlu2 %v7676_v4 }
  0x67   : > { %v4306_v12 = vpop.permute.xlu2 %328 }
  0x70   : > { %v4308_v13 = vpop.permute.xlu2 %338 }
  0x79   : > { %v378_v15 = vpop.permute.xlu2 %377 }
  0x7f   : > { %v4310_v14 = vpop.permute.xlu1 %308 }
  0x82   : > { %v4314_v17 = vpop.permute.xlu2 %427 }
  0x88   : > { %v4312_v16 = vpop.permute.xlu1 %318 }
  0x8b   : > { %v4323_v21 = vpop.permute.xlu2 %494 }
  0x8c   : > { %v289_v18 = vpop.permute.xlu0 %288 }
  0x8d   : > { %v4317_v19 = vsel %vm292_vm0, 0.0, %v289_v18 }
  0x8e   : > { %457 = vrot.lane.b32.xlu0 %v4317_v19, %s4199_s14  ;;  %v4338_v25 = vperm.slane %v4317_v19, 1  ;;  %v4351_v29 = vperm.slane %v4317_v19, 3  ;;  %v4359_v33 = vperm.slane %v4317_v19, 0  ;;  %v4398_v52 = vperm.slane %v4317_v19, 2 }
  0x90   : > { %v4321_v20 = vpop.permute.xlu1 %484  ;;  %8047 = vst [vmem:[#allocation3_spill] sm:$0xff] %v4338_v25  ;;  %v383_v27 = vmul.f32 %v4338_v25, %v378_v15  ;;  %v433_v34 = vmul.f32 %v4351_v29, %v4314_v17 }
  0x91   : > { %8048 = vst [vmem:[#allocation4_spill] sm:$0xff] %v4351_v29 }
  0x92   : > { %8050 = vst [vmem:[#allocation6_spill] sm:$0xff] %v4359_v33 }
  0x93   : > { %8056 = vst [vmem:[#allocation12_spill] sm:$0xff] %v4398_v52 }
  0x94   : > { %v291_v22 = vpop.permute.xlu0 %290  ;;  %v4343_v28 = vpop.permute.xlu2 %530 }
  0x95   : > { %v4326_v23 = vsel %vm292_vm0, %v289_v18, %v291_v22  ;;  %v4329_v24 = vsel %vm292_vm0, %v291_v22, 0.0 }
  0x96   : > { %461 = vrot.lane.b32.xlu2 %v4329_v24, %s4199_s14  ;;  %515 = vrot.lane.b32.xlu0 %v4326_v23, %s4200_s15  ;;  %v4356_v32 = vperm.slane %v4326_v23, 0  ;;  %v4371_v38 = vperm.slane %v4329_v24, 1  ;;  %v4374_v40 = vperm.slane %v4329_v24, 0  ;;  %v4383_v44 = vperm.slane %v4326_v23, 1 }
  0x97   : > { %459 = vrot.lane.b32.xlu1 %v4326_v23, %s4199_s14  ;;  %v4386_v47 = vperm.slane %v4326_v23, 2  ;;  %v4395_v51 = vperm.slane %v4329_v24, 3  ;;  %v4406_v55 = vperm.slane %v4329_v24, 2  ;;  %v4413_v58 = vperm.slane %v4326_v23, 3 }
  0x98   : > { %8049 = vst [vmem:[#allocation5_spill] sm:$0xff] %v4356_v32  ;;  %v385_v42 = vmul.f32 %v4371_v38, %v378_v15  ;;  %v384_v50 = vmul.f32 %v4383_v44, %v378_v15 }
  0x99   : > { %v4340_v26 = vpop.permute.xlu1 %504  ;;  %8051 = vst [vmem:[#allocation7_spill] sm:$0xff] %v4371_v38  ;;  %v435_v53 = vmul.f32 %v4395_v51, %v4314_v17  ;;  %v434_v60 = vmul.f32 %v4413_v58, %v4314_v17 }
  0x9a   : > { %8052 = vst [vmem:[#allocation8_spill] sm:$0xff] %v4374_v40 }
  0x9b   : > { %8053 = vst [vmem:[#allocation9_spill] sm:$0xff] %v4383_v44 }
  0x9c   : > { %v352_v30 = vpop.permute.xlu0 %351  ;;  %8054 = vst [vmem:[#allocation10_spill] sm:$0xff] %v4386_v47 }
  0x9d   : > { %v358_v35 = vmul.f32 %v4356_v32, %v352_v30  ;;  %v357_v36 = vmul.f32 %v4359_v33, %v352_v30  ;;  %v4367_v37 = vpop.permute.xlu2 %560  ;;  %v359_v43 = vmul.f32 %v4374_v40, %v352_v30  ;;  %8055 = vst [vmem:[#allocation11_spill] sm:$0xff] %v4395_v51 }
  0x9e   : > { %513 = vrot.lane.b32.xlu2 %v4317_v19, %s4200_s15  ;;  %389 = vrot.lane.b32.xlu0 %v383_v27, %s4201_s16  ;;  %8057 = vst [vmem:[#allocation13_spill] sm:$0xff] %v4406_v55 }
  0x9f   : > { %517 = vrot.lane.b32.xlu1 %v4329_v24, %s4200_s15  ;;  %8058 = vst [vmem:[#allocation14_spill] sm:$0xff] %v4413_v58 }
  0xa2   : > { %v4353_v31 = vpop.permute.xlu1 %550 }
  0xa5   : > { %v403_v45 = vpop.permute.xlu0 %402 }
  0xa6   : > { %439 = vrot.lane.b32.xlu0 %v433_v34, %s4201_s16  ;;  %365 = vrot.lane.b32.xlu2 %v358_v35, %s4201_s16  ;;  %v597_v46 = vpop.permute.xlu2 %596  ;;  %v409_v49 = vmul.f32 %v4386_v47, %v403_v45  ;;  %v408_v54 = vmul.f32 %v4398_v52, %v403_v45  ;;  %v410_v57 = vmul.f32 %v4406_v55, %v403_v45 }
  0xa7   : > { %363 = vrot.lane.b32.xlu1 %v357_v36, %s4201_s16  ;;  %v599_v48 = vmul.f32 %v597_v46, %v4338_v25  ;;  %v601_v59 = vmul.f32 %v597_v46, %v4371_v38  ;;  %v600_v0 = vmul.f32 %v597_v46, %v4383_v44  ;;  %v3912_v46 = vld [vmem:[%s7662_s1 + $0x18] sm:$0xf] }
  0xab   : > { %v574_v39 = vpop.permute.xlu1 %573 }
  0xac   : > { %v577_v41 = vmul.f32 %v574_v39, %v4356_v32  ;;  %v576_v56 = vmul.f32 %v574_v39, %v4359_v33  ;;  %v578_v63 = vmul.f32 %v574_v39, %v4374_v40 }
  0xad   : > { %v619_v61 = vpop.permute.xlu0 %618 }
  0xae   : > { %584 = vrot.lane.b32.xlu0 %v577_v41, %s4202_s17  ;;  %393 = vrot.lane.b32.xlu2 %v385_v42, %s4201_s16  ;;  %v622_v62 = vmul.f32 %v619_v61, %v4386_v47  ;;  %v621_v6 = vmul.f32 %v619_v61, %v4398_v52  ;;  %v623_v8 = vmul.f32 %v619_v61, %v4406_v55 }
  0xaf   : > { %367 = vrot.lane.b32.xlu1 %v359_v43, %s4201_s16  ;;  %v4469_v43 = vld [vmem:[%s7662_s1 + $0x14] sm:$0xf] }
  0xb6   : > { %605 = vrot.lane.b32.xlu0 %v599_v48, %s4202_s17  ;;  %416 = vrot.lane.b32.xlu2 %v409_v49, %s4201_s16 }
  0xb7   : > { %391 = vrot.lane.b32.xlu1 %v384_v50, %s4201_s16 }
  0xbe   : > { %443 = vrot.lane.b32.xlu2 %v435_v53, %s4201_s16  ;;  %v4499_v53 = vld [vmem:[%s7662_s1 + $0x1c] sm:$0xf] }
  0xbf   : > { %414 = vrot.lane.b32.xlu1 %v408_v54, %s4201_s16 }
  0xc6   : > { %582 = vrot.lane.b32.xlu2 %v576_v56, %s4202_s17 }
  0xc7   : > { %418 = vrot.lane.b32.xlu1 %v410_v57, %s4201_s16 }
  0xce   : > { %609 = vrot.lane.b32.xlu2 %v601_v59, %s4202_s17 }
  0xcf   : > { %441 = vrot.lane.b32.xlu1 %v434_v60, %s4201_s16 }
  0xd6   : > { %629 = vrot.lane.b32.xlu2 %v622_v62, %s4202_s17 }
  0xd7   : > { %586 = vrot.lane.b32.xlu1 %v578_v63, %s4202_s17 }
  0xde   : > { %640 = vperm.xlu2 %4005, %v4294_v11  }
  0xdf   : > { %607 = vrot.lane.b32.xlu1 %v600_v0, %s4202_s17 }
  0xe6   : > { %4007 = vset.pattern.permute.xlu2 %v7670_v1 }
  0xe7   : > { %627 = vrot.lane.b32.xlu1 %v621_v6, %s4202_s17 }
  0xef   : > { %631 = vrot.lane.b32.xlu1 %v623_v8, %s4202_s17 }
  0xf0   : > { %v4432_v9 = vpop.permute.xlu2 %461 }
  0xf8   : > { %v4434_v10 = vpop.permute.xlu2 %513 }
  0xf9   : > { %8059 = vst [vmem:[#allocation15_spill] sm:$0xff] %v4434_v10  ;;  %v4556_v10 = vpop.permute.xlu0 %540 }
 0x100   : > { %v4436_v15 = vpop.permute.xlu2 %365 }
 0x108   : > { %v4438_v17 = vpop.permute.xlu2 %393 }
 0x109   : > { %v4450_v34 = vpop.permute.xlu1 %459 }
 0x110   : > { %v4440_v11 = vpop.permute.xlu2 %416 }
 0x111   : > { %v4458_v42 = vpop.permute.xlu1 %517 }
 0x118   : > { %v4442_v18 = vpop.permute.xlu2 %443 }
 0x119   : > { %v4474_v45 = vpop.permute.xlu1 %363 }
 0x11a   : > { %8061 = vst [vmem:[#allocation17_spill] sm:$0xff] %v4474_v45 }
 0x120   : > { %v4444_v22 = vpop.permute.xlu2 %582 }
 0x121   : > { %8060 = vst [vmem:[#allocation16_spill] sm:$0xff] %v4444_v22  ;;  %v4485_v48 = vpop.permute.xlu1 %367 }
 0x128   : > { %v4446_v27 = vpop.permute.xlu2 %609 }
 0x129   : > { %v4491_v49 = vpop.permute.xlu1 %391 }
 0x130   : > { %v4448_v30 = vpop.permute.xlu2 %629 }
 0x131   : > { %v4494_v50 = vpop.permute.xlu1 %414 }
 0x132   : > { %8062 = vst [vmem:[#allocation18_spill] sm:$0xff] %v4494_v50 }
 0x138   : > { %v641_v35 = vpop.permute.xlu2 %640 }
 0x139   : > { %v645_v36 = vmul.f32 %v641_v35, %v4395_v51  ;;  %v643_v39 = vmul.f32 %v641_v35, %v4351_v29  ;;  %v644_v41 = vmul.f32 %v641_v35, %v4413_v58  ;;  %v4504_v54 = vpop.permute.xlu1 %418 }
 0x13b   : > { %653 = vrot.lane.b32.xlu2 %v645_v36, %s4202_s17  ;;  %649 = vrot.lane.b32.xlu0 %v643_v39, %s4202_s17 }
 0x13c   : > { %651 = vrot.lane.b32.xlu1 %v644_v41, %s4202_s17 }
 0x141   : > { %v4507_v56 = vpop.permute.xlu1 %441 }
 0x143   : > { %665 = vrot.lane.b32.xlu2 %v4329_v24, %s4203_s18  ;;  %661 = vrot.lane.b32.xlu0 %v4317_v19, %s4203_s18 }
 0x144   : > { %663 = vrot.lane.b32.xlu1 %v4326_v23, %s4203_s18 }
 0x149   : > { %v4509_v57 = vpop.permute.xlu1 %586 }
 0x14b   : > { %698 = vperm.xlu2 %4007, %v4469_v43   ;;  %719 = vrot.lane.b32.xlu0 %v4326_v23, %s4204_s23 }
 0x14c   : > { %688 = vperm.xlu1 %4006, %v4469_v43  }
 0x151   : > { %v4511_v59 = vpop.permute.xlu1 %607 }
 0x153   : > { %717 = vrot.lane.b32.xlu2 %v4317_v19, %s4204_s23  ;;  %744 = vperm.xlu0 %4004, %v3912_v46  }
 0x154   : > { %4008 = vset.pattern.permute.xlu1 %v7676_v4  ;;  %4009 = vset.pattern.permute.xlu2 %v7672_v2 }
 0x155   : > { %708 = vperm.xlu1 %4008, %v4469_v43  }
 0x159   : > { %v4513_v60 = vpop.permute.xlu1 %627 }
 0x15a   : > { %8063 = vst [vmem:[#allocation19_spill] sm:$0xff] %v4513_v60 }
 0x15b   : > { %734 = vperm.xlu2 %4009, %v3912_v46   ;;  %4014 = vset.pattern.permute.xlu0 %v7670_v1 }
 0x15d   : > { %721 = vrot.lane.b32.xlu1 %v4329_v24, %s4204_s23 }
 0x15e   : > { %4010 = vset.pattern.permute.xlu1 %v7670_v1 }
 0x161   : > { %v4515_v61 = vpop.permute.xlu1 %631 }
 0x163   : > { %4011 = vset.pattern.permute.xlu2 %v7676_v4 }
 0x164   : > { %764 = vperm.xlu2 %4011, %v3912_v46  }
 0x165   : > { %754 = vperm.xlu1 %4010, %v3912_v46  }
 0x16c   : > { %4013 = vset.pattern.permute.xlu2 %v7668_v5 }
 0x16d   : > { %4012 = vset.pattern.permute.xlu1 %v7672_v2 }
 0x16e   : > { %777 = vperm.xlu1 %4012, %v4499_v53  }
 0x176   : > { %4017 = vset.pattern.permute.xlu1 %v7668_v5 }
 0x195   : > { %v4537_v5 = vpop.permute.xlu2 %653 }
 0x19d   : > { %v4539_v1 = vpop.permute.xlu2 %665 }
 0x1a5   : > { %v4541_v2 = vpop.permute.xlu2 %698 }
 0x1ad   : > { %v4543_v3 = vpop.permute.xlu2 %717 }
 0x1ae   : > { %v4517_v62 = vpop.permute.xlu1 %651  ;;  %8065 = vst [vmem:[#allocation21_spill] sm:$0xff] %v4543_v3  ;;  %v4560_v3 = vpop.permute.xlu0 %457 }
 0x1af   : > { %8069 = vst [vmem:[#allocation25_spill] sm:$0xff] %v4560_v3 }
 0x1b6   : > { %v4519_v63 = vpop.permute.xlu1 %663  ;;  %v4564_v50 = vpop.permute.xlu0 %515 }
 0x1be   : > { %v4521_v0 = vpop.permute.xlu1 %688 }
 0x1c7   : > { %v4523_v6 = vpop.permute.xlu1 %708 }
 0x1cf   : > { %v4525_v8 = vpop.permute.xlu1 %721 }
 0x1d7   : > { %v4527_v35 = vpop.permute.xlu1 %754 }
 0x1d8   : > { %8064 = vst [vmem:[#allocation20_spill] sm:$0xff] %v4527_v35 }
 0x1e0   : > { %v778_v36 = vpop.permute.xlu1 %777 }
 0x1e1   : > { %v782_v39 = vmul.f32 %v778_v36, %v4374_v40  ;;  %v781_v41 = vmul.f32 %v778_v36, %v4356_v32  ;;  %v780_v46 = vmul.f32 %v778_v36, %v4359_v33  ;;  %v4545_v36 = vpop.permute.xlu2 %734 }
 0x1e2   : > { %8066 = vst [vmem:[#allocation22_spill] sm:$0xff] %v4545_v36 }
 0x1e3   : > { %790 = vrot.lane.b32.xlu1 %v782_v39, %s4205_s30  ;;  %788 = vrot.lane.b32.xlu0 %v781_v41, %s4205_s30 }
 0x1e4   : > { %786 = vrot.lane.b32.xlu2 %v780_v46, %s4205_s30 }
 0x1e9   : > { %v4547_v60 = vpop.permute.xlu2 %764 }
 0x1ea   : > { %8067 = vst [vmem:[#allocation23_spill] sm:$0xff] %v4547_v60 }
 0x1ec   : > { %800 = vperm.xlu2 %4013, %v4499_v53  }
 0x1f4   : > { %4016 = vset.pattern.permute.xlu2 %v7676_v4 }
 0x23e   : > { %v4549_v39 = vpop.permute.xlu2 %786 }
 0x23f   : > { %8068 = vst [vmem:[#allocation24_spill] sm:$0xff] %v4549_v39  ;;  %v8070_v39 = vmov 0  }
 0x246   : > { %v801_v41 = vpop.permute.xlu2 %800 }
 0x247   : > { %v805_v46 = vmul.f32 %v801_v41, %v4371_v38  ;;  %v804_v22 = vmul.f32 %v801_v41, %v4383_v44  ;;  %v803_v4 = vmul.f32 %v801_v41, %v4338_v25  ;;  %v4567_v41 = vpop.permute.xlu0 %389 }
 0x248   : > { %8071 = vst [vmem:[#allocation26_spill] sm:$0xff] %v4567_v41 }
 0x249   : > { %813 = vrot.lane.b32.xlu2 %v805_v46, %s4205_s30  ;;  %811 = vrot.lane.b32.xlu1 %v804_v22, %s4205_s30 }
 0x24a   : > { %809 = vrot.lane.b32.xlu0 %v803_v4, %s4205_s30 }
 0x24f   : > { %v4569_v46 = vpop.permute.xlu0 %439 }
 0x250   : > { %8072 = vst [vmem:[#allocation27_spill] sm:$0xff] %v4569_v46 }
 0x252   : > { %822 = vperm.xlu0 %4014, %v4499_v53  }
 0x257   : > { %v4571_v22 = vpop.permute.xlu0 %584 }
 0x25a   : > { %4015 = vset.pattern.permute.xlu0 %v8070_v39 }
 0x25b   : > { %474 = vperm.xlu0 %4015, %v4273_v7  }
 0x25f   : > { %v4573_v45 = vpop.permute.xlu0 %605 }
 0x260   : > { %8073 = vst [vmem:[#allocation28_spill] sm:$0xff] %v4573_v45 }
 0x263   : > { %678 = vperm.xlu0 %4015, %v4469_v43  }
 0x267   : > { %v4575_v4 = vpop.permute.xlu0 %649 }
 0x268   : > { %8074 = vst [vmem:[#allocation29_spill] sm:$0xff] %v4575_v4 }
 0x26f   : > { %v4577_v60 = vpop.permute.xlu0 %661 }
 0x270   : > { %8075 = vst [vmem:[#allocation30_spill] sm:$0xff] %v4577_v60  ;;  %v8078_v60 = vmov 2  }
 0x277   : > { %v4579_v3 = vpop.permute.xlu0 %719 }
 0x27f   : > { %v4581_v35 = vpop.permute.xlu0 %744 }
 0x287   : > { %v4583_v7 = vpop.permute.xlu0 %788 }
 0x288   : > { %8076 = vst [vmem:[#allocation31_spill] sm:$0xff] %v4583_v7 }
 0x2a3   : > { %v4595_v45 = vpop.permute.xlu2 %813 }
 0x2bc   : > { %v4585_v36 = vpop.permute.xlu0 %809 }
 0x2bd   : > { %8077 = vst [vmem:[#allocation32_spill] sm:$0xff] %v4585_v36 }
 0x2c4   : > { %v823_v43 = vpop.permute.xlu0 %822 }
 0x2c5   : > { %v826_v41 = vmul.f32 %v823_v43, %v4386_v47  ;;  %v825_v46 = vmul.f32 %v823_v43, %v4398_v52  ;;  %v827_v4 = vmul.f32 %v823_v43, %v4406_v55 }
 0x2c7   : > { %833 = vrot.lane.b32.xlu2 %v826_v41, %s4205_s30  ;;  %831 = vrot.lane.b32.xlu1 %v825_v46, %s4205_s30  ;;  %v4628_v46 = vld [vmem:[%s7663_s2 + $0x8] sm:$0xf] }
 0x2cf   : > { %844 = vperm.xlu2 %4016, %v4499_v53   ;;  %835 = vrot.lane.b32.xlu1 %v827_v4, %s4205_s30  ;;  %v3914_v53 = vld [vmem:[%s7662_s1 + $0x20] sm:$0xf]  ;;  %v8080_v4 = vmov 1  }
 0x2d7   : > { %4018 = vset.pattern.permute.xlu2 %v8078_v60 }
 0x321   : > { %v4597_v36 = vpop.permute.xlu2 %833 }
 0x329   : > { %v845_v7 = vpop.permute.xlu2 %844 }
 0x32a   : > { %v849_v47 = vmul.f32 %v845_v7, %v4395_v51  ;;  %v847_v52 = vmul.f32 %v845_v7, %v4351_v29  ;;  %v848_v41 = vmul.f32 %v845_v7, %v4413_v58  ;;  %v4634_v7 = vpop.permute.xlu1 %790 }
 0x32c   : > { %857 = vrot.lane.b32.xlu2 %v849_v47, %s4205_s30  ;;  %853 = vrot.lane.b32.xlu0 %v847_v52, %s4205_s30  ;;  %v921_v47 = vld [vmem:[%s7666_s5] sm:$0xf] }
 0x32d   : > { %855 = vrot.lane.b32.xlu1 %v848_v41, %s4205_s30  ;;  %v943_v52 = vld [vmem:[%s7663_s2] sm:$0xf] }
 0x332   : > { %v4636_v43 = vpop.permute.xlu1 %811 }
 0x334   : > { %869 = vrot.lane.b32.xlu2 %v4329_v24, %s4206_s7  ;;  %865 = vrot.lane.b32.xlu0 %v4317_v19, %s4206_s7  ;;  %v8079_v24 = vmov 3  }
 0x335   : > { %867 = vrot.lane.b32.xlu1 %v4326_v23, %s4206_s7 }
 0x33a   : > { %v4638_v41 = vpop.permute.xlu1 %831 }
 0x33b   : > { %8081 = vst [vmem:[#allocation33_spill] sm:$0xff] %v4638_v41 }
 0x33c   : > { %902 = vperm.xlu2 %4018, %v3914_v53   ;;  %882 = vperm.xlu0 %4015, %v3914_v53  }
 0x33d   : > { %892 = vperm.xlu1 %4017, %v3914_v53  }
 0x344   : > { %4020 = vset.pattern.permute.xlu2 %v8070_v39  ;;  %4025 = vset.pattern.permute.xlu0 %v8078_v60 }
 0x345   : > { %4019 = vset.pattern.permute.xlu1 %v8079_v24  ;;  %924 = vperm.xlu2 %4020, %v921_v47  }
 0x346   : > { %912 = vperm.xlu1 %4019, %v3914_v53   ;;  %v4640_v53 = vpop.permute.xlu1 %835 }
 0x34d   : > { %946 = vperm.xlu2 %4020, %v943_v52  }
 0x34e   : > { %4021 = vset.pattern.permute.xlu1 %v8078_v60 }
 0x34f   : > { %962 = vperm.xlu1 %4021, %v943_v52  }
 0x355   : > { %4022 = vset.pattern.permute.xlu2 %v8079_v24 }
 0x356   : > { %970 = vperm.xlu2 %4022, %v943_v52  }
 0x357   : > { %4023 = vset.pattern.permute.xlu1 %v8070_v39 }
 0x358   : > { %981 = vperm.xlu1 %4023, %v4628_v46  }
 0x35e   : > { %4024 = vset.pattern.permute.xlu2 %v8080_v4 }
 0x360   : > { %4027 = vset.pattern.permute.xlu1 %v8080_v4 }
 0x386   : > { %v4660_v41 = vpop.permute.xlu2 %857 }
 0x387   : > { %8086 = vst [vmem:[#allocation38_spill] sm:$0xff] %v4660_v41 }
 0x39f   : > { %v4642_v47 = vpop.permute.xlu1 %855 }
 0x3a0   : > { %8082 = vst [vmem:[#allocation34_spill] sm:$0xff] %v4642_v47 }
 0x3a7   : > { %v4644_v58 = vpop.permute.xlu1 %867 }
 0x3af   : > { %v4646_v52 = vpop.permute.xlu1 %892 }
 0x3b0   : > { %8083 = vst [vmem:[#allocation35_spill] sm:$0xff] %v4646_v52 }
 0x3b8   : > { %v4648_v39 = vpop.permute.xlu1 %912 }
 0x3b9   : > { %8084 = vst [vmem:[#allocation36_spill] sm:$0xff] %v4648_v39 }
 0x3c1   : > { %v4650_v29 = vpop.permute.xlu1 %962 }
 0x3c2   : > { %8085 = vst [vmem:[#allocation37_spill] sm:$0xff] %v4650_v29  ;;  %v4662_v29 = vpop.permute.xlu2 %869 }
 0x3ca   : > { %v982_v51 = vpop.permute.xlu1 %981  ;;  %v4664_v39 = vpop.permute.xlu2 %902 }
 0x3cb   : > { %v986_v4 = vmul.f32 %v982_v51, %v4374_v40  ;;  %v985_v60 = vmul.f32 %v982_v51, %v4356_v32  ;;  %v984_v55 = vmul.f32 %v982_v51, %v4359_v33  ;;  %8087 = vst [vmem:[#allocation39_spill] sm:$0xff] %v4664_v39 }
 0x3cd   : > { %994 = vrot.lane.b32.xlu1 %v986_v4, %s4201_s16  ;;  %992 = vrot.lane.b32.xlu0 %v985_v60, %s4201_s16  ;;  %v252_v4 = vlaneseq }
 0x3ce   : > { %990 = vrot.lane.b32.xlu2 %v984_v55, %s4201_s16 }
 0x3cf   : > { %v4674_v55 = vand.u32 127, %v252_v4 }
 0x3d1   : > { %v254_v33 = vadd.s32 128, %v4674_v55 }
 0x3d2   : > { %v4666_v40 = vpop.permute.xlu2 %924 }
 0x3d3   : > { %8088 = vst [vmem:[#allocation40_spill] sm:$0xff] %v4666_v40  ;;  %v8092_v40 = vmov 0 }
 0x3d6   : > { %1003 = vperm.xlu2 %4024, %v4628_v46  }
 0x3da   : > { %v4668_v32 = vpop.permute.xlu2 %946 }
 0x3db   : > { %8089 = vst [vmem:[#allocation41_spill] sm:$0xff] %v4668_v32 }
 0x3de   : > { %4026 = vset.pattern.permute.xlu2 %v8079_v24  ;;  %v266_v24 = vand.u32 15, %v254_v33 }
 0x3e0   : > { %vm4680_vm1 = vcmp.gt.s32.totalorder %v266_v24, 0  ;;  %vm4705_vm3 = vcmp.lt.s32.totalorder %v266_v24, 15  ;;  %v396_v24 = vsel %vm369_vm4, %v4491_v49, %v4438_v17 }
 0x3e1   : > { %v8093_v40 = vsel %vm4680_vm1, 4294967295, %v8092_v40  ;;  %v304_v33 = vsel %vm4680_vm1, %v4326_v23, 0.0 }
 0x3e2   : > { %v4670_v51 = vpop.permute.xlu2 %970  ;;  %8094 = vst [vmem:[#allocation44_spill] sm:$0xff] %v8093_v40  ;;  %v4690_v4 = vperm.slane %v304_v33, 0  ;;  %v4703_v32 = vperm.slane %v304_v33, 3 }
 0x3e3   : > { %8090 = vst [vmem:[#allocation42_spill] sm:$0xff] %v4670_v51  ;;  %v4699_v51 = vperm.slane %v304_v33, 2 }
 0x3e4   : > { %8095 = vst [vmem:[#allocation45_spill] sm:$0xff] %v4690_v4 }
 0x3e5   : > { %8097 = vst [vmem:[#allocation47_spill] sm:$0xff] %v4699_v51 }
 0x3e6   : > { %8098 = vst [vmem:[#allocation48_spill] sm:$0xff] %v4703_v32 }
 0x428   : > { %v4672_v60 = vpop.permute.xlu2 %990 }
 0x429   : > { %8091 = vst [vmem:[#allocation43_spill] sm:$0xff] %v4672_v60  ;;  %v4692_v60 = vperm.slane %v304_v33, 1 }
 0x42b   : > { %8096 = vst [vmem:[#allocation46_spill] sm:$0xff] %v4692_v60 }
 0x430   : > { %v1004_v52 = vpop.permute.xlu2 %1003 }
 0x431   : > { %v1008_v47 = vmul.f32 %v1004_v52, %v4371_v38  ;;  %v1007_v41 = vmul.f32 %v1004_v52, %v4383_v44  ;;  %v1006_v39 = vmul.f32 %v1004_v52, %v4338_v25  ;;  %v314_v52 = vmul.f32 %v4690_v4, %v4310_v14 }
 0x432   : > { %v8099_v25 = vmov 0  ;;  %v465_v4 = vsel %vm463_vm2, %v4450_v34, %v4432_v9  ;;  %v421_v9 = vsel %vm369_vm4, %v4440_v11, %v4504_v54 }
 0x433   : > { %1016 = vrot.lane.b32.xlu2 %v1008_v47, %s4201_s16  ;;  %1014 = vrot.lane.b32.xlu1 %v1007_v41, %s4201_s16  ;;  %v324_v47 = vmul.f32 %v4692_v60, %v4312_v16  ;;  %v8100_v25 = vsel %vm4705_vm3, 4294967295, %v8099_v25  ;;  %v344_v60 = vmul.f32 %v4703_v32, %v4308_v13 }
 0x434   : > { %1012 = vrot.lane.b32.xlu0 %v1006_v39, %s4201_s16  ;;  %v334_v39 = vmul.f32 %v4699_v51, %v4306_v12  ;;  %8101 = vst [vmem:[#allocation49_spill] sm:$0xff] %v8100_v25 }
 0x435   : > { %v326_v41 = vadd.f32 %v324_v47, %v314_v52  ;;  %v371_v52 = vsel %vm369_vm4, %v4436_v15, %v4485_v48  ;;  %v469_v47 = vsel %vm4705_vm3, %v465_v4, 0.0  ;;  %v446_v48 = vsel %vm369_vm4, %v4507_v56, %v4442_v18 }
 0x436   : > { %v4727_v51 = vperm.slane %v469_v47, 0  ;;  %v4743_v18 = vperm.slane %v469_v47, 3 }
 0x437   : > { %v336_v23 = vadd.f32 %v334_v39, %v326_v41  ;;  %v4725_v39 = vpop.permute.xlu0 %474 }
 0x438   : > { %8102 = vst [vmem:[#allocation50_spill] sm:$0xff] %v4727_v51  ;;  %v480_v4 = vmul.f32 %v4727_v51, %v4725_v39 }
 0x439   : > { %v346_v33 = vadd.f32 %v344_v60, %v336_v23  ;;  %v4734_v23 = vperm.slane %v469_v47, 1  ;;  %8105 = vst [vmem:[#allocation53_spill] sm:$0xff] %v4743_v18 }
 0x43b   : > { %v375_v41 = vadd.f32 %v371_v52, %v346_v33  ;;  %8103 = vst [vmem:[#allocation51_spill] sm:$0xff] %v4734_v23  ;;  %v4736_v33 = vperm.slane %v469_v47, 2  ;;  %v490_v54 = vmul.f32 %v4734_v23, %v4321_v20 }
 0x43c   : > { %1025 = vperm.xlu0 %4025, %v4628_v46  }
 0x43d   : > { %v400_v32 = vadd.f32 %v396_v24, %v375_v41  ;;  %8104 = vst [vmem:[#allocation52_spill] sm:$0xff] %v4736_v33  ;;  %v521_v24 = vsel %vm519_vm5, %v4564_v50, %v4458_v42 }
 0x43f   : > { %v425_v60 = vadd.f32 %v421_v9, %v400_v32  ;;  %v500_v32 = vmul.f32 %v4736_v33, %v4323_v21  ;;  %v525_v9 = vsel %vm4680_vm1, %v521_v24, 0.0 }
 0x440   : > { %v4755_v42 = vperm.slane %v525_v9, 1 }
 0x441   : > { %v450_v17 = vadd.f32 %v446_v48, %v425_v60  ;;  %v510_v60 = vmul.f32 %v4743_v18, %v4340_v26 }
 0x442   : > { %8107 = vst [vmem:[#allocation55_spill] sm:$0xff] %v4755_v42 }
 0x443   : > { %v482_v52 = vadd.f32 %v480_v4, %v450_v17  ;;  %v4751_v4 = vperm.slane %v525_v9, 0 }
 0x445   : > { %v492_v41 = vadd.f32 %v490_v54, %v482_v52  ;;  %8106 = vst [vmem:[#allocation54_spill] sm:$0xff] %v4751_v4  ;;  %v536_v23 = vmul.f32 %v4751_v4, %v4343_v28  ;;  %v546_v52 = vmul.f32 %v4755_v42, %v4556_v10  ;;  %v4759_v54 = vperm.slane %v525_v9, 2  ;;  %v8125_v4 = vld [vmem:[#allocation23_spill] sm:$0xff] }
 0x447   : > { %v502_v48 = vadd.f32 %v500_v32, %v492_v41  ;;  %8108 = vst [vmem:[#allocation56_spill] sm:$0xff] %v4759_v54  ;;  %v556_v24 = vmul.f32 %v4759_v54, %v4353_v31  ;;  %v4763_v41 = vperm.slane %v525_v9, 3  ;;  %v634_v9 = vsel %vm588_vm6, %v4448_v30, %v4515_v61  ;;  %v8124_v54 = vld [vmem:[#allocation20_spill] sm:$0xff] }
 0x449   : > { %v512_v17 = vadd.f32 %v510_v60, %v502_v48  ;;  %8109 = vst [vmem:[#allocation57_spill] sm:$0xff] %v4763_v41  ;;  %v566_v48 = vmul.f32 %v4763_v41, %v4367_v37 }
 0x44b   : > { %v538_v47 = vadd.f32 %v536_v23, %v512_v17  ;;  %v590_v23 = vsel %vm588_vm6, %v4571_v22, %v4509_v57 }
 0x44d   : > { %v548_v33 = vadd.f32 %v546_v52, %v538_v47  ;;  %v612_v47 = vsel %vm588_vm6, %v4511_v59, %v4446_v27  ;;  %v656_v27 = vsel %vm588_vm6, %v4517_v62, %v4537_v5  ;;  %v725_v5 = vsel %vm723_vm8, %v4579_v3, %v4525_v8 }
 0x44f   : > { %v558_v32 = vadd.f32 %v556_v24, %v548_v33  ;;  %v669_v33 = vsel %vm667_vm7, %v4519_v63, %v4539_v1  ;;  %v4779_v24 = vpop.permute.xlu0 %678 }
 0x450   : > { %v673_v57 = vsel %vm4705_vm3, %v669_v33, 0.0 }
 0x451   : > { %v568_v60 = vadd.f32 %v566_v48, %v558_v32 }
 0x453   : > { %v594_v17 = vadd.f32 %v590_v23, %v568_v60  ;;  %v4786_v60 = vperm.slane %v673_v57, 0 }
 0x455   : > { %v616_v52 = vadd.f32 %v612_v47, %v594_v17  ;;  %8110 = vst [vmem:[#allocation58_spill] sm:$0xff] %v4786_v60  ;;  %v684_v1 = vmul.f32 %v4786_v60, %v4779_v24  ;;  %v4792_v17 = vperm.slane %v673_v57, 1  ;;  %v4794_v47 = vperm.slane %v673_v57, 2 }
 0x457   : > { %v638_v32 = vadd.f32 %v634_v9, %v616_v52  ;;  %v4790_v23 = vpop.permute.xlu0 %853  ;;  %8111 = vst [vmem:[#allocation59_spill] sm:$0xff] %v4792_v17  ;;  %v694_v52 = vmul.f32 %v4792_v17, %v4521_v0  ;;  %v704_v9 = vmul.f32 %v4794_v47, %v4541_v2 }
 0x458   : > { %8112 = vst [vmem:[#allocation60_spill] sm:$0xff] %v4794_v47 }
 0x459   : > { %v660_v48 = vadd.f32 %v656_v27, %v638_v32  ;;  %v729_v32 = vsel %vm4680_vm1, %v725_v5, 0.0  ;;  %v4805_v27 = vperm.slane %v673_v57, 3 }
 0x45a   : > { %v4812_v41 = vperm.slane %v729_v32, 0  ;;  %v4820_v57 = vperm.slane %v729_v32, 1 }
 0x45b   : > { %v686_v61 = vadd.f32 %v684_v1, %v660_v48  ;;  %8113 = vst [vmem:[#allocation61_spill] sm:$0xff] %v4805_v27  ;;  %v259_v1 = vand.u32 15, %v4674_v55  ;;  %v714_v17 = vmul.f32 %v4805_v27, %v4523_v6  ;;  %v4833_v27 = vperm.slane %v729_v32, 2 }
 0x45c   : > { %8114 = vst [vmem:[#allocation62_spill] sm:$0xff] %v4812_v41 }
 0x45d   : > { %v696_v33 = vadd.f32 %v694_v52, %v686_v61  ;;  %vm4814_vm9 = vcmp.gt.s32.totalorder %v259_v1, 0  ;;  %v8115_v61 = vmov 0  ;;  %v8118_v52 = vld [vmem:[#allocation22_spill] sm:$0xff]  ;;  %8122 = vst [vmem:[#allocation66_spill] sm:$0xff] %v4833_v27  ;;  %v760_v42 = vmul.f32 %v4833_v27, %v8124_v54 }
 0x45e   : > { %v8116_v61 = vsel %vm4814_vm9, 4294967295, %v8115_v61  ;;  %v740_v5 = vmul.f32 %v4812_v41, %v8118_v52  ;;  %8119 = vst [vmem:[#allocation22_spill] sm:$0xff] %v4820_v57  ;;  %v303_v55 = vsel %vm4814_vm9, %v4317_v19, 0.0  ;;  %v4835_v41 = vperm.slane %v729_v32, 3 }
 0x45f   : > { %v706_v48 = vadd.f32 %v704_v9, %v696_v33  ;;  %v4808_v60 = vpop.permute.xlu0 %865  ;;  %8117 = vst [vmem:[#allocation63_spill] sm:$0xff] %v8116_v61  ;;  %v750_v9 = vmul.f32 %v4820_v57, %v4581_v35  ;;  %v4827_v40 = vperm.slane %v303_v55, 0  ;;  %v4843_v57 = vperm.slane %v303_v55, 2 }
 0x460   : > { %8123 = vst [vmem:[#allocation67_spill] sm:$0xff] %v4835_v41  ;;  %v770_v18 = vmul.f32 %v4835_v41, %v8125_v4  ;;  %v4851_v27 = vperm.slane %v303_v55, 3  ;;  %vm4859_vm12 = vcmp.lt.s32.totalorder %v259_v1, 15  ;;  %v816_v1 = vsel %vm792_vm11, %v4636_v43, %v4595_v45 }
 0x461   : > { %v716_v8 = vadd.f32 %v714_v17, %v706_v48  ;;  %8120 = vst [vmem:[#allocation64_spill] sm:$0xff] %v4827_v40  ;;  %v4829_v17 = vperm.slane %v303_v55, 1  ;;  %v313_v19 = vmul.f32 %v4827_v40, %v4310_v14  ;;  %v873_v14 = vsel %vm871_vm10, %v4644_v58, %v4662_v29 }
 0x462   : > { %v343_v55 = vmul.f32 %v4851_v27, %v4308_v13  ;;  %v877_v29 = vsel %vm4705_vm3, %v873_v14, 0.0 }
 0x463   : > { %v742_v33 = vadd.f32 %v740_v5, %v716_v8  ;;  %8121 = vst [vmem:[#allocation65_spill] sm:$0xff] %v4829_v17  ;;  %v323_v8 = vmul.f32 %v4829_v17, %v4312_v16 }
 0x465   : > { %v752_v47 = vadd.f32 %v750_v9, %v742_v33  ;;  %v325_v51 = vadd.f32 %v323_v8, %v313_v19  ;;  %v333_v9 = vmul.f32 %v4843_v57, %v4306_v12  ;;  %v8128_v8 = vmov 0 }
 0x466   : > { %v8129_v8 = vsel %vm4859_vm12, 4294967295, %v8128_v8 }
 0x467   : > { %v4831_v48 = vpop.permute.xlu0 %882  ;;  %v762_v5 = vadd.f32 %v760_v42, %v752_v47  ;;  %v335_v16 = vadd.f32 %v333_v9, %v325_v51  ;;  %v8127_v42 = vld [vmem:[#allocation31_spill] sm:$0xff]  ;;  %8130 = vst [vmem:[#allocation23_spill] sm:$0xff] %v8129_v8  ;;  %v8132_v51 = vld [vmem:[#allocation17_spill] sm:$0xff]  ;;  %v8134_v9 = vld [vmem:[#allocation26_spill] sm:$0xff] }
 0x468   : > { %v794_v47 = vsel %vm792_vm11, %v8127_v42, %v4634_v7  ;;  %v395_v14 = vsel %vm369_vm4, %v8134_v9, %v4491_v49  ;;  %v8139_v49 = vld [vmem:[#allocation27_spill] sm:$0xff]  ;;  %v4903_v9 = vperm.slane %v877_v29, 1 }
 0x469   : > { %v772_v32 = vadd.f32 %v770_v18, %v762_v5  ;;  %v8131_v18 = vld [vmem:[#allocation25_spill] sm:$0xff]  ;;  %v370_v5 = vsel %vm369_vm4, %v8132_v51, %v4436_v15  ;;  %v345_v7 = vadd.f32 %v343_v55, %v335_v16  ;;  %v4886_v15 = vperm.slane %v877_v29, 0  ;;  %v8137_v55 = vld [vmem:[#allocation34_spill] sm:$0xff]  ;;  %v8193_v8 = vld [vmem:[#allocation3_spill] sm:$0xff] }
 0x46a   : > { %v464_v12 = vsel %vm463_vm2, %v8131_v18, %v4450_v34  ;;  %v8136_v18 = vld [vmem:[#allocation38_spill] sm:$0xff]  ;;  %8140 = vst [vmem:[#allocation17_spill] sm:$0xff] %v4903_v9 }
 0x46b   : > { %v798_v19 = vadd.f32 %v794_v47, %v772_v32  ;;  %v838_v32 = vsel %vm792_vm11, %v4597_v36, %v4640_v53  ;;  %v468_v13 = vsel %vm4859_vm12, %v464_v12, 0.0  ;;  %8135 = vst [vmem:[#allocation25_spill] sm:$0xff] %v4886_v15  ;;  %v374_v16 = vadd.f32 %v370_v5, %v345_v7  ;;  %v8138_v51 = vld [vmem:[#allocation18_spill] sm:$0xff] }
 0x46c   : > { %v860_v45 = vsel %vm792_vm11, %v8137_v55, %v8136_v18  ;;  %v420_v53 = vsel %vm369_vm4, %v8138_v51, %v4440_v11  ;;  %v888_v12 = vmul.f32 %v4886_v15, %v4831_v48  ;;  %v4905_v11 = vperm.slane %v468_v13, 1  ;;  %v8144_v15 = vld [vmem:[#allocation10_spill] sm:$0xff] }
 0x46d   : > { %v820_v47 = vadd.f32 %v816_v1, %v798_v19  ;;  %v399_v41 = vadd.f32 %v395_v14, %v374_v16  ;;  %v445_v19 = vsel %vm369_vm4, %v8139_v49, %v4507_v56  ;;  %v4907_v51 = vperm.slane %v877_v29, 2  ;;  %v8143_v14 = vld [vmem:[#allocation35_spill] sm:$0xff]  ;;  %v8145_v56 = vld [vmem:[#allocation12_spill] sm:$0xff] }
 0x46e   : > { %8141 = vst [vmem:[#allocation26_spill] sm:$0xff] %v4905_v11  ;;  %v898_v16 = vmul.f32 %v4903_v9, %v8143_v14  ;;  %v8148_v49 = vld [vmem:[#allocation39_spill] sm:$0xff]  ;;  %v8152_v9 = vld [vmem:[#allocation13_spill] sm:$0xff] }
 0x46f   : > { %v4847_v33 = vpop.permute.xlu0 %992  ;;  %v842_v25 = vadd.f32 %v838_v32, %v820_v47  ;;  %v424_v7 = vadd.f32 %v420_v53, %v399_v41  ;;  %8142 = vst [vmem:[#allocation38_spill] sm:$0xff] %v4907_v51  ;;  %v4913_v53 = vperm.slane %v877_v29, 3 }
 0x470   : > { %8126 = vst [vmem:[#allocation20_spill] sm:$0xff] %v4847_v33 }
 0x471   : > { %v864_v5 = vadd.f32 %v860_v45, %v842_v25  ;;  %v449_v32 = vadd.f32 %v445_v19, %v424_v7  ;;  %8146 = vst [vmem:[#allocation34_spill] sm:$0xff] %v4913_v53  ;;  %v908_v19 = vmul.f32 %v4907_v51, %v8148_v49 }
 0x473   : > { %v890_v18 = vadd.f32 %v888_v12, %v864_v5  ;;  %v489_v12 = vmul.f32 %v4905_v11, %v4321_v20  ;;  %v8149_v5 = vld [vmem:[#allocation36_spill] sm:$0xff] }
 0x474   : > { %v918_v7 = vmul.f32 %v4913_v53, %v8149_v5 }
 0x475   : > { %v900_v45 = vadd.f32 %v898_v16, %v890_v18 }
 0x4a6   : > { %v4879_v34 = vpop.permute.xlu0 %1012 }
 0x4a7   : > { %8133 = vst [vmem:[#allocation31_spill] sm:$0xff] %v4879_v34  ;;  %v4896_v34 = vperm.slane %v468_v13, 0 }
 0x4a9   : > { %v479_v1 = vmul.f32 %v4896_v34, %v4725_v39  ;;  %v4917_v39 = vperm.slane %v468_v13, 2 }
 0x4ab   : > { %v481_v41 = vadd.f32 %v479_v1, %v449_v32  ;;  %8147 = vst [vmem:[#allocation18_spill] sm:$0xff] %v4917_v39  ;;  %v8150_v1 = vld [vmem:[#allocation15_spill] sm:$0xff]  ;;  %v910_v32 = vadd.f32 %v908_v19, %v900_v45  ;;  %v499_v16 = vmul.f32 %v4917_v39, %v4323_v21 }
 0x4ac   : > { %v520_v29 = vsel %vm519_vm5, %v8150_v1, %v4564_v50 }
 0x4ad   : > { %v491_v18 = vadd.f32 %v489_v12, %v481_v41  ;;  %v524_v20 = vsel %vm4814_vm9, %v520_v29, 0.0 }
 0x4ae   : > { %v1026_v47 = vpop.permute.xlu0 %1025  ;;  %v4939_v41 = vperm.slane %v524_v20, 0  ;;  %v4944_v19 = vperm.slane %v524_v20, 1 }
 0x4af   : > { %v1029_v33 = vmul.f32 %v1026_v47, %v8144_v15  ;;  %v1028_v25 = vmul.f32 %v1026_v47, %v8145_v56  ;;  %v1030_v51 = vmul.f32 %v1026_v47, %v8152_v9  ;;  %v501_v11 = vadd.f32 %v499_v16, %v491_v18  ;;  %v8160_v16 = vld [vmem:[#allocation16_spill] sm:$0xff] }
 0x4b0   : > { %8153 = vst [vmem:[#allocation35_spill] sm:$0xff] %v4939_v41  ;;  %v535_v21 = vmul.f32 %v4939_v41, %v4343_v28  ;;  %v4957_v28 = vperm.slane %v524_v20, 3 }
 0x4b1   : > { %1036 = vrot.lane.b32.xlu2 %v1029_v33, %s4201_s16  ;;  %1034 = vrot.lane.b32.xlu1 %v1028_v25, %s4201_s16  ;;  %v4928_v33 = vperm.slane %v468_v13, 3  ;;  %v920_v25 = vadd.f32 %v918_v7, %v910_v32  ;;  %v8154_v13 = vld [vmem:[#allocation40_spill] sm:$0xff]  ;;  %8155 = vst [vmem:[#allocation39_spill] sm:$0xff] %v4944_v19 }
 0x4b2   : > { %8159 = vst [vmem:[#allocation40_spill] sm:$0xff] %v4957_v28  ;;  %v565_v18 = vmul.f32 %v4957_v28, %v4367_v37 }
 0x4b3   : > { %8151 = vst [vmem:[#allocation27_spill] sm:$0xff] %v4928_v33  ;;  %v509_v50 = vmul.f32 %v4928_v33, %v4340_v26  ;;  %v928_v45 = vadd.f32 %v8154_v13, %v920_v25  ;;  %v545_v26 = vmul.f32 %v4944_v19, %v4556_v10  ;;  %v589_v25 = vsel %vm588_vm6, %v8160_v16, %v4571_v22  ;;  %v8161_v10 = vld [vmem:[#allocation28_spill] sm:$0xff]  ;;  %v8164_v22 = vld [vmem:[#allocation29_spill] sm:$0xff] }
 0x4b4   : > { %v8168_v16 = vld [vmem:[#allocation21_spill] sm:$0xff] }
 0x4b5   : > { %v511_v12 = vadd.f32 %v509_v50, %v501_v11  ;;  %v4946_v7 = vmax.f32 %v928_v45, 0.0  ;;  %v611_v45 = vsel %vm588_vm6, %v8161_v10, %v4511_v59 }
 0x4b7   : > { %8156 = vst [vmem:[#allocation36_spill] sm:$0xff] %v4946_v7  ;;  %v537_v47 = vadd.f32 %v535_v21, %v511_v12  ;;  %v8162_v21 = vld [vmem:[#allocation30_spill] sm:$0xff] }
 0x4b9   : > { %1047 = vperm.xlu2 %4026, %v4628_v46   ;;  %1038 = vrot.lane.b32.xlu1 %v1030_v51, %s4201_s16  ;;  %v8157_v46 = vmov 2   ;;  %v4953_v51 = vperm.slane %v524_v20, 2  ;;  %v547_v1 = vadd.f32 %v545_v26, %v537_v47  ;;  %v8163_v20 = vld [vmem:[#allocation19_spill] sm:$0xff] }
 0x4ba   : > { %v633_v47 = vsel %vm588_vm6, %v8163_v20, %v4448_v30 }
 0x4bb   : > { %8158 = vst [vmem:[#allocation15_spill] sm:$0xff] %v4953_v51  ;;  %v555_v11 = vmul.f32 %v4953_v51, %v4353_v31  ;;  %v668_v31 = vsel %vm667_vm7, %v8162_v21, %v4519_v63 }
 0x4bc   : > { %v672_v26 = vsel %vm4859_vm12, %v668_v31, 0.0 }
 0x4bd   : > { %v557_v29 = vadd.f32 %v555_v11, %v547_v1  ;;  %v655_v1 = vsel %vm588_vm6, %v8164_v22, %v4517_v62  ;;  %v4978_v11 = vperm.slane %v672_v26, 0 }
 0x4bf   : > { %v567_v32 = vadd.f32 %v565_v18, %v557_v29  ;;  %8165 = vst [vmem:[#allocation16_spill] sm:$0xff] %v4978_v11  ;;  %v683_v29 = vmul.f32 %v4978_v11, %v4779_v24  ;;  %v4982_v18 = vperm.slane %v672_v26, 1  ;;  %v4995_v24 = vperm.slane %v672_v26, 3 }
 0x4c1   : > { %935 = vrot.lane.b32.xlu1 %v4946_v7, %s4198_s29  ;;  %4028 = vset.pattern.permute.xlu2 %v8157_v46  ;;  %v593_v50 = vadd.f32 %v589_v25, %v567_v32  ;;  %8166 = vst [vmem:[#allocation28_spill] sm:$0xff] %v4982_v18  ;;  %v4984_v32 = vperm.slane %v672_v26, 2  ;;  %v693_v30 = vmul.f32 %v4982_v18, %v4521_v0 }
 0x4c2   : > { %v724_v25 = vsel %vm723_vm8, %v8168_v16, %v4579_v3  ;;  %8169 = vst [vmem:[#allocation19_spill] sm:$0xff] %v4995_v24  ;;  %v713_v21 = vmul.f32 %v4995_v24, %v4523_v6  ;;  %v8175_v16 = vld [vmem:[#allocation32_spill] sm:$0xff] }
 0x4c3   : > { %v615_v12 = vadd.f32 %v611_v45, %v593_v50  ;;  %8167 = vst [vmem:[#allocation30_spill] sm:$0xff] %v4984_v32  ;;  %v703_v62 = vmul.f32 %v4984_v32, %v4541_v2  ;;  %v728_v10 = vsel %vm4814_vm9, %v724_v25, 0.0  ;;  %v8176_v25 = vld [vmem:[#allocation33_spill] sm:$0xff] }
 0x4c4   : > { %v5003_v3 = vperm.slane %v728_v10, 1  ;;  %v5009_v26 = vperm.slane %v728_v10, 3 }
 0x4c5   : > { %v637_v37 = vadd.f32 %v633_v47, %v615_v12  ;;  %v4997_v12 = vperm.slane %v728_v10, 0  ;;  %v5007_v47 = vperm.slane %v728_v10, 2 }
 0x4c6   : > { %8171 = vst [vmem:[#allocation21_spill] sm:$0xff] %v5003_v3  ;;  %v749_v2 = vmul.f32 %v5003_v3, %v4581_v35  ;;  %v769_v6 = vmul.f32 %v5009_v26, %v8125_v4  ;;  %v837_v4 = vsel %vm792_vm11, %v8176_v25, %v4597_v36  ;;  %v5089_v25 = vpop.permute.xlu1 %994 }
 0x4c7   : > { %v659_v59 = vadd.f32 %v655_v1, %v637_v37  ;;  %8170 = vst [vmem:[#allocation29_spill] sm:$0xff] %v4997_v12  ;;  %v739_v31 = vmul.f32 %v4997_v12, %v8118_v52  ;;  %v759_v22 = vmul.f32 %v5007_v47, %v8124_v54  ;;  %v872_v52 = vsel %vm871_vm10, %v4808_v60, %v4644_v58 }
 0x4c8   : > { %8172 = vst [vmem:[#allocation68_spill] sm:$0xff] %v5007_v47  ;;  %v815_v54 = vsel %vm792_vm11, %v8175_v16, %v4636_v43  ;;  %v859_v60 = vsel %vm792_vm11, %v4790_v23, %v8137_v55  ;;  %v3918_v16 = vld [vmem:[%s7663_s2 + $0x20] sm:$0xf] }
 0x4c9   : > { %v685_v63 = vadd.f32 %v683_v29, %v659_v59  ;;  %8173 = vst [vmem:[#allocation69_spill] sm:$0xff] %v5009_v26  ;;  %v8174_v29 = vld [vmem:[#allocation24_spill] sm:$0xff] }
 0x4ca   : > { %v793_v35 = vsel %vm792_vm11, %v8174_v29, %v8127_v42  ;;  %v8183_v29 = vld [vmem:[#allocation14_spill] sm:$0xff] }
 0x4cb   : > { %v695_v50 = vadd.f32 %v693_v30, %v685_v63  ;;  %v876_v30 = vsel %vm4859_vm12, %v872_v52, 0.0 }
 0x4cc   : > { %v5031_v58 = vperm.slane %v876_v30, 0  ;;  %v5042_v36 = vperm.slane %v876_v30, 2 }
 0x4cd   : > { %v705_v45 = vadd.f32 %v703_v62, %v695_v50  ;;  %v5029_v50 = vpop.permute.xlu2 %1016 }
 0x4ce   : > { %8177 = vst [vmem:[#allocation24_spill] sm:$0xff] %v5031_v58  ;;  %v887_v10 = vmul.f32 %v5031_v58, %v4831_v48  ;;  %v907_v23 = vmul.f32 %v5042_v36, %v8148_v49  ;;  %v5062_v49 = vld [vmem:[%s7663_s2 + $0x10] sm:$0xf] }
 0x4cf   : > { %v715_v0 = vadd.f32 %v713_v21, %v705_v45  ;;  %v5038_v21 = vperm.slane %v876_v30, 1  ;;  %8179 = vst [vmem:[#allocation33_spill] sm:$0xff] %v5042_v36 }
 0x4d1   : > { %v741_v20 = vadd.f32 %v739_v31, %v715_v0  ;;  %8178 = vst [vmem:[#allocation32_spill] sm:$0xff] %v5038_v21  ;;  %v897_v31 = vmul.f32 %v5038_v21, %v8143_v14 }
 0x4d3   : > { %v751_v37 = vadd.f32 %v749_v2, %v741_v20  ;;  %v5046_v20 = vperm.slane %v876_v30, 3  ;;  %v8186_v30 = vmov 3  }
 0x4d5   : > { %v761_v1 = vadd.f32 %v759_v22, %v751_v37  ;;  %8180 = vst [vmem:[#allocation70_spill] sm:$0xff] %v5046_v20  ;;  %v917_v48 = vmul.f32 %v5046_v20, %v8149_v5 }
 0x4d7   : > { %v771_v59 = vadd.f32 %v769_v6, %v761_v1  ;;  %v8181_v1 = vld [vmem:[#allocation11_spill] sm:$0xff] }
 0x4d9   : > { %v797_v63 = vadd.f32 %v793_v35, %v771_v59  ;;  %v8182_v59 = vld [vmem:[#allocation4_spill] sm:$0xff] }
 0x4db   : > { %v819_v62 = vadd.f32 %v815_v54, %v797_v63  ;;  %v5073_v63 = vld [vmem:[%s7663_s2 + $0x18] sm:$0xf]  ;;  %v8187_v54 = vmov 1  }
 0x4dd   : > { %v841_v42 = vadd.f32 %v837_v4, %v819_v62  ;;  %v5091_v4 = vpop.permute.xlu1 %1014 }
 0x4df   : > { %v863_v45 = vadd.f32 %v859_v60, %v841_v42 }
 0x4e1   : > { %v889_v43 = vadd.f32 %v887_v10, %v863_v45 }
 0x4e3   : > { %v899_v2 = vadd.f32 %v897_v31, %v889_v43 }
 0x4e5   : > { %v909_v55 = vadd.f32 %v907_v23, %v899_v2  ;;  %v8188_v23 = vld [vmem:[#allocation8_spill] sm:$0xff] }
 0x4e7   : > { %v919_v22 = vadd.f32 %v917_v48, %v909_v55  ;;  %v8189_v55 = vld [vmem:[#allocation5_spill] sm:$0xff] }
 0x4e9   : > { %v927_v14 = vadd.f32 %v8154_v13, %v919_v22  ;;  %v8185_v13 = vmov 0   ;;  %v8190_v22 = vld [vmem:[#allocation6_spill] sm:$0xff] }
 0x4eb   : > { %v5064_v5 = vmax.f32 %v927_v14, 0.0 }
 0x4ed   : > { %8184 = vst [vmem:[#allocation71_spill] sm:$0xff] %v5064_v5 }
 0x50b   : > { %v5040_v0 = vpop.permute.xlu2 %1036 }
 0x513   : > { %v1048_v37 = vpop.permute.xlu2 %1047 }
 0x514   : > { %v1052_v6 = vmul.f32 %v1048_v37, %v8181_v1  ;;  %v1050_v52 = vmul.f32 %v1048_v37, %v8182_v59  ;;  %v1051_v35 = vmul.f32 %v1048_v37, %v8183_v29 }
 0x516   : > { %1060 = vrot.lane.b32.xlu2 %v1052_v6, %s4201_s16  ;;  %1056 = vrot.lane.b32.xlu0 %v1050_v52, %s4201_s16 }
 0x517   : > { %1058 = vrot.lane.b32.xlu1 %v1051_v35, %s4201_s16 }
 0x51e   : > { %1088 = vperm.xlu2 %4028, %v5062_v49   ;;  %933 = vrot.lane.b32.xlu0 %v5064_v5, %s4198_s29 }
 0x51f   : > { %1080 = vperm.xlu1 %4027, %v5062_v49  }
 0x523   : > { %v5093_v62 = vpop.permute.xlu1 %1034 }
 0x526   : > { %4030 = vset.pattern.permute.xlu2 %v8185_v13 }
 0x527   : > { %4029 = vset.pattern.permute.xlu1 %v8186_v30  ;;  %1107 = vperm.xlu2 %4030, %v5073_v63  }
 0x528   : > { %1096 = vperm.xlu1 %4029, %v5062_v49  }
 0x52b   : > { %v5095_v60 = vpop.permute.xlu1 %1038 }
 0x52f   : > { %4032 = vset.pattern.permute.xlu2 %v8186_v30 }
 0x530   : > { %4031 = vset.pattern.permute.xlu1 %v8157_v46  ;;  %1131 = vperm.xlu2 %4032, %v5073_v63  }
 0x531   : > { %1123 = vperm.xlu1 %4031, %v5073_v63  }
 0x533   : > { %v5097_v42 = vpop.permute.xlu1 %935 }
 0x538   : > { %4034 = vset.pattern.permute.xlu2 %v8187_v54 }
 0x539   : > { %4033 = vset.pattern.permute.xlu1 %v8185_v13 }
 0x53a   : > { %1142 = vperm.xlu1 %4033, %v3918_v16  }
 0x542   : > { %4036 = vset.pattern.permute.xlu1 %v8187_v54 }
 0x570   : > { %v5114_v52 = vpop.permute.xlu2 %1060 }
 0x578   : > { %v5116_v35 = vpop.permute.xlu2 %1088 }
 0x581   : > { %v5118_v14 = vpop.permute.xlu2 %1107 }
 0x588   : > { %v5130_v53 = vpop.permute.xlu0 %1056 }
 0x589   : > { %v5099_v10 = vpop.permute.xlu1 %1058 }
 0x58a   : > { %v5120_v7 = vpop.permute.xlu2 %1131 }
 0x58b   : > { %8191 = vst [vmem:[#allocation72_spill] sm:$0xff] %v5120_v7 }
 0x590   : > { %v5132_v20 = vpop.permute.xlu0 %933 }
 0x591   : > { %v5101_v45 = vpop.permute.xlu1 %1080 }
 0x59a   : > { %v5103_v43 = vpop.permute.xlu1 %1096 }
 0x5a3   : > { %v5105_v31 = vpop.permute.xlu1 %1123 }
 0x5ac   : > { %v1143_v2 = vpop.permute.xlu1 %1142 }
 0x5ad   : > { %v1147_v48 = vmul.f32 %v1143_v2, %v8188_v23  ;;  %v1146_v37 = vmul.f32 %v1143_v2, %v8189_v55  ;;  %v1145_v6 = vmul.f32 %v1143_v2, %v8190_v22 }
 0x5af   : > { %1155 = vrot.lane.b32.xlu1 %v1147_v48, %s4202_s17  ;;  %1153 = vrot.lane.b32.xlu0 %v1146_v37, %s4202_s17 }
 0x5b0   : > { %1151 = vrot.lane.b32.xlu2 %v1145_v6, %s4202_s17 }
 0x5b8   : > { %1164 = vperm.xlu2 %4034, %v3918_v16  }
 0x5c0   : > { %4035 = vset.pattern.permute.xlu2 %v8186_v30 }
 0x60a   : > { %v5122_v5 = vpop.permute.xlu2 %1151 }
 0x60b   : > { %8192 = vst [vmem:[#allocation73_spill] sm:$0xff] %v5122_v5 }
 0x612   : > { %v1165_v2 = vpop.permute.xlu2 %1164 }
 0x613   : > { %v1169_v48 = vmul.f32 %v1165_v2, %v4371_v38  ;;  %v1168_v37 = vmul.f32 %v1165_v2, %v4383_v44  ;;  %v1167_v6 = vmul.f32 %v1165_v2, %v8193_v8 }
 0x615   : > { %1177 = vrot.lane.b32.xlu2 %v1169_v48, %s4202_s17  ;;  %1175 = vrot.lane.b32.xlu1 %v1168_v37, %s4202_s17 }
 0x616   : > { %1173 = vrot.lane.b32.xlu0 %v1167_v6, %s4202_s17 }
 0x61e   : > { %1186 = vperm.xlu0 %4025, %v3918_v16  }
 0x621   : > { %v5134_v61 = vpop.permute.xlu0 %1153 }
 0x622   : > { %8194 = vst [vmem:[#allocation74_spill] sm:$0xff] %v5134_v61 }
 0x66f   : > { %v5145_v37 = vpop.permute.xlu2 %1177 }
 0x670   : > { %8196 = vst [vmem:[#allocation76_spill] sm:$0xff] %v5145_v37 }
 0x688   : > { %v5136_v36 = vpop.permute.xlu0 %1173 }
 0x689   : > { %8195 = vst [vmem:[#allocation75_spill] sm:$0xff] %v5136_v36 }
 0x690   : > { %v1187_v21 = vpop.permute.xlu0 %1186 }
 0x691   : > { %v1190_v58 = vmul.f32 %v1187_v21, %v8144_v15  ;;  %v1189_v2 = vmul.f32 %v1187_v21, %v8145_v56  ;;  %v1191_v48 = vmul.f32 %v1187_v21, %v8152_v9  ;;  %v5158_v21 = vld [vmem:[%s7663_s2 + $0x28] sm:$0xf] }
 0x693   : > { %1197 = vrot.lane.b32.xlu2 %v1190_v58, %s4202_s17  ;;  %1195 = vrot.lane.b32.xlu1 %v1189_v2, %s4202_s17 }
 0x69b   : > { %1208 = vperm.xlu2 %4035, %v3918_v16   ;;  %1199 = vrot.lane.b32.xlu1 %v1191_v48, %s4202_s17  ;;  %v5165_v16 = vld [vmem:[%s7663_s2 + $0x30] sm:$0xf] }
 0x6a3   : > { %4037 = vset.pattern.permute.xlu2 %v8157_v46 }
 0x6ed   : > { %v5147_v6 = vpop.permute.xlu2 %1197 }
 0x6ee   : > { %8197 = vst [vmem:[#allocation77_spill] sm:$0xff] %v5147_v6 }
 0x6f5   : > { %v1209_v26 = vpop.permute.xlu2 %1208 }
 0x6f6   : > { %v1212_v47 = vmul.f32 %v1209_v26, %v8183_v29  ;;  %v1213_v3 = vmul.f32 %v1209_v26, %v8181_v1  ;;  %v1211_v58 = vmul.f32 %v1209_v26, %v8182_v59 }
 0x6f8   : > { %1221 = vrot.lane.b32.xlu2 %v1213_v3, %s4202_s17  ;;  %1217 = vrot.lane.b32.xlu0 %v1211_v58, %s4202_s17  ;;  %v3921_v3 = vld [vmem:[%s7663_s2 + $0x38] sm:$0xf] }
 0x6f9   : > { %1219 = vrot.lane.b32.xlu1 %v1212_v47, %s4202_s17  ;;  %v5181_v47 = vpop.permute.xlu1 %1155 }
 0x6fa   : > { %8198 = vst [vmem:[#allocation78_spill] sm:$0xff] %v5181_v47 }
 0x700   : > { %1249 = vperm.xlu2 %4037, %v5158_v21  }
 0x701   : > { %1241 = vperm.xlu1 %4036, %v5158_v21   ;;  %v5183_v26 = vpop.permute.xlu1 %1175 }
 0x702   : > { %8199 = vst [vmem:[#allocation79_spill] sm:$0xff] %v5183_v26 }
 0x708   : > { %4039 = vset.pattern.permute.xlu2 %v8185_v13 }
 0x709   : > { %4038 = vset.pattern.permute.xlu1 %v8186_v30  ;;  %1268 = vperm.xlu2 %4039, %v5165_v16   ;;  %v5185_v2 = vpop.permute.xlu1 %1195 }
 0x70a   : > { %1257 = vperm.xlu1 %4038, %v5158_v21   ;;  %8200 = vst [vmem:[#allocation80_spill] sm:$0xff] %v5185_v2 }
 0x711   : > { %4041 = vset.pattern.permute.xlu2 %v8186_v30  ;;  %v5187_v48 = vpop.permute.xlu1 %1199 }
 0x712   : > { %4040 = vset.pattern.permute.xlu1 %v8157_v46  ;;  %1292 = vperm.xlu2 %4041, %v5165_v16   ;;  %8201 = vst [vmem:[#allocation81_spill] sm:$0xff] %v5187_v48 }
 0x713   : > { %1284 = vperm.xlu1 %4040, %v5165_v16  }
 0x71a   : > { %4043 = vset.pattern.permute.xlu2 %v8187_v54 }
 0x71b   : > { %4042 = vset.pattern.permute.xlu1 %v8185_v13 }
 0x71c   : > { %1303 = vperm.xlu1 %4042, %v3921_v3  }
 0x724   : > { %4045 = vset.pattern.permute.xlu1 %v8187_v54 }
 0x76b   : > { %v5189_v58 = vpop.permute.xlu1 %1219 }
 0x76c   : > { %8202 = vst [vmem:[#allocation82_spill] sm:$0xff] %v5189_v58 }
 0x773   : > { %v5191_v12 = vpop.permute.xlu1 %1241 }
 0x774   : > { %8203 = vst [vmem:[#allocation83_spill] sm:$0xff] %v5191_v12  ;;  %v5204_v12 = vpop.permute.xlu2 %1221 }
 0x775   : > { %8206 = vst [vmem:[#allocation86_spill] sm:$0xff] %v5204_v12 }
 0x77c   : > { %v5193_v24 = vpop.permute.xlu1 %1257 }
 0x77d   : > { %8204 = vst [vmem:[#allocation84_spill] sm:$0xff] %v5193_v24  ;;  %v5206_v24 = vpop.permute.xlu2 %1249 }
 0x77e   : > { %8207 = vst [vmem:[#allocation87_spill] sm:$0xff] %v5206_v24 }
 0x785   : > { %v5195_v32 = vpop.permute.xlu1 %1284 }
 0x786   : > { %8205 = vst [vmem:[#allocation85_spill] sm:$0xff] %v5195_v32  ;;  %v5208_v32 = vpop.permute.xlu2 %1268 }
 0x787   : > { %8208 = vst [vmem:[#allocation88_spill] sm:$0xff] %v5208_v32 }
 0x78e   : > { %v1304_v18 = vpop.permute.xlu1 %1303 }
 0x78f   : > { %v1306_v11 = vmul.f32 %v1304_v18, %v8190_v22  ;;  %v1308_v6 = vmul.f32 %v1304_v18, %v8188_v23  ;;  %v1307_v36 = vmul.f32 %v1304_v18, %v8189_v55  ;;  %v5210_v22 = vpop.permute.xlu2 %1292  ;;  %v5220_v55 = vpop.permute.xlu0 %1217 }
 0x790   : > { %8209 = vst [vmem:[#allocation89_spill] sm:$0xff] %v5210_v22 }
 0x791   : > { %1316 = vrot.lane.b32.xlu1 %v1308_v6, %s4205_s30  ;;  %1314 = vrot.lane.b32.xlu0 %v1307_v36, %s4205_s30  ;;  %8211 = vst [vmem:[#allocation91_spill] sm:$0xff] %v5220_v55 }
 0x792   : > { %1312 = vrot.lane.b32.xlu2 %v1306_v11, %s4205_s30 }
 0x79a   : > { %1325 = vperm.xlu2 %4043, %v3921_v3  }
 0x7a2   : > { %4044 = vset.pattern.permute.xlu2 %v8186_v30 }
 0x7ec   : > { %v5212_v23 = vpop.permute.xlu2 %1312 }
 0x7ed   : > { %8210 = vst [vmem:[#allocation90_spill] sm:$0xff] %v5212_v23 }
 0x7f4   : > { %v1326_v18 = vpop.permute.xlu2 %1325 }
 0x7f5   : > { %v1329_v6 = vmul.f32 %v1326_v18, %v4383_v44  ;;  %v1330_v36 = vmul.f32 %v1326_v18, %v4371_v38  ;;  %v1328_v11 = vmul.f32 %v1326_v18, %v8193_v8  ;;  %v5292_v8 = vsel %vm292_vm0, %v5132_v20, %v5097_v42 }
 0x7f6   : > { %v5349_v12 = vperm.slane %v5292_v8, 2  ;;  %v5366_v55 = vperm.slane %v5292_v8, 3 }
 0x7f7   : > { %1338 = vrot.lane.b32.xlu2 %v1330_v36, %s4205_s30  ;;  %1336 = vrot.lane.b32.xlu1 %v1329_v6, %s4205_s30 }
 0x7f8   : > { %1334 = vrot.lane.b32.xlu0 %v1328_v11, %s4205_s30 }
 0x800   : > { %1347 = vperm.xlu0 %4025, %v3921_v3  }
 0x803   : > { %v5222_v32 = vpop.permute.xlu0 %1314 }
 0x804   : > { %8212 = vst [vmem:[#allocation92_spill] sm:$0xff] %v5222_v32 }
 0x851   : > { %v5233_v6 = vpop.permute.xlu2 %1338 }
 0x852   : > { %8214 = vst [vmem:[#allocation94_spill] sm:$0xff] %v5233_v6 }
 0x86a   : > { %v5224_v22 = vpop.permute.xlu0 %1334 }
 0x86b   : > { %8213 = vst [vmem:[#allocation93_spill] sm:$0xff] %v5224_v22 }
 0x872   : > { %v1348_v23 = vpop.permute.xlu0 %1347 }
 0x873   : > { %v1350_v44 = vmul.f32 %v1348_v23, %v8145_v56  ;;  %v1351_v38 = vmul.f32 %v1348_v23, %v8144_v15  ;;  %v1352_v18 = vmul.f32 %v1348_v23, %v8152_v9  ;;  %v5253_v23 = vld [vmem:[%s7663_s2 + $0x4] sm:$0xf]  ;;  %v5287_v9 = vsel %vm292_vm0, %v5097_v42, 0.0 }
 0x875   : > { %1358 = vrot.lane.b32.xlu2 %v1351_v38, %s4205_s30  ;;  %1356 = vrot.lane.b32.xlu1 %v1350_v44, %s4205_s30  ;;  %v5246_v44 = vld [vmem:[%s7663_s2 + $0x40] sm:$0xf] }
 0x87d   : > { %1369 = vperm.xlu2 %4044, %v3921_v3   ;;  %1360 = vrot.lane.b32.xlu1 %v1352_v18, %s4205_s30 }
 0x885   : > { %4046 = vset.pattern.permute.xlu2 %v8157_v46 }
 0x8cf   : > { %v5235_v36 = vpop.permute.xlu2 %1358 }
 0x8d0   : > { %8215 = vst [vmem:[#allocation95_spill] sm:$0xff] %v5235_v36 }
 0x8d7   : > { %v1370_v11 = vpop.permute.xlu2 %1369 }
 0x8d8   : > { %v1373_v56 = vmul.f32 %v1370_v11, %v8183_v29  ;;  %v1374_v15 = vmul.f32 %v1370_v11, %v8181_v1  ;;  %v1372_v38 = vmul.f32 %v1370_v11, %v8182_v59 }
 0x8da   : > { %1382 = vrot.lane.b32.xlu2 %v1374_v15, %s4205_s30  ;;  %1378 = vrot.lane.b32.xlu0 %v1372_v38, %s4205_s30  ;;  %v3924_v15 = vld [vmem:[%s7663_s2 + $0xc] sm:$0xf] }
 0x8db   : > { %1380 = vrot.lane.b32.xlu1 %v1373_v56, %s4205_s30  ;;  %v5269_v56 = vpop.permute.xlu1 %1316 }
 0x8dc   : > { %8216 = vst [vmem:[#allocation96_spill] sm:$0xff] %v5269_v56 }
 0x8e2   : > { %1410 = vperm.xlu2 %4046, %v5246_v44  }
 0x8e3   : > { %1402 = vperm.xlu1 %4045, %v5246_v44   ;;  %v5271_v3 = vpop.permute.xlu1 %1336 }
 0x8e4   : > { %8217 = vst [vmem:[#allocation97_spill] sm:$0xff] %v5271_v3 }
 0x8ea   : > { %4048 = vset.pattern.permute.xlu2 %v8185_v13 }
 0x8eb   : > { %4047 = vset.pattern.permute.xlu1 %v8186_v30  ;;  %1431 = vperm.xlu2 %4048, %v5253_v23   ;;  %v5273_v18 = vpop.permute.xlu1 %1356 }
 0x8ec   : > { %1418 = vperm.xlu1 %4047, %v5246_v44   ;;  %8218 = vst [vmem:[#allocation98_spill] sm:$0xff] %v5273_v18 }
 0x8f3   : > { %4050 = vset.pattern.permute.xlu2 %v8186_v30  ;;  %v5275_v11 = vpop.permute.xlu1 %1360 }
 0x8f4   : > { %4049 = vset.pattern.permute.xlu1 %v8157_v46  ;;  %1461 = vperm.xlu2 %4050, %v5253_v23   ;;  %8219 = vst [vmem:[#allocation99_spill] sm:$0xff] %v5275_v11  ;;  %v5296_v11 = vsel %vm292_vm0, 0.0, %v5132_v20 }
 0x8f5   : > { %1451 = vperm.xlu1 %4049, %v5253_v23   ;;  %v5346_v24 = vperm.slane %v5296_v11, 2 }
 0x8fc   : > { %4052 = vset.pattern.permute.xlu2 %v8187_v54 }
 0x8fd   : > { %4051 = vset.pattern.permute.xlu1 %v8185_v13 }
 0x8fe   : > { %1474 = vperm.xlu1 %4051, %v3924_v15  }
 0x906   : > { %4054 = vset.pattern.permute.xlu1 %v8187_v54 }
 0x934   : > { %v5314_v20 = vpop.permute.xlu2 %1382 }
 0x935   : > { %8227 = vst [vmem:[#allocation107_spill] sm:$0xff] %v5314_v20 }
 0x93c   : > { %v5316_v22 = vpop.permute.xlu2 %1410 }
 0x93d   : > { %8228 = vst [vmem:[#allocation108_spill] sm:$0xff] %v5316_v22 }
 0x945   : > { %v5318_v3 = vpop.permute.xlu2 %1431 }
 0x946   : > { %8229 = vst [vmem:[#allocation109_spill] sm:$0xff] %v5318_v3 }
 0x94d   : > { %v5277_v38 = vpop.permute.xlu1 %1380 }
 0x94e   : > { %8220 = vst [vmem:[#allocation100_spill] sm:$0xff] %v5277_v38  ;;  %v5299_v38 = vperm.slane %v5296_v11, 0  ;;  %v5320_v6 = vpop.permute.xlu2 %1461 }
 0x94f   : > { %8230 = vst [vmem:[#allocation110_spill] sm:$0xff] %v5320_v6 }
 0x950   : > { %8224 = vst [vmem:[#allocation104_spill] sm:$0xff] %v5299_v38 }
 0x955   : > { %v5279_v1 = vpop.permute.xlu1 %1402 }
 0x956   : > { %8221 = vst [vmem:[#allocation101_spill] sm:$0xff] %v5279_v1 }
 0x95e   : > { %v5281_v29 = vpop.permute.xlu1 %1418 }
 0x95f   : > { %8222 = vst [vmem:[#allocation102_spill] sm:$0xff] %v5281_v29  ;;  %v5302_v29 = vperm.slane %v5287_v9, 0 }
 0x961   : > { %8225 = vst [vmem:[#allocation105_spill] sm:$0xff] %v5302_v29 }
 0x967   : > { %v5283_v59 = vpop.permute.xlu1 %1451 }
 0x968   : > { %8223 = vst [vmem:[#allocation103_spill] sm:$0xff] %v5283_v59  ;;  %v5305_v59 = vperm.slane %v5292_v8, 0 }
 0x96a   : > { %8226 = vst [vmem:[#allocation106_spill] sm:$0xff] %v5305_v59 }
 0x970   : > { %v1475_v1 = vpop.permute.xlu1 %1474 }
 0x971   : > { %v1480_v18 = vmul.f32 %v5299_v38, %v1475_v1  ;;  %v1482_v36 = vmul.f32 %v5302_v29, %v1475_v1  ;;  %v1481_v42 = vmul.f32 %v5305_v59, %v1475_v1  ;;  %v5325_v1 = vperm.slane %v5292_v8, 1 }
 0x973   : > { %1490 = vrot.lane.b32.xlu1 %v1482_v36, %s4201_s16  ;;  %1488 = vrot.lane.b32.xlu0 %v1481_v42, %s4201_s16  ;;  %8232 = vst [vmem:[#allocation112_spill] sm:$0xff] %v5325_v1  ;;  %v5328_v36 = vperm.slane %v5287_v9, 1 }
 0x974   : > { %1486 = vrot.lane.b32.xlu2 %v1480_v18, %s4201_s16  ;;  %v5331_v18 = vperm.slane %v5296_v11, 1 }
 0x975   : > { %8233 = vst [vmem:[#allocation113_spill] sm:$0xff] %v5328_v36 }
 0x976   : > { %8234 = vst [vmem:[#allocation114_spill] sm:$0xff] %v5331_v18 }
 0x97c   : > { %1499 = vperm.xlu2 %4052, %v3924_v15  }
 0x984   : > { %4053 = vset.pattern.permute.xlu2 %v8186_v30 }
 0x9ce   : > { %v5322_v56 = vpop.permute.xlu2 %1486 }
 0x9cf   : > { %8231 = vst [vmem:[#allocation111_spill] sm:$0xff] %v5322_v56  ;;  %v5339_v56 = vpop.permute.xlu0 %1378 }
 0x9d0   : > { %8235 = vst [vmem:[#allocation115_spill] sm:$0xff] %v5339_v56 }
 0x9d6   : > { %v1500_v42 = vpop.permute.xlu2 %1499 }
 0x9d7   : > { %v1506_v20 = vmul.f32 %v5325_v1, %v1500_v42  ;;  %v1507_v22 = vmul.f32 %v5328_v36, %v1500_v42  ;;  %v1505_v3 = vmul.f32 %v5331_v18, %v1500_v42 }
 0x9d9   : > { %1515 = vrot.lane.b32.xlu2 %v1507_v22, %s4201_s16  ;;  %1513 = vrot.lane.b32.xlu1 %v1506_v20, %s4201_s16 }
 0x9da   : > { %1511 = vrot.lane.b32.xlu0 %v1505_v3, %s4201_s16  ;;  %v5356_v3 = vperm.slane %v5287_v9, 2 }
 0x9e2   : > { %1524 = vperm.xlu0 %4025, %v3924_v15  }
 0x9e5   : > { %v5341_v6 = vpop.permute.xlu0 %1488 }
 0x9e6   : > { %8236 = vst [vmem:[#allocation116_spill] sm:$0xff] %v5341_v6 }
 0xa33   : > { %v5361_v6 = vpop.permute.xlu2 %1515 }
 0xa34   : > { %8238 = vst [vmem:[#allocation118_spill] sm:$0xff] %v5361_v6 }
 0xa4c   : > { %v5343_v32 = vpop.permute.xlu0 %1511 }
 0xa4d   : > { %8237 = vst [vmem:[#allocation117_spill] sm:$0xff] %v5343_v32 }
 0xa54   : > { %v1525_v42 = vpop.permute.xlu0 %1524 }
 0xa55   : > { %v1530_v22 = vmul.f32 %v5346_v24, %v1525_v42  ;;  %v1531_v20 = vmul.f32 %v5349_v12, %v1525_v42  ;;  %v1532_v32 = vmul.f32 %v5356_v3, %v1525_v42 }
 0xa57   : > { %1538 = vrot.lane.b32.xlu2 %v1531_v20, %s4201_s16  ;;  %1536 = vrot.lane.b32.xlu1 %v1530_v22, %s4201_s16  ;;  %v5369_v20 = vperm.slane %v5287_v9, 3  ;;  %v5372_v22 = vperm.slane %v5296_v11, 3 }
 0xa5f   : > { %1549 = vperm.xlu2 %4053, %v3924_v15   ;;  %1540 = vrot.lane.b32.xlu1 %v1532_v32, %s4201_s16 }
 0xa67   : > { %4055 = vset.pattern.permute.xlu2 %v8157_v46 }
 0xab1   : > { %v5363_v56 = vpop.permute.xlu2 %1538 }
 0xab2   : > { %8239 = vst [vmem:[#allocation119_spill] sm:$0xff] %v5363_v56  ;;  %v5389_v56 = vld [vmem:[%s7663_s2 + $0x14] sm:$0xf] }
 0xab9   : > { %v1550_v58 = vpop.permute.xlu2 %1549 }
 0xaba   : > { %v1556_v15 = vmul.f32 %v5366_v55, %v1550_v58  ;;  %v1557_v32 = vmul.f32 %v5369_v20, %v1550_v58  ;;  %v1555_v42 = vmul.f32 %v5372_v22, %v1550_v58  ;;  %v3926_v58 = vld [vmem:[%s7663_s2 + $0x1c] sm:$0xf] }
 0xabc   : > { %1565 = vrot.lane.b32.xlu2 %v1557_v32, %s4201_s16  ;;  %1561 = vrot.lane.b32.xlu0 %v1555_v42, %s4201_s16  ;;  %v5413_v32 = vpop.permute.xlu1 %1490 }
 0xabd   : > { %1563 = vrot.lane.b32.xlu1 %v1556_v15, %s4201_s16  ;;  %v3927_v15 = vld [vmem:[%s7663_s2 + $0x24] sm:$0xf]  ;;  %8240 = vst [vmem:[#allocation120_spill] sm:$0xff] %v5413_v32 }
 0xac4   : > { %1579 = vrot.lane.b32.xlu2 %v5287_v9, %s4199_s14  ;;  %1575 = vrot.lane.b32.xlu0 %v5296_v11, %s4199_s14  ;;  %v5415_v42 = vpop.permute.xlu1 %1513 }
 0xac5   : > { %1577 = vrot.lane.b32.xlu1 %v5292_v8, %s4199_s14  ;;  %8241 = vst [vmem:[#allocation121_spill] sm:$0xff] %v5415_v42 }
 0xacc   : > { %1611 = vperm.xlu2 %4055, %v5389_v56   ;;  %1632 = vrot.lane.b32.xlu0 %v5292_v8, %s4200_s15  ;;  %v5417_v6 = vpop.permute.xlu1 %1536 }
 0xacd   : > { %1601 = vperm.xlu1 %4054, %v5389_v56   ;;  %8242 = vst [vmem:[#allocation122_spill] sm:$0xff] %v5417_v6 }
 0xad4   : > { %1630 = vrot.lane.b32.xlu2 %v5296_v11, %s4200_s15  ;;  %v5419_v48 = vpop.permute.xlu1 %1540 }
 0xad5   : > { %4056 = vset.pattern.permute.xlu1 %v8186_v30  ;;  %4057 = vset.pattern.permute.xlu2 %v8185_v13  ;;  %8243 = vst [vmem:[#allocation123_spill] sm:$0xff] %v5419_v48 }
 0xad6   : > { %1621 = vperm.xlu1 %4056, %v5389_v56  }
 0xadc   : > { %1646 = vperm.xlu2 %4057, %v3926_v58  }
 0xade   : > { %1634 = vrot.lane.b32.xlu1 %v5287_v9, %s4200_s15 }
 0xadf   : > { %4058 = vset.pattern.permute.xlu1 %v8157_v46 }
 0xae4   : > { %4059 = vset.pattern.permute.xlu2 %v8186_v30 }
 0xae5   : > { %1676 = vperm.xlu2 %4059, %v3926_v58  }
 0xae6   : > { %1666 = vperm.xlu1 %4058, %v3926_v58  }
 0xaed   : > { %4061 = vset.pattern.permute.xlu2 %v8187_v54 }
 0xaee   : > { %4060 = vset.pattern.permute.xlu1 %v8185_v13 }
 0xaef   : > { %1689 = vperm.xlu1 %4060, %v3927_v15  }
 0xaf7   : > { %4064 = vset.pattern.permute.xlu1 %v8187_v54 }
 0xb2f   : > { %v5421_v2 = vpop.permute.xlu1 %1563 }
 0xb30   : > { %8244 = vst [vmem:[#allocation124_spill] sm:$0xff] %v5421_v2 }
 0xb37   : > { %v5423_v26 = vpop.permute.xlu1 %1577 }
 0xb38   : > { %8245 = vst [vmem:[#allocation125_spill] sm:$0xff] %v5423_v26 }
 0xb3f   : > { %v5425_v37 = vpop.permute.xlu1 %1601 }
 0xb40   : > { %8246 = vst [vmem:[#allocation126_spill] sm:$0xff] %v5425_v37 }
 0xb48   : > { %v5427_v47 = vpop.permute.xlu1 %1621 }
 0xb49   : > { %8247 = vst [vmem:[#allocation127_spill] sm:$0xff] %v5427_v47  ;;  %v5440_v47 = vpop.permute.xlu2 %1565 }
 0xb50   : > { %v5429_v5 = vpop.permute.xlu1 %1634 }
 0xb51   : > { %8248 = vst [vmem:[#allocation128_spill] sm:$0xff] %v5429_v5  ;;  %v5442_v5 = vpop.permute.xlu2 %1579 }
 0xb58   : > { %v5431_v61 = vpop.permute.xlu1 %1666 }
 0xb59   : > { %8249 = vst [vmem:[#allocation129_spill] sm:$0xff] %v5431_v61  ;;  %v5444_v61 = vpop.permute.xlu2 %1611 }
 0xb5a   : > { %8250 = vst [vmem:[#allocation130_spill] sm:$0xff] %v5444_v61 }
 0xb61   : > { %v1690_v7 = vpop.permute.xlu1 %1689  ;;  %v5446_v37 = vpop.permute.xlu2 %1630 }
 0xb62   : > { %v1692_v32 = vmul.f32 %v1690_v7, %v5299_v38  ;;  %v1694_v42 = vmul.f32 %v1690_v7, %v5302_v29  ;;  %v1693_v6 = vmul.f32 %v1690_v7, %v5305_v59  ;;  %8251 = vst [vmem:[#allocation131_spill] sm:$0xff] %v5446_v37 }
 0xb64   : > { %1702 = vrot.lane.b32.xlu1 %v1694_v42, %s4202_s17  ;;  %1700 = vrot.lane.b32.xlu0 %v1693_v6, %s4202_s17 }
 0xb65   : > { %1698 = vrot.lane.b32.xlu2 %v1692_v32, %s4202_s17 }
 0xb69   : > { %v5448_v2 = vpop.permute.xlu2 %1646 }
 0xb6a   : > { %8252 = vst [vmem:[#allocation132_spill] sm:$0xff] %v5448_v2 }
 0xb6d   : > { %1711 = vperm.xlu2 %4061, %v3927_v15  }
 0xb71   : > { %v5450_v7 = vpop.permute.xlu2 %1676 }
 0xb72   : > { %8253 = vst [vmem:[#allocation133_spill] sm:$0xff] %v5450_v7 }
 0xb75   : > { %4063 = vset.pattern.permute.xlu2 %v8186_v30 }
 0xbbf   : > { %v5452_v42 = vpop.permute.xlu2 %1698 }
 0xbc0   : > { %8254 = vst [vmem:[#allocation134_spill] sm:$0xff] %v5452_v42  ;;  %v4183_v42 = vld [vmem:[%s7663_s2] sm:$0xf] }
 0xbc7   : > { %v1712_v6 = vpop.permute.xlu2 %1711 }
 0xbc8   : > { %v1715_v32 = vmul.f32 %v1712_v6, %v5325_v1  ;;  %v1716_v48 = vmul.f32 %v1712_v6, %v5328_v36  ;;  %v1714_v26 = vmul.f32 %v1712_v6, %v5331_v18 }
 0xbca   : > { %1724 = vrot.lane.b32.xlu2 %v1716_v48, %s4202_s17  ;;  %1722 = vrot.lane.b32.xlu1 %v1715_v32, %s4202_s17  ;;  %v5467_v48 = vpop.permute.xlu0 %1561 }
 0xbcb   : > { %1720 = vrot.lane.b32.xlu0 %v1714_v26, %s4202_s17 }
 0xbd2   : > { %v5469_v6 = vpop.permute.xlu0 %1575 }
 0xbd3   : > { %1733 = vperm.xlu0 %4025, %v3927_v15  }
 0xbda   : > { %v5471_v26 = vpop.permute.xlu0 %1632 }
 0xbdb   : > { %4062 = vset.pattern.permute.xlu0 %v8187_v54  ;;  %8255 = vst [vmem:[#allocation135_spill] sm:$0xff] %v5471_v26 }
 0xbdc   : > { %954 = vperm.xlu0 %4062, %v4183_v42  }
 0xbe2   : > { %v5473_v32 = vpop.permute.xlu0 %1700 }
 0xbe3   : > { %8256 = vst [vmem:[#allocation136_spill] sm:$0xff] %v5473_v32 }
 0xbe4   : > { %1115 = vperm.xlu0 %4062, %v5073_v63  }
 0xbec   : > { %1276 = vperm.xlu0 %4062, %v5165_v16  }
 0xbf4   : > { %1441 = vperm.xlu0 %4062, %v5253_v23  }
 0xbfc   : > { %1656 = vperm.xlu0 %4062, %v3926_v58  }
 0xc24   : > { %v5484_v23 = vpop.permute.xlu2 %1724 }
 0xc25   : > { %8258 = vst [vmem:[#allocation138_spill] sm:$0xff] %v5484_v23 }
 0xc3d   : > { %v5475_v7 = vpop.permute.xlu0 %1720 }
 0xc3e   : > { %8257 = vst [vmem:[#allocation137_spill] sm:$0xff] %v5475_v7 }
 0xc45   : > { %v1734_v2 = vpop.permute.xlu0 %1733 }
 0xc46   : > { %v1736_v42 = vmul.f32 %v1734_v2, %v5346_v24  ;;  %v1737_v63 = vmul.f32 %v1734_v2, %v5349_v12  ;;  %v1738_v16 = vmul.f32 %v1734_v2, %v5356_v3  ;;  %v5503_v2 = vld [vmem:[%s7663_s2 + $0x2c] sm:$0xf] }
 0xc48   : > { %1744 = vrot.lane.b32.xlu2 %v1737_v63, %s4202_s17  ;;  %1742 = vrot.lane.b32.xlu1 %v1736_v42, %s4202_s17 }
 0xc50   : > { %1755 = vperm.xlu2 %4063, %v3927_v15   ;;  %1746 = vrot.lane.b32.xlu1 %v1738_v16, %s4202_s17  ;;  %v5525_v15 = vld [vmem:[%s7663_s2 + $0x3c] sm:$0xf] }
 0xc58   : > { %4065 = vset.pattern.permute.xlu2 %v8157_v46 }
 0xca2   : > { %v5486_v58 = vpop.permute.xlu2 %1744 }
 0xca3   : > { %8259 = vst [vmem:[#allocation139_spill] sm:$0xff] %v5486_v58 }
 0xcaa   : > { %v1756_v7 = vpop.permute.xlu2 %1755 }
 0xcab   : > { %v1758_v32 = vmul.f32 %v1756_v7, %v5372_v22  ;;  %v1759_v61 = vmul.f32 %v1756_v7, %v5366_v55  ;;  %v1760_v63 = vmul.f32 %v1756_v7, %v5369_v20  ;;  %v5531_v7 = vpop.permute.xlu1 %1702 }
 0xcac   : > { %8260 = vst [vmem:[#allocation140_spill] sm:$0xff] %v5531_v7 }
 0xcad   : > { %1768 = vrot.lane.b32.xlu2 %v1760_v63, %s4202_s17  ;;  %1764 = vrot.lane.b32.xlu0 %v1758_v32, %s4202_s17 }
 0xcae   : > { %1766 = vrot.lane.b32.xlu1 %v1759_v61, %s4202_s17  ;;  %v3929_v61 = vld [vmem:[%s7663_s2 + $0x34] sm:$0xf] }
 0xcb3   : > { %v5533_v32 = vpop.permute.xlu1 %1722 }
 0xcb4   : > { %8261 = vst [vmem:[#allocation141_spill] sm:$0xff] %v5533_v32 }
 0xcb5   : > { %1780 = vrot.lane.b32.xlu2 %v5287_v9, %s4203_s18  ;;  %1776 = vrot.lane.b32.xlu0 %v5296_v11, %s4203_s18 }
 0xcb6   : > { %1778 = vrot.lane.b32.xlu1 %v5292_v8, %s4203_s18 }
 0xcbb   : > { %v5535_v42 = vpop.permute.xlu1 %1742 }
 0xcbc   : > { %8262 = vst [vmem:[#allocation142_spill] sm:$0xff] %v5535_v42 }
 0xcbd   : > { %1812 = vperm.xlu2 %4065, %v5503_v2   ;;  %1833 = vrot.lane.b32.xlu0 %v5292_v8, %s4204_s23 }
 0xcbe   : > { %1802 = vperm.xlu1 %4064, %v5503_v2  }
 0xcc3   : > { %v5537_v16 = vpop.permute.xlu1 %1746 }
 0xcc4   : > { %8263 = vst [vmem:[#allocation143_spill] sm:$0xff] %v5537_v16 }
 0xcc5   : > { %1831 = vrot.lane.b32.xlu2 %v5296_v11, %s4204_s23  ;;  %1857 = vperm.xlu0 %4062, %v3929_v61  }
 0xcc6   : > { %4066 = vset.pattern.permute.xlu1 %v8186_v30  ;;  %4067 = vset.pattern.permute.xlu2 %v8185_v13 }
 0xcc7   : > { %1822 = vperm.xlu1 %4066, %v5503_v2  }
 0xccd   : > { %1847 = vperm.xlu2 %4067, %v3929_v61   ;;  %4072 = vset.pattern.permute.xlu0 %v8157_v46 }
 0xccf   : > { %1835 = vrot.lane.b32.xlu1 %v5287_v9, %s4204_s23 }
 0xcd0   : > { %4068 = vset.pattern.permute.xlu1 %v8157_v46 }
 0xcd5   : > { %4069 = vset.pattern.permute.xlu2 %v8186_v30 }
 0xcd6   : > { %1877 = vperm.xlu2 %4069, %v3929_v61  }
 0xcd7   : > { %1867 = vperm.xlu1 %4068, %v3929_v61  }
 0xcde   : > { %4071 = vset.pattern.permute.xlu2 %v8187_v54 }
 0xcdf   : > { %4070 = vset.pattern.permute.xlu1 %v8185_v13 }
 0xce0   : > { %1890 = vperm.xlu1 %4070, %v5525_v15  }
 0xce8   : > { %4075 = vset.pattern.permute.xlu1 %v8187_v54 }
 0xd20   : > { %v5539_v63 = vpop.permute.xlu1 %1766 }
 0xd21   : > { %8264 = vst [vmem:[#allocation144_spill] sm:$0xff] %v5539_v63 }
 0xd28   : > { %v5541_v61 = vpop.permute.xlu1 %1778 }
 0xd29   : > { %8265 = vst [vmem:[#allocation145_spill] sm:$0xff] %v5541_v61  ;;  %v8287_v61 = vld [vmem:[#allocation48_spill] sm:$0xff] }
 0xd30   : > { %v5543_v58 = vpop.permute.xlu1 %1802 }
 0xd31   : > { %8266 = vst [vmem:[#allocation146_spill] sm:$0xff] %v5543_v58 }
 0xd39   : > { %v5545_v23 = vpop.permute.xlu1 %1822 }
 0xd3a   : > { %8267 = vst [vmem:[#allocation147_spill] sm:$0xff] %v5545_v23  ;;  %v5559_v23 = vpop.permute.xlu2 %1768 }
 0xd3b   : > { %8270 = vst [vmem:[#allocation150_spill] sm:$0xff] %v5559_v23  ;;  %v8284_v23 = vld [vmem:[#allocation37_spill] sm:$0xff] }
 0xd3c   : > { %v965_v16 = vmul.f32 %v8284_v23, %v4843_v57 }
 0xd41   : > { %v5547_v37 = vpop.permute.xlu1 %1835 }
 0xd42   : > { %8268 = vst [vmem:[#allocation148_spill] sm:$0xff] %v5547_v37 }
 0xd49   : > { %v5549_v26 = vpop.permute.xlu1 %1867 }
 0xd4a   : > { %8269 = vst [vmem:[#allocation149_spill] sm:$0xff] %v5549_v26  ;;  %v5561_v26 = vpop.permute.xlu2 %1780 }
 0xd4b   : > { %8271 = vst [vmem:[#allocation151_spill] sm:$0xff] %v5561_v26 }
 0xd52   : > { %v1891_v54 = vpop.permute.xlu1 %1890  ;;  %v5563_v37 = vpop.permute.xlu2 %1812 }
 0xd53   : > { %v1893_v7 = vmul.f32 %v1891_v54, %v5299_v38  ;;  %v1894_v32 = vmul.f32 %v1891_v54, %v5305_v59  ;;  %v1895_v42 = vmul.f32 %v1891_v54, %v5302_v29  ;;  %8272 = vst [vmem:[#allocation152_spill] sm:$0xff] %v5563_v37 }
 0xd55   : > { %1903 = vrot.lane.b32.xlu1 %v1895_v42, %s4205_s30  ;;  %1901 = vrot.lane.b32.xlu0 %v1894_v32, %s4205_s30 }
 0xd56   : > { %1899 = vrot.lane.b32.xlu2 %v1893_v7, %s4205_s30 }
 0xd5a   : > { %v5565_v38 = vpop.permute.xlu2 %1831 }
 0xd5b   : > { %8273 = vst [vmem:[#allocation153_spill] sm:$0xff] %v5565_v38 }
 0xd5e   : > { %1912 = vperm.xlu2 %4071, %v5525_v15  }
 0xd62   : > { %v5567_v59 = vpop.permute.xlu2 %1847 }
 0xd63   : > { %8274 = vst [vmem:[#allocation154_spill] sm:$0xff] %v5567_v59 }
 0xd66   : > { %4074 = vset.pattern.permute.xlu2 %v8186_v30 }
 0xd6a   : > { %v5569_v54 = vpop.permute.xlu2 %1877 }
 0xd6b   : > { %8275 = vst [vmem:[#allocation155_spill] sm:$0xff] %v5569_v54 }
 0xdb0   : > { %v5571_v42 = vpop.permute.xlu2 %1899 }
 0xdb1   : > { %8276 = vst [vmem:[#allocation156_spill] sm:$0xff] %v5571_v42  ;;  %v955_v42 = vpop.permute.xlu0 %954 }
 0xdb8   : > { %v1913_v32 = vpop.permute.xlu2 %1912 }
 0xdb9   : > { %v1915_v7 = vmul.f32 %v1913_v32, %v5331_v18  ;;  %v1916_v29 = vmul.f32 %v1913_v32, %v5325_v1  ;;  %v1917_v58 = vmul.f32 %v1913_v32, %v5328_v36  ;;  %v5583_v18 = vpop.permute.xlu0 %1115  ;;  %v8281_v1 = vld [vmem:[#allocation46_spill] sm:$0xff] }
 0xdba   : > { %v958_v54 = vmul.f32 %v955_v42, %v8281_v1 }
 0xdbb   : > { %1925 = vrot.lane.b32.xlu2 %v1917_v58, %s4205_s30  ;;  %1923 = vrot.lane.b32.xlu1 %v1916_v29, %s4205_s30 }
 0xdbc   : > { %1921 = vrot.lane.b32.xlu0 %v1915_v7, %s4205_s30 }
 0xdc1   : > { %v5586_v32 = vpop.permute.xlu0 %1276 }
 0xdc4   : > { %1934 = vperm.xlu0 %4072, %v5525_v15  }
 0xdc9   : > { %v5590_v29 = vpop.permute.xlu0 %1441 }
 0xdcc   : > { %4073 = vset.pattern.permute.xlu0 %v8185_v13 }
 0xdcd   : > { %1072 = vperm.xlu0 %4073, %v5062_v49  }
 0xdd1   : > { %v5592_v58 = vpop.permute.xlu0 %1656 }
 0xdd5   : > { %1233 = vperm.xlu0 %4073, %v5158_v21  }
 0xdd9   : > { %v5594_v7 = vpop.permute.xlu0 %1764 }
 0xdda   : > { %8277 = vst [vmem:[#allocation157_spill] sm:$0xff] %v5594_v7 }
 0xddd   : > { %1394 = vperm.xlu0 %4073, %v5246_v44   ;;  %v957_v44 = vmul.f32 %v955_v42, %v4829_v17  ;;  %v8286_v42 = vld [vmem:[#allocation42_spill] sm:$0xff] }
 0xdde   : > { %v973_v1 = vmul.f32 %v8286_v42, %v4851_v27 }
 0xde1   : > { %v5596_v49 = vpop.permute.xlu0 %1776 }
 0xde2   : > { %8278 = vst [vmem:[#allocation158_spill] sm:$0xff] %v5596_v49 }
 0xde5   : > { %1591 = vperm.xlu0 %4073, %v5389_v56   ;;  %v8282_v56 = vld [vmem:[#allocation41_spill] sm:$0xff] }
 0xde6   : > { %v949_v59 = vmul.f32 %v8282_v56, %v4827_v40  ;;  %v974_v40 = vmul.f32 %v8286_v42, %v8287_v61 }
 0xde8   : > { %v959_v63 = vadd.f32 %v957_v44, %v949_v59  ;;  %v8288_v59 = vld [vmem:[#allocation20_spill] sm:$0xff]  ;;  %v8290_v44 = vld [vmem:[#allocation31_spill] sm:$0xff] }
 0xde9   : > { %v5598_v36 = vpop.permute.xlu0 %1833 }
 0xdea   : > { %8279 = vst [vmem:[#allocation159_spill] sm:$0xff] %v5598_v36  ;;  %v8285_v36 = vld [vmem:[#allocation47_spill] sm:$0xff]  ;;  %v967_v49 = vadd.f32 %v965_v16, %v959_v63 }
 0xded   : > { %1792 = vperm.xlu0 %4073, %v5503_v2   ;;  %v8283_v2 = vld [vmem:[#allocation45_spill] sm:$0xff] }
 0xdee   : > { %v950_v37 = vmul.f32 %v8282_v56, %v8283_v2  ;;  %v975_v56 = vadd.f32 %v973_v1, %v967_v49  ;;  %v1018_v1 = vsel %vm369_vm4, %v8290_v44, %v5091_v4 }
 0xdf0   : > { %v960_v7 = vadd.f32 %v958_v54, %v950_v37  ;;  %v8289_v37 = vld [vmem:[#allocation43_spill] sm:$0xff] }
 0xdf1   : > { %v5600_v21 = vpop.permute.xlu0 %1857  ;;  %v996_v54 = vsel %vm369_vm4, %v8289_v37, %v8288_v59 }
 0xdf2   : > { %8280 = vst [vmem:[#allocation160_spill] sm:$0xff] %v5600_v21  ;;  %v966_v21 = vmul.f32 %v8284_v23, %v8285_v36  ;;  %v997_v23 = vsel %vm369_vm4, %v8288_v59, %v5089_v25  ;;  %v1000_v16 = vadd.f32 %v996_v54, %v975_v56  ;;  %v1040_v25 = vsel %vm369_vm4, %v5093_v62, %v5040_v0 }
 0xdf3   : > { %v1062_v56 = vsel %vm369_vm4, %v5130_v53, %v5099_v10  ;;  %v1063_v59 = vsel %vm369_vm4, %v5099_v10, %v5114_v52 }
 0xdf4   : > { %v968_v17 = vadd.f32 %v966_v21, %v960_v7  ;;  %v1019_v21 = vsel %vm369_vm4, %v5091_v4, %v5029_v50  ;;  %v1022_v49 = vadd.f32 %v1018_v1, %v1000_v16  ;;  %v1041_v50 = vsel %vm369_vm4, %v5040_v0, %v5095_v60  ;;  %v8292_v0 = vld [vmem:[#allocation26_spill] sm:$0xff]  ;;  %v8293_v60 = vld [vmem:[#allocation51_spill] sm:$0xff]  ;;  %v8294_v1 = vld [vmem:[#allocation52_spill] sm:$0xff] }
 0xdf5   : > { %v1083_v53 = vmul.f32 %v5101_v45, %v8292_v0  ;;  %v1084_v44 = vmul.f32 %v5101_v45, %v8293_v60  ;;  %v1110_v45 = vmul.f32 %v5118_v14, %v4939_v41 }
 0xdf6   : > { %v976_v2 = vadd.f32 %v974_v40, %v968_v17 }
 0xdf8   : > { %v1001_v63 = vadd.f32 %v997_v23, %v976_v2  ;;  %v1044_v2 = vadd.f32 %v1040_v25, %v1022_v49 }
 0xdf9   : > { %v5608_v38 = vpop.permute.xlu0 %1901 }
 0xdfa   : > { %v1023_v42 = vadd.f32 %v1019_v21, %v1001_v63  ;;  %v1066_v23 = vadd.f32 %v1062_v56, %v1044_v2  ;;  %v8291_v63 = vld [vmem:[#allocation50_spill] sm:$0xff] }
 0xdfc   : > { %v1045_v4 = vadd.f32 %v1041_v50, %v1023_v42  ;;  %v8295_v42 = vld [vmem:[#allocation53_spill] sm:$0xff] }
 0xdfd   : > { %v1100_v25 = vmul.f32 %v5103_v43, %v8295_v42 }
 0xdfe   : > { %v1067_v16 = vadd.f32 %v1063_v59, %v1045_v4  ;;  %v8296_v4 = vld [vmem:[#allocation54_spill] sm:$0xff] }
 0xdff   : > { %v1111_v56 = vmul.f32 %v5118_v14, %v8296_v4 }
 0xe2e   : > { %v5618_v26 = vpop.permute.xlu0 %1921 }
 0xe36   : > { %v1935_v7 = vpop.permute.xlu0 %1934 }
 0xe37   : > { %v1937_v40 = vmul.f32 %v1935_v7, %v5346_v24  ;;  %v1938_v17 = vmul.f32 %v1935_v7, %v5349_v12  ;;  %v1939_v37 = vmul.f32 %v1935_v7, %v5356_v3  ;;  %v1091_v7 = vmul.f32 %v5116_v35, %v4917_v39 }
 0xe39   : > { %1945 = vrot.lane.b32.xlu2 %v1938_v17, %s4205_s30  ;;  %1943 = vrot.lane.b32.xlu1 %v1937_v40, %s4205_s30  ;;  %v1092_v40 = vmul.f32 %v5116_v35, %v8294_v1  ;;  %v1118_v35 = vmul.f32 %v5583_v18, %v4944_v19 }
 0xe3f   : > { %v1073_v54 = vpop.permute.xlu0 %1072 }
 0xe40   : > { %v1075_v62 = vmul.f32 %v1073_v54, %v4896_v34  ;;  %v1076_v21 = vmul.f32 %v1073_v54, %v8291_v63  ;;  %v8297_v54 = vld [vmem:[#allocation55_spill] sm:$0xff] }
 0xe41   : > { %1956 = vperm.xlu2 %4074, %v5525_v15   ;;  %1947 = vrot.lane.b32.xlu1 %v1939_v37, %s4205_s30  ;;  %v1099_v15 = vmul.f32 %v5103_v43, %v4928_v33 }
 0xe42   : > { %v1077_v10 = vadd.f32 %v1075_v62, %v1066_v23  ;;  %v1078_v52 = vadd.f32 %v1076_v21, %v1067_v16  ;;  %v1119_v23 = vmul.f32 %v5583_v18, %v8297_v54 }
 0xe44   : > { %v1085_v17 = vadd.f32 %v1083_v53, %v1077_v10  ;;  %v1086_v49 = vadd.f32 %v1084_v44, %v1078_v52  ;;  %v1126_v53 = vmul.f32 %v5105_v31, %v4953_v51  ;;  %v8298_v44 = vld [vmem:[#allocation56_spill] sm:$0xff] }
 0xe45   : > { %v1127_v14 = vmul.f32 %v5105_v31, %v8298_v44 }
 0xe46   : > { %v1093_v50 = vadd.f32 %v1091_v7, %v1085_v17  ;;  %v1094_v2 = vadd.f32 %v1092_v40, %v1086_v49  ;;  %v8299_v7 = vld [vmem:[#allocation72_spill] sm:$0xff]  ;;  %v8300_v17 = vld [vmem:[#allocation57_spill] sm:$0xff] }
 0xe47   : > { %v1134_v40 = vmul.f32 %v8299_v7, %v4957_v28  ;;  %v1135_v49 = vmul.f32 %v8299_v7, %v8300_v17  ;;  %v8319_v17 = vld [vmem:[#allocation87_spill] sm:$0xff] }
 0xe48   : > { %v1101_v59 = vadd.f32 %v1099_v15, %v1093_v50  ;;  %v1102_v37 = vadd.f32 %v1100_v25, %v1094_v2  ;;  %v8301_v25 = vld [vmem:[#allocation74_spill] sm:$0xff]  ;;  %v8302_v50 = vld [vmem:[#allocation73_spill] sm:$0xff] }
 0xe49   : > { %4076 = vset.pattern.permute.xlu2 %v8157_v46  ;;  %v1157_v2 = vsel %vm588_vm6, %v8302_v50, %v8301_v25  ;;  %v8312_v50 = vld [vmem:[#allocation86_spill] sm:$0xff] }
 0xe4a   : > { %v1112_v16 = vadd.f32 %v1110_v45, %v1101_v59  ;;  %v1113_v43 = vadd.f32 %v1111_v56, %v1102_v37  ;;  %v8303_v45 = vld [vmem:[#allocation78_spill] sm:$0xff]  ;;  %v8304_v37 = vld [vmem:[#allocation76_spill] sm:$0xff] }
 0xe4b   : > { %v1158_v56 = vsel %vm588_vm6, %v8301_v25, %v8303_v45  ;;  %v1234_v45 = vpop.permute.xlu0 %1233 }
 0xe4c   : > { %v1120_v62 = vadd.f32 %v1118_v35, %v1112_v16  ;;  %v1121_v21 = vadd.f32 %v1119_v23, %v1113_v43  ;;  %v8305_v35 = vld [vmem:[#allocation79_spill] sm:$0xff] }
 0xe4d   : > { %v1180_v23 = vsel %vm588_vm6, %v8305_v35, %v8304_v37  ;;  %v8306_v16 = vld [vmem:[#allocation75_spill] sm:$0xff] }
 0xe4e   : > { %v1128_v10 = vadd.f32 %v1126_v53, %v1120_v62  ;;  %v1129_v52 = vadd.f32 %v1127_v14, %v1121_v21  ;;  %v1179_v43 = vsel %vm588_vm6, %v8306_v16, %v8305_v35  ;;  %v8307_v53 = vld [vmem:[#allocation77_spill] sm:$0xff]  ;;  %v8308_v14 = vld [vmem:[#allocation80_spill] sm:$0xff]  ;;  %v8314_v35 = vld [vmem:[#allocation58_spill] sm:$0xff] }
 0xe50   : > { %v1136_v15 = vadd.f32 %v1134_v40, %v1128_v10  ;;  %v1137_v18 = vadd.f32 %v1135_v49, %v1129_v52  ;;  %v1201_v10 = vsel %vm588_vm6, %v8308_v14, %v8307_v53  ;;  %v8309_v52 = vld [vmem:[#allocation81_spill] sm:$0xff]  ;;  %v8317_v14 = vld [vmem:[#allocation59_spill] sm:$0xff] }
 0xe51   : > { %v1202_v7 = vsel %vm588_vm6, %v8307_v53, %v8309_v52  ;;  %v8315_v53 = vld [vmem:[#allocation28_spill] sm:$0xff] }
 0xe52   : > { %v1161_v59 = vadd.f32 %v1157_v2, %v1136_v15  ;;  %v1162_v31 = vadd.f32 %v1158_v56, %v1137_v18  ;;  %v8310_v15 = vld [vmem:[#allocation82_spill] sm:$0xff]  ;;  %v8311_v18 = vld [vmem:[#allocation91_spill] sm:$0xff] }
 0xe53   : > { %v1223_v25 = vsel %vm588_vm6, %v8311_v18, %v8310_v15  ;;  %v1224_v2 = vsel %vm588_vm6, %v8310_v15, %v8312_v50  ;;  %v8318_v18 = vld [vmem:[#allocation30_spill] sm:$0xff]  ;;  %v8320_v50 = vld [vmem:[#allocation60_spill] sm:$0xff] }
 0xe54   : > { %v1183_v62 = vadd.f32 %v1179_v43, %v1161_v59  ;;  %v1184_v21 = vadd.f32 %v1180_v23, %v1162_v31  ;;  %v8313_v31 = vld [vmem:[#allocation16_spill] sm:$0xff]  ;;  %v1237_v23 = vmul.f32 %v1234_v45, %v8314_v35  ;;  %v1252_v15 = vmul.f32 %v8319_v17, %v8318_v18  ;;  %v8324_v35 = vld [vmem:[#allocation29_spill] sm:$0xff] }
 0xe55   : > { %v1236_v37 = vmul.f32 %v1234_v45, %v8313_v31  ;;  %v8322_v45 = vld [vmem:[#allocation84_spill] sm:$0xff] }
 0xe56   : > { %v1205_v40 = vadd.f32 %v1201_v10, %v1183_v62  ;;  %v1206_v49 = vadd.f32 %v1202_v7, %v1184_v21  ;;  %v8316_v62 = vld [vmem:[#allocation83_spill] sm:$0xff] }
 0xe57   : > { %v1244_v21 = vmul.f32 %v8316_v62, %v8315_v53  ;;  %v1245_v10 = vmul.f32 %v8316_v62, %v8317_v14  ;;  %v8325_v62 = vld [vmem:[#allocation88_spill] sm:$0xff]  ;;  %v8327_v14 = vld [vmem:[#allocation21_spill] sm:$0xff] }
 0xe58   : > { %v1227_v56 = vadd.f32 %v1223_v25, %v1205_v40  ;;  %v1228_v59 = vadd.f32 %v1224_v2, %v1206_v49  ;;  %v1253_v40 = vmul.f32 %v8319_v17, %v8320_v50  ;;  %v8321_v2 = vld [vmem:[#allocation19_spill] sm:$0xff]  ;;  %v1279_v17 = vmul.f32 %v5586_v32, %v8327_v14 }
 0xe5a   : > { %v1238_v16 = vadd.f32 %v1236_v37, %v1227_v56  ;;  %v1239_v43 = vadd.f32 %v1237_v23, %v1228_v59  ;;  %v1260_v56 = vmul.f32 %v8322_v45, %v8321_v2  ;;  %v8323_v59 = vld [vmem:[#allocation61_spill] sm:$0xff]  ;;  %v8329_v2 = vld [vmem:[#allocation68_spill] sm:$0xff] }
 0xe5b   : > { %v1261_v37 = vmul.f32 %v8322_v45, %v8323_v59  ;;  %v8330_v45 = vld [vmem:[#allocation85_spill] sm:$0xff] }
 0xe5c   : > { %v1246_v52 = vadd.f32 %v1244_v21, %v1238_v16  ;;  %v1247_v7 = vadd.f32 %v1245_v10, %v1239_v43  ;;  %v1271_v16 = vmul.f32 %v8325_v62, %v8324_v35  ;;  %v8326_v43 = vld [vmem:[#allocation62_spill] sm:$0xff]  ;;  %v8332_v59 = vld [vmem:[#allocation69_spill] sm:$0xff] }
 0xe5d   : > { %v1272_v21 = vmul.f32 %v8325_v62, %v8326_v43  ;;  %v8333_v62 = vld [vmem:[#allocation89_spill] sm:$0xff]  ;;  %v8335_v43 = vld [vmem:[#allocation92_spill] sm:$0xff] }
 0xe5e   : > { %v1254_v49 = vadd.f32 %v1252_v15, %v1246_v52  ;;  %v1255_v25 = vadd.f32 %v1253_v40, %v1247_v7  ;;  %v8328_v52 = vld [vmem:[#allocation22_spill] sm:$0xff] }
 0xe5f   : > { %v1280_v7 = vmul.f32 %v5586_v32, %v8328_v52  ;;  %v8336_v32 = vld [vmem:[#allocation90_spill] sm:$0xff] }
 0xe60   : > { %v1262_v23 = vadd.f32 %v1260_v56, %v1254_v49  ;;  %v1263_v53 = vadd.f32 %v1261_v37, %v1255_v25  ;;  %v1287_v49 = vmul.f32 %v8330_v45, %v8329_v2  ;;  %v8331_v25 = vld [vmem:[#allocation66_spill] sm:$0xff] }
 0xe61   : > { %v1288_v56 = vmul.f32 %v8330_v45, %v8331_v25  ;;  %v8348_v25 = vld [vmem:[#allocation25_spill] sm:$0xff] }
 0xe62   : > { %v1273_v10 = vadd.f32 %v1271_v16, %v1262_v23  ;;  %v1274_v18 = vadd.f32 %v1272_v21, %v1263_v53  ;;  %v1295_v23 = vmul.f32 %v8333_v62, %v8332_v59  ;;  %v8334_v53 = vld [vmem:[#allocation67_spill] sm:$0xff] }
 0xe63   : > { %v1296_v16 = vmul.f32 %v8333_v62, %v8334_v53  ;;  %v8343_v59 = vld [vmem:[#allocation99_spill] sm:$0xff] }
 0xe64   : > { %v1281_v15 = vadd.f32 %v1279_v17, %v1273_v10  ;;  %v1282_v40 = vadd.f32 %v1280_v7, %v1274_v18  ;;  %v1318_v18 = vsel %vm792_vm11, %v8336_v32, %v8335_v43  ;;  %v8337_v10 = vld [vmem:[#allocation96_spill] sm:$0xff]  ;;  %v8342_v32 = vld [vmem:[#allocation98_spill] sm:$0xff] }
 0xe65   : > { %v1319_v17 = vsel %vm792_vm11, %v8335_v43, %v8337_v10  ;;  %v8345_v10 = vld [vmem:[#allocation115_spill] sm:$0xff] }
 0xe66   : > { %v1289_v37 = vadd.f32 %v1287_v49, %v1281_v15  ;;  %v1290_v35 = vadd.f32 %v1288_v56, %v1282_v40  ;;  %v8338_v15 = vld [vmem:[#allocation94_spill] sm:$0xff]  ;;  %v8339_v40 = vld [vmem:[#allocation97_spill] sm:$0xff] }
 0xe67   : > { %v1341_v49 = vsel %vm792_vm11, %v8339_v40, %v8338_v15  ;;  %v8340_v56 = vld [vmem:[#allocation93_spill] sm:$0xff]  ;;  %v8346_v15 = vld [vmem:[#allocation107_spill] sm:$0xff] }
 0xe68   : > { %v1297_v21 = vadd.f32 %v1295_v23, %v1289_v37  ;;  %v1298_v14 = vadd.f32 %v1296_v16, %v1290_v35  ;;  %v1340_v62 = vsel %vm792_vm11, %v8340_v56, %v8339_v40  ;;  %v5748_v37 = vpop.permute.xlu2 %1925  ;;  %v8341_v16 = vld [vmem:[#allocation95_spill] sm:$0xff] }
 0xe69   : > { %v1362_v53 = vsel %vm792_vm11, %v8342_v32, %v8341_v16 }
 0xe6a   : > { %v1322_v7 = vadd.f32 %v1318_v18, %v1297_v21  ;;  %v1323_v45 = vadd.f32 %v1319_v17, %v1298_v14  ;;  %v1363_v14 = vsel %vm792_vm11, %v8341_v16, %v8343_v59  ;;  %v8344_v18 = vld [vmem:[#allocation100_spill] sm:$0xff] }
 0xe6b   : > { %v1384_v17 = vsel %vm792_vm11, %v8345_v10, %v8344_v18  ;;  %v1385_v40 = vsel %vm792_vm11, %v8344_v18, %v8346_v15  ;;  %v8353_v15 = vld [vmem:[#allocation108_spill] sm:$0xff] }
 0xe6c   : > { %v1344_v35 = vadd.f32 %v1340_v62, %v1322_v7  ;;  %v1345_v23 = vadd.f32 %v1341_v49, %v1323_v45  ;;  %v1395_v7 = vpop.permute.xlu0 %1394  ;;  %v8347_v62 = vld [vmem:[#allocation24_spill] sm:$0xff] }
 0xe6d   : > { %v1397_v32 = vmul.f32 %v1395_v7, %v8347_v62  ;;  %v1398_v2 = vmul.f32 %v1395_v7, %v8348_v25  ;;  %v8354_v62 = vld [vmem:[#allocation38_spill] sm:$0xff]  ;;  %v8421_v25 = vld [vmem:[#allocation155_spill] sm:$0xff] }
 0xe6e   : > { %v1366_v43 = vadd.f32 %v1362_v53, %v1344_v35  ;;  %v1367_v21 = vadd.f32 %v1363_v14, %v1345_v23  ;;  %v8349_v35 = vld [vmem:[#allocation32_spill] sm:$0xff]  ;;  %v8350_v23 = vld [vmem:[#allocation101_spill] sm:$0xff]  ;;  %v1414_v7 = vmul.f32 %v8353_v15, %v8354_v62 }
 0xe6f   : > { %v1405_v16 = vmul.f32 %v8350_v23, %v8349_v35  ;;  %v8351_v14 = vld [vmem:[#allocation17_spill] sm:$0xff] }
 0xe70   : > { %v1388_v45 = vadd.f32 %v1384_v17, %v1366_v43  ;;  %v1389_v49 = vadd.f32 %v1385_v40, %v1367_v21  ;;  %v1406_v10 = vmul.f32 %v8350_v23, %v8351_v14  ;;  %v8352_v17 = vld [vmem:[#allocation33_spill] sm:$0xff]  ;;  %v5788_v23 = vsel %vm4680_vm1, %v5292_v8, 0.0  ;;  %v8418_v14 = vld [vmem:[#allocation154_spill] sm:$0xff] }
 0xe71   : > { %v1413_v40 = vmul.f32 %v8353_v15, %v8352_v17  ;;  %8358 = vst [vmem:[#allocation37_spill] sm:$0xff] %v5788_v23 }
 0xe72   : > { %v1399_v59 = vadd.f32 %v1397_v32, %v1388_v45  ;;  %v1400_v53 = vadd.f32 %v1398_v2, %v1389_v49 }
 0xe74   : > { %v1407_v52 = vadd.f32 %v1405_v16, %v1399_v59  ;;  %v1408_v50 = vadd.f32 %v1406_v10, %v1400_v53  ;;  %v5783_v59 = vsel %vm4814_vm9, %v5296_v11, 0.0  ;;  %v8359_v16 = vld [vmem:[#allocation70_spill] sm:$0xff] }
 0xe75   : > { %8356 = vst [vmem:[#allocation41_spill] sm:$0xff] %v5783_v59  ;;  %v8360_v10 = vld [vmem:[#allocation102_spill] sm:$0xff] }
 0xe76   : > { %v1415_v45 = vadd.f32 %v1413_v40, %v1407_v52  ;;  %v1416_v49 = vadd.f32 %v1414_v7, %v1408_v50  ;;  %v7881_v50 = vperm.slane %v5783_v59, 0  ;;  %v7876_v52 = vperm.slane %v5788_v23, 0  ;;  %v8362_v7 = vld [vmem:[#allocation109_spill] sm:$0xff] }
 0xe78   : > { %v1437_v62 = vmul.f32 %v7876_v52, %v8362_v7 }
 0xe93   : > { %v5762_v56 = vpop.permute.xlu2 %1945 }
 0xe9b   : > { %v1957_v18 = vpop.permute.xlu2 %1956 }
 0xe9c   : > { %v1959_v43 = vmul.f32 %v1957_v18, %v5372_v22  ;;  %v1960_v21 = vmul.f32 %v1957_v18, %v5366_v55  ;;  %v1961_v2 = vmul.f32 %v1957_v18, %v5369_v20  ;;  %v1421_v18 = vmul.f32 %v8360_v10, %v8359_v16  ;;  %v8389_v16 = vld [vmem:[#allocation132_spill] sm:$0xff] }
 0xe9e   : > { %1965 = vrot.lane.b32.xlu0 %v1959_v43, %s4205_s30  ;;  %1967 = vrot.lane.b32.xlu1 %v1960_v21, %s4205_s30  ;;  %v8361_v43 = vld [vmem:[#allocation34_spill] sm:$0xff]  ;;  %v1423_v15 = vadd.f32 %v1421_v18, %v1415_v45 }
 0xe9f   : > { %1969 = vrot.lane.b32.xlu2 %v1961_v2, %s4205_s30  ;;  %v1422_v21 = vmul.f32 %v8360_v10, %v8361_v43  ;;  %v1436_v2 = vmul.f32 %v7881_v50, %v8362_v7  ;;  %v7879_v10 = vperm.slane %v5783_v59, 1  ;;  %v7878_v43 = vperm.slane %v5788_v23, 1  ;;  %v8366_v50 = vld [vmem:[#allocation111_spill] sm:$0xff] }
 0xea1   : > { %v1424_v40 = vadd.f32 %v1422_v21, %v1416_v49  ;;  %v1438_v45 = vadd.f32 %v1436_v2, %v1423_v15  ;;  %v1446_v18 = vmul.f32 %v7879_v10, %v5590_v29  ;;  %v7877_v21 = vperm.slane %v5783_v59, 2  ;;  %v8363_v15 = vld [vmem:[#allocation103_spill] sm:$0xff] }
 0xea2   : > { %v7882_v2 = vperm.slane %v5788_v23, 3 }
 0xea3   : > { %v1439_v49 = vadd.f32 %v1437_v62, %v1424_v40  ;;  %v1448_v7 = vadd.f32 %v1446_v18, %v1438_v45  ;;  %v3931_v62 = vld [vmem:[%s7663_s2 + $0x44] sm:$0xf]  ;;  %v8364_v18 = vld [vmem:[#allocation110_spill] sm:$0xff] }
 0xea6   : > { %1977 = vrot.lane.b32.xlu0 %v5296_v11, %s4206_s7  ;;  %1979 = vrot.lane.b32.xlu1 %v5292_v8, %s4206_s7  ;;  %v1447_v11 = vmul.f32 %v7878_v43, %v5590_v29  ;;  %v7880_v8 = vperm.slane %v5788_v23, 2  ;;  %v7883_v29 = vperm.slane %v5783_v59, 3 }
 0xea7   : > { %1981 = vrot.lane.b32.xlu2 %v5287_v9, %s4206_s7  ;;  %v1456_v9 = vmul.f32 %v7877_v21, %v8363_v15  ;;  %v1467_v21 = vmul.f32 %v7882_v2, %v8364_v18 }
 0xea8   : > { %v1449_v52 = vadd.f32 %v1447_v11, %v1439_v49  ;;  %v1457_v40 = vmul.f32 %v7880_v8, %v8363_v15  ;;  %v1466_v11 = vmul.f32 %v7883_v29, %v8364_v18  ;;  %v3932_v15 = vld [vmem:[%s7666_s5 + $0x4] sm:$0xf]  ;;  %v8365_v8 = vld [vmem:[#allocation116_spill] sm:$0xff] }
 0xea9   : > { %v1458_v45 = vadd.f32 %v1456_v9, %v1448_v7  ;;  %v1492_v7 = vsel %vm369_vm4, %v8366_v50, %v8365_v8  ;;  %v8370_v50 = vld [vmem:[#allocation117_spill] sm:$0xff] }
 0xeaa   : > { %v1459_v49 = vadd.f32 %v1457_v40, %v1449_v52  ;;  %v8367_v52 = vld [vmem:[#allocation120_spill] sm:$0xff] }
 0xeab   : > { %v1468_v43 = vadd.f32 %v1466_v11, %v1458_v45  ;;  %v1493_v9 = vsel %vm369_vm4, %v8365_v8, %v8367_v52  ;;  %v8369_v45 = vld [vmem:[#allocation121_spill] sm:$0xff] }
 0xeac   : > { %v1469_v10 = vadd.f32 %v1467_v21, %v1459_v49  ;;  %v8368_v21 = vld [vmem:[#allocation118_spill] sm:$0xff]  ;;  %v1517_v11 = vsel %vm369_vm4, %v8370_v50, %v8369_v45  ;;  %v8371_v52 = vld [vmem:[#allocation125_spill] sm:$0xff]  ;;  %v8379_v50 = vld [vmem:[#allocation124_spill] sm:$0xff] }
 0xead   : > { %v1496_v40 = vadd.f32 %v1492_v7, %v1468_v43  ;;  %v1518_v49 = vsel %vm369_vm4, %v8369_v45, %v8368_v21  ;;  %v1581_v29 = vsel %vm463_vm2, %v5469_v6, %v8371_v52  ;;  %v1582_v43 = vsel %vm463_vm2, %v8371_v52, %v5442_v5 }
 0xeae   : > { %1993 = vperm.xlu0 %4073, %v3931_v62   ;;  %2003 = vperm.xlu1 %4075, %v3931_v62   ;;  %v1497_v18 = vadd.f32 %v1493_v9, %v1469_v10  ;;  %v5862_v10 = vld [vmem:[%s7664_s3] sm:$0xf]  ;;  %v8374_v9 = vld [vmem:[#allocation123_spill] sm:$0xff]  ;;  %v5873_v5 = vsel %vm4859_vm12, %v1581_v29, 0.0 }
 0xeaf   : > { %2013 = vperm.xlu2 %4076, %v3931_v62   ;;  %v1521_v2 = vadd.f32 %v1517_v11, %v1496_v40  ;;  %8376 = vst [vmem:[#allocation47_spill] sm:$0xff] %v5873_v5  ;;  %v1567_v11 = vsel %vm369_vm4, %v5467_v48, %v8379_v50  ;;  %v7887_v29 = vperm.slane %v5873_v5, 0 }
 0xeb0   : > { %v1522_v8 = vadd.f32 %v1518_v49, %v1497_v18  ;;  %v5877_v49 = vsel %vm4705_vm3, %v1582_v43, 0.0 }
 0xeb1   : > { %8378 = vst [vmem:[#allocation42_spill] sm:$0xff] %v5877_v49  ;;  %v7889_v48 = vperm.slane %v5877_v49, 1 }
 0xeb6   : > { %4077 = vset.pattern.permute.xlu1 %v8186_v30  ;;  %4083 = vset.pattern.permute.xlu0 %v8157_v46 }
 0xeb7   : > { %4078 = vset.pattern.permute.xlu2 %v8185_v13  ;;  %2023 = vperm.xlu1 %4077, %v3931_v62   ;;  %v8372_v62 = vld [vmem:[#allocation119_spill] sm:$0xff] }
 0xeb8   : > { %2036 = vperm.xlu2 %4078, %v3932_v15   ;;  %v8373_v15 = vld [vmem:[#allocation122_spill] sm:$0xff]  ;;  %v1543_v40 = vsel %vm369_vm4, %v8372_v62, %v8374_v9  ;;  %v7888_v9 = vperm.slane %v5873_v5, 1 }
 0xeb9   : > { %v1542_v7 = vsel %vm369_vm4, %v8373_v15, %v8372_v62  ;;  %v1547_v21 = vadd.f32 %v1543_v40, %v1522_v8  ;;  %v1592_v8 = vpop.permute.xlu0 %1591  ;;  %v7886_v15 = vperm.slane %v5877_v49, 0 }
 0xeba   : > { %v1546_v18 = vadd.f32 %v1542_v7, %v1521_v2  ;;  %v1568_v2 = vsel %vm369_vm4, %v8379_v50, %v5440_v47  ;;  %v1596_v43 = vmul.f32 %v7887_v29, %v1592_v8  ;;  %v7891_v47 = vperm.slane %v5873_v5, 2  ;;  %v8384_v29 = vld [vmem:[#allocation130_spill] sm:$0xff] }
 0xebb   : > { %v1572_v62 = vadd.f32 %v1568_v2, %v1547_v21  ;;  %v1597_v7 = vmul.f32 %v7886_v15, %v1592_v8  ;;  %v8380_v21 = vld [vmem:[#allocation126_spill] sm:$0xff]  ;;  %v8381_v2 = vld [vmem:[#allocation135_spill] sm:$0xff] }
 0xebc   : > { %v1571_v52 = vadd.f32 %v1567_v11, %v1546_v18  ;;  %v7890_v18 = vperm.slane %v5877_v49, 2  ;;  %v1606_v50 = vmul.f32 %v7888_v9, %v8380_v21  ;;  %v1607_v11 = vmul.f32 %v7889_v48, %v8380_v21  ;;  %v8382_v8 = vld [vmem:[#allocation131_spill] sm:$0xff] }
 0xebd   : > { %v1599_v23 = vadd.f32 %v1597_v7, %v1572_v62  ;;  %v8383_v62 = vld [vmem:[#allocation128_spill] sm:$0xff]  ;;  %v1616_v9 = vmul.f32 %v7891_v47, %v8384_v29 }
 0xebe   : > { %v1598_v40 = vadd.f32 %v1596_v43, %v1571_v52  ;;  %v1636_v52 = vsel %vm519_vm5, %v8382_v8, %v8381_v2  ;;  %v1637_v43 = vsel %vm519_vm5, %v8381_v2, %v8383_v62  ;;  %v1617_v21 = vmul.f32 %v7890_v18, %v8384_v29  ;;  %v8387_v62 = vld [vmem:[#allocation127_spill] sm:$0xff] }
 0xebf   : > { %4079 = vset.pattern.permute.xlu1 %v8157_v46  ;;  %v1609_v15 = vadd.f32 %v1607_v11, %v1599_v23  ;;  %v5918_v48 = vsel %vm4814_vm9, %v1636_v52, 0.0  ;;  %v5922_v8 = vsel %vm4680_vm1, %v1637_v43, 0.0  ;;  %v7894_v2 = vperm.slane %v5873_v5, 3  ;;  %v8394_v5 = vld [vmem:[#allocation140_spill] sm:$0xff] }
 0xec0   : > { %2058 = vperm.xlu2 %4078, %v5862_v10   ;;  %v1608_v7 = vadd.f32 %v1606_v50, %v1598_v40  ;;  %8385 = vst [vmem:[#allocation48_spill] sm:$0xff] %v5918_v48  ;;  %v7895_v23 = vperm.slane %v5877_v49, 3  ;;  %v7897_v11 = vperm.slane %v5918_v48, 0  ;;  %v7896_v18 = vperm.slane %v5922_v8, 0  ;;  %v8393_v49 = vld [vmem:[#allocation134_spill] sm:$0xff] }
 0xec1   : > { %8386 = vst [vmem:[#allocation20_spill] sm:$0xff] %v5922_v8  ;;  %v1619_v50 = vadd.f32 %v1617_v21, %v1609_v15  ;;  %v1626_v29 = vmul.f32 %v7894_v2, %v8387_v62  ;;  %v8388_v43 = vmov 1   ;;  %v7898_v21 = vperm.slane %v5922_v8, 1 }
 0xec2   : > { %v1618_v40 = vadd.f32 %v1616_v9, %v1608_v7  ;;  %v1627_v52 = vmul.f32 %v7895_v23, %v8387_v62  ;;  %v1651_v15 = vmul.f32 %v7897_v11, %v8389_v16  ;;  %v1652_v9 = vmul.f32 %v7896_v18, %v8389_v16 }
 0xec3   : > { %v7899_v7 = vperm.slane %v5918_v48, 1  ;;  %v7905_v18 = vperm.slane %v5918_v48, 3  ;;  %v7907_v11 = vperm.slane %v5922_v8, 3 }
 0xec4   : > { %v1628_v47 = vadd.f32 %v1626_v29, %v1618_v40  ;;  %v1629_v59 = vadd.f32 %v1627_v52, %v1619_v50  ;;  %v1662_v40 = vmul.f32 %v7898_v21, %v5592_v58  ;;  %v7902_v50 = vperm.slane %v5918_v48, 2  ;;  %v8391_v21 = vld [vmem:[#allocation133_spill] sm:$0xff]  ;;  %v8412_v48 = vld [vmem:[#allocation148_spill] sm:$0xff] }
 0xec5   : > { %v1661_v23 = vmul.f32 %v7899_v7, %v5592_v58  ;;  %v7906_v29 = vperm.slane %v5922_v8, 2  ;;  %v1681_v7 = vmul.f32 %v7905_v18, %v8391_v21 }
 0xec6   : > { %v1653_v2 = vadd.f32 %v1651_v15, %v1628_v47  ;;  %v1654_v62 = vadd.f32 %v1652_v9, %v1629_v59  ;;  %v8390_v47 = vld [vmem:[#allocation129_spill] sm:$0xff] }
 0xec7   : > { %v1671_v59 = vmul.f32 %v7902_v50, %v8390_v47  ;;  %v1672_v15 = vmul.f32 %v7906_v29, %v8390_v47  ;;  %v8397_v29 = vld [vmem:[#allocation137_spill] sm:$0xff] }
 0xec8   : > { %4080 = vset.pattern.permute.xlu2 %v8186_v30  ;;  %v1663_v52 = vadd.f32 %v1661_v23, %v1653_v2  ;;  %v1664_v16 = vadd.f32 %v1662_v40, %v1654_v62  ;;  %v1682_v2 = vmul.f32 %v7907_v11, %v8391_v21  ;;  %v8392_v40 = vld [vmem:[#allocation136_spill] sm:$0xff]  ;;  %v8400_v11 = vld [vmem:[#allocation158_spill] sm:$0xff] }
 0xec9   : > { %2082 = vperm.xlu2 %4080, %v5862_v10   ;;  %v1704_v50 = vsel %vm588_vm6, %v8393_v49, %v8392_v40  ;;  %v1705_v47 = vsel %vm588_vm6, %v8392_v40, %v8394_v5  ;;  %v8403_v40 = vld [vmem:[#allocation143_spill] sm:$0xff] }
 0xeca   : > { %v1673_v9 = vadd.f32 %v1671_v59, %v1663_v52  ;;  %v1674_v58 = vadd.f32 %v1672_v15, %v1664_v16  ;;  %v8395_v59 = vld [vmem:[#allocation138_spill] sm:$0xff]  ;;  %v8396_v15 = vld [vmem:[#allocation141_spill] sm:$0xff] }
 0xecb   : > { %v1727_v18 = vsel %vm588_vm6, %v8396_v15, %v8395_v59  ;;  %v1726_v21 = vsel %vm588_vm6, %v8397_v29, %v8396_v15  ;;  %v5989_v59 = vpop.permute.xlu1 %1903  ;;  %v8407_v15 = vld [vmem:[#allocation144_spill] sm:$0xff] }
 0xecc   : > { %v1683_v23 = vadd.f32 %v1681_v7, %v1673_v9  ;;  %v1684_v62 = vadd.f32 %v1682_v2, %v1674_v58  ;;  %v8398_v58 = vld [vmem:[#allocation151_spill] sm:$0xff]  ;;  %v8399_v2 = vld [vmem:[#allocation145_spill] sm:$0xff] }
 0xecd   : > { %v1783_v49 = vsel %vm667_vm7, %v8399_v2, %v8398_v58  ;;  %v1782_v5 = vsel %vm667_vm7, %v8400_v11, %v8399_v2  ;;  %v8406_v11 = vld [vmem:[#allocation150_spill] sm:$0xff]  ;;  %v8408_v58 = vld [vmem:[#allocation157_spill] sm:$0xff] }
 0xece   : > { %v1708_v52 = vadd.f32 %v1704_v50, %v1683_v23  ;;  %v1709_v16 = vadd.f32 %v1705_v47, %v1684_v62  ;;  %v8401_v50 = vld [vmem:[#allocation139_spill] sm:$0xff]  ;;  %v8402_v23 = vld [vmem:[#allocation142_spill] sm:$0xff]  ;;  %v1770_v2 = vsel %vm588_vm6, %v8408_v58, %v8407_v15 }
 0xecf   : > { %v1748_v62 = vsel %vm588_vm6, %v8402_v23, %v8401_v50  ;;  %v1749_v47 = vsel %vm588_vm6, %v8401_v50, %v8403_v40  ;;  %v1793_v50 = vpop.permute.xlu0 %1792 }
 0xed0   : > { %v1730_v7 = vadd.f32 %v1726_v21, %v1708_v52  ;;  %v1731_v9 = vadd.f32 %v1727_v18, %v1709_v16  ;;  %v5993_v52 = vsel %vm4705_vm3, %v1783_v49, 0.0  ;;  %v5997_v16 = vsel %vm4859_vm12, %v1782_v5, 0.0 }
 0xed1   : > { %4082 = vset.pattern.permute.xlu2 %v8388_v43  ;;  %8404 = vst [vmem:[#allocation43_spill] sm:$0xff] %v5993_v52  ;;  %v1771_v21 = vsel %vm588_vm6, %v8407_v15, %v8406_v11  ;;  %v7908_v49 = vperm.slane %v5993_v52, 0  ;;  %v7914_v11 = vperm.slane %v5997_v16, 1 }
 0xed2   : > { %v1752_v29 = vadd.f32 %v1748_v62, %v1730_v7  ;;  %v1753_v18 = vadd.f32 %v1749_v47, %v1731_v9  ;;  %8405 = vst [vmem:[#allocation31_spill] sm:$0xff] %v5997_v16  ;;  %v7909_v9 = vperm.slane %v5997_v16, 0  ;;  %v7915_v47 = vperm.slane %v5993_v52, 1 }
 0xed3   : > { %v1798_v5 = vmul.f32 %v7908_v49, %v1793_v50  ;;  %v6011_v40 = vpop.permute.xlu1 %1923  ;;  %v8410_v49 = vld [vmem:[#allocation159_spill] sm:$0xff] }
 0xed4   : > { %v1774_v23 = vadd.f32 %v1770_v2, %v1752_v29  ;;  %v1775_v7 = vadd.f32 %v1771_v21, %v1753_v18  ;;  %v1797_v62 = vmul.f32 %v7909_v9, %v1793_v50  ;;  %v7916_v29 = vperm.slane %v5993_v52, 2  ;;  %v8409_v21 = vld [vmem:[#allocation146_spill] sm:$0xff]  ;;  %v8411_v9 = vld [vmem:[#allocation153_spill] sm:$0xff] }
 0xed5   : > { %v1807_v2 = vmul.f32 %v7914_v11, %v8409_v21  ;;  %v1808_v50 = vmul.f32 %v7915_v47, %v8409_v21  ;;  %v1837_v8 = vsel %vm723_vm8, %v8411_v9, %v8410_v49  ;;  %v8414_v11 = vperm.slane %v5997_v16, 2 }
 0xed6   : > { %v1799_v15 = vadd.f32 %v1797_v62, %v1774_v23  ;;  %v1800_v58 = vadd.f32 %v1798_v5, %v1775_v7  ;;  %v1838_v23 = vsel %vm723_vm8, %v8410_v49, %v8412_v48  ;;  %v8413_v5 = vld [vmem:[#allocation152_spill] sm:$0xff]  ;;  %v6037_v21 = vsel %vm4814_vm9, %v1837_v8, 0.0 }
 0xed7   : > { %v1818_v18 = vmul.f32 %v7916_v29, %v8413_v5  ;;  %v1817_v17 = vmul.f32 %v8414_v11, %v8413_v5  ;;  %8415 = vst [vmem:[#allocation50_spill] sm:$0xff] %v6037_v21  ;;  %v6041_v9 = vsel %vm4680_vm1, %v1838_v23, 0.0  ;;  %v7924_v48 = vperm.slane %v5993_v52, 3 }
 0xed8   : > { %v1809_v7 = vadd.f32 %v1807_v2, %v1799_v15  ;;  %v1810_v62 = vadd.f32 %v1808_v50, %v1800_v58  ;;  %8416 = vst [vmem:[#allocation26_spill] sm:$0xff] %v6041_v9  ;;  %v7917_v49 = vperm.slane %v5997_v16, 3  ;;  %v7921_v2 = vperm.slane %v6037_v21, 0  ;;  %v8417_v50 = vld [vmem:[#allocation147_spill] sm:$0xff] }
 0xed9   : > { %v1828_v8 = vmul.f32 %v7924_v48, %v8417_v50  ;;  %v7920_v23 = vperm.slane %v6041_v9, 0 }
 0xeda   : > { %v1819_v15 = vadd.f32 %v1817_v17, %v1809_v7  ;;  %v1820_v58 = vadd.f32 %v1818_v18, %v1810_v62  ;;  %v1827_v11 = vmul.f32 %v7917_v49, %v8417_v50  ;;  %v1852_v35 = vmul.f32 %v7921_v2, %v8418_v14  ;;  %v8419_v50 = vld [vmem:[#allocation160_spill] sm:$0xff] }
 0xedb   : > { %v1944_v47 = vpop.permute.xlu1 %1943  ;;  %v1853_v17 = vmul.f32 %v7920_v23, %v8418_v14  ;;  %v7923_v18 = vperm.slane %v6041_v9, 1  ;;  %v7922_v7 = vperm.slane %v6037_v21, 1  ;;  %v7929_v2 = vperm.slane %v6037_v21, 3 }
 0xedc   : > { %v1829_v5 = vadd.f32 %v1827_v11, %v1819_v15  ;;  %v1830_v29 = vadd.f32 %v1828_v8, %v1820_v58  ;;  %v7927_v11 = vperm.slane %v6037_v21, 2  ;;  %v7928_v8 = vperm.slane %v6041_v9, 2  ;;  %v8438_v21 = vld [vmem:[#allocation11_spill] sm:$0xff] }
 0xedd   : > { %v1862_v15 = vmul.f32 %v7922_v7, %v8419_v50  ;;  %v1863_v58 = vmul.f32 %v7923_v18, %v8419_v50 }
 0xede   : > { %v1854_v62 = vadd.f32 %v1852_v35, %v1829_v5  ;;  %v1855_v49 = vadd.f32 %v1853_v17, %v1830_v29  ;;  %v7940_v35 = vperm.slane %v6041_v9, 3  ;;  %v8420_v29 = vld [vmem:[#allocation149_spill] sm:$0xff] }
 0xedf   : > { %v1872_v5 = vmul.f32 %v7927_v11, %v8420_v29  ;;  %v1873_v17 = vmul.f32 %v7928_v8, %v8420_v29  ;;  %v8422_v11 = vld [vmem:[#allocation156_spill] sm:$0xff] }
 0xee0   : > { %v1864_v14 = vadd.f32 %v1862_v15, %v1854_v62  ;;  %v1865_v23 = vadd.f32 %v1863_v58, %v1855_v49  ;;  %v1882_v49 = vmul.f32 %v7929_v2, %v8421_v25  ;;  %v1883_v62 = vmul.f32 %v7940_v35, %v8421_v25 }
 0xee1   : > { %v1905_v31 = vsel %vm792_vm11, %v8422_v11, %v5608_v38  ;;  %v1928_v25 = vsel %vm792_vm11, %v6011_v40, %v5748_v37  ;;  %v1949_v37 = vsel %vm792_vm11, %v1944_v47, %v5762_v56 }
 0xee2   : > { %v1874_v50 = vadd.f32 %v1872_v5, %v1864_v14  ;;  %v1875_v18 = vadd.f32 %v1873_v17, %v1865_v23  ;;  %v1906_v23 = vsel %vm792_vm11, %v5608_v38, %v5989_v59 }
 0xee3   : > { %v1948_v52 = vpop.permute.xlu1 %1947 }
 0xee4   : > { %v1884_v15 = vadd.f32 %v1882_v49, %v1874_v50  ;;  %v1885_v58 = vadd.f32 %v1883_v62, %v1875_v18  ;;  %v1927_v18 = vsel %vm792_vm11, %v5618_v26, %v6011_v40  ;;  %v1950_v38 = vsel %vm792_vm11, %v5762_v56, %v1948_v52 }
 0xee6   : > { %v1909_v14 = vadd.f32 %v1905_v31, %v1884_v15  ;;  %v1910_v29 = vadd.f32 %v1906_v23, %v1885_v58 }
 0xee8   : > { %v1931_v11 = vadd.f32 %v1927_v18, %v1909_v14  ;;  %v1932_v50 = vadd.f32 %v1928_v25, %v1910_v29 }
 0xeea   : > { %v1953_v40 = vadd.f32 %v1949_v37, %v1931_v11  ;;  %v1954_v49 = vadd.f32 %v1950_v38, %v1932_v50 }
 0xef9   : > { %v1970_v7 = vpop.permute.xlu2 %1969 }
 0xf01   : > { %v1982_v5 = vpop.permute.xlu2 %1981 }
 0xf10   : > { %v1968_v48 = vpop.permute.xlu1 %1967  ;;  %v1966_v16 = vpop.permute.xlu0 %1965 }
 0xf11   : > { %v1971_v26 = vsel %vm792_vm11, %v1966_v16, %v1968_v48 }
 0xf12   : > { %v1975_v23 = vadd.f32 %v1971_v26, %v1953_v40 }
 0xf18   : > { %v1980_v17 = vpop.permute.xlu1 %1979  ;;  %v1978_v8 = vpop.permute.xlu0 %1977 }
 0xf19   : > { %v1984_v2 = vsel %vm871_vm10, %v1980_v17, %v1982_v5  ;;  %v1983_v9 = vsel %vm871_vm10, %v1978_v8, %v1980_v17  ;;  %v1972_v8 = vsel %vm792_vm11, %v1968_v48, %v1970_v7  ;;  %v2014_v48 = vpop.permute.xlu2 %2013 }
 0xf1a   : > { %v6101_v31 = vsel %vm4705_vm3, %v1984_v2, 0.0  ;;  %v6105_v59 = vsel %vm4859_vm12, %v1983_v9, 0.0  ;;  %v1976_v58 = vadd.f32 %v1972_v8, %v1954_v49 }
 0xf1b   : > { %8423 = vst [vmem:[#allocation72_spill] sm:$0xff] %v6101_v31  ;;  %v7939_v62 = vperm.slane %v6105_v59, 0  ;;  %v7938_v52 = vperm.slane %v6101_v31, 0  ;;  %v7936_v47 = vperm.slane %v6101_v31, 1  ;;  %v7937_v16 = vperm.slane %v6105_v59, 1 }
 0xf1c   : > { %8424 = vst [vmem:[#allocation74_spill] sm:$0xff] %v6105_v59  ;;  %v7934_v29 = vperm.slane %v6101_v31, 2  ;;  %v7935_v5 = vperm.slane %v6105_v59, 2  ;;  %v7932_v37 = vperm.slane %v6101_v31, 3  ;;  %v7933_v8 = vperm.slane %v6105_v59, 3  ;;  %v8437_v31 = vld [vmem:[#allocation14_spill] sm:$0xff] }
 0xf1e   : > { %v2018_v50 = vmul.f32 %v7935_v5, %v2014_v48  ;;  %v2019_v38 = vmul.f32 %v7934_v29, %v2014_v48 }
 0xf20   : > { %v2004_v15 = vpop.permute.xlu1 %2003  ;;  %v1994_v2 = vpop.permute.xlu0 %1993 }
 0xf21   : > { %v1998_v9 = vmul.f32 %v7939_v62, %v1994_v2  ;;  %v1999_v56 = vmul.f32 %v7938_v52, %v1994_v2  ;;  %v2008_v17 = vmul.f32 %v7937_v16, %v2004_v15  ;;  %v2009_v25 = vmul.f32 %v7936_v47, %v2004_v15  ;;  %v8433_v47 = vld [vmem:[#allocation12_spill] sm:$0xff]  ;;  %v8434_v52 = vld [vmem:[#allocation10_spill] sm:$0xff] }
 0xf23   : > { %v2000_v7 = vadd.f32 %v1998_v9, %v1975_v23  ;;  %v2001_v14 = vadd.f32 %v1999_v56, %v1976_v58  ;;  %v2037_v9 = vpop.permute.xlu2 %2036 }
 0xf25   : > { %v2010_v18 = vadd.f32 %v2008_v17, %v2000_v7  ;;  %v2011_v11 = vadd.f32 %v2009_v25, %v2001_v14  ;;  %v3933_v17 = vld [vmem:[%s7664_s3 + $0xc] sm:$0xf] }
 0xf27   : > { %v2020_v40 = vadd.f32 %v2018_v50, %v2010_v18  ;;  %v2021_v49 = vadd.f32 %v2019_v38, %v2011_v11  ;;  %v8427_v50 = vld [vmem:[#allocation6_spill] sm:$0xff] }
 0xf29   : > { %v2024_v26 = vpop.permute.xlu1 %2023 }
 0xf2a   : > { %v2028_v2 = vmul.f32 %v7933_v8, %v2024_v26  ;;  %v2029_v15 = vmul.f32 %v7932_v37, %v2024_v26  ;;  %v8428_v26 = vld [vmem:[#allocation5_spill] sm:$0xff]  ;;  %v8432_v8 = vld [vmem:[#allocation7_spill] sm:$0xff] }
 0xf2b   : > { %v8431_v37 = vld [vmem:[#allocation9_spill] sm:$0xff] }
 0xf2c   : > { %v2030_v58 = vadd.f32 %v2028_v2, %v2020_v40  ;;  %v2031_v23 = vadd.f32 %v2029_v15, %v2021_v49  ;;  %v8429_v49 = vld [vmem:[#allocation8_spill] sm:$0xff]  ;;  %v6160_v15 = vpop.permute.xlu2 %2058 }
 0xf2e   : > { %v2039_v56 = vadd.f32 %v2037_v9, %v2030_v58  ;;  %v2040_v7 = vadd.f32 %v2037_v9, %v2031_v23 }
 0xf30   : > { %v6135_v14 = vmax.f32 %v2039_v56, 0.0  ;;  %v6137_v48 = vmax.f32 %v2040_v7, 0.0  ;;  %v8430_v56 = vld [vmem:[#allocation3_spill] sm:$0xff] }
 0xf32   : > { %8425 = vst [vmem:[#allocation73_spill] sm:$0xff] %v6135_v14  ;;  %2047 = vrot.lane.b32.xlu1 %v6137_v48, %s4198_s29  ;;  %2045 = vrot.lane.b32.xlu0 %v6135_v14, %s4198_s29  ;;  %v8436_v14 = vld [vmem:[#allocation4_spill] sm:$0xff] }
 0xf33   : > { %8426 = vst [vmem:[#allocation78_spill] sm:$0xff] %v6137_v48 }
 0xf34   : > { %v6162_v58 = vpop.permute.xlu2 %2082 }
 0xf3a   : > { %2074 = vperm.xlu1 %4079, %v5862_v10  }
 0xf42   : > { %4081 = vset.pattern.permute.xlu1 %v8185_v13 }
 0xf43   : > { %2093 = vperm.xlu1 %4081, %v3933_v17  }
 0xf4b   : > { %4085 = vset.pattern.permute.xlu1 %v8388_v43 }
 0xfa4   : > { %v6149_v25 = vpop.permute.xlu1 %2047 }
 0xfac   : > { %v6151_v18 = vpop.permute.xlu1 %2074 }
 0xfb5   : > { %v2094_v11 = vpop.permute.xlu1 %2093 }
 0xfb6   : > { %v2096_v38 = vmul.f32 %v2094_v11, %v8427_v50  ;;  %v2097_v40 = vmul.f32 %v2094_v11, %v8428_v26  ;;  %v2098_v2 = vmul.f32 %v2094_v11, %v8429_v49 }
 0xfb8   : > { %2106 = vrot.lane.b32.xlu1 %v2098_v2, %s4201_s16  ;;  %2102 = vrot.lane.b32.xlu2 %v2096_v38, %s4201_s16  ;;  %v6172_v38 = vpop.permute.xlu0 %2045 }
 0xfb9   : > { %2104 = vrot.lane.b32.xlu0 %v2097_v40, %s4201_s16 }
 0xfc0   : > { %2115 = vperm.xlu2 %4082, %v3933_v17  }
 0xfc8   : > { %4084 = vset.pattern.permute.xlu2 %v8186_v30 }
0x1012   : > { %v6164_v23 = vpop.permute.xlu2 %2102 }
0x101a   : > { %v2116_v9 = vpop.permute.xlu2 %2115 }
0x101b   : > { %v2118_v7 = vmul.f32 %v2116_v9, %v8430_v56  ;;  %v2119_v11 = vmul.f32 %v2116_v9, %v8431_v37  ;;  %v2120_v2 = vmul.f32 %v2116_v9, %v8432_v8  ;;  %v8435_v9 = vld [vmem:[#allocation13_spill] sm:$0xff] }
0x101d   : > { %2128 = vrot.lane.b32.xlu2 %v2120_v2, %s4201_s16  ;;  %2126 = vrot.lane.b32.xlu1 %v2119_v11, %s4201_s16 }
0x101e   : > { %2124 = vrot.lane.b32.xlu0 %v2118_v7, %s4201_s16 }
0x1026   : > { %2137 = vperm.xlu0 %4083, %v3933_v17  }
0x102b   : > { %v6174_v40 = vpop.permute.xlu0 %2104 }
0x1077   : > { %v6185_v7 = vpop.permute.xlu2 %2128 }
0x1090   : > { %v6176_v29 = vpop.permute.xlu0 %2124 }
0x1098   : > { %v2138_v5 = vpop.permute.xlu0 %2137 }
0x1099   : > { %v2140_v16 = vmul.f32 %v2138_v5, %v8433_v47  ;;  %v2141_v62 = vmul.f32 %v2138_v5, %v8434_v52  ;;  %v2142_v11 = vmul.f32 %v2138_v5, %v8435_v9  ;;  %v3935_v5 = vld [vmem:[%s7664_s3 + $0x24] sm:$0xf] }
0x109b   : > { %2148 = vrot.lane.b32.xlu2 %v2141_v62, %s4201_s16  ;;  %2146 = vrot.lane.b32.xlu1 %v2140_v16, %s4201_s16  ;;  %v3934_v16 = vld [vmem:[%s7664_s3 + $0x18] sm:$0xf] }
0x10a3   : > { %2159 = vperm.xlu2 %4084, %v3933_v17   ;;  %2150 = vrot.lane.b32.xlu1 %v2142_v11, %s4201_s16 }
0x10ab   : > { %4086 = vset.pattern.permute.xlu2 %v8157_v46 }
0x10f5   : > { %v6187_v2 = vpop.permute.xlu2 %2148 }
0x10fd   : > { %v2160_v35 = vpop.permute.xlu2 %2159 }
0x10fe   : > { %v2162_v48 = vmul.f32 %v2160_v35, %v8436_v14  ;;  %v2163_v59 = vmul.f32 %v2160_v35, %v8437_v31  ;;  %v2164_v62 = vmul.f32 %v2160_v35, %v8438_v21  ;;  %v3936_v35 = vld [vmem:[%s7664_s3 + $0x30] sm:$0xf] }
0x1100   : > { %2172 = vrot.lane.b32.xlu2 %v2164_v62, %s4201_s16  ;;  %2168 = vrot.lane.b32.xlu0 %v2162_v48, %s4201_s16 }
0x1101   : > { %2170 = vrot.lane.b32.xlu1 %v2163_v59, %s4201_s16  ;;  %v6211_v59 = vpop.permute.xlu1 %2106 }
0x1108   : > { %2200 = vperm.xlu2 %4086, %v3934_v16  }
0x1109   : > { %2192 = vperm.xlu1 %4085, %v3934_v16   ;;  %v6213_v48 = vpop.permute.xlu1 %2126 }
0x1110   : > { %4088 = vset.pattern.permute.xlu2 %v8185_v13 }
0x1111   : > { %4087 = vset.pattern.permute.xlu1 %v8186_v30  ;;  %2219 = vperm.xlu2 %4088, %v3935_v5   ;;  %v6215_v17 = vpop.permute.xlu1 %2146 }
0x1112   : > { %2208 = vperm.xlu1 %4087, %v3934_v16  }
0x1119   : > { %4090 = vset.pattern.permute.xlu2 %v8186_v30  ;;  %v6217_v11 = vpop.permute.xlu1 %2150 }
0x111a   : > { %4089 = vset.pattern.permute.xlu1 %v8157_v46  ;;  %2243 = vperm.xlu2 %4090, %v3935_v5  }
0x111b   : > { %2235 = vperm.xlu1 %4089, %v3935_v5  }
0x1122   : > { %4092 = vset.pattern.permute.xlu2 %v8388_v43 }
0x1123   : > { %4091 = vset.pattern.permute.xlu1 %v8185_v13 }
0x1124   : > { %2254 = vperm.xlu1 %4091, %v3936_v35  }
0x112c   : > { %4095 = vset.pattern.permute.xlu1 %v8388_v43 }
0x115a   : > { %v6234_v41 = vpop.permute.xlu2 %2172 }
0x1162   : > { %v6236_v42 = vpop.permute.xlu2 %2200 }
0x1163   : > { %8441 = vst [vmem:[#allocation75_spill] sm:$0xff] %v6236_v42 }
0x1173   : > { %v6219_v62 = vpop.permute.xlu1 %2170 }
0x117b   : > { %v6221_v16 = vpop.permute.xlu1 %2192 }
0x1184   : > { %v6223_v28 = vpop.permute.xlu1 %2208 }
0x1185   : > { %8439 = vst [vmem:[#allocation76_spill] sm:$0xff] %v6223_v28 }
0x118d   : > { %v6225_v44 = vpop.permute.xlu1 %2235 }
0x118e   : > { %8440 = vst [vmem:[#allocation79_spill] sm:$0xff] %v6225_v44  ;;  %v6238_v44 = vpop.permute.xlu2 %2219 }
0x118f   : > { %8442 = vst [vmem:[#allocation77_spill] sm:$0xff] %v6238_v44 }
0x1196   : > { %v2255_v51 = vpop.permute.xlu1 %2254  ;;  %v6240_v28 = vpop.permute.xlu2 %2243 }
0x1197   : > { %v2257_v54 = vmul.f32 %v2255_v51, %v8427_v50  ;;  %v2258_v19 = vmul.f32 %v2255_v51, %v8428_v26  ;;  %v2259_v4 = vmul.f32 %v2255_v51, %v8429_v49  ;;  %8443 = vst [vmem:[#allocation80_spill] sm:$0xff] %v6240_v28 }
0x1199   : > { %2267 = vrot.lane.b32.xlu1 %v2259_v4, %s4202_s17  ;;  %2265 = vrot.lane.b32.xlu0 %v2258_v19, %s4202_s17 }
0x119a   : > { %2263 = vrot.lane.b32.xlu2 %v2257_v54, %s4202_s17 }
0x11a2   : > { %2276 = vperm.xlu2 %4092, %v3936_v35  }
0x11aa   : > { %4094 = vset.pattern.permute.xlu2 %v8186_v30 }
0x11f4   : > { %v6242_v33 = vpop.permute.xlu2 %2263 }
0x11f5   : > { %8444 = vst [vmem:[#allocation81_spill] sm:$0xff] %v6242_v33  ;;  %v6252_v33 = vpop.permute.xlu0 %2168 }
0x11fc   : > { %v2277_v51 = vpop.permute.xlu2 %2276 }
0x11fd   : > { %v2279_v4 = vmul.f32 %v2277_v51, %v8430_v56  ;;  %v2280_v19 = vmul.f32 %v2277_v51, %v8431_v37  ;;  %v2281_v54 = vmul.f32 %v2277_v51, %v8432_v8 }
0x11ff   : > { %2289 = vrot.lane.b32.xlu2 %v2281_v54, %s4202_s17  ;;  %2287 = vrot.lane.b32.xlu1 %v2280_v19, %s4202_s17 }
0x1200   : > { %2285 = vrot.lane.b32.xlu0 %v2279_v4, %s4202_s17 }
0x1208   : > { %2298 = vperm.xlu0 %4083, %v3936_v35  }
0x120b   : > { %v6254_v28 = vpop.permute.xlu0 %2265 }
0x120c   : > { %8445 = vst [vmem:[#allocation82_spill] sm:$0xff] %v6254_v28 }
0x1210   : > { %4093 = vset.pattern.permute.xlu0 %v8388_v43 }
0x1211   : > { %2066 = vperm.xlu0 %4093, %v5862_v10  }
0x1219   : > { %2227 = vperm.xlu0 %4093, %v3935_v5  }
0x1259   : > { %v6265_v10 = vpop.permute.xlu2 %2289 }
0x125a   : > { %8447 = vst [vmem:[#allocation86_spill] sm:$0xff] %v6265_v10 }
0x1272   : > { %v6256_v44 = vpop.permute.xlu0 %2285 }
0x1273   : > { %8446 = vst [vmem:[#allocation91_spill] sm:$0xff] %v6256_v44 }
0x127a   : > { %v2299_v1 = vpop.permute.xlu0 %2298 }
0x127b   : > { %v2301_v51 = vmul.f32 %v2299_v1, %v8433_v47  ;;  %v2302_v54 = vmul.f32 %v2299_v1, %v8434_v52  ;;  %v2303_v4 = vmul.f32 %v2299_v1, %v8435_v9  ;;  %v6278_v1 = vld [vmem:[%s7664_s3 + $0x3c] sm:$0xf] }
0x127d   : > { %2309 = vrot.lane.b32.xlu2 %v2302_v54, %s4202_s17  ;;  %2307 = vrot.lane.b32.xlu1 %v2301_v51, %s4202_s17 }
0x1285   : > { %2320 = vperm.xlu2 %4094, %v3936_v35   ;;  %2311 = vrot.lane.b32.xlu1 %v2303_v4, %s4202_s17  ;;  %v3938_v35 = vld [vmem:[%s7664_s3 + $0x48] sm:$0xf] }
0x128d   : > { %4096 = vset.pattern.permute.xlu2 %v8157_v46 }
0x12d7   : > { %v6267_v5 = vpop.permute.xlu2 %2309 }
0x12d8   : > { %8448 = vst [vmem:[#allocation83_spill] sm:$0xff] %v6267_v5 }
0x12df   : > { %v2321_v19 = vpop.permute.xlu2 %2320 }
0x12e0   : > { %v2323_v44 = vmul.f32 %v2321_v19, %v8436_v14  ;;  %v2324_v28 = vmul.f32 %v2321_v19, %v8437_v31  ;;  %v2325_v54 = vmul.f32 %v2321_v19, %v8438_v21 }
0x12e2   : > { %2333 = vrot.lane.b32.xlu2 %v2325_v54, %s4202_s17  ;;  %2329 = vrot.lane.b32.xlu0 %v2323_v44, %s4202_s17  ;;  %v6297_v44 = vpop.permute.xlu1 %2267 }
0x12e3   : > { %2331 = vrot.lane.b32.xlu1 %v2324_v28, %s4202_s17  ;;  %v3939_v28 = vld [vmem:[%s7664_s3 + $0x54] sm:$0xf]  ;;  %8449 = vst [vmem:[#allocation87_spill] sm:$0xff] %v6297_v44 }
0x12ea   : > { %2361 = vperm.xlu2 %4096, %v6278_v1   ;;  %2388 = vperm.xlu0 %4093, %v3938_v35   ;;  %v6299_v51 = vpop.permute.xlu1 %2287 }
0x12eb   : > { %2353 = vperm.xlu1 %4095, %v6278_v1   ;;  %8450 = vst [vmem:[#allocation84_spill] sm:$0xff] %v6299_v51 }
0x12f2   : > { %4098 = vset.pattern.permute.xlu2 %v8185_v13  ;;  %4103 = vset.pattern.permute.xlu0 %v8157_v46  ;;  %v6301_v4 = vpop.permute.xlu1 %2307 }
0x12f3   : > { %4097 = vset.pattern.permute.xlu1 %v8186_v30  ;;  %2380 = vperm.xlu2 %4098, %v3938_v35   ;;  %8451 = vst [vmem:[#allocation88_spill] sm:$0xff] %v6301_v4 }
0x12f4   : > { %2369 = vperm.xlu1 %4097, %v6278_v1  }
0x12fa   : > { %v6303_v19 = vpop.permute.xlu1 %2311 }
0x12fb   : > { %4100 = vset.pattern.permute.xlu2 %v8186_v30  ;;  %8452 = vst [vmem:[#allocation85_spill] sm:$0xff] %v6303_v19 }
0x12fc   : > { %4099 = vset.pattern.permute.xlu1 %v8157_v46  ;;  %2404 = vperm.xlu2 %4100, %v3938_v35  }
0x12fd   : > { %2396 = vperm.xlu1 %4099, %v3938_v35  }
0x1304   : > { %4102 = vset.pattern.permute.xlu2 %v8388_v43 }
0x1305   : > { %4101 = vset.pattern.permute.xlu1 %v8185_v13 }
0x1306   : > { %2415 = vperm.xlu1 %4101, %v3939_v28  }
0x130e   : > { %4105 = vset.pattern.permute.xlu1 %v8388_v43 }
0x1355   : > { %v6305_v54 = vpop.permute.xlu1 %2331 }
0x1356   : > { %8453 = vst [vmem:[#allocation89_spill] sm:$0xff] %v6305_v54 }
0x135d   : > { %v6307_v35 = vpop.permute.xlu1 %2353 }
0x135e   : > { %8454 = vst [vmem:[#allocation92_spill] sm:$0xff] %v6307_v35  ;;  %v6320_v35 = vpop.permute.xlu2 %2333 }
0x135f   : > { %8457 = vst [vmem:[#allocation94_spill] sm:$0xff] %v6320_v35 }
0x1366   : > { %v6309_v5 = vpop.permute.xlu1 %2369 }
0x1367   : > { %8455 = vst [vmem:[#allocation90_spill] sm:$0xff] %v6309_v5  ;;  %v6322_v5 = vpop.permute.xlu2 %2361 }
0x1368   : > { %8458 = vst [vmem:[#allocation97_spill] sm:$0xff] %v6322_v5 }
0x136f   : > { %v6311_v10 = vpop.permute.xlu1 %2396 }
0x1370   : > { %8456 = vst [vmem:[#allocation96_spill] sm:$0xff] %v6311_v10  ;;  %v6324_v10 = vpop.permute.xlu2 %2380 }
0x1371   : > { %8459 = vst [vmem:[#allocation93_spill] sm:$0xff] %v6324_v10 }
0x1378   : > { %v2416_v42 = vpop.permute.xlu1 %2415 }
0x1379   : > { %v2418_v39 = vmul.f32 %v2416_v42, %v8427_v50  ;;  %v2419_v60 = vmul.f32 %v2416_v42, %v8428_v26  ;;  %v2420_v44 = vmul.f32 %v2416_v42, %v8429_v49  ;;  %v6326_v50 = vpop.permute.xlu2 %2404 }
0x137a   : > { %8460 = vst [vmem:[#allocation95_spill] sm:$0xff] %v6326_v50 }
0x137b   : > { %2428 = vrot.lane.b32.xlu1 %v2420_v44, %s4205_s30  ;;  %2426 = vrot.lane.b32.xlu0 %v2419_v60, %s4205_s30  ;;  %v6336_v44 = vpop.permute.xlu0 %2066 }
0x137c   : > { %2424 = vrot.lane.b32.xlu2 %v2418_v39, %s4205_s30 }
0x1383   : > { %v6338_v10 = vpop.permute.xlu0 %2227 }
0x1384   : > { %2437 = vperm.xlu2 %4102, %v3939_v28  }
0x138b   : > { %v6340_v50 = vpop.permute.xlu0 %2329 }
0x138c   : > { %4104 = vset.pattern.permute.xlu2 %v8186_v30  ;;  %8462 = vst [vmem:[#allocation99_spill] sm:$0xff] %v6340_v50  ;;  %v8486_v50 = vld [vmem:[#allocation113_spill] sm:$0xff] }
0x13d6   : > { %v6328_v26 = vpop.permute.xlu2 %2424 }
0x13d7   : > { %8461 = vst [vmem:[#allocation98_spill] sm:$0xff] %v6328_v26  ;;  %v6342_v26 = vpop.permute.xlu0 %2388 }
0x13d8   : > { %8463 = vst [vmem:[#allocation100_spill] sm:$0xff] %v6342_v26 }
0x13de   : > { %v2438_v42 = vpop.permute.xlu2 %2437 }
0x13df   : > { %v2440_v49 = vmul.f32 %v2438_v42, %v8430_v56  ;;  %v2441_v60 = vmul.f32 %v2438_v42, %v8431_v37  ;;  %v2442_v39 = vmul.f32 %v2438_v42, %v8432_v8 }
0x13e1   : > { %2450 = vrot.lane.b32.xlu2 %v2442_v39, %s4205_s30  ;;  %2448 = vrot.lane.b32.xlu1 %v2441_v60, %s4205_s30 }
0x13e2   : > { %2446 = vrot.lane.b32.xlu0 %v2440_v49, %s4205_s30 }
0x13ea   : > { %2459 = vperm.xlu0 %4103, %v3939_v28  }
0x13ed   : > { %v6344_v56 = vpop.permute.xlu0 %2426 }
0x13ee   : > { %8464 = vst [vmem:[#allocation115_spill] sm:$0xff] %v6344_v56 }
0x143b   : > { %v6355_v39 = vpop.permute.xlu2 %2450 }
0x143c   : > { %8466 = vst [vmem:[#allocation101_spill] sm:$0xff] %v6355_v39  ;;  %v8477_v39 = vld [vmem:[#allocation106_spill] sm:$0xff] }
0x1454   : > { %v6346_v37 = vpop.permute.xlu0 %2446 }
0x1455   : > { %8465 = vst [vmem:[#allocation107_spill] sm:$0xff] %v6346_v37 }
0x145c   : > { %v2460_v8 = vpop.permute.xlu0 %2459 }
0x145d   : > { %v2462_v42 = vmul.f32 %v2460_v8, %v8433_v47  ;;  %v2463_v60 = vmul.f32 %v2460_v8, %v8434_v52  ;;  %v2464_v49 = vmul.f32 %v2460_v8, %v8435_v9  ;;  %v6368_v9 = vld [vmem:[%s7664_s3 + $0x60] sm:$0xf] }
0x145f   : > { %2470 = vrot.lane.b32.xlu2 %v2463_v60, %s4205_s30  ;;  %2468 = vrot.lane.b32.xlu1 %v2462_v42, %s4205_s30 }
0x1467   : > { %2481 = vperm.xlu2 %4104, %v3939_v28   ;;  %2472 = vrot.lane.b32.xlu1 %v2464_v49, %s4205_s30 }
0x146f   : > { %4106 = vset.pattern.permute.xlu2 %v8157_v46 }
0x14b9   : > { %v6357_v56 = vpop.permute.xlu2 %2470 }
0x14ba   : > { %8467 = vst [vmem:[#allocation108_spill] sm:$0xff] %v6357_v56 }
0x14c1   : > { %v2482_v37 = vpop.permute.xlu2 %2481 }
0x14c2   : > { %v2484_v47 = vmul.f32 %v2482_v37, %v8436_v14  ;;  %v2485_v52 = vmul.f32 %v2482_v37, %v8437_v31  ;;  %v2486_v60 = vmul.f32 %v2482_v37, %v8438_v21  ;;  %v3941_v31 = vld [vmem:[%s7664_s3 + $0x4] sm:$0xf]  ;;  %v3942_v21 = vld [vmem:[%s7664_s3 + $0x10] sm:$0xf]  ;;  %v6386_v14 = vpop.permute.xlu1 %2428 }
0x14c3   : > { %8468 = vst [vmem:[#allocation63_spill] sm:$0xff] %v6386_v14  ;;  %v8478_v14 = vld [vmem:[#allocation105_spill] sm:$0xff] }
0x14c4   : > { %2494 = vrot.lane.b32.xlu2 %v2486_v60, %s4205_s30  ;;  %2490 = vrot.lane.b32.xlu0 %v2484_v47, %s4205_s30 }
0x14c5   : > { %2492 = vrot.lane.b32.xlu1 %v2485_v52, %s4205_s30 }
0x14ca   : > { %v6388_v28 = vpop.permute.xlu1 %2448 }
0x14cb   : > { %8469 = vst [vmem:[#allocation44_spill] sm:$0xff] %v6388_v28  ;;  %v8485_v28 = vld [vmem:[#allocation112_spill] sm:$0xff] }
0x14cc   : > { %2522 = vperm.xlu2 %4106, %v6368_v9  }
0x14cd   : > { %2514 = vperm.xlu1 %4105, %v6368_v9  }
0x14d2   : > { %v6390_v37 = vpop.permute.xlu1 %2468 }
0x14d3   : > { %8470 = vst [vmem:[#allocation102_spill] sm:$0xff] %v6390_v37  ;;  %v8484_v37 = vld [vmem:[#allocation114_spill] sm:$0xff] }
0x14d4   : > { %4108 = vset.pattern.permute.xlu2 %v8185_v13 }
0x14d5   : > { %4107 = vset.pattern.permute.xlu1 %v8186_v30  ;;  %2541 = vperm.xlu2 %4108, %v3941_v31  }
0x14d6   : > { %2530 = vperm.xlu1 %4107, %v6368_v9  }
0x14da   : > { %v6392_v8 = vpop.permute.xlu1 %2472 }
0x14db   : > { %8471 = vst [vmem:[#allocation109_spill] sm:$0xff] %v6392_v8 }
0x14dd   : > { %4110 = vset.pattern.permute.xlu2 %v8186_v30 }
0x14de   : > { %4109 = vset.pattern.permute.xlu1 %v8157_v46  ;;  %2565 = vperm.xlu2 %4110, %v3941_v31  }
0x14df   : > { %2557 = vperm.xlu1 %4109, %v3941_v31   ;;  %v8476_v31 = vld [vmem:[#allocation104_spill] sm:$0xff] }
0x14e6   : > { %4112 = vset.pattern.permute.xlu2 %v8388_v43 }
0x14e7   : > { %4111 = vset.pattern.permute.xlu1 %v8185_v13 }
0x14e8   : > { %2576 = vperm.xlu1 %4111, %v3942_v21  }
0x14f0   : > { %4114 = vset.pattern.permute.xlu1 %v8388_v43 }
0x1537   : > { %v6394_v42 = vpop.permute.xlu1 %2492 }
0x1538   : > { %8472 = vst [vmem:[#allocation103_spill] sm:$0xff] %v6394_v42 }
0x153f   : > { %v6396_v49 = vpop.permute.xlu1 %2514 }
0x1540   : > { %8473 = vst [vmem:[#allocation110_spill] sm:$0xff] %v6396_v49  ;;  %v6409_v49 = vpop.permute.xlu2 %2494 }
0x1541   : > { %8479 = vst [vmem:[#allocation120_spill] sm:$0xff] %v6409_v49 }
0x1548   : > { %v6398_v47 = vpop.permute.xlu1 %2530 }
0x1549   : > { %8474 = vst [vmem:[#allocation116_spill] sm:$0xff] %v6398_v47  ;;  %v6411_v47 = vpop.permute.xlu2 %2522 }
0x154a   : > { %8480 = vst [vmem:[#allocation118_spill] sm:$0xff] %v6411_v47  ;;  %v6425_v47 = vpop.permute.xlu0 %2490 }
0x154b   : > { %8487 = vst [vmem:[#allocation119_spill] sm:$0xff] %v6425_v47 }
0x1551   : > { %v6400_v52 = vpop.permute.xlu1 %2557 }
0x1552   : > { %8475 = vst [vmem:[#allocation111_spill] sm:$0xff] %v6400_v52  ;;  %v6413_v52 = vpop.permute.xlu2 %2541 }
0x1553   : > { %8481 = vst [vmem:[#allocation121_spill] sm:$0xff] %v6413_v52 }
0x155a   : > { %v2577_v60 = vpop.permute.xlu1 %2576  ;;  %v6415_v42 = vpop.permute.xlu2 %2565 }
0x155b   : > { %v2579_v56 = vmul.f32 %v2577_v60, %v8476_v31  ;;  %v2580_v26 = vmul.f32 %v2577_v60, %v8477_v39  ;;  %v2581_v5 = vmul.f32 %v2577_v60, %v8478_v14  ;;  %8482 = vst [vmem:[#allocation117_spill] sm:$0xff] %v6415_v42 }
0x155d   : > { %2589 = vrot.lane.b32.xlu1 %v2581_v5, %s4201_s16  ;;  %2587 = vrot.lane.b32.xlu0 %v2580_v26, %s4201_s16 }
0x155e   : > { %2585 = vrot.lane.b32.xlu2 %v2579_v56, %s4201_s16 }
0x1566   : > { %2598 = vperm.xlu2 %4112, %v3942_v21  }
0x156e   : > { %4113 = vset.pattern.permute.xlu2 %v8186_v30 }
0x15b8   : > { %v6417_v8 = vpop.permute.xlu2 %2585 }
0x15b9   : > { %8483 = vst [vmem:[#allocation125_spill] sm:$0xff] %v6417_v8 }
0x15c0   : > { %v2599_v60 = vpop.permute.xlu2 %2598 }
0x15c1   : > { %v2601_v5 = vmul.f32 %v2599_v60, %v8484_v37  ;;  %v2602_v26 = vmul.f32 %v2599_v60, %v8485_v28  ;;  %v2603_v56 = vmul.f32 %v2599_v60, %v8486_v50 }
0x15c3   : > { %2611 = vrot.lane.b32.xlu2 %v2603_v56, %s4201_s16  ;;  %2609 = vrot.lane.b32.xlu1 %v2602_v26, %s4201_s16 }
0x15c4   : > { %2607 = vrot.lane.b32.xlu0 %v2601_v5, %s4201_s16 }
0x15cc   : > { %2620 = vperm.xlu0 %4103, %v3942_v21  }
0x15cf   : > { %v6427_v52 = vpop.permute.xlu0 %2587 }
0x15d0   : > { %8488 = vst [vmem:[#allocation122_spill] sm:$0xff] %v6427_v52 }
0x161d   : > { %v6438_v5 = vpop.permute.xlu2 %2611 }
0x161e   : > { %8490 = vst [vmem:[#allocation124_spill] sm:$0xff] %v6438_v5 }
0x1636   : > { %v6429_v42 = vpop.permute.xlu0 %2607 }
0x1637   : > { %8489 = vst [vmem:[#allocation123_spill] sm:$0xff] %v6429_v42 }
0x163e   : > { %v2621_v8 = vpop.permute.xlu0 %2620 }
0x163f   : > { %v2623_v49 = vmul.f32 %v2621_v8, %v5346_v24  ;;  %v2624_v54 = vmul.f32 %v2621_v8, %v5349_v12  ;;  %v2625_v60 = vmul.f32 %v2621_v8, %v5356_v3  ;;  %v6458_v8 = vld [vmem:[%s7664_s3 + $0x28] sm:$0xf] }
0x1640   : > { %8492 = vst [vmem:[#allocation135_spill] sm:$0xff] %v6458_v8 }
0x1641   : > { %2631 = vrot.lane.b32.xlu2 %v2624_v54, %s4201_s16  ;;  %2629 = vrot.lane.b32.xlu1 %v2623_v49, %s4201_s16  ;;  %v6474_v49 = vpop.permute.xlu1 %2589 }
0x1642   : > { %8493 = vst [vmem:[#allocation131_spill] sm:$0xff] %v6474_v49 }
0x1649   : > { %2642 = vperm.xlu2 %4113, %v3942_v21   ;;  %2633 = vrot.lane.b32.xlu1 %v2625_v60, %s4201_s16  ;;  %v6451_v21 = vld [vmem:[%s7664_s3 + $0x1c] sm:$0xf] }
0x1651   : > { %4115 = vset.pattern.permute.xlu2 %v8157_v46 }
0x169b   : > { %v6440_v26 = vpop.permute.xlu2 %2631 }
0x169c   : > { %8491 = vst [vmem:[#allocation126_spill] sm:$0xff] %v6440_v26 }
0x16a3   : > { %v2643_v56 = vpop.permute.xlu2 %2642 }
0x16a4   : > { %v2645_v42 = vmul.f32 %v2643_v56, %v5372_v22  ;;  %v2646_v52 = vmul.f32 %v2643_v56, %v5366_v55  ;;  %v2647_v54 = vmul.f32 %v2643_v56, %v5369_v20 }
0x16a6   : > { %2655 = vrot.lane.b32.xlu2 %v2647_v54, %s4201_s16  ;;  %2651 = vrot.lane.b32.xlu0 %v2645_v42, %s4201_s16  ;;  %v3945_v42 = vld [vmem:[%s7664_s3 + $0x34] sm:$0xf] }
0x16a7   : > { %2653 = vrot.lane.b32.xlu1 %v2646_v52, %s4201_s16  ;;  %v6476_v52 = vpop.permute.xlu1 %2609 }
0x16a8   : > { %8494 = vst [vmem:[#allocation128_spill] sm:$0xff] %v6476_v52 }
0x16ae   : > { %2683 = vperm.xlu2 %4115, %v6451_v21  }
0x16af   : > { %2675 = vperm.xlu1 %4114, %v6451_v21  }
0x16b3   : > { %v6478_v60 = vpop.permute.xlu1 %2629 }
0x16b4   : > { %8495 = vst [vmem:[#allocation130_spill] sm:$0xff] %v6478_v60 }
0x16b6   : > { %4117 = vset.pattern.permute.xlu2 %v8185_v13 }
0x16b7   : > { %4116 = vset.pattern.permute.xlu1 %v8186_v30  ;;  %2702 = vperm.xlu2 %4117, %v6458_v8  }
0x16b8   : > { %2691 = vperm.xlu1 %4116, %v6451_v21  }
0x16bb   : > { %v6480_v56 = vpop.permute.xlu1 %2633 }
0x16bc   : > { %8496 = vst [vmem:[#allocation127_spill] sm:$0xff] %v6480_v56 }
0x16bf   : > { %4119 = vset.pattern.permute.xlu2 %v8186_v30 }
0x16c0   : > { %4118 = vset.pattern.permute.xlu1 %v8157_v46  ;;  %2726 = vperm.xlu2 %4119, %v6458_v8  }
0x16c1   : > { %2718 = vperm.xlu1 %4118, %v6458_v8  }
0x16c8   : > { %4121 = vset.pattern.permute.xlu2 %v8388_v43 }
0x16c9   : > { %4120 = vset.pattern.permute.xlu1 %v8185_v13 }
0x16ca   : > { %2737 = vperm.xlu1 %4120, %v3945_v42  }
0x16d2   : > { %4123 = vset.pattern.permute.xlu1 %v8388_v43 }
0x1719   : > { %v6482_v54 = vpop.permute.xlu1 %2653 }
0x171a   : > { %8497 = vst [vmem:[#allocation132_spill] sm:$0xff] %v6482_v54 }
0x1721   : > { %v6484_v26 = vpop.permute.xlu1 %2675 }
0x1722   : > { %8498 = vst [vmem:[#allocation129_spill] sm:$0xff] %v6484_v26  ;;  %v6497_v26 = vpop.permute.xlu2 %2655 }
0x1723   : > { %8501 = vst [vmem:[#allocation134_spill] sm:$0xff] %v6497_v26 }
0x172a   : > { %v6486_v5 = vpop.permute.xlu1 %2691 }
0x172b   : > { %8499 = vst [vmem:[#allocation133_spill] sm:$0xff] %v6486_v5  ;;  %v6499_v5 = vpop.permute.xlu2 %2683 }
0x172c   : > { %8502 = vst [vmem:[#allocation140_spill] sm:$0xff] %v6499_v5  ;;  %v6513_v5 = vpop.permute.xlu0 %2651 }
0x172d   : > { %8506 = vst [vmem:[#allocation151_spill] sm:$0xff] %v6513_v5 }
0x1733   : > { %v6488_v8 = vpop.permute.xlu1 %2718 }
0x1734   : > { %8500 = vst [vmem:[#allocation136_spill] sm:$0xff] %v6488_v8  ;;  %v6501_v8 = vpop.permute.xlu2 %2702 }
0x1735   : > { %8503 = vst [vmem:[#allocation138_spill] sm:$0xff] %v6501_v8 }
0x173c   : > { %v2738_v47 = vpop.permute.xlu1 %2737  ;;  %v6503_v54 = vpop.permute.xlu2 %2726 }
0x173d   : > { %v2740_v35 = vmul.f32 %v2738_v47, %v8476_v31  ;;  %v2741_v19 = vmul.f32 %v2738_v47, %v8477_v39  ;;  %v2742_v49 = vmul.f32 %v2738_v47, %v8478_v14  ;;  %8504 = vst [vmem:[#allocation141_spill] sm:$0xff] %v6503_v54 }
0x173f   : > { %2750 = vrot.lane.b32.xlu1 %v2742_v49, %s4202_s17  ;;  %2748 = vrot.lane.b32.xlu0 %v2741_v19, %s4202_s17 }
0x1740   : > { %2746 = vrot.lane.b32.xlu2 %v2740_v35, %s4202_s17 }
0x1748   : > { %2759 = vperm.xlu2 %4121, %v3945_v42  }
0x1750   : > { %4122 = vset.pattern.permute.xlu2 %v8186_v30 }
0x179a   : > { %v6505_v56 = vpop.permute.xlu2 %2746 }
0x179b   : > { %8505 = vst [vmem:[#allocation137_spill] sm:$0xff] %v6505_v56 }
0x17a2   : > { %v2760_v47 = vpop.permute.xlu2 %2759 }
0x17a3   : > { %v2762_v49 = vmul.f32 %v2760_v47, %v8484_v37  ;;  %v2763_v19 = vmul.f32 %v2760_v47, %v8485_v28  ;;  %v2764_v35 = vmul.f32 %v2760_v47, %v8486_v50 }
0x17a5   : > { %2772 = vrot.lane.b32.xlu2 %v2764_v35, %s4202_s17  ;;  %2770 = vrot.lane.b32.xlu1 %v2763_v19, %s4202_s17 }
0x17a6   : > { %2768 = vrot.lane.b32.xlu0 %v2762_v49, %s4202_s17 }
0x17ae   : > { %2781 = vperm.xlu0 %4103, %v3945_v42  }
0x17b1   : > { %v6515_v8 = vpop.permute.xlu0 %2748 }
0x17b2   : > { %8507 = vst [vmem:[#allocation145_spill] sm:$0xff] %v6515_v8 }
0x17ff   : > { %v6526_v49 = vpop.permute.xlu2 %2772 }
0x1800   : > { %8509 = vst [vmem:[#allocation139_spill] sm:$0xff] %v6526_v49 }
0x1818   : > { %v6517_v54 = vpop.permute.xlu0 %2768 }
0x1819   : > { %8508 = vst [vmem:[#allocation158_spill] sm:$0xff] %v6517_v54 }
0x1820   : > { %v2782_v56 = vpop.permute.xlu0 %2781 }
0x1821   : > { %v2784_v26 = vmul.f32 %v2782_v56, %v5346_v24  ;;  %v2785_v60 = vmul.f32 %v2782_v56, %v5349_v12  ;;  %v2786_v47 = vmul.f32 %v2782_v56, %v5356_v3  ;;  %v6562_v56 = vpop.permute.xlu1 %2750 }
0x1822   : > { %8512 = vst [vmem:[#allocation150_spill] sm:$0xff] %v6562_v56 }
0x1823   : > { %2792 = vrot.lane.b32.xlu2 %v2785_v60, %s4202_s17  ;;  %2790 = vrot.lane.b32.xlu1 %v2784_v26, %s4202_s17  ;;  %v6539_v26 = vld [vmem:[%s7664_s3 + $0x40] sm:$0xf] }
0x182b   : > { %2803 = vperm.xlu2 %4122, %v3945_v42   ;;  %2794 = vrot.lane.b32.xlu1 %v2786_v47, %s4202_s17  ;;  %v6546_v42 = vld [vmem:[%s7664_s3 + $0x4c] sm:$0xf] }
0x182c   : > { %8511 = vst [vmem:[#allocation143_spill] sm:$0xff] %v6546_v42 }
0x1833   : > { %4124 = vset.pattern.permute.xlu2 %v8157_v46 }
0x187d   : > { %v6528_v19 = vpop.permute.xlu2 %2792 }
0x187e   : > { %8510 = vst [vmem:[#allocation142_spill] sm:$0xff] %v6528_v19 }
0x1885   : > { %v2804_v35 = vpop.permute.xlu2 %2803 }
0x1886   : > { %v2806_v54 = vmul.f32 %v2804_v35, %v5372_v22  ;;  %v2807_v8 = vmul.f32 %v2804_v35, %v5366_v55  ;;  %v2808_v60 = vmul.f32 %v2804_v35, %v5369_v20 }
0x1888   : > { %2816 = vrot.lane.b32.xlu2 %v2808_v60, %s4202_s17  ;;  %2812 = vrot.lane.b32.xlu0 %v2806_v54, %s4202_s17  ;;  %v6564_v54 = vpop.permute.xlu1 %2770 }
0x1889   : > { %2814 = vrot.lane.b32.xlu1 %v2807_v8, %s4202_s17  ;;  %v3948_v8 = vld [vmem:[%s7664_s3 + $0x58] sm:$0xf]  ;;  %8513 = vst [vmem:[#allocation144_spill] sm:$0xff] %v6564_v54 }
0x1890   : > { %2844 = vperm.xlu2 %4124, %v6539_v26  }
0x1891   : > { %2836 = vperm.xlu1 %4123, %v6539_v26  }
0x1895   : > { %v6566_v47 = vpop.permute.xlu1 %2790 }
0x1896   : > { %8514 = vst [vmem:[#allocation157_spill] sm:$0xff] %v6566_v47 }
0x1898   : > { %4126 = vset.pattern.permute.xlu2 %v8185_v13 }
0x1899   : > { %4125 = vset.pattern.permute.xlu1 %v8186_v30  ;;  %2863 = vperm.xlu2 %4126, %v6546_v42  }
0x189a   : > { %2852 = vperm.xlu1 %4125, %v6539_v26  }
0x189d   : > { %v6568_v35 = vpop.permute.xlu1 %2794 }
0x189e   : > { %8515 = vst [vmem:[#allocation146_spill] sm:$0xff] %v6568_v35 }
0x18a1   : > { %4128 = vset.pattern.permute.xlu2 %v8186_v30 }
0x18a2   : > { %4127 = vset.pattern.permute.xlu1 %v8157_v46  ;;  %2887 = vperm.xlu2 %4128, %v6546_v42  }
0x18a3   : > { %2879 = vperm.xlu1 %4127, %v6546_v42  }
0x18aa   : > { %4130 = vset.pattern.permute.xlu2 %v8388_v43 }
0x18ab   : > { %4129 = vset.pattern.permute.xlu1 %v8185_v13 }
0x18ac   : > { %2898 = vperm.xlu1 %4129, %v3948_v8  }
0x18b4   : > { %4132 = vset.pattern.permute.xlu1 %v8388_v43 }
0x18fb   : > { %v6570_v60 = vpop.permute.xlu1 %2814 }
0x18fc   : > { %8516 = vst [vmem:[#allocation159_spill] sm:$0xff] %v6570_v60 }
0x1903   : > { %v6572_v19 = vpop.permute.xlu1 %2836 }
0x1904   : > { %8517 = vst [vmem:[#allocation153_spill] sm:$0xff] %v6572_v19  ;;  %v6585_v19 = vpop.permute.xlu2 %2816 }
0x1905   : > { %8520 = vst [vmem:[#allocation147_spill] sm:$0xff] %v6585_v19 }
0x190c   : > { %v6574_v49 = vpop.permute.xlu1 %2852 }
0x190d   : > { %8518 = vst [vmem:[#allocation148_spill] sm:$0xff] %v6574_v49  ;;  %v6587_v49 = vpop.permute.xlu2 %2844 }
0x190e   : > { %8521 = vst [vmem:[#allocation154_spill] sm:$0xff] %v6587_v49 }
0x1915   : > { %v6576_v5 = vpop.permute.xlu1 %2879 }
0x1916   : > { %8519 = vst [vmem:[#allocation152_spill] sm:$0xff] %v6576_v5  ;;  %v6589_v5 = vpop.permute.xlu2 %2863 }
0x1917   : > { %8522 = vst [vmem:[#allocation160_spill] sm:$0xff] %v6589_v5 }
0x191e   : > { %v2899_v52 = vpop.permute.xlu1 %2898 }
0x191f   : > { %v2901_v42 = vmul.f32 %v2899_v52, %v8476_v31  ;;  %v2902_v4 = vmul.f32 %v2899_v52, %v8477_v39  ;;  %v2903_v56 = vmul.f32 %v2899_v52, %v8478_v14  ;;  %v6591_v31 = vpop.permute.xlu2 %2887 }
0x1920   : > { %8523 = vst [vmem:[#allocation149_spill] sm:$0xff] %v6591_v31 }
0x1921   : > { %2911 = vrot.lane.b32.xlu1 %v2903_v56, %s4205_s30  ;;  %2909 = vrot.lane.b32.xlu0 %v2902_v4, %s4205_s30  ;;  %v6601_v56 = vpop.permute.xlu0 %2812 }
0x1922   : > { %2907 = vrot.lane.b32.xlu2 %v2901_v42, %s4205_s30  ;;  %8525 = vst [vmem:[#allocation156_spill] sm:$0xff] %v6601_v56 }
0x192a   : > { %2920 = vperm.xlu2 %4130, %v3948_v8  }
0x1932   : > { %4131 = vset.pattern.permute.xlu2 %v8186_v30 }
0x197c   : > { %v6593_v39 = vpop.permute.xlu2 %2907 }
0x197d   : > { %8524 = vst [vmem:[#allocation155_spill] sm:$0xff] %v6593_v39 }
0x1984   : > { %v2921_v14 = vpop.permute.xlu2 %2920 }
0x1985   : > { %v2923_v52 = vmul.f32 %v2921_v14, %v8484_v37  ;;  %v2924_v4 = vmul.f32 %v2921_v14, %v8485_v28  ;;  %v2925_v42 = vmul.f32 %v2921_v14, %v8486_v50 }
0x1987   : > { %2933 = vrot.lane.b32.xlu2 %v2925_v42, %s4205_s30  ;;  %2931 = vrot.lane.b32.xlu1 %v2924_v4, %s4205_s30 }
0x1988   : > { %2929 = vrot.lane.b32.xlu0 %v2923_v52, %s4205_s30 }
0x1990   : > { %2942 = vperm.xlu0 %4103, %v3948_v8  }
0x1993   : > { %v6603_v5 = vpop.permute.xlu0 %2909  ;;  %v6618_v4 = vpop.permute.xlu1 %2911 }
0x1994   : > { %8526 = vst [vmem:[#allocation6_spill] sm:$0xff] %v6603_v5 }
0x1995   : > { %8530 = vst [vmem:[#allocation9_spill] sm:$0xff] %v6618_v4 }
0x19e1   : > { %v6614_v14 = vpop.permute.xlu2 %2933 }
0x19e2   : > { %8528 = vst [vmem:[#allocation8_spill] sm:$0xff] %v6614_v14 }
0x19fa   : > { %v6605_v31 = vpop.permute.xlu0 %2929 }
0x19fb   : > { %8527 = vst [vmem:[#allocation5_spill] sm:$0xff] %v6605_v31 }
0x1a02   : > { %v2943_v39 = vpop.permute.xlu0 %2942 }
0x1a03   : > { %v2945_v37 = vmul.f32 %v2943_v39, %v5346_v24  ;;  %v2946_v28 = vmul.f32 %v2943_v39, %v5349_v12  ;;  %v2947_v50 = vmul.f32 %v2943_v39, %v5356_v3  ;;  %v6626_v3 = vpop.permute.xlu1 %2931  ;;  %v3951_v39 = vld [vmem:[%s7664_s3 + $0x14] sm:$0xf] }
0x1a04   : > { %8531 = vst [vmem:[#allocation7_spill] sm:$0xff] %v6626_v3 }
0x1a05   : > { %2953 = vrot.lane.b32.xlu2 %v2946_v28, %s4205_s30  ;;  %2951 = vrot.lane.b32.xlu1 %v2945_v37, %s4205_s30 }
0x1a0d   : > { %2964 = vperm.xlu2 %4131, %v3948_v8   ;;  %2955 = vrot.lane.b32.xlu1 %v2947_v50, %s4205_s30  ;;  %v6631_v8 = vld [vmem:[%s7664_s3 + $0x64] sm:$0xf] }
0x1a15   : > { %4133 = vset.pattern.permute.xlu2 %v8157_v46 }
0x1a5f   : > { %v6616_v52 = vpop.permute.xlu2 %2953 }
0x1a60   : > { %8529 = vst [vmem:[#allocation3_spill] sm:$0xff] %v6616_v52 }
0x1a67   : > { %v2965_v24 = vpop.permute.xlu2 %2964 }
0x1a68   : > { %v2967_v12 = vmul.f32 %v2965_v24, %v5372_v22  ;;  %v2968_v42 = vmul.f32 %v2965_v24, %v5366_v55  ;;  %v2969_v37 = vmul.f32 %v2965_v24, %v5369_v20  ;;  %v6642_v22 = vld [vmem:[%s7664_s3 + $0x8] sm:$0xf] }
0x1a69   : > { %8533 = vst [vmem:[#allocation10_spill] sm:$0xff] %v6642_v22 }
0x1a6a   : > { %2977 = vrot.lane.b32.xlu2 %v2969_v37, %s4205_s30  ;;  %2973 = vrot.lane.b32.xlu0 %v2967_v12, %s4205_s30 }
0x1a6b   : > { %2975 = vrot.lane.b32.xlu1 %v2968_v42, %s4205_s30 }
0x1a72   : > { %3005 = vperm.xlu2 %4133, %v6631_v8  }
0x1a73   : > { %2997 = vperm.xlu1 %4132, %v6631_v8  }
0x1a77   : > { %v2952_v55 = vpop.permute.xlu1 %2951 }
0x1a78   : > { %v6637_v20 = vsel %vm792_vm11, %v2952_v55, %v6616_v52  ;;  %v6679_v52 = vsel %vm292_vm0, %v6172_v38, %v6149_v25 }
0x1a79   : > { %8532 = vst [vmem:[#allocation12_spill] sm:$0xff] %v6637_v20  ;;  %v6674_v20 = vsel %vm292_vm0, %v6149_v25, 0.0  ;;  %v6734_v19 = vperm.slane %v6679_v52, 2 }
0x1a7a   : > { %4135 = vset.pattern.permute.xlu2 %v8185_v13  ;;  %8540 = vst [vmem:[#allocation105_spill] sm:$0xff] %v6674_v20 }
0x1a7b   : > { %4134 = vset.pattern.permute.xlu1 %v8186_v30  ;;  %3026 = vperm.xlu2 %4135, %v6642_v22   ;;  %8541 = vst [vmem:[#allocation114_spill] sm:$0xff] %v6679_v52 }
0x1a7c   : > { %3013 = vperm.xlu1 %4134, %v6631_v8   ;;  %8554 = vst [vmem:[#allocation171_spill] sm:$0xff] %v6734_v19 }
0x1a7f   : > { %v6658_v28 = vpop.permute.xlu1 %2955 }
0x1a80   : > { %8534 = vst [vmem:[#allocation13_spill] sm:$0xff] %v6658_v28  ;;  %v6683_v28 = vsel %vm292_vm0, 0.0, %v6172_v38 }
0x1a81   : > { %8542 = vst [vmem:[#allocation112_spill] sm:$0xff] %v6683_v28  ;;  %v6710_v4 = vperm.slane %v6683_v28, 1  ;;  %v6731_v49 = vperm.slane %v6683_v28, 2  ;;  %v6751_v56 = vperm.slane %v6683_v28, 3 }
0x1a83   : > { %4137 = vset.pattern.permute.xlu2 %v8186_v30  ;;  %8547 = vst [vmem:[#allocation164_spill] sm:$0xff] %v6710_v4 }
0x1a84   : > { %4136 = vset.pattern.permute.xlu1 %v8157_v46  ;;  %3056 = vperm.xlu2 %4137, %v6642_v22   ;;  %8553 = vst [vmem:[#allocation170_spill] sm:$0xff] %v6731_v49 }
0x1a85   : > { %3046 = vperm.xlu1 %4136, %v6642_v22   ;;  %8558 = vst [vmem:[#allocation175_spill] sm:$0xff] %v6751_v56 }
0x1a8c   : > { %4139 = vset.pattern.permute.xlu2 %v8388_v43 }
0x1a8d   : > { %4138 = vset.pattern.permute.xlu1 %v8185_v13 }
0x1a8e   : > { %3069 = vperm.xlu1 %4138, %v3951_v39  }
0x1a96   : > { %4141 = vset.pattern.permute.xlu1 %v8388_v43 }
0x1ac4   : > { %v2978_v50 = vpop.permute.xlu2 %2977 }
0x1acc   : > { %v6701_v38 = vpop.permute.xlu2 %3005 }
0x1acd   : > { %8543 = vst [vmem:[#allocation113_spill] sm:$0xff] %v6701_v38 }
0x1ad5   : > { %v6703_v31 = vpop.permute.xlu2 %3026 }
0x1ad6   : > { %8544 = vst [vmem:[#allocation161_spill] sm:$0xff] %v6703_v31 }
0x1add   : > { %v6660_v24 = vpop.permute.xlu1 %2975 }
0x1ade   : > { %8535 = vst [vmem:[#allocation4_spill] sm:$0xff] %v6660_v24  ;;  %v6664_v12 = vsel %vm792_vm11, %v6660_v24, %v2978_v50  ;;  %v6686_v50 = vperm.slane %v6683_v28, 0  ;;  %v6705_v3 = vpop.permute.xlu2 %3056 }
0x1adf   : > { %8536 = vst [vmem:[#allocation14_spill] sm:$0xff] %v6664_v12 }
0x1ae0   : > { %8545 = vst [vmem:[#allocation162_spill] sm:$0xff] %v6705_v3 }
0x1ae5   : > { %v6666_v42 = vpop.permute.xlu1 %2997 }
0x1ae6   : > { %8537 = vst [vmem:[#allocation11_spill] sm:$0xff] %v6666_v42 }
0x1aee   : > { %v6668_v37 = vpop.permute.xlu1 %3013 }
0x1aef   : > { %8538 = vst [vmem:[#allocation104_spill] sm:$0xff] %v6668_v37  ;;  %v6689_v37 = vperm.slane %v6679_v52, 0 }
0x1af7   : > { %v6670_v55 = vpop.permute.xlu1 %3046 }
0x1af8   : > { %8539 = vst [vmem:[#allocation106_spill] sm:$0xff] %v6670_v55  ;;  %v6692_v55 = vperm.slane %v6674_v20, 0 }
0x1b00   : > { %v3070_v42 = vpop.permute.xlu1 %3069 }
0x1b01   : > { %v3075_v12 = vmul.f32 %v6686_v50, %v3070_v42  ;;  %v3076_v24 = vmul.f32 %v6689_v37, %v3070_v42  ;;  %v3077_v25 = vmul.f32 %v6692_v55, %v3070_v42  ;;  %v6713_v42 = vperm.slane %v6679_v52, 1 }
0x1b03   : > { %3085 = vrot.lane.b32.xlu1 %v3077_v25, %s4201_s16  ;;  %3083 = vrot.lane.b32.xlu0 %v3076_v24, %s4201_s16  ;;  %8548 = vst [vmem:[#allocation165_spill] sm:$0xff] %v6713_v42  ;;  %v6716_v24 = vperm.slane %v6674_v20, 1 }
0x1b04   : > { %3081 = vrot.lane.b32.xlu2 %v3075_v12, %s4201_s16 }
0x1b05   : > { %8549 = vst [vmem:[#allocation166_spill] sm:$0xff] %v6716_v24 }
0x1b0c   : > { %3094 = vperm.xlu2 %4139, %v3951_v39  }
0x1b14   : > { %4140 = vset.pattern.permute.xlu2 %v8186_v30 }
0x1b5e   : > { %v6707_v14 = vpop.permute.xlu2 %3081 }
0x1b5f   : > { %8546 = vst [vmem:[#allocation163_spill] sm:$0xff] %v6707_v14  ;;  %v6724_v14 = vpop.permute.xlu0 %2973 }
0x1b60   : > { %8550 = vst [vmem:[#allocation167_spill] sm:$0xff] %v6724_v14 }
0x1b66   : > { %v3095_v12 = vpop.permute.xlu2 %3094 }
0x1b67   : > { %v3100_v25 = vmul.f32 %v6710_v4, %v3095_v12  ;;  %v3101_v38 = vmul.f32 %v6713_v42, %v3095_v12  ;;  %v3102_v31 = vmul.f32 %v6716_v24, %v3095_v12 }
0x1b69   : > { %3110 = vrot.lane.b32.xlu2 %v3102_v31, %s4201_s16  ;;  %3108 = vrot.lane.b32.xlu1 %v3101_v38, %s4201_s16 }
0x1b6a   : > { %3106 = vrot.lane.b32.xlu0 %v3100_v25, %s4201_s16  ;;  %v6741_v25 = vperm.slane %v6674_v20, 2 }
0x1b6c   : > { %8555 = vst [vmem:[#allocation172_spill] sm:$0xff] %v6741_v25 }
0x1b72   : > { %3119 = vperm.xlu0 %4103, %v3951_v39  }
0x1b75   : > { %v6726_v3 = vpop.permute.xlu0 %3083  ;;  %v6759_v60 = vpop.permute.xlu1 %3085 }
0x1b76   : > { %8551 = vst [vmem:[#allocation168_spill] sm:$0xff] %v6726_v3 }
0x1b77   : > { %8561 = vst [vmem:[#allocation178_spill] sm:$0xff] %v6759_v60 }
0x1bc3   : > { %v6746_v3 = vpop.permute.xlu2 %3110 }
0x1bc4   : > { %8556 = vst [vmem:[#allocation173_spill] sm:$0xff] %v6746_v3 }
0x1bdb   : > { %v6767_v35 = vpop.permute.xlu1 %3108 }
0x1bdc   : > { %v6728_v5 = vpop.permute.xlu0 %3106  ;;  %8562 = vst [vmem:[#allocation179_spill] sm:$0xff] %v6767_v35 }
0x1bdd   : > { %8552 = vst [vmem:[#allocation169_spill] sm:$0xff] %v6728_v5 }
0x1be4   : > { %v3120_v12 = vpop.permute.xlu0 %3119 }
0x1be5   : > { %v3125_v31 = vmul.f32 %v6731_v49, %v3120_v12  ;;  %v3126_v38 = vmul.f32 %v6734_v19, %v3120_v12  ;;  %v3127_v5 = vmul.f32 %v6741_v25, %v3120_v12 }
0x1be7   : > { %3133 = vrot.lane.b32.xlu2 %v3126_v38, %s4201_s16  ;;  %3131 = vrot.lane.b32.xlu1 %v3125_v31, %s4201_s16  ;;  %v6754_v38 = vperm.slane %v6679_v52, 3  ;;  %v6757_v31 = vperm.slane %v6674_v20, 3 }
0x1be9   : > { %8559 = vst [vmem:[#allocation176_spill] sm:$0xff] %v6754_v38 }
0x1bea   : > { %8560 = vst [vmem:[#allocation177_spill] sm:$0xff] %v6757_v31 }
0x1bef   : > { %3144 = vperm.xlu2 %4140, %v3951_v39   ;;  %3135 = vrot.lane.b32.xlu1 %v3127_v5, %s4201_s16 }
0x1bf7   : > { %4142 = vset.pattern.permute.xlu2 %v8157_v46 }
0x1c41   : > { %v6748_v14 = vpop.permute.xlu2 %3133 }
0x1c42   : > { %8557 = vst [vmem:[#allocation174_spill] sm:$0xff] %v6748_v14 }
0x1c49   : > { %v3145_v39 = vpop.permute.xlu2 %3144 }
0x1c4a   : > { %v3150_v5 = vmul.f32 %v6751_v56, %v3145_v39  ;;  %v3151_v12 = vmul.f32 %v6754_v38, %v3145_v39  ;;  %v3152_v3 = vmul.f32 %v6757_v31, %v3145_v39 }
0x1c4c   : > { %3160 = vrot.lane.b32.xlu2 %v3152_v3, %s4201_s16  ;;  %3156 = vrot.lane.b32.xlu0 %v3150_v5, %s4201_s16  ;;  %v6778_v3 = vld [vmem:[%s7664_s3 + $0x20] sm:$0xf]  ;;  %v6808_v5 = vld [vmem:[%s7664_s3 + $0x38] sm:$0xf] }
0x1c4d   : > { %3158 = vrot.lane.b32.xlu1 %v3151_v12, %s4201_s16 }
0x1c54   : > { %3174 = vrot.lane.b32.xlu2 %v6674_v20, %s4199_s14  ;;  %3170 = vrot.lane.b32.xlu0 %v6683_v28, %s4199_s14 }
0x1c55   : > { %3172 = vrot.lane.b32.xlu1 %v6679_v52, %s4199_s14 }
0x1c59   : > { %v3132_v60 = vpop.permute.xlu1 %3131 }
0x1c5a   : > { %v6782_v39 = vsel %vm369_vm4, %v3132_v60, %v6748_v14  ;;  %v6796_v60 = vld [vmem:[%s7664_s3 + $0x2c] sm:$0xf] }
0x1c5b   : > { %8563 = vst [vmem:[#allocation180_spill] sm:$0xff] %v6782_v39 }
0x1c5c   : > { %3206 = vperm.xlu2 %4142, %v6778_v3   ;;  %3227 = vrot.lane.b32.xlu0 %v6679_v52, %s4200_s15  ;;  %8564 = vst [vmem:[#allocation181_spill] sm:$0xff] %v6796_v60 }
0x1c5d   : > { %3196 = vperm.xlu1 %4141, %v6778_v3  }
0x1c61   : > { %v6814_v14 = vpop.permute.xlu1 %3135 }
0x1c62   : > { %8565 = vst [vmem:[#allocation182_spill] sm:$0xff] %v6814_v14 }
0x1c64   : > { %3225 = vrot.lane.b32.xlu2 %v6683_v28, %s4200_s15 }
0x1c65   : > { %4143 = vset.pattern.permute.xlu1 %v8186_v30  ;;  %4144 = vset.pattern.permute.xlu2 %v8185_v13 }
0x1c66   : > { %3216 = vperm.xlu1 %4143, %v6778_v3  }
0x1c6c   : > { %3241 = vperm.xlu2 %4144, %v6796_v60  }
0x1c6e   : > { %3229 = vrot.lane.b32.xlu1 %v6674_v20, %s4200_s15 }
0x1c6f   : > { %4145 = vset.pattern.permute.xlu1 %v8157_v46 }
0x1c74   : > { %4146 = vset.pattern.permute.xlu2 %v8186_v30 }
0x1c75   : > { %3271 = vperm.xlu2 %4146, %v6796_v60  }
0x1c76   : > { %3261 = vperm.xlu1 %4145, %v6796_v60  }
0x1c7d   : > { %4148 = vset.pattern.permute.xlu2 %v8388_v43 }
0x1c7e   : > { %4147 = vset.pattern.permute.xlu1 %v8185_v13 }
0x1c7f   : > { %3284 = vperm.xlu1 %4147, %v6808_v5  }
0x1c87   : > { %4152 = vset.pattern.permute.xlu1 %v8388_v43 }
0x1ca6   : > { %v3161_v12 = vpop.permute.xlu2 %3160 }
0x1cae   : > { %v3175_v39 = vpop.permute.xlu2 %3174 }
0x1cb6   : > { %v3207_v54 = vpop.permute.xlu2 %3206 }
0x1cbe   : > { %v3157_v35 = vpop.permute.xlu0 %3156  ;;  %v3226_v38 = vpop.permute.xlu2 %3225 }
0x1cbf   : > { %v3159_v47 = vpop.permute.xlu1 %3158 }
0x1cc0   : > { %v6817_v60 = vsel %vm369_vm4, %v3157_v35, %v3159_v47  ;;  %v6820_v22 = vsel %vm369_vm4, %v3159_v47, %v3161_v12 }
0x1cc1   : > { %8566 = vst [vmem:[#allocation183_spill] sm:$0xff] %v6817_v60 }
0x1cc2   : > { %8567 = vst [vmem:[#allocation184_spill] sm:$0xff] %v6820_v22 }
0x1cc6   : > { %v3171_v52 = vpop.permute.xlu0 %3170 }
0x1cc7   : > { %v3173_v28 = vpop.permute.xlu1 %3172 }
0x1cc8   : > { %v3176_v20 = vsel %vm463_vm2, %v3171_v52, %v3173_v28  ;;  %v3177_v31 = vsel %vm463_vm2, %v3173_v28, %v3175_v39 }
0x1cc9   : > { %v6826_v43 = vsel %vm4859_vm12, %v3176_v20, 0.0  ;;  %v6830_v14 = vsel %vm4705_vm3, %v3177_v31, 0.0 }
0x1cca   : > { %v3209_v35 = vperm.slane %v6826_v43, 2  ;;  %v3210_v47 = vperm.slane %v6830_v14, 2  ;;  %v3199_v28 = vperm.slane %v6826_v43, 1  ;;  %v3200_v39 = vperm.slane %v6830_v14, 1 }
0x1ccc   : > { %v6834_v12 = vmul.f32 %v3209_v35, %v3207_v54  ;;  %v6836_v22 = vmul.f32 %v3210_v47, %v3207_v54  ;;  %v3242_v54 = vpop.permute.xlu2 %3241 }
0x1cce   : > { %8568 = vst [vmem:[#allocation185_spill] sm:$0xff] %v6834_v12  ;;  %v3228_v52 = vpop.permute.xlu0 %3227  ;;  %v3220_v12 = vperm.slane %v6830_v14, 3 }
0x1ccf   : > { %8569 = vst [vmem:[#allocation186_spill] sm:$0xff] %v6836_v22  ;;  %v3231_v20 = vsel %vm519_vm5, %v3226_v38, %v3228_v52  ;;  %v3197_v60 = vpop.permute.xlu1 %3196  ;;  %v3219_v22 = vperm.slane %v6826_v43, 3 }
0x1cd0   : > { %v6843_v31 = vsel %vm4814_vm9, %v3231_v20, 0.0  ;;  %v6845_v6 = vmul.f32 %v3199_v28, %v3197_v60  ;;  %v6847_v45 = vmul.f32 %v3200_v39, %v3197_v60 }
0x1cd1   : > { %v3244_v35 = vperm.slane %v6843_v31, 0 }
0x1cd2   : > { %8570 = vst [vmem:[#allocation187_spill] sm:$0xff] %v6845_v6 }
0x1cd3   : > { %8571 = vst [vmem:[#allocation188_spill] sm:$0xff] %v6847_v45  ;;  %v6850_v47 = vmul.f32 %v3244_v35, %v3242_v54 }
0x1cd5   : > { %8572 = vst [vmem:[#allocation189_spill] sm:$0xff] %v6850_v47  ;;  %v3264_v47 = vperm.slane %v6843_v31, 2 }
0x1cd8   : > { %v3217_v56 = vpop.permute.xlu1 %3216 }
0x1cd9   : > { %v6854_v38 = vmul.f32 %v3219_v22, %v3217_v56  ;;  %v6856_v51 = vmul.f32 %v3220_v12, %v3217_v56 }
0x1ce0   : > { %v3230_v20 = vpop.permute.xlu1 %3229 }
0x1ce1   : > { %v3232_v28 = vsel %vm519_vm5, %v3228_v52, %v3230_v20 }
0x1ce2   : > { %v6861_v60 = vsel %vm4680_vm1, %v3232_v28, 0.0 }
0x1ce3   : > { %v3245_v39 = vperm.slane %v6861_v60, 0  ;;  %v3265_v45 = vperm.slane %v6861_v60, 2 }
0x1ce5   : > { %v6864_v35 = vmul.f32 %v3245_v39, %v3242_v54  ;;  %v6880_v54 = vpop.permute.xlu2 %3271 }
0x1ce8   : > { %v3262_v6 = vpop.permute.xlu1 %3261 }
0x1ce9   : > { %v6868_v22 = vmul.f32 %v3264_v47, %v3262_v6  ;;  %v6870_v56 = vmul.f32 %v3265_v45, %v3262_v6 }
0x1cf1   : > { %v3285_v12 = vpop.permute.xlu1 %3284 }
0x1cf2   : > { %v3287_v52 = vmul.f32 %v3285_v12, %v6686_v50  ;;  %v3288_v20 = vmul.f32 %v3285_v12, %v6689_v37  ;;  %v3289_v28 = vmul.f32 %v3285_v12, %v6692_v55 }
0x1cf4   : > { %3297 = vrot.lane.b32.xlu1 %v3289_v28, %s4202_s17  ;;  %3295 = vrot.lane.b32.xlu0 %v3288_v20, %s4202_s17  ;;  %v8573_v20 = vld [vmem:[#allocation65_spill] sm:$0xff] }
0x1cf5   : > { %3293 = vrot.lane.b32.xlu2 %v3287_v52, %s4202_s17  ;;  %v4184_v52 = vld [vmem:[%s7664_s3 + $0x18] sm:$0xf]  ;;  %v2069_v28 = vmul.f32 %v6336_v44, %v8573_v20 }
0x1cfd   : > { %3306 = vperm.xlu2 %4148, %v6808_v5  }
0x1d05   : > { %4150 = vset.pattern.permute.xlu2 %v8186_v30 }
0x1d4f   : > { %v6882_v6 = vpop.permute.xlu2 %3293 }
0x1d57   : > { %v3307_v45 = vpop.permute.xlu2 %3306 }
0x1d58   : > { %v3309_v47 = vmul.f32 %v3307_v45, %v6710_v4  ;;  %v3310_v39 = vmul.f32 %v3307_v45, %v6713_v42  ;;  %v3311_v12 = vmul.f32 %v3307_v45, %v6716_v24  ;;  %v8574_v45 = vld [vmem:[#allocation46_spill] sm:$0xff] }
0x1d5a   : > { %3319 = vrot.lane.b32.xlu2 %v3311_v12, %s4202_s17  ;;  %3317 = vrot.lane.b32.xlu1 %v3310_v39, %s4202_s17  ;;  %v8575_v39 = vld [vmem:[#allocation64_spill] sm:$0xff] }
0x1d5b   : > { %3315 = vrot.lane.b32.xlu0 %v3309_v47, %s4202_s17  ;;  %v2070_v47 = vmul.f32 %v6336_v44, %v8574_v45  ;;  %v2061_v12 = vmul.f32 %v6160_v15, %v8575_v39  ;;  %v2085_v44 = vmul.f32 %v6162_v58, %v4851_v27  ;;  %v2086_v45 = vmul.f32 %v6162_v58, %v8287_v61 }
0x1d5c   : > { %v2131_v27 = vsel %vm369_vm4, %v6213_v48, %v6185_v7  ;;  %v2130_v61 = vsel %vm369_vm4, %v6176_v29, %v6213_v48  ;;  %v2153_v7 = vsel %vm369_vm4, %v6187_v2, %v6217_v11  ;;  %v2174_v48 = vsel %vm369_vm4, %v6252_v33, %v6219_v62 }
0x1d5d   : > { %v2195_v33 = vmul.f32 %v6221_v16, %v8292_v0 }
0x1d63   : > { %3328 = vperm.xlu0 %4103, %v6808_v5  }
0x1d6b   : > { %4149 = vset.pattern.permute.xlu0 %v8185_v13 }
0x1d6c   : > { %2184 = vperm.xlu0 %4149, %v4184_v52   ;;  %v6909_v52 = vpop.permute.xlu0 %3295 }
0x1d74   : > { %2345 = vperm.xlu0 %4149, %v6278_v1   ;;  %v8576_v1 = vld [vmem:[#allocation45_spill] sm:$0xff] }
0x1d7c   : > { %2506 = vperm.xlu0 %4149, %v6368_v9   ;;  %v2062_v9 = vmul.f32 %v6160_v15, %v8576_v1 }
0x1d84   : > { %2667 = vperm.xlu0 %4149, %v6451_v21   ;;  %v2071_v21 = vadd.f32 %v2069_v28, %v2061_v12  ;;  %v2108_v28 = vsel %vm369_vm4, %v6164_v23, %v6174_v40 }
0x1d8c   : > { %2828 = vperm.xlu0 %4149, %v6539_v26   ;;  %v2072_v26 = vadd.f32 %v2070_v47, %v2062_v9  ;;  %v2175_v9 = vsel %vm369_vm4, %v6219_v62, %v6234_v41 }
0x1d94   : > { %2989 = vperm.xlu0 %4149, %v6631_v8   ;;  %v2077_v8 = vmul.f32 %v6151_v18, %v4843_v57  ;;  %v2109_v57 = vsel %vm369_vm4, %v6174_v40, %v6211_v59  ;;  %v2152_v40 = vsel %vm369_vm4, %v6215_v17, %v6187_v2  ;;  %v8577_v2 = vld [vmem:[#allocation51_spill] sm:$0xff] }
0x1d95   : > { %v2196_v11 = vmul.f32 %v6221_v16, %v8577_v2  ;;  %v8585_v16 = vld [vmem:[#allocation77_spill] sm:$0xff] }
0x1d96   : > { %v2079_v20 = vadd.f32 %v2077_v8, %v2071_v21 }
0x1d98   : > { %v2087_v15 = vadd.f32 %v2085_v44, %v2079_v20  ;;  %v8578_v44 = vld [vmem:[#allocation18_spill] sm:$0xff] }
0x1d9c   : > { %3186 = vperm.xlu0 %4149, %v6778_v3   ;;  %v2078_v3 = vmul.f32 %v6151_v18, %v8285_v36  ;;  %v2112_v36 = vadd.f32 %v2108_v28, %v2087_v15 }
0x1d9e   : > { %v2080_v24 = vadd.f32 %v2078_v3, %v2072_v26  ;;  %v2134_v23 = vadd.f32 %v2130_v61, %v2112_v36  ;;  %v8584_v61 = vld [vmem:[#allocation35_spill] sm:$0xff] }
0x1da0   : > { %v2088_v1 = vadd.f32 %v2086_v45, %v2080_v24  ;;  %v2156_v59 = vadd.f32 %v2152_v40, %v2134_v23  ;;  %v8579_v45 = vld [vmem:[#allocation75_spill] sm:$0xff] }
0x1da1   : > { %v2203_v15 = vmul.f32 %v8579_v45, %v8578_v44  ;;  %v8594_v44 = vld [vmem:[#allocation57_spill] sm:$0xff] }
0x1da2   : > { %v2113_v18 = vadd.f32 %v2109_v57, %v2088_v1  ;;  %v2178_v8 = vadd.f32 %v2174_v48, %v2156_v59  ;;  %v8580_v1 = vld [vmem:[#allocation52_spill] sm:$0xff]  ;;  %v8581_v57 = vld [vmem:[#allocation27_spill] sm:$0xff] }
0x1da4   : > { %v2135_v12 = vadd.f32 %v2131_v27, %v2113_v18  ;;  %v8583_v18 = vld [vmem:[#allocation53_spill] sm:$0xff] }
0x1da6   : > { %v2157_v29 = vadd.f32 %v2153_v7, %v2135_v12  ;;  %v8587_v7 = vld [vmem:[#allocation39_spill] sm:$0xff] }
0x1da7   : > { %v2230_v59 = vmul.f32 %v6338_v10, %v8587_v7 }
0x1da8   : > { %v2179_v3 = vadd.f32 %v2175_v9, %v2157_v29  ;;  %v8588_v29 = vld [vmem:[#allocation55_spill] sm:$0xff] }
0x1da9   : > { %v2231_v48 = vmul.f32 %v6338_v10, %v8588_v29 }
0x1dcd   : > { %v6919_v39 = vpop.permute.xlu0 %3315 }
0x1dd5   : > { %v3329_v47 = vpop.permute.xlu0 %3328 }
0x1dd6   : > { %v3331_v58 = vmul.f32 %v3329_v47, %v6731_v49  ;;  %v3332_v24 = vmul.f32 %v3329_v47, %v6734_v19  ;;  %v3333_v21 = vmul.f32 %v3329_v47, %v6741_v25  ;;  %v8669_v25 = vld [vmem:[#allocation34_spill] sm:$0xff]  ;;  %v8670_v49 = vld [vmem:[#allocation41_spill] sm:$0xff] }
0x1dd7   : > { %v8671_v42 = vperm.slane %v8670_v49, 0 }
0x1dd8   : > { %3339 = vrot.lane.b32.xlu2 %v3332_v24, %s4202_s17  ;;  %3337 = vrot.lane.b32.xlu1 %v3331_v58, %s4202_s17  ;;  %v2222_v58 = vmul.f32 %v8585_v16, %v8584_v61  ;;  %v8586_v24 = vld [vmem:[#allocation54_spill] sm:$0xff] }
0x1dd9   : > { %v2223_v23 = vmul.f32 %v8585_v16, %v8586_v24  ;;  %v8600_v16 = vld [vmem:[#allocation91_spill] sm:$0xff] }
0x1dde   : > { %v2185_v26 = vpop.permute.xlu0 %2184 }
0x1ddf   : > { %v2187_v17 = vmul.f32 %v2185_v26, %v4896_v34  ;;  %v2188_v20 = vmul.f32 %v2185_v26, %v8291_v63  ;;  %v2204_v34 = vmul.f32 %v8579_v45, %v8580_v1  ;;  %v8589_v26 = vld [vmem:[#allocation15_spill] sm:$0xff] }
0x1de0   : > { %3350 = vperm.xlu2 %4150, %v6808_v5   ;;  %3341 = vrot.lane.b32.xlu1 %v3333_v21, %s4202_s17  ;;  %v8582_v5 = vld [vmem:[#allocation76_spill] sm:$0xff] }
0x1de1   : > { %v2189_v41 = vadd.f32 %v2187_v17, %v2178_v8  ;;  %v2190_v62 = vadd.f32 %v2188_v20, %v2179_v3  ;;  %v2211_v36 = vmul.f32 %v8582_v5, %v8581_v57  ;;  %v2212_v47 = vmul.f32 %v8582_v5, %v8583_v18  ;;  %v8590_v8 = vld [vmem:[#allocation79_spill] sm:$0xff]  ;;  %v8591_v17 = vld [vmem:[#allocation56_spill] sm:$0xff] }
0x1de2   : > { %v2238_v3 = vmul.f32 %v8590_v8, %v8589_v26  ;;  %v2239_v20 = vmul.f32 %v8590_v8, %v8591_v17  ;;  %v8597_v5 = vld [vmem:[#allocation87_spill] sm:$0xff]  ;;  %v8604_v26 = vld [vmem:[#allocation94_spill] sm:$0xff]  ;;  %v8605_v8 = vld [vmem:[#allocation89_spill] sm:$0xff] }
0x1de3   : > { %v2197_v28 = vadd.f32 %v2195_v33, %v2189_v41  ;;  %v2198_v63 = vadd.f32 %v2196_v11, %v2190_v62  ;;  %v8592_v11 = vld [vmem:[#allocation40_spill] sm:$0xff]  ;;  %v8606_v17 = vld [vmem:[#allocation99_spill] sm:$0xff] }
0x1de4   : > { %v8593_v41 = vld [vmem:[#allocation80_spill] sm:$0xff] }
0x1de5   : > { %v2205_v0 = vadd.f32 %v2203_v15, %v2197_v28  ;;  %v2206_v27 = vadd.f32 %v2204_v34, %v2198_v63  ;;  %v2246_v62 = vmul.f32 %v8593_v41, %v8592_v11  ;;  %v2247_v45 = vmul.f32 %v8593_v41, %v8594_v44  ;;  %v8595_v28 = vld [vmem:[#allocation82_spill] sm:$0xff]  ;;  %v8596_v63 = vld [vmem:[#allocation81_spill] sm:$0xff]  ;;  %v8607_v11 = vld [vmem:[#allocation16_spill] sm:$0xff] }
0x1de6   : > { %v2269_v57 = vsel %vm588_vm6, %v8596_v63, %v8595_v28 }
0x1de7   : > { %v2213_v12 = vadd.f32 %v2211_v36, %v2205_v0  ;;  %v2214_v40 = vadd.f32 %v2212_v47, %v2206_v27  ;;  %v2270_v36 = vsel %vm588_vm6, %v8595_v28, %v8597_v5  ;;  %v8598_v0 = vld [vmem:[#allocation86_spill] sm:$0xff]  ;;  %v8599_v27 = vld [vmem:[#allocation84_spill] sm:$0xff]  ;;  %v8613_v5 = vld [vmem:[#allocation97_spill] sm:$0xff] }
0x1de8   : > { %4153 = vset.pattern.permute.xlu2 %v8157_v46  ;;  %v2292_v61 = vsel %vm588_vm6, %v8599_v27, %v8598_v0 }
0x1de9   : > { %v2224_v9 = vadd.f32 %v2222_v58, %v2213_v12  ;;  %v2225_v21 = vadd.f32 %v2223_v23, %v2214_v40  ;;  %v2291_v58 = vsel %vm588_vm6, %v8600_v16, %v8599_v27  ;;  %v8601_v12 = vld [vmem:[#allocation83_spill] sm:$0xff]  ;;  %v8602_v40 = vld [vmem:[#allocation88_spill] sm:$0xff]  ;;  %v8616_v16 = vld [vmem:[#allocation90_spill] sm:$0xff] }
0x1dea   : > { %v2313_v7 = vsel %vm588_vm6, %v8602_v40, %v8601_v12 }
0x1deb   : > { %v2232_v33 = vadd.f32 %v2230_v59, %v2224_v9  ;;  %v2233_v2 = vadd.f32 %v2231_v48, %v2225_v21  ;;  %v8603_v59 = vld [vmem:[#allocation85_spill] sm:$0xff]  ;;  %v2346_v48 = vpop.permute.xlu0 %2345 }
0x1dec   : > { %v2314_v29 = vsel %vm588_vm6, %v8601_v12, %v8603_v59  ;;  %v2348_v41 = vmul.f32 %v2346_v48, %v8607_v11  ;;  %v8619_v59 = vld [vmem:[#allocation93_spill] sm:$0xff] }
0x1ded   : > { %v2240_v15 = vadd.f32 %v2238_v3, %v2232_v33  ;;  %v2241_v1 = vadd.f32 %v2239_v20, %v2233_v2  ;;  %v2336_v3 = vsel %vm588_vm6, %v8605_v8, %v8604_v26  ;;  %v2335_v20 = vsel %vm588_vm6, %v8606_v17, %v8605_v8  ;;  %v8621_v8 = vld [vmem:[#allocation21_spill] sm:$0xff] }
0x1def   : > { %v2248_v34 = vadd.f32 %v2246_v62, %v2240_v15  ;;  %v2249_v10 = vadd.f32 %v2247_v45, %v2241_v1  ;;  %v8608_v62 = vld [vmem:[#allocation58_spill] sm:$0xff]  ;;  %v8609_v45 = vld [vmem:[#allocation28_spill] sm:$0xff] }
0x1df0   : > { %v2349_v44 = vmul.f32 %v2346_v48, %v8608_v62  ;;  %v8610_v15 = vld [vmem:[#allocation92_spill] sm:$0xff]  ;;  %v8620_v48 = vld [vmem:[#allocation62_spill] sm:$0xff] }
0x1df1   : > { %v2273_v18 = vadd.f32 %v2269_v57, %v2248_v34  ;;  %v2274_v47 = vadd.f32 %v2270_v36, %v2249_v10  ;;  %v2356_v1 = vmul.f32 %v8610_v15, %v8609_v45  ;;  %v8611_v34 = vld [vmem:[#allocation59_spill] sm:$0xff]  ;;  %v8612_v57 = vld [vmem:[#allocation30_spill] sm:$0xff]  ;;  %v8625_v62 = vld [vmem:[#allocation96_spill] sm:$0xff] }
0x1df2   : > { %v2357_v10 = vmul.f32 %v8610_v15, %v8611_v34  ;;  %v2364_v36 = vmul.f32 %v8613_v5, %v8612_v57  ;;  %v8626_v45 = vld [vmem:[#allocation66_spill] sm:$0xff]  ;;  %v8629_v57 = vld [vmem:[#allocation67_spill] sm:$0xff] }
0x1df3   : > { %v2295_v24 = vadd.f32 %v2291_v58, %v2273_v18  ;;  %v2296_v23 = vadd.f32 %v2292_v61, %v2274_v47  ;;  %v8614_v18 = vld [vmem:[#allocation60_spill] sm:$0xff]  ;;  %v8615_v61 = vld [vmem:[#allocation19_spill] sm:$0xff]  ;;  %v2400_v15 = vmul.f32 %v8625_v62, %v8626_v45 }
0x1df4   : > { %v2365_v47 = vmul.f32 %v8613_v5, %v8614_v18  ;;  %v2372_v58 = vmul.f32 %v8616_v16, %v8615_v61  ;;  %v8631_v61 = vld [vmem:[#allocation98_spill] sm:$0xff]  ;;  %v8641_v45 = vld [vmem:[#allocation120_spill] sm:$0xff] }
0x1df5   : > { %v2317_v9 = vadd.f32 %v2313_v7, %v2295_v24  ;;  %v2318_v21 = vadd.f32 %v2314_v29, %v2296_v23  ;;  %v8617_v24 = vld [vmem:[#allocation61_spill] sm:$0xff] }
0x1df6   : > { %v2373_v23 = vmul.f32 %v8616_v16, %v8617_v24  ;;  %v8618_v7 = vld [vmem:[#allocation29_spill] sm:$0xff] }
0x1df7   : > { %v2339_v33 = vadd.f32 %v2335_v20, %v2317_v9  ;;  %v2340_v2 = vadd.f32 %v2336_v3, %v2318_v21  ;;  %v2383_v29 = vmul.f32 %v8619_v59, %v8618_v7  ;;  %v2384_v9 = vmul.f32 %v8619_v59, %v8620_v48  ;;  %v8622_v3 = vld [vmem:[#allocation100_spill] sm:$0xff]  ;;  %v8623_v20 = vld [vmem:[#allocation22_spill] sm:$0xff] }
0x1df8   : > { %v2391_v17 = vmul.f32 %v8622_v3, %v8621_v8  ;;  %v8634_v7 = vld [vmem:[#allocation44_spill] sm:$0xff]  ;;  %v8637_v8 = vld [vmem:[#allocation102_spill] sm:$0xff] }
0x1df9   : > { %v2350_v28 = vadd.f32 %v2348_v41, %v2339_v33  ;;  %v2351_v63 = vadd.f32 %v2349_v44, %v2340_v2  ;;  %v2392_v33 = vmul.f32 %v8622_v3, %v8623_v20  ;;  %v8624_v41 = vld [vmem:[#allocation68_spill] sm:$0xff] }
0x1dfa   : > { %v2399_v44 = vmul.f32 %v8625_v62, %v8624_v41  ;;  %v8639_v41 = vld [vmem:[#allocation103_spill] sm:$0xff] }
0x1dfb   : > { %v2358_v0 = vadd.f32 %v2356_v1, %v2350_v28  ;;  %v2359_v27 = vadd.f32 %v2357_v10, %v2351_v63  ;;  %v8627_v10 = vld [vmem:[#allocation69_spill] sm:$0xff]  ;;  %v8628_v28 = vld [vmem:[#allocation95_spill] sm:$0xff] }
0x1dfc   : > { %v2407_v63 = vmul.f32 %v8628_v28, %v8627_v10  ;;  %v2408_v5 = vmul.f32 %v8628_v28, %v8629_v57  ;;  %v8640_v62 = vld [vmem:[#allocation119_spill] sm:$0xff]  ;;  %v8642_v10 = vld [vmem:[#allocation24_spill] sm:$0xff] }
0x1dfd   : > { %v2366_v12 = vadd.f32 %v2364_v36, %v2358_v0  ;;  %v2367_v40 = vadd.f32 %v2365_v47, %v2359_v27  ;;  %v8630_v27 = vld [vmem:[#allocation115_spill] sm:$0xff] }
0x1dfe   : > { %v2430_v16 = vsel %vm792_vm11, %v8631_v61, %v8630_v27  ;;  %v8644_v61 = vld [vmem:[#allocation175_spill] sm:$0xff] }
0x1dff   : > { %v2374_v21 = vadd.f32 %v2372_v58, %v2366_v12  ;;  %v2375_v26 = vadd.f32 %v2373_v23, %v2367_v40  ;;  %v8632_v58 = vld [vmem:[#allocation63_spill] sm:$0xff]  ;;  %v8633_v40 = vld [vmem:[#allocation101_spill] sm:$0xff] }
0x1e00   : > { %v2431_v24 = vsel %vm792_vm11, %v8630_v27, %v8632_v58  ;;  %v2453_v59 = vsel %vm792_vm11, %v8634_v7, %v8633_v40  ;;  %v8645_v58 = vld [vmem:[#allocation176_spill] sm:$0xff] }
0x1e01   : > { %v2385_v2 = vadd.f32 %v2383_v29, %v2374_v21  ;;  %v2386_v11 = vadd.f32 %v2384_v9, %v2375_v26  ;;  %v8635_v29 = vld [vmem:[#allocation107_spill] sm:$0xff]  ;;  %v8636_v26 = vld [vmem:[#allocation108_spill] sm:$0xff] }
0x1e02   : > { %v2452_v48 = vsel %vm792_vm11, %v8635_v29, %v8634_v7  ;;  %v2474_v3 = vsel %vm792_vm11, %v8637_v8, %v8636_v26  ;;  %v8647_v7 = vld [vmem:[#allocation105_spill] sm:$0xff]  ;;  %v8649_v29 = vld [vmem:[#allocation114_spill] sm:$0xff] }
0x1e03   : > { %v2393_v1 = vadd.f32 %v2391_v17, %v2385_v2  ;;  %v2394_v34 = vadd.f32 %v2392_v33, %v2386_v11  ;;  %v8638_v17 = vld [vmem:[#allocation109_spill] sm:$0xff]  ;;  %v2507_v33 = vpop.permute.xlu0 %2506 }
0x1e04   : > { %v2475_v20 = vsel %vm792_vm11, %v8636_v26, %v8638_v17  ;;  %v2509_v28 = vmul.f32 %v2507_v33, %v8642_v10  ;;  %v8650_v26 = vmov 1   ;;  %v4185_v8 = vld [vmem:[%s7664_s3 + $0x4] sm:$0xf]  ;;  %v8651_v17 = vld [vmem:[#allocation135_spill] sm:$0xff] }
0x1e05   : > { %v2401_v36 = vadd.f32 %v2399_v44, %v2393_v1  ;;  %v2402_v18 = vadd.f32 %v2400_v15, %v2394_v34  ;;  %v2496_v44 = vsel %vm792_vm11, %v8640_v62, %v8639_v41  ;;  %v2497_v15 = vsel %vm792_vm11, %v8639_v41, %v8641_v45 }
0x1e07   : > { %v2409_v47 = vadd.f32 %v2407_v63, %v2401_v36  ;;  %v2410_v0 = vadd.f32 %v2408_v5, %v2402_v18  ;;  %v8643_v63 = vld [vmem:[#allocation25_spill] sm:$0xff]  ;;  %v7067_v18 = vpop.permute.xlu2 %3319 }
0x1e08   : > { %v2510_v57 = vmul.f32 %v2507_v33, %v8643_v63  ;;  %v7114_v33 = vld [vmem:[%s7664_s3 + $0x5c] sm:$0xf] }
0x1e09   : > { %v2434_v23 = vadd.f32 %v2430_v16, %v2409_v47  ;;  %v2435_v12 = vadd.f32 %v2431_v24, %v2410_v0  ;;  %v7071_v0 = vpop.permute.xlu1 %3297 }
0x1e0b   : > { %v2456_v9 = vadd.f32 %v2452_v48, %v2434_v23  ;;  %v2457_v21 = vadd.f32 %v2453_v59, %v2435_v12  ;;  %v8646_v23 = vld [vmem:[#allocation177_spill] sm:$0xff]  ;;  %v8648_v59 = vld [vmem:[#allocation112_spill] sm:$0xff]  ;;  %v7124_v41 = vpop.permute.xlu0 %2667 }
0x1e0d   : > { %v2478_v2 = vadd.f32 %v2474_v3, %v2456_v9  ;;  %v2479_v11 = vadd.f32 %v2475_v20, %v2457_v21  ;;  %v3955_v9 = vld [vmem:[%s7664_s3 + $0x44] sm:$0xf]  ;;  %v3956_v3 = vld [vmem:[%s7664_s3 + $0x50] sm:$0xf] }
0x1e0e   : > { %v8652_v20 = vld [vmem:[#allocation143_spill] sm:$0xff] }
0x1e0f   : > { %v2500_v1 = vadd.f32 %v2496_v44, %v2478_v2  ;;  %v2501_v34 = vadd.f32 %v2497_v15, %v2479_v11  ;;  %v8653_v2 = vld [vmem:[#allocation10_spill] sm:$0xff]  ;;  %v8654_v11 = vld [vmem:[#allocation181_spill] sm:$0xff] }
0x1e11   : > { %v7063_v5 = vadd.f32 %v2509_v28, %v2500_v1  ;;  %v7065_v36 = vadd.f32 %v2510_v57, %v2501_v34  ;;  %v7079_v40 = vpop.permute.xlu1 %3317 }
0x1e13   : > { %v7127_v62 = vpop.permute.xlu0 %2828 }
0x1e1b   : > { %v7129_v44 = vpop.permute.xlu0 %2989 }
0x1e23   : > { %v7131_v45 = vpop.permute.xlu0 %3186 }
0x1e32   : > { %v7069_v47 = vpop.permute.xlu2 %3339 }
0x1e3a   : > { %v3351_v27 = vpop.permute.xlu2 %3350 }
0x1e3b   : > { %v3353_v16 = vmul.f32 %v3351_v27, %v8644_v61  ;;  %v3354_v24 = vmul.f32 %v3351_v27, %v8645_v58  ;;  %v3355_v12 = vmul.f32 %v3351_v27, %v8646_v23 }
0x1e3d   : > { %3363 = vrot.lane.b32.xlu2 %v3355_v12, %s4202_s17  ;;  %3359 = vrot.lane.b32.xlu0 %v3353_v16, %s4202_s17 }
0x1e3e   : > { %3361 = vrot.lane.b32.xlu1 %v3354_v24, %s4202_s17 }
0x1e45   : > { %3375 = vrot.lane.b32.xlu2 %v8647_v7, %s4203_s18  ;;  %3371 = vrot.lane.b32.xlu0 %v8648_v59, %s4203_s18 }
0x1e46   : > { %3373 = vrot.lane.b32.xlu1 %v8649_v29, %s4203_s18  ;;  %s251_s18 = scalar_lea.vmem %s7667_s6, %s3966_s25 }
0x1e4a   : > { %v3338_v48 = vpop.permute.xlu1 %3337 }
0x1e4b   : > { %v7092_v21 = vsel %vm588_vm6, %v3338_v48, %v7069_v47 }
0x1e4d   : > { %3407 = vperm.xlu2 %4153, %v3955_v9   ;;  %3387 = vperm.xlu0 %4149, %v3955_v9  }
0x1e4e   : > { %3397 = vperm.xlu1 %4152, %v3955_v9  }
0x1e52   : > { %v7133_v15 = vpop.permute.xlu1 %3341 }
0x1e55   : > { %3426 = vrot.lane.b32.xlu2 %v8648_v59, %s4204_s23  ;;  %4151 = vset.pattern.permute.xlu0 %v8650_v26 }
0x1e56   : > { %4154 = vset.pattern.permute.xlu1 %v8186_v30  ;;  %2549 = vperm.xlu0 %4151, %v4185_v8   ;;  %v8663_v8 = vld [vmem:[#allocation118_spill] sm:$0xff] }
0x1e57   : > { %3417 = vperm.xlu1 %4154, %v3955_v9   ;;  %4155 = vset.pattern.permute.xlu2 %v8185_v13 }
0x1e5d   : > { %3442 = vperm.xlu2 %4155, %v3956_v3  }
0x1e5e   : > { %2710 = vperm.xlu0 %4151, %v8651_v17   ;;  %v8657_v17 = vld [vmem:[#allocation32_spill] sm:$0xff] }
0x1e5f   : > { %3430 = vrot.lane.b32.xlu1 %v8647_v7, %s4204_s23 }
0x1e60   : > { %4156 = vset.pattern.permute.xlu1 %v8157_v46 }
0x1e65   : > { %4157 = vset.pattern.permute.xlu2 %v8186_v30 }
0x1e66   : > { %2871 = vperm.xlu0 %4151, %v8652_v20   ;;  %3472 = vperm.xlu2 %4157, %v3956_v3   ;;  %v8658_v20 = vld [vmem:[#allocation110_spill] sm:$0xff] }
0x1e67   : > { %3462 = vperm.xlu1 %4156, %v3956_v3  }
0x1e6e   : > { %3036 = vperm.xlu0 %4151, %v8653_v2   ;;  %4159 = vset.pattern.permute.xlu2 %v8650_v26  ;;  %v2517_v2 = vmul.f32 %v8658_v20, %v8657_v17  ;;  %v8664_v17 = vld [vmem:[#allocation38_spill] sm:$0xff] }
0x1e6f   : > { %4158 = vset.pattern.permute.xlu1 %v8185_v13  ;;  %v2526_v23 = vmul.f32 %v8663_v8, %v8664_v17 }
0x1e70   : > { %3485 = vperm.xlu1 %4158, %v7114_v33   ;;  %v2519_v13 = vadd.f32 %v2517_v2, %v7063_v5 }
0x1e76   : > { %3251 = vperm.xlu0 %4151, %v8654_v11   ;;  %v8659_v11 = vld [vmem:[#allocation17_spill] sm:$0xff] }
0x1e78   : > { %4162 = vset.pattern.permute.xlu1 %v8650_v26 }
0x1e7e   : > { %3428 = vrot.lane.b32.xlu0 %v8649_v29, %s4204_s23 }
0x1e86   : > { %3452 = vperm.xlu0 %4151, %v3956_v3  }
0x1e8e   : > { %4160 = vset.pattern.permute.xlu0 %v8157_v46 }
0x1e97   : > { %v3364_v1 = vpop.permute.xlu2 %3363 }
0x1e9f   : > { %v3376_v57 = vpop.permute.xlu2 %3375 }
0x1ea7   : > { %v3408_v26 = vpop.permute.xlu2 %3407 }
0x1eaf   : > { %v3360_v34 = vpop.permute.xlu0 %3359 }
0x1eb0   : > { %v3362_v10 = vpop.permute.xlu1 %3361 }
0x1eb1   : > { %v7136_v28 = vsel %vm588_vm6, %v3362_v10, %v3364_v1  ;;  %v7139_v63 = vsel %vm588_vm6, %v3360_v34, %v3362_v10  ;;  %v2518_v1 = vmul.f32 %v8658_v20, %v8659_v11 }
0x1eb7   : > { %v3372_v27 = vpop.permute.xlu0 %3371 }
0x1eb8   : > { %v3374_v16 = vpop.permute.xlu1 %3373 }
0x1eb9   : > { %v3378_v24 = vsel %vm667_vm7, %v3374_v16, %v3376_v57  ;;  %v3377_v12 = vsel %vm667_vm7, %v3372_v27, %v3374_v16  ;;  %v2520_v57 = vadd.f32 %v2518_v1, %v7065_v36 }
0x1eba   : > { %v3382_v9 = vsel %vm4705_vm3, %v3378_v24, 0.0  ;;  %v3381_v3 = vsel %vm4859_vm12, %v3377_v12, 0.0  ;;  %v8662_v12 = vld [vmem:[#allocation33_spill] sm:$0xff] }
0x1ebb   : > { %v3411_v34 = vperm.slane %v3382_v9, 2  ;;  %v3410_v10 = vperm.slane %v3381_v3, 2  ;;  %v3390_v24 = vperm.slane %v3381_v3, 0  ;;  %v3391_v48 = vperm.slane %v3382_v9, 0 }
0x1ebc   : > { %v2525_v7 = vmul.f32 %v8663_v8, %v8662_v12  ;;  %v3401_v20 = vperm.slane %v3382_v9, 1  ;;  %v3400_v11 = vperm.slane %v3381_v3, 1  ;;  %v2528_v2 = vadd.f32 %v2526_v23, %v2520_v57 }
0x1ebd   : > { %v7153_v27 = vmul.f32 %v3411_v34, %v3408_v26  ;;  %v7155_v16 = vmul.f32 %v3410_v10, %v3408_v26  ;;  %v8667_v34 = vld [vmem:[#allocation70_spill] sm:$0xff]  ;;  %v8668_v10 = vld [vmem:[#allocation116_spill] sm:$0xff]  ;;  %v3421_v23 = vperm.slane %v3382_v9, 3 }
0x1ebe   : > { %v2527_v36 = vadd.f32 %v2525_v7, %v2519_v13  ;;  %v2533_v12 = vmul.f32 %v8668_v10, %v8667_v34  ;;  %v2534_v8 = vmul.f32 %v8668_v10, %v8669_v25  ;;  %v3420_v7 = vperm.slane %v3381_v3, 3 }
0x1ebf   : > { %8660 = vst [vmem:[#allocation65_spill] sm:$0xff] %v7153_v27  ;;  %v3388_v58 = vpop.permute.xlu0 %3387  ;;  %v8675_v34 = vperm.slane %v8670_v49, 1 }
0x1ec0   : > { %8661 = vst [vmem:[#allocation46_spill] sm:$0xff] %v7155_v16  ;;  %v3398_v61 = vpop.permute.xlu1 %3397  ;;  %v7161_v46 = vmul.f32 %v3390_v24, %v3388_v58  ;;  %v7163_v5 = vmul.f32 %v3391_v48, %v3388_v58  ;;  %v2535_v17 = vadd.f32 %v2533_v12, %v2527_v36  ;;  %v2536_v19 = vadd.f32 %v2534_v8, %v2528_v2  ;;  %v8672_v24 = vld [vmem:[#allocation121_spill] sm:$0xff]  ;;  %v8680_v12 = vld [vmem:[#allocation111_spill] sm:$0xff]  ;;  %v8712_v16 = vld [vmem:[#allocation138_spill] sm:$0xff] }
0x1ec1   : > { %v7165_v26 = vmul.f32 %v3400_v11, %v3398_v61  ;;  %v7167_v1 = vmul.f32 %v3401_v20, %v3398_v61  ;;  %v2544_v4 = vmul.f32 %v8672_v24, %v8671_v42  ;;  %v8673_v58 = vld [vmem:[#allocation37_spill] sm:$0xff]  ;;  %v8679_v42 = vperm.slane %v8670_v49, 2 }
0x1ec2   : > { %v8674_v48 = vperm.slane %v8673_v58, 0  ;;  %v8676_v25 = vperm.slane %v8673_v58, 1  ;;  %v8681_v9 = vperm.slane %v8673_v58, 2 }
0x1ec3   : > { %8665 = vst [vmem:[#allocation64_spill] sm:$0xff] %v7165_v26  ;;  %v2546_v20 = vadd.f32 %v2544_v4, %v2535_v17  ;;  %v2560_v8 = vmul.f32 %v8680_v12, %v8679_v42  ;;  %v8682_v17 = vperm.slane %v8670_v49, 3  ;;  %v8686_v42 = vld [vmem:[#allocation125_spill] sm:$0xff] }
0x1ec4   : > { %8666 = vst [vmem:[#allocation45_spill] sm:$0xff] %v7167_v1  ;;  %v2545_v13 = vmul.f32 %v8672_v24, %v8674_v48  ;;  %v2561_v3 = vmul.f32 %v8680_v12, %v8681_v9  ;;  %v8683_v24 = vld [vmem:[#allocation117_spill] sm:$0xff]  ;;  %v8689_v12 = vld [vmem:[#allocation128_spill] sm:$0xff]  ;;  %v8690_v9 = vld [vmem:[#allocation123_spill] sm:$0xff] }
0x1ec5   : > { %v2568_v48 = vmul.f32 %v8683_v24, %v8682_v17  ;;  %v8691_v17 = vld [vmem:[#allocation126_spill] sm:$0xff]  ;;  %v8713_v1 = vld [vmem:[#allocation20_spill] sm:$0xff] }
0x1ec6   : > { %v2547_v11 = vadd.f32 %v2545_v13, %v2536_v19  ;;  %v8684_v13 = vperm.slane %v8673_v58, 3  ;;  %v8688_v58 = vld [vmem:[#allocation124_spill] sm:$0xff]  ;;  %v8714_v26 = vperm.slane %v8713_v1, 0 }
0x1ec8   : > { %v2550_v61 = vpop.permute.xlu0 %2549 }
0x1ec9   : > { %v3418_v57 = vpop.permute.xlu1 %3417  ;;  %v2552_v27 = vmul.f32 %v2550_v61, %v8675_v34  ;;  %v2553_v36 = vmul.f32 %v2550_v61, %v8676_v25  ;;  %v8685_v25 = vld [vmem:[#allocation122_spill] sm:$0xff] }
0x1eca   : > { %v7183_v2 = vmul.f32 %v3420_v7, %v3418_v57  ;;  %v7185_v10 = vmul.f32 %v3421_v23, %v3418_v57  ;;  %v2569_v7 = vmul.f32 %v8683_v24, %v8684_v13  ;;  %v8692_v24 = vld [vmem:[#allocation130_spill] sm:$0xff] }
0x1ecb   : > { %v2554_v4 = vadd.f32 %v2552_v27, %v2546_v20  ;;  %v2555_v19 = vadd.f32 %v2553_v36, %v2547_v11 }
0x1ecc   : > { %8677 = vst [vmem:[#allocation51_spill] sm:$0xff] %v7183_v2  ;;  %v8687_v2 = vld [vmem:[#allocation131_spill] sm:$0xff] }
0x1ecd   : > { %8678 = vst [vmem:[#allocation18_spill] sm:$0xff] %v7185_v10  ;;  %v2562_v23 = vadd.f32 %v2560_v8, %v2554_v4  ;;  %v2563_v61 = vadd.f32 %v2561_v3, %v2555_v19  ;;  %v2591_v10 = vsel %vm369_vm4, %v8686_v42, %v8685_v25  ;;  %v2592_v27 = vsel %vm369_vm4, %v8685_v25, %v8687_v2  ;;  %v8693_v2 = vld [vmem:[#allocation127_spill] sm:$0xff] }
0x1ece   : > { %v2614_v8 = vsel %vm369_vm4, %v8689_v12, %v8688_v58  ;;  %v2613_v3 = vsel %vm369_vm4, %v8690_v9, %v8689_v12  ;;  %v8697_v42 = vld [vmem:[#allocation47_spill] sm:$0xff] }
0x1ecf   : > { %v2570_v57 = vadd.f32 %v2568_v48, %v2562_v23  ;;  %v2571_v34 = vadd.f32 %v2569_v7, %v2563_v61  ;;  %v2635_v48 = vsel %vm369_vm4, %v8692_v24, %v8691_v17  ;;  %v8694_v23 = vld [vmem:[#allocation132_spill] sm:$0xff]  ;;  %v8695_v61 = vld [vmem:[#allocation151_spill] sm:$0xff] }
0x1ed0   : > { %v2711_v20 = vpop.permute.xlu0 %2710 }
0x1ed1   : > { %v2595_v49 = vadd.f32 %v2591_v10, %v2570_v57  ;;  %v2596_v11 = vadd.f32 %v2592_v27, %v2571_v34  ;;  %v7205_v36 = vpop.permute.xlu1 %3430  ;;  %v2636_v10 = vsel %vm369_vm4, %v8691_v17, %v8693_v2  ;;  %v2657_v57 = vsel %vm369_vm4, %v8695_v61, %v8694_v23  ;;  %v8696_v34 = vld [vmem:[#allocation134_spill] sm:$0xff] }
0x1ed2   : > { %v2658_v25 = vsel %vm369_vm4, %v8694_v23, %v8696_v34  ;;  %v8698_v27 = vperm.slane %v8697_v42, 0  ;;  %v8704_v61 = vperm.slane %v8697_v42, 2  ;;  %v8705_v34 = vld [vmem:[#allocation140_spill] sm:$0xff] }
0x1ed3   : > { %v2617_v4 = vadd.f32 %v2613_v3, %v2595_v49  ;;  %v2618_v19 = vadd.f32 %v2614_v8, %v2596_v11  ;;  %v8699_v11 = vld [vmem:[#allocation42_spill] sm:$0xff] }
0x1ed4   : > { %v2670_v49 = vmul.f32 %v7124_v41, %v8698_v27  ;;  %v8700_v58 = vperm.slane %v8699_v11, 0  ;;  %v8703_v24 = vperm.slane %v8699_v11, 1  ;;  %v8707_v27 = vperm.slane %v8697_v42, 3 }
0x1ed5   : > { %v2639_v13 = vadd.f32 %v2635_v48, %v2617_v4  ;;  %v2640_v7 = vadd.f32 %v2636_v10, %v2618_v19  ;;  %v8701_v4 = vperm.slane %v8697_v42, 1  ;;  %v8702_v19 = vld [vmem:[#allocation129_spill] sm:$0xff] }
0x1ed6   : > { %v2671_v12 = vmul.f32 %v7124_v41, %v8700_v58  ;;  %v2679_v48 = vmul.f32 %v8702_v19, %v8703_v24  ;;  %v2686_v41 = vmul.f32 %v8705_v34, %v8704_v61  ;;  %v8708_v58 = vld [vmem:[#allocation133_spill] sm:$0xff] }
0x1ed7   : > { %v2661_v8 = vadd.f32 %v2657_v57, %v2639_v13  ;;  %v2662_v9 = vadd.f32 %v2658_v25, %v2640_v7  ;;  %v2678_v17 = vmul.f32 %v8702_v19, %v8701_v4  ;;  %v8706_v13 = vperm.slane %v8699_v11, 2 }
0x1ed8   : > { %v7231_v3 = vpop.permute.xlu0 %2871  ;;  %v2694_v4 = vmul.f32 %v8708_v58, %v8707_v27  ;;  %v8709_v19 = vperm.slane %v8699_v11, 3 }
0x1ed9   : > { %v2672_v2 = vadd.f32 %v2670_v49, %v2661_v8  ;;  %v2673_v10 = vadd.f32 %v2671_v12, %v2662_v9  ;;  %v7239_v23 = vpop.permute.xlu1 %3462  ;;  %v2687_v7 = vmul.f32 %v8705_v34, %v8706_v13  ;;  %v8710_v9 = vld [vmem:[#allocation48_spill] sm:$0xff]  ;;  %v2706_v34 = vmul.f32 %v8712_v16, %v8714_v26 }
0x1eda   : > { %v2695_v49 = vmul.f32 %v8708_v58, %v8709_v19  ;;  %v8711_v24 = vperm.slane %v8710_v9, 0  ;;  %v8715_v11 = vperm.slane %v8710_v9, 1  ;;  %v8719_v58 = vperm.slane %v8713_v1, 2 }
0x1edb   : > { %v2680_v57 = vadd.f32 %v2678_v17, %v2672_v2  ;;  %v2681_v25 = vadd.f32 %v2679_v48, %v2673_v10 }
0x1edc   : > { %v2705_v61 = vmul.f32 %v8712_v16, %v8711_v24  ;;  %v2713_v13 = vmul.f32 %v2711_v20, %v8715_v11  ;;  %v8721_v24 = vld [vmem:[#allocation141_spill] sm:$0xff] }
0x1edd   : > { %v2688_v12 = vadd.f32 %v2686_v41, %v2680_v57  ;;  %v2689_v8 = vadd.f32 %v2687_v7, %v2681_v25  ;;  %v8716_v41 = vperm.slane %v8713_v1, 1  ;;  %v8717_v57 = vperm.slane %v8710_v9, 2  ;;  %v8718_v25 = vld [vmem:[#allocation136_spill] sm:$0xff] }
0x1ede   : > { %v2722_v16 = vmul.f32 %v8718_v25, %v8719_v58 }
0x1edf   : > { %v2696_v17 = vadd.f32 %v2694_v4, %v2688_v12  ;;  %v2697_v48 = vadd.f32 %v2695_v49, %v2689_v8  ;;  %v2714_v7 = vmul.f32 %v2711_v20, %v8716_v41  ;;  %v2721_v27 = vmul.f32 %v8718_v25, %v8717_v57 }
0x1ee0   : > { %v7259_v2 = vpop.permute.xlu0 %3036  ;;  %v8720_v8 = vperm.slane %v8710_v9, 3  ;;  %v3254_v9 = vperm.slane %v6843_v31, 1 }
0x1ee1   : > { %v2707_v42 = vadd.f32 %v2705_v61, %v2696_v17  ;;  %v2708_v10 = vadd.f32 %v2706_v34, %v2697_v48  ;;  %v8722_v34 = vperm.slane %v8713_v1, 3 }
0x1ee2   : > { %v3486_v26 = vpop.permute.xlu1 %3485  ;;  %v2729_v61 = vmul.f32 %v8721_v24, %v8720_v8 }
0x1ee3   : > { %v2715_v4 = vadd.f32 %v2713_v13, %v2707_v42  ;;  %v2716_v19 = vadd.f32 %v2714_v7, %v2708_v10  ;;  %v3488_v49 = vmul.f32 %v3486_v26, %v6686_v50  ;;  %v3489_v12 = vmul.f32 %v3486_v26, %v6689_v37  ;;  %v8723_v10 = vld [vmem:[#allocation145_spill] sm:$0xff]  ;;  %v8725_v13 = vld [vmem:[#allocation150_spill] sm:$0xff] }
0x1ee4   : > { %v3490_v20 = vmul.f32 %v3486_v26, %v6692_v55  ;;  %v2730_v17 = vmul.f32 %v8721_v24, %v8722_v34  ;;  %v3255_v42 = vperm.slane %v6861_v60, 1  ;;  %v8724_v55 = vld [vmem:[#allocation137_spill] sm:$0xff]  ;;  %v2753_v41 = vsel %vm588_vm6, %v8723_v10, %v8725_v13  ;;  %v8727_v26 = vld [vmem:[#allocation144_spill] sm:$0xff]  ;;  %v8729_v24 = vld [vmem:[#allocation142_spill] sm:$0xff] }
0x1ee5   : > { %v2723_v48 = vadd.f32 %v2721_v27, %v2715_v4  ;;  %v2724_v11 = vadd.f32 %v2722_v16, %v2716_v19  ;;  %3496 = vrot.lane.b32.xlu0 %v3489_v12, %s4205_s30  ;;  %3494 = vrot.lane.b32.xlu2 %v3488_v49, %s4205_s30  ;;  %v2752_v1 = vsel %vm588_vm6, %v8724_v55, %v8723_v10  ;;  %v8726_v16 = vld [vmem:[#allocation139_spill] sm:$0xff]  ;;  %v8728_v19 = vld [vmem:[#allocation158_spill] sm:$0xff] }
0x1ee6   : > { %3498 = vrot.lane.b32.xlu1 %v3490_v20, %s4205_s30  ;;  %v2775_v4 = vsel %vm588_vm6, %v8727_v26, %v8726_v16  ;;  %v2774_v49 = vsel %vm588_vm6, %v8728_v19, %v8727_v26  ;;  %v8731_v34 = vld [vmem:[#allocation146_spill] sm:$0xff]  ;;  %v8734_v10 = vld [vmem:[#allocation147_spill] sm:$0xff]  ;;  %v8740_v19 = vld [vmem:[#allocation153_spill] sm:$0xff] }
0x1ee7   : > { %v2731_v50 = vadd.f32 %v2729_v61, %v2723_v48  ;;  %v2732_v37 = vadd.f32 %v2730_v17, %v2724_v11  ;;  %v8730_v61 = vld [vmem:[#allocation157_spill] sm:$0xff]  ;;  %v2797_v17 = vsel %vm588_vm6, %v8729_v24, %v8731_v34  ;;  %v3427_v48 = vpop.permute.xlu2 %3426 }
0x1ee8   : > { %v3252_v7 = vpop.permute.xlu0 %3251  ;;  %v2796_v20 = vsel %vm588_vm6, %v8730_v61, %v8729_v24 }
0x1ee9   : > { %v2756_v57 = vadd.f32 %v2752_v1, %v2731_v50  ;;  %v2757_v25 = vadd.f32 %v2753_v41, %v2732_v37  ;;  %v7291_v27 = vmul.f32 %v3254_v9, %v3252_v7  ;;  %v7293_v58 = vmul.f32 %v3255_v42, %v3252_v7  ;;  %v8732_v37 = vld [vmem:[#allocation159_spill] sm:$0xff]  ;;  %v8733_v9 = vld [vmem:[#allocation156_spill] sm:$0xff] }
0x1eea   : > { %v2818_v42 = vsel %vm588_vm6, %v8733_v9, %v8732_v37  ;;  %v2819_v55 = vsel %vm588_vm6, %v8732_v37, %v8734_v10  ;;  %v8735_v1 = vld [vmem:[#allocation31_spill] sm:$0xff] }
0x1eeb   : > { %v2778_v12 = vadd.f32 %v2774_v49, %v2756_v57  ;;  %v2779_v8 = vadd.f32 %v2775_v4, %v2757_v25  ;;  %v8736_v13 = vperm.slane %v8735_v1, 0  ;;  %v8737_v7 = vld [vmem:[#allocation43_spill] sm:$0xff]  ;;  %v8739_v4 = vperm.slane %v8735_v1, 1 }
0x1eec   : > { %v8738_v57 = vperm.slane %v8737_v7, 0  ;;  %v8744_v37 = vperm.slane %v8737_v7, 2 }
0x1eed   : > { %v2800_v11 = vadd.f32 %v2796_v20, %v2778_v12  ;;  %v2801_v50 = vadd.f32 %v2797_v17, %v2779_v8  ;;  %3507 = vperm.xlu2 %4159, %v7114_v33   ;;  %v2831_v41 = vmul.f32 %v7127_v62, %v8736_v13  ;;  %v2839_v49 = vmul.f32 %v8740_v19, %v8739_v4 }
0x1eee   : > { %v2832_v25 = vmul.f32 %v7127_v62, %v8738_v57  ;;  %v8741_v12 = vperm.slane %v8737_v7, 1  ;;  %v8742_v62 = vperm.slane %v8735_v1, 2  ;;  %v8746_v57 = vld [vmem:[#allocation148_spill] sm:$0xff] }
0x1eef   : > { %v2822_v16 = vadd.f32 %v2818_v42, %v2800_v11  ;;  %v2823_v26 = vadd.f32 %v2819_v55, %v2801_v50  ;;  %v8743_v11 = vld [vmem:[#allocation154_spill] sm:$0xff]  ;;  %v3443_v4 = vpop.permute.xlu2 %3442 }
0x1ef0   : > { %v2840_v8 = vmul.f32 %v8740_v19, %v8741_v12  ;;  %v3429_v24 = vpop.permute.xlu0 %3428  ;;  %v2847_v50 = vmul.f32 %v8743_v11, %v8742_v62  ;;  %v2848_v9 = vmul.f32 %v8743_v11, %v8744_v37 }
0x1ef1   : > { %v2833_v61 = vadd.f32 %v2831_v41, %v2822_v16  ;;  %v2834_v20 = vadd.f32 %v2832_v25, %v2823_v26  ;;  %v3432_v34 = vsel %vm723_vm8, %v3427_v48, %v3429_v24  ;;  %v3433_v17 = vsel %vm723_vm8, %v3429_v24, %v7205_v36 }
0x1ef2   : > { %v7337_v42 = vsel %vm4814_vm9, %v3432_v34, 0.0  ;;  %v7341_v10 = vsel %vm4680_vm1, %v3433_v17, 0.0  ;;  %v8745_v41 = vperm.slane %v8735_v1, 3  ;;  %v8747_v16 = vperm.slane %v8737_v7, 3  ;;  %v8748_v1 = vld [vmem:[#allocation50_spill] sm:$0xff]  ;;  %v8750_v34 = vld [vmem:[#allocation160_spill] sm:$0xff] }
0x1ef3   : > { %v2841_v48 = vadd.f32 %v2839_v49, %v2833_v61  ;;  %v2842_v55 = vadd.f32 %v2840_v8, %v2834_v20  ;;  %v3445_v36 = vperm.slane %v7337_v42, 0  ;;  %v3446_v13 = vperm.slane %v7341_v10, 0  ;;  %v8751_v7 = vld [vmem:[#allocation26_spill] sm:$0xff] }
0x1ef4   : > { %v2855_v25 = vmul.f32 %v8746_v57, %v8745_v41  ;;  %v2856_v26 = vmul.f32 %v8746_v57, %v8747_v16  ;;  %v3465_v19 = vperm.slane %v7337_v42, 2  ;;  %v3466_v12 = vperm.slane %v7341_v10, 2 }
0x1ef5   : > { %v2849_v24 = vadd.f32 %v2847_v50, %v2841_v48  ;;  %v2850_v49 = vadd.f32 %v2848_v9, %v2842_v55  ;;  %v7353_v8 = vmul.f32 %v3445_v36, %v3443_v4  ;;  %v7355_v61 = vmul.f32 %v3446_v13, %v3443_v4  ;;  %4161 = vset.pattern.permute.xlu2 %v8186_v30  ;;  %v8763_v30 = vld [vmem:[#allocation9_spill] sm:$0xff] }
0x1ef6   : > { %v8749_v20 = vperm.slane %v8748_v1, 0  ;;  %v8752_v62 = vperm.slane %v8751_v7, 0  ;;  %v7365_v57 = vmul.f32 %v3465_v19, %v7239_v23  ;;  %v7368_v50 = vmul.f32 %v3466_v12, %v7239_v23 }
0x1ef7   : > { %v2857_v37 = vadd.f32 %v2855_v25, %v2849_v24  ;;  %v2858_v41 = vadd.f32 %v2856_v26, %v2850_v49  ;;  %v8753_v55 = vperm.slane %v8748_v1, 1  ;;  %v8754_v13 = vperm.slane %v8751_v7, 1  ;;  %v8756_v25 = vld [vmem:[#allocation152_spill] sm:$0xff] }
0x1ef8   : > { %v2866_v17 = vmul.f32 %v8750_v34, %v8749_v20  ;;  %v2867_v11 = vmul.f32 %v8750_v34, %v8752_v62  ;;  %v8755_v4 = vperm.slane %v8748_v1, 2  ;;  %v8757_v19 = vperm.slane %v8751_v7, 2  ;;  %v8759_v20 = vld [vmem:[#allocation149_spill] sm:$0xff] }
0x1ef9   : > { %v2874_v36 = vmul.f32 %v7231_v3, %v8753_v55  ;;  %v2875_v16 = vmul.f32 %v7231_v3, %v8754_v13  ;;  %v8758_v49 = vperm.slane %v8748_v1, 3  ;;  %v8761_v55 = vld [vmem:[#allocation6_spill] sm:$0xff]  ;;  %v8762_v13 = vld [vmem:[#allocation155_spill] sm:$0xff] }
0x1efa   : > { %v2868_v9 = vadd.f32 %v2866_v17, %v2857_v37  ;;  %v2869_v48 = vadd.f32 %v2867_v11, %v2858_v41  ;;  %v2882_v26 = vmul.f32 %v8756_v25, %v8755_v4  ;;  %v2883_v24 = vmul.f32 %v8756_v25, %v8757_v19  ;;  %v8766_v25 = vld [vmem:[#allocation5_spill] sm:$0xff] }
0x1efb   : > { %v2890_v34 = vmul.f32 %v8759_v20, %v8758_v49  ;;  %v8760_v17 = vperm.slane %v8751_v7, 3  ;;  %v2913_v4 = vsel %vm792_vm11, %v8762_v13, %v8761_v55 }
0x1efc   : > { %v2876_v23 = vadd.f32 %v2874_v36, %v2868_v9  ;;  %v2877_v12 = vadd.f32 %v2875_v16, %v2869_v48  ;;  %v2914_v9 = vsel %vm792_vm11, %v8761_v55, %v8763_v30  ;;  %v8764_v36 = vld [vmem:[#allocation8_spill] sm:$0xff]  ;;  %v8765_v16 = vld [vmem:[#allocation7_spill] sm:$0xff] }
0x1efd   : > { %v2891_v62 = vmul.f32 %v8759_v20, %v8760_v17  ;;  %v2936_v7 = vsel %vm792_vm11, %v8765_v16, %v8764_v36  ;;  %v8769_v20 = vld [vmem:[#allocation12_spill] sm:$0xff]  ;;  %v3020_v36 = vsel %vm4814_vm9, %v8648_v59, 0.0 }
0x1efe   : > { %v2884_v11 = vadd.f32 %v2882_v26, %v2876_v23  ;;  %v2885_v3 = vadd.f32 %v2883_v24, %v2877_v12  ;;  %v2935_v26 = vsel %vm792_vm11, %v8766_v25, %v8765_v16  ;;  %v8767_v23 = vld [vmem:[#allocation13_spill] sm:$0xff]  ;;  %v8768_v12 = vld [vmem:[#allocation3_spill] sm:$0xff]  ;;  %v8770_v30 = vld [vmem:[#allocation4_spill] sm:$0xff]  ;;  %v3021_v16 = vsel %vm4680_vm1, %v8649_v29, 0.0 }
0x1eff   : > { %v2958_v49 = vsel %vm792_vm11, %v8768_v12, %v8767_v23  ;;  %v8774_v55 = vld [vmem:[#allocation72_spill] sm:$0xff]  ;;  %v8778_v25 = vld [vmem:[#allocation11_spill] sm:$0xff] }
0x1f00   : > { %v2892_v37 = vadd.f32 %v2890_v34, %v2884_v11  ;;  %v2893_v41 = vadd.f32 %v2891_v62, %v2885_v3  ;;  %v8771_v62 = vld [vmem:[#allocation167_spill] sm:$0xff]  ;;  %v8772_v3 = vld [vmem:[#allocation74_spill] sm:$0xff]  ;;  %v8775_v13 = vperm.slane %v8774_v55, 0  ;;  %v8782_v32 = vperm.slane %v8774_v55, 2 }
0x1f01   : > { %v2979_v11 = vsel %vm792_vm11, %v8771_v62, %v8770_v30  ;;  %v8780_v12 = vperm.slane %v8772_v3, 2  ;;  %v3029_v30 = vperm.slane %v3020_v36, 0  ;;  %v3030_v62 = vperm.slane %v3021_v16, 0 }
0x1f02   : > { %v2917_v48 = vadd.f32 %v2913_v4, %v2892_v37  ;;  %v2918_v1 = vadd.f32 %v2914_v9, %v2893_v41  ;;  %v8773_v37 = vperm.slane %v8772_v3, 0  ;;  %v2993_v4 = vmul.f32 %v7129_v44, %v8775_v13 }
0x1f04   : > { %v2939_v19 = vadd.f32 %v2935_v26, %v2917_v48  ;;  %v2940_v24 = vadd.f32 %v2936_v7, %v2918_v1  ;;  %v2992_v41 = vmul.f32 %v7129_v44, %v8773_v37  ;;  %v8776_v48 = vld [vmem:[#allocation14_spill] sm:$0xff]  ;;  %v8777_v7 = vperm.slane %v8772_v3, 1  ;;  %v8784_v37 = vld [vmem:[#allocation104_spill] sm:$0xff] }
0x1f06   : > { %v2961_v34 = vadd.f32 %v8769_v20, %v2939_v19  ;;  %v2962_v17 = vadd.f32 %v2958_v49, %v2940_v24  ;;  %v3000_v26 = vmul.f32 %v8778_v25, %v8777_v7  ;;  %v8779_v19 = vperm.slane %v8774_v55, 1  ;;  %v8781_v49 = vld [vmem:[#allocation113_spill] sm:$0xff] }
0x1f07   : > { %v3008_v20 = vmul.f32 %v8781_v49, %v8780_v12  ;;  %v3040_v7 = vperm.slane %v3021_v16, 1 }
0x1f08   : > { %v2983_v9 = vadd.f32 %v2979_v11, %v2961_v34  ;;  %v2984_v1 = vadd.f32 %v8776_v48, %v2962_v17  ;;  %v3001_v24 = vmul.f32 %v8778_v25, %v8779_v19  ;;  %v3009_v34 = vmul.f32 %v8781_v49, %v8782_v32  ;;  %v8786_v25 = vld [vmem:[#allocation161_spill] sm:$0xff] }
0x1f09   : > { %v8783_v11 = vperm.slane %v8772_v3, 3  ;;  %v8785_v48 = vperm.slane %v8774_v55, 3  ;;  %v3031_v19 = vmul.f32 %v3029_v30, %v8786_v25  ;;  %v3032_v12 = vmul.f32 %v3030_v62, %v8786_v25 }
0x1f0a   : > { %v2994_v44 = vadd.f32 %v2992_v41, %v2983_v9  ;;  %v2995_v23 = vadd.f32 %v2993_v4, %v2984_v1  ;;  %v3039_v1 = vperm.slane %v3020_v36, 1  ;;  %v3042_v55 = vmul.f32 %v3040_v7, %v7259_v2 }
0x1f0b   : > { %v3016_v13 = vmul.f32 %v8784_v37, %v8783_v11  ;;  %v3017_v41 = vmul.f32 %v8784_v37, %v8785_v48  ;;  %v3059_v11 = vperm.slane %v3020_v36, 3  ;;  %v3060_v37 = vperm.slane %v3021_v16, 3  ;;  %v8788_v48 = vld [vmem:[#allocation162_spill] sm:$0xff] }
0x1f0c   : > { %v3002_v53 = vadd.f32 %v3000_v26, %v2994_v44  ;;  %v3003_v17 = vadd.f32 %v3001_v24, %v2995_v23  ;;  %v3049_v44 = vperm.slane %v3020_v36, 2  ;;  %v3050_v23 = vperm.slane %v3021_v16, 2  ;;  %v8791_v36 = vld [vmem:[#allocation178_spill] sm:$0xff] }
0x1f0d   : > { %v3041_v32 = vmul.f32 %v3039_v1, %v7259_v2  ;;  %v3061_v62 = vmul.f32 %v3059_v11, %v8788_v48  ;;  %v8790_v1 = vld [vmem:[#allocation163_spill] sm:$0xff]  ;;  %v8796_v11 = vld [vmem:[#allocation174_spill] sm:$0xff] }
0x1f0e   : > { %v3010_v4 = vadd.f32 %v3008_v20, %v3002_v53  ;;  %v3011_v9 = vadd.f32 %v3009_v34, %v3003_v17  ;;  %v8787_v20 = vld [vmem:[#allocation106_spill] sm:$0xff] }
0x1f0f   : > { %v3051_v34 = vmul.f32 %v3049_v44, %v8787_v20  ;;  %v3052_v53 = vmul.f32 %v3050_v23, %v8787_v20  ;;  %v8794_v23 = vld [vmem:[#allocation169_spill] sm:$0xff]  ;;  %v3189_v20 = vperm.slane %v6826_v43, 0 }
0x1f10   : > { %v3018_v26 = vadd.f32 %v3016_v13, %v3010_v4  ;;  %v3019_v24 = vadd.f32 %v3017_v41, %v3011_v9  ;;  %v3062_v13 = vmul.f32 %v3060_v37, %v8788_v48  ;;  %v8802_v43 = vld [vmem:[#allocation185_spill] sm:$0xff] }
0x1f11   : > { %v3191_v48 = vmul.f32 %v3189_v20, %v7131_v45 }
0x1f12   : > { %v3033_v49 = vadd.f32 %v3031_v19, %v3018_v26  ;;  %v3034_v3 = vadd.f32 %v3032_v12, %v3019_v24  ;;  %v8789_v19 = vld [vmem:[#allocation168_spill] sm:$0xff]  ;;  %v8792_v26 = vld [vmem:[#allocation173_spill] sm:$0xff]  ;;  %v8793_v24 = vld [vmem:[#allocation179_spill] sm:$0xff] }
0x1f13   : > { %v3087_v2 = vsel %vm369_vm4, %v8790_v1, %v8789_v19  ;;  %v3088_v16 = vsel %vm369_vm4, %v8789_v19, %v8791_v36  ;;  %v3113_v44 = vsel %vm369_vm4, %v8793_v24, %v8792_v26  ;;  %v8800_v1 = vld [vmem:[#allocation187_spill] sm:$0xff]  ;;  %v8801_v36 = vld [vmem:[#allocation188_spill] sm:$0xff] }
0x1f14   : > { %v3043_v17 = vadd.f32 %v3041_v32, %v3033_v49  ;;  %v3044_v30 = vadd.f32 %v3042_v55, %v3034_v3  ;;  %v3112_v49 = vsel %vm369_vm4, %v8794_v23, %v8793_v24  ;;  %v8795_v55 = vld [vmem:[#allocation182_spill] sm:$0xff]  ;;  %v8804_v23 = vld [vmem:[#allocation189_spill] sm:$0xff] }
0x1f15   : > { %v3138_v37 = vsel %vm369_vm4, %v8796_v11, %v8795_v55 }
0x1f16   : > { %v3053_v41 = vadd.f32 %v3051_v34, %v3043_v17  ;;  %v3054_v4 = vadd.f32 %v3052_v53, %v3044_v30  ;;  %v3190_v34 = vperm.slane %v6830_v14, 0  ;;  %v8797_v53 = vld [vmem:[#allocation180_spill] sm:$0xff]  ;;  %v8803_v14 = vld [vmem:[#allocation186_spill] sm:$0xff] }
0x1f18   : > { %v3063_v9 = vadd.f32 %v3061_v62, %v3053_v41  ;;  %v3064_v25 = vadd.f32 %v3062_v13, %v3054_v4  ;;  %v3192_v62 = vmul.f32 %v3190_v34, %v7131_v45  ;;  %v8798_v13 = vld [vmem:[#allocation183_spill] sm:$0xff]  ;;  %v8799_v4 = vld [vmem:[#allocation184_spill] sm:$0xff]  ;;  %v3274_v45 = vperm.slane %v6843_v31, 3 }
0x1f1a   : > { %v3091_v7 = vadd.f32 %v3087_v2, %v3063_v9  ;;  %v3092_v12 = vadd.f32 %v3088_v16, %v3064_v25  ;;  %v3276_v11 = vmul.f32 %v3274_v45, %v6880_v54 }
0x1f1c   : > { %v3116_v3 = vadd.f32 %v3112_v49, %v3091_v7  ;;  %v3117_v32 = vadd.f32 %v3113_v44, %v3092_v12  ;;  %v3275_v44 = vperm.slane %v6861_v60, 3  ;;  %v3299_v60 = vsel %vm588_vm6, %v6882_v6, %v6909_v52 }
0x1f1d   : > { %v3344_v6 = vsel %vm588_vm6, %v7069_v47, %v7133_v15  ;;  %v3453_v15 = vpop.permute.xlu0 %3452 }
0x1f1e   : > { %v3141_v17 = vadd.f32 %v8797_v53, %v3116_v3  ;;  %v3142_v30 = vadd.f32 %v3138_v37, %v3117_v32  ;;  %v3277_v37 = vmul.f32 %v3275_v44, %v6880_v54  ;;  %v3322_v54 = vsel %vm588_vm6, %v7079_v40, %v7067_v18 }
0x1f20   : > { %v3166_v41 = vadd.f32 %v8798_v13, %v3141_v17  ;;  %v3167_v9 = vadd.f32 %v8799_v4, %v3142_v30 }
0x1f22   : > { %v3193_v25 = vadd.f32 %v3191_v48, %v3166_v41  ;;  %v3194_v19 = vadd.f32 %v3192_v62, %v3167_v9  ;;  %v8805_v62 = vld [vmem:[#allocation64_spill] sm:$0xff]  ;;  %v8807_v41 = vld [vmem:[#allocation46_spill] sm:$0xff]  ;;  %v8808_v9 = vld [vmem:[#allocation65_spill] sm:$0xff] }
0x1f24   : > { %v3203_v2 = vadd.f32 %v8800_v1, %v3193_v25  ;;  %v3204_v16 = vadd.f32 %v8801_v36, %v3194_v19  ;;  %v8810_v19 = vld [vmem:[#allocation18_spill] sm:$0xff] }
0x1f26   : > { %v3213_v7 = vadd.f32 %v8802_v43, %v3203_v2  ;;  %v3214_v12 = vadd.f32 %v8803_v14, %v3204_v16  ;;  %v3476_v2 = vperm.slane %v7341_v10, 3 }
0x1f28   : > { %v3223_v26 = vadd.f32 %v6854_v38, %v3213_v7  ;;  %v3224_v24 = vadd.f32 %v6856_v51, %v3214_v12 }
0x1f2a   : > { %v3248_v49 = vadd.f32 %v8804_v23, %v3223_v26  ;;  %v3249_v3 = vadd.f32 %v6864_v35, %v3224_v24  ;;  %v3300_v35 = vsel %vm588_vm6, %v6909_v52, %v7071_v0  ;;  %v3473_v52 = vpop.permute.xlu2 %3472 }
0x1f2b   : > { %v3478_v24 = vmul.f32 %v3476_v2, %v3473_v52  ;;  %v3962_v2 = vld [vmem:[%s7665_s4 + $0xc] sm:$0xf] }
0x1f2c   : > { %v3258_v32 = vadd.f32 %v7291_v27, %v3248_v49  ;;  %v3259_v55 = vadd.f32 %v7293_v58, %v3249_v3 }
0x1f2e   : > { %v3268_v38 = vadd.f32 %v6868_v22, %v3258_v32  ;;  %v3269_v51 = vadd.f32 %v6870_v56, %v3259_v55  ;;  %v3321_v22 = vsel %vm588_vm6, %v6919_v39, %v7079_v40  ;;  %v8806_v40 = vld [vmem:[#allocation45_spill] sm:$0xff] }
0x1f30   : > { %v3278_v20 = vadd.f32 %v3276_v11, %v3268_v38  ;;  %v3279_v31 = vadd.f32 %v3277_v37, %v3269_v51  ;;  %v8814_v37 = vmov 3  }
0x1f32   : > { %v3303_v27 = vadd.f32 %v3299_v60, %v3278_v20  ;;  %v3304_v58 = vadd.f32 %v3300_v35, %v3279_v31 }
0x1f34   : > { %v3325_v56 = vadd.f32 %v3321_v22, %v3303_v27  ;;  %v3326_v34 = vadd.f32 %v3322_v54, %v3304_v58  ;;  %v8815_v27 = vld [vmem:[#allocation170_spill] sm:$0xff]  ;;  %v8816_v54 = vld [vmem:[#allocation171_spill] sm:$0xff] }
0x1f36   : > { %v3347_v53 = vadd.f32 %v7092_v21, %v3325_v56  ;;  %v3348_v17 = vadd.f32 %v3344_v6, %v3326_v34  ;;  %v8809_v21 = vld [vmem:[#allocation51_spill] sm:$0xff]  ;;  %v8817_v56 = vld [vmem:[#allocation172_spill] sm:$0xff]  ;;  %v8818_v6 = vmov 2  }
0x1f38   : > { %v3369_v0 = vadd.f32 %v7139_v63, %v3347_v53  ;;  %v3370_v30 = vadd.f32 %v7136_v28, %v3348_v17  ;;  %v3455_v63 = vperm.slane %v7337_v42, 1  ;;  %v3456_v28 = vperm.slane %v7341_v10, 1  ;;  %v8812_v10 = vld [vmem:[#allocation165_spill] sm:$0xff] }
0x1f3a   : > { %v3394_v18 = vadd.f32 %v7161_v46, %v3369_v0  ;;  %v3395_v48 = vadd.f32 %v7163_v5, %v3370_v30  ;;  %v3475_v5 = vperm.slane %v7337_v42, 3  ;;  %v3457_v43 = vmul.f32 %v3455_v63, %v3453_v15  ;;  %v8811_v42 = vld [vmem:[#allocation164_spill] sm:$0xff]  ;;  %v8819_v0 = vld [vmem:[#allocation175_spill] sm:$0xff] }
0x1f3b   : > { %v3458_v7 = vmul.f32 %v3456_v28, %v3453_v15  ;;  %v8823_v63 = vmov 0   ;;  %v8824_v28 = vmov 1  }
0x1f3c   : > { %v3404_v39 = vadd.f32 %v8805_v62, %v3394_v18  ;;  %v3405_v13 = vadd.f32 %v8806_v40, %v3395_v48  ;;  %v3477_v26 = vmul.f32 %v3475_v5, %v3473_v52  ;;  %v8820_v18 = vld [vmem:[#allocation176_spill] sm:$0xff]  ;;  %v8821_v62 = vld [vmem:[#allocation177_spill] sm:$0xff] }
0x1f3d   : > { %v3960_v5 = vld [vmem:[%s7665_s4 + $0x4] sm:$0xf] }
0x1f3e   : > { %v3414_v4 = vadd.f32 %v8807_v41, %v3404_v39  ;;  %v3415_v47 = vadd.f32 %v8808_v9, %v3405_v13  ;;  %v3958_v13 = vld [vmem:[%s7664_s3 + $0x68] sm:$0xf]  ;;  %v3638_v41 = vld [vmem:[%s7665_s4] sm:$0xf] }
0x1f3f   : > { %v3495_v46 = vpop.permute.xlu2 %3494 }
0x1f40   : > { %v3424_v25 = vadd.f32 %v8809_v21, %v3414_v4  ;;  %v3425_v1 = vadd.f32 %v8810_v19, %v3415_v47  ;;  %v3959_v19 = vld [vmem:[%s7666_s5 + $0x8] sm:$0xf] }
0x1f42   : > { %v3449_v36 = vadd.f32 %v7353_v8, %v3424_v25  ;;  %v3450_v16 = vadd.f32 %v7355_v61, %v3425_v1  ;;  %v8813_v8 = vld [vmem:[#allocation166_spill] sm:$0xff] }
0x1f44   : > { %v3459_v14 = vadd.f32 %v3457_v43, %v3449_v36  ;;  %v3460_v12 = vadd.f32 %v3458_v7, %v3450_v16  ;;  %v3963_v36 = vld [vmem:[%s7666_s5 + $0xc] sm:$0xf] }
0x1f46   : > { %v3469_v45 = vadd.f32 %v7365_v57, %v3459_v14  ;;  %v3470_v44 = vadd.f32 %v7368_v50, %v3460_v12 }
0x1f47   : > { %v3508_v23 = vpop.permute.xlu2 %3507 }
0x1f48   : > { %v3479_v49 = vadd.f32 %v3477_v26, %v3469_v45  ;;  %v3480_v3 = vadd.f32 %v3478_v24, %v3470_v44  ;;  %v3510_v32 = vmul.f32 %v3508_v23, %v8811_v42  ;;  %v3511_v55 = vmul.f32 %v3508_v23, %v8812_v10  ;;  %v8825_v42 = vld [vmem:[#allocation2_spill] sm:$0xff] }
0x1f49   : > { %v3512_v11 = vmul.f32 %v3508_v23, %v8813_v8  ;;  %v3645_v10 = vperm.slane %v8825_v42, 4  ;;  %v3658_v8 = vperm.slane %v8825_v42, 1 }
0x1f4a   : > { %3518 = vrot.lane.b32.xlu1 %v3511_v55, %s4205_s30  ;;  %3516 = vrot.lane.b32.xlu0 %v3510_v32, %s4205_s30  ;;  %v3644_v32 = vperm.slane %v8825_v42, 0 }
0x1f4b   : > { %3520 = vrot.lane.b32.xlu2 %v3512_v11, %s4205_s30  ;;  %v3659_v11 = vperm.slane %v8825_v42, 5 }
0x1f52   : > { %3529 = vperm.xlu0 %4160, %v7114_v33  }
0x1f57   : > { %v3497_v61 = vpop.permute.xlu0 %3496 }
0x1f58   : > { %v3500_v57 = vsel %vm792_vm11, %v3495_v46, %v3497_v61  ;;  %v3499_v38 = vpop.permute.xlu1 %3498  ;;  %v3961_v46 = vld [vmem:[%s7665_s4 + $0x8] sm:$0xf] }
0x1f59   : > { %v3504_v50 = vadd.f32 %v3500_v57, %v3479_v49  ;;  %v3501_v47 = vsel %vm792_vm11, %v3497_v61, %v3499_v38  ;;  %v3672_v61 = vperm.slane %v8825_v42, 2  ;;  %v3673_v57 = vperm.slane %v8825_v42, 6 }
0x1f5a   : > { %4168 = vset.pattern.permute.xlu0 %v8814_v37 }
0x1fa5   : > { %v3521_v53 = vpop.permute.xlu2 %3520 }
0x1fbc   : > { %v3519_v51 = vpop.permute.xlu1 %3518  ;;  %v3517_v20 = vpop.permute.xlu0 %3516 }
0x1fbd   : > { %v3522_v31 = vsel %vm792_vm11, %v3517_v20, %v3519_v51  ;;  %v3662_v20 = vperm.slane %v3658_v8, 1 }
0x1fbe   : > { %v3526_v60 = vadd.f32 %v3522_v31, %v3504_v50  ;;  %v3648_v50 = vperm.slane %v3644_v32, 0  ;;  %v3663_v31 = vperm.slane %v3659_v11, 1 }
0x1fc4   : > { %v3530_v35 = vpop.permute.xlu0 %3529 }
0x1fc5   : > { %v3532_v58 = vmul.f32 %v3530_v35, %v8815_v27  ;;  %v3533_v22 = vmul.f32 %v3530_v35, %v8816_v54  ;;  %v3534_v34 = vmul.f32 %v3530_v35, %v8817_v56  ;;  %v3686_v27 = vperm.slane %v8825_v42, 3 }
0x1fc7   : > { %3540 = vrot.lane.b32.xlu2 %v3533_v22, %s4205_s30  ;;  %3538 = vrot.lane.b32.xlu1 %v3532_v58, %s4205_s30  ;;  %v3687_v58 = vperm.slane %v8825_v42, 7 }
0x1fcf   : > { %3551 = vperm.xlu2 %4161, %v7114_v33   ;;  %3542 = vrot.lane.b32.xlu1 %v3534_v34, %s4205_s30  ;;  %v8822_v33 = vld [vmem:[#allocation105_spill] sm:$0xff] }
0x1fd7   : > { %4163 = vset.pattern.permute.xlu2 %v8818_v6 }
0x2021   : > { %v3541_v17 = vpop.permute.xlu2 %3540 }
0x2029   : > { %v3552_v52 = vpop.permute.xlu2 %3551 }
0x202a   : > { %v3554_v30 = vmul.f32 %v3552_v52, %v8819_v0  ;;  %v3555_v48 = vmul.f32 %v3552_v52, %v8820_v18  ;;  %v3556_v39 = vmul.f32 %v3552_v52, %v8821_v62  ;;  %v3690_v18 = vperm.slane %v3686_v27, 3 }
0x202c   : > { %3564 = vrot.lane.b32.xlu2 %v3556_v39, %s4205_s30  ;;  %3560 = vrot.lane.b32.xlu0 %v3554_v30, %s4205_s30 }
0x202d   : > { %3562 = vrot.lane.b32.xlu1 %v3555_v48, %s4205_s30  ;;  %v3691_v48 = vperm.slane %v3687_v58, 3 }
0x2034   : > { %3576 = vrot.lane.b32.xlu2 %v8822_v33, %s4206_s7  ;;  %3572 = vrot.lane.b32.xlu0 %v8648_v59, %s4206_s7  ;;  %v3523_v59 = vsel %vm792_vm11, %v3519_v51, %v3521_v53  ;;  %v3677_v53 = vperm.slane %v3673_v57, 2 }
0x2035   : > { %3574 = vrot.lane.b32.xlu1 %v8649_v29, %s4206_s7  ;;  %v3505_v29 = vadd.f32 %v3501_v47, %v3480_v3 }
0x2037   : > { %v3527_v15 = vadd.f32 %v3523_v59, %v3505_v29 }
0x2039   : > { %v3539_v40 = vpop.permute.xlu1 %3538 }
0x203a   : > { %v3544_v4 = vsel %vm792_vm11, %v3539_v40, %v3541_v17 }
0x203b   : > { %v7555_v9 = vadd.f32 %v3544_v4, %v3526_v60 }
0x203c   : > { %3608 = vperm.xlu2 %4163, %v3958_v13   ;;  %3683 = vperm.xlu0 %4168, %v3638_v41  }
0x203d   : > { %3598 = vperm.xlu1 %4162, %v3958_v13  }
0x2041   : > { %v3543_v21 = vpop.permute.xlu1 %3542 }
0x2042   : > { %v3545_v25 = vsel %vm792_vm11, %v3541_v17, %v3543_v21 }
0x2043   : > { %v7563_v1 = vadd.f32 %v3545_v25, %v3527_v15 }
0x2044   : > { %4165 = vset.pattern.permute.xlu2 %v8823_v63  ;;  %4169 = vset.pattern.permute.xlu0 %v8823_v63 }
0x2045   : > { %4164 = vset.pattern.permute.xlu1 %v8814_v37  ;;  %3631 = vperm.xlu2 %4165, %v3959_v19  }
0x2046   : > { %3588 = vperm.xlu0 %4169, %v3958_v13   ;;  %3618 = vperm.xlu1 %4164, %v3958_v13  }
0x204d   : > { %4167 = vset.pattern.permute.xlu2 %v8818_v6 }
0x204e   : > { %3641 = vperm.xlu0 %4169, %v3638_v41   ;;  %4166 = vset.pattern.permute.xlu1 %v8824_v28 }
0x204f   : > { %3669 = vperm.xlu2 %4167, %v3638_v41   ;;  %3655 = vperm.xlu1 %4166, %v3638_v41  }
0x2056   : > { %3743 = vperm.xlu0 %4169, %v3961_v46  }
0x2057   : > { %4171 = vset.pattern.permute.xlu2 %v8824_v28  ;;  %4170 = vset.pattern.permute.xlu1 %v8823_v63 }
0x2058   : > { %3710 = vperm.xlu2 %4171, %v3960_v5   ;;  %3700 = vperm.xlu1 %4170, %v3960_v5  }
0x205e   : > { %4178 = vset.pattern.permute.xlu0 %v8824_v28 }
0x205f   : > { %3796 = vperm.xlu0 %4178, %v3962_v2  }
0x2060   : > { %4173 = vset.pattern.permute.xlu2 %v8814_v37  ;;  %4172 = vset.pattern.permute.xlu1 %v8818_v6 }
0x2061   : > { %3730 = vperm.xlu2 %4173, %v3960_v5   ;;  %3720 = vperm.xlu1 %4172, %v3960_v5  }
0x2067   : > { %4182 = vset.pattern.permute.xlu0 %v8823_v63 }
0x2069   : > { %4175 = vset.pattern.permute.xlu2 %v8818_v6  ;;  %4174 = vset.pattern.permute.xlu1 %v8824_v28 }
0x206a   : > { %3763 = vperm.xlu2 %4175, %v3961_v46   ;;  %3753 = vperm.xlu1 %4174, %v3961_v46  }
0x2072   : > { %4177 = vset.pattern.permute.xlu2 %v8823_v63  ;;  %4176 = vset.pattern.permute.xlu1 %v8814_v37 }
0x2073   : > { %3786 = vperm.xlu2 %4177, %v3962_v2   ;;  %3773 = vperm.xlu1 %4176, %v3961_v46   ;;  %v8829_v46 = vld [vmem:[#allocation36_spill] sm:$0xff] }
0x2074   : > { %v3704_v5 = vperm.slane %v8829_v46, 0 }
0x207b   : > { %4180 = vset.pattern.permute.xlu2 %v8814_v37  ;;  %4179 = vset.pattern.permute.xlu1 %v8818_v6  ;;  %v3649_v37 = vperm.slane %v3645_v10, 0  ;;  %v3676_v6 = vperm.slane %v3672_v61, 2  ;;  %v3714_v61 = vperm.slane %v8829_v46, 1 }
0x207c   : > { %3816 = vperm.xlu2 %4180, %v3962_v2   ;;  %3806 = vperm.xlu1 %4179, %v3962_v2  }
0x2084   : > { %4181 = vset.pattern.permute.xlu1 %v8823_v63  ;;  %v8828_v63 = vld [vmem:[#allocation71_spill] sm:$0xff] }
0x2085   : > { %3829 = vperm.xlu1 %4181, %v3963_v36   ;;  %v3703_v28 = vperm.slane %v8828_v63, 0 }
0x2086   : > { %v3565_v16 = vpop.permute.xlu2 %3564 }
0x208e   : > { %v3577_v14 = vpop.permute.xlu2 %3576 }
0x2096   : > { %v7595_v24 = vpop.permute.xlu2 %3608 }
0x209e   : > { %v3561_v43 = vpop.permute.xlu0 %3560 }
0x209f   : > { %v3563_v7 = vpop.permute.xlu1 %3562  ;;  %v7597_v23 = vpop.permute.xlu2 %3631 }
0x20a0   : > { %v3566_v39 = vsel %vm792_vm11, %v3561_v43, %v3563_v7  ;;  %v3567_v33 = vsel %vm792_vm11, %v3563_v7, %v3565_v16 }
0x20a1   : > { %v3570_v25 = vadd.f32 %v3566_v39, %v7555_v9  ;;  %v3571_v19 = vadd.f32 %v3567_v33, %v7563_v1 }
0x20a6   : > { %v3573_v12 = vpop.permute.xlu0 %3572 }
0x20a7   : > { %v3575_v26 = vpop.permute.xlu1 %3574 }
0x20a8   : > { %v3578_v38 = vsel %vm871_vm10, %v3573_v12, %v3575_v26  ;;  %v3579_v51 = vsel %vm871_vm10, %v3575_v26, %v3577_v14 }
0x20a9   : > { %v3670_v55 = vpop.permute.xlu2 %3669  ;;  %v7613_v22 = vsel %vm4859_vm12, %v3578_v38, 0.0  ;;  %v7617_v34 = vsel %vm4705_vm3, %v3579_v51, 0.0  ;;  %v3723_v51 = vperm.slane %v8828_v63, 2 }
0x20aa   : > { %v3591_v40 = vperm.slane %v7613_v22, 0  ;;  %v3592_v13 = vperm.slane %v7617_v34, 0  ;;  %v3678_v41 = vmul.f32 %v3676_v6, %v3670_v55  ;;  %v3679_v4 = vmul.f32 %v3677_v53, %v3670_v55 }
0x20ab   : > { %v3601_v7 = vperm.slane %v7613_v22, 1  ;;  %v3602_v14 = vperm.slane %v7617_v34, 1  ;;  %v3611_v9 = vperm.slane %v7613_v22, 2  ;;  %v3612_v1 = vperm.slane %v7617_v34, 2 }
0x20ac   : > { %v3621_v53 = vperm.slane %v7613_v22, 3  ;;  %v8830_v22 = vld [vmem:[#allocation78_spill] sm:$0xff] }
0x20ae   : > { %v3684_v45 = vpop.permute.xlu0 %3683 }
0x20af   : > { %v3599_v44 = vpop.permute.xlu1 %3598  ;;  %v3692_v2 = vmul.f32 %v3690_v18, %v3684_v45  ;;  %v3693_v36 = vmul.f32 %v3691_v48, %v3684_v45  ;;  %v3713_v45 = vperm.slane %v8828_v63, 1  ;;  %v3733_v48 = vperm.slane %v8828_v63, 3 }
0x20b0   : > { %v3603_v32 = vmul.f32 %v3601_v7, %v3599_v44  ;;  %v3604_v10 = vmul.f32 %v3602_v14, %v3599_v44 }
0x20b2   : > { %v3711_v62 = vpop.permute.xlu2 %3710 }
0x20b3   : > { %v3716_v27 = vmul.f32 %v3714_v61, %v3711_v62 }
0x20b8   : > { %v3589_v49 = vpop.permute.xlu0 %3588  ;;  %v7599_v3 = vpop.permute.xlu1 %3618 }
0x20b9   : > { %v3593_v29 = vmul.f32 %v3591_v40, %v3589_v49  ;;  %v3594_v15 = vmul.f32 %v3592_v13, %v3589_v49 }
0x20bb   : > { %v3595_v12 = vadd.f32 %v3593_v29, %v3570_v25  ;;  %v3596_v26 = vadd.f32 %v3594_v15, %v3571_v19  ;;  %v3731_v55 = vpop.permute.xlu2 %3730 }
0x20bc   : > { %v3735_v13 = vmul.f32 %v3733_v48, %v3731_v55 }
0x20bd   : > { %v3605_v57 = vadd.f32 %v3603_v32, %v3595_v12  ;;  %v3767_v12 = vperm.slane %v8830_v22, 2 }
0x20c0   : > { %v3642_v60 = vpop.permute.xlu0 %3641 }
0x20c1   : > { %v3656_v35 = vpop.permute.xlu1 %3655  ;;  %v3650_v17 = vmul.f32 %v3648_v50, %v3642_v60  ;;  %v3651_v52 = vmul.f32 %v3649_v37, %v3642_v60  ;;  %v3606_v50 = vadd.f32 %v3604_v10, %v3596_v26  ;;  %v3614_v60 = vmul.f32 %v3612_v1, %v7595_v24 }
0x20c2   : > { %v3664_v0 = vmul.f32 %v3662_v20, %v3656_v35  ;;  %v3665_v30 = vmul.f32 %v3663_v31, %v3656_v35  ;;  %v3724_v20 = vperm.slane %v8829_v46, 2  ;;  %v3613_v31 = vmul.f32 %v3611_v9, %v7595_v24 }
0x20c3   : > { %v3715_v35 = vmul.f32 %v3713_v45, %v3711_v62  ;;  %v3616_v6 = vadd.f32 %v3614_v60, %v3606_v50  ;;  %v3734_v24 = vperm.slane %v8829_v46, 3  ;;  %v3777_v10 = vperm.slane %v8830_v22, 3 }
0x20c4   : > { %v3666_v47 = vadd.f32 %v3664_v0, %v3650_v17  ;;  %v3667_v59 = vadd.f32 %v3665_v30, %v3651_v52  ;;  %v3615_v56 = vadd.f32 %v3613_v31, %v3605_v57  ;;  %v3622_v17 = vperm.slane %v7617_v34, 3 }
0x20c5   : > { %v3623_v30 = vmul.f32 %v3621_v53, %v7599_v3 }
0x20c6   : > { %v3680_v16 = vadd.f32 %v3678_v41, %v3666_v47  ;;  %v3681_v43 = vadd.f32 %v3679_v4, %v3667_v59  ;;  %v3624_v18 = vmul.f32 %v3622_v17, %v7599_v3  ;;  %v3736_v41 = vmul.f32 %v3734_v24, %v3731_v55  ;;  %v3764_v4 = vpop.permute.xlu2 %3763  ;;  %v8831_v59 = vld [vmem:[#allocation73_spill] sm:$0xff] }
0x20c7   : > { %v3625_v33 = vadd.f32 %v3623_v30, %v3615_v56  ;;  %v3747_v47 = vperm.slane %v8830_v22, 0  ;;  %v3746_v29 = vperm.slane %v8831_v59, 0  ;;  %v3757_v3 = vperm.slane %v8830_v22, 1 }
0x20c8   : > { %v3694_v8 = vadd.f32 %v3692_v2, %v3680_v16  ;;  %v3695_v11 = vadd.f32 %v3693_v36, %v3681_v43  ;;  %v3626_v40 = vadd.f32 %v3624_v18, %v3616_v6  ;;  %v3744_v34 = vpop.permute.xlu0 %3743  ;;  %v3756_v19 = vperm.slane %v8831_v59, 1 }
0x20c9   : > { %v3634_v63 = vadd.f32 %v7597_v23, %v3625_v33  ;;  %v3748_v46 = vmul.f32 %v3746_v29, %v3744_v34  ;;  %v3766_v26 = vperm.slane %v8831_v59, 2  ;;  %v3769_v1 = vmul.f32 %v3767_v12, %v3764_v4 }
0x20ca   : > { %v3701_v21 = vpop.permute.xlu1 %3700 }
0x20cb   : > { %v3705_v49 = vmul.f32 %v3703_v28, %v3701_v21  ;;  %v3706_v42 = vmul.f32 %v3704_v5, %v3701_v21  ;;  %v3635_v28 = vadd.f32 %v7597_v23, %v3626_v40  ;;  %v3749_v5 = vmul.f32 %v3747_v47, %v3744_v34 }
0x20cc   : > { %v3636_v7 = vmax.f32 %v3634_v63, 0.0  ;;  %v3768_v9 = vmul.f32 %v3766_v26, %v3764_v4  ;;  %v3776_v23 = vperm.slane %v8831_v59, 3 }
0x20cd   : > { %v3707_v37 = vadd.f32 %v3705_v49, %v3694_v8  ;;  %v3708_v38 = vadd.f32 %v3706_v42, %v3695_v11  ;;  %v3637_v14 = vmax.f32 %v3635_v28, 0.0 }
0x20ce   : > { %v3787_v32 = vpop.permute.xlu2 %3786  ;;  %v3789_v55 = vperm.slane %v3636_v7, 0  ;;  %v3809_v53 = vperm.slane %v3636_v7, 2  ;;  %v3819_v30 = vperm.slane %v3636_v7, 3 }
0x20cf   : > { %v3717_v52 = vadd.f32 %v3715_v35, %v3707_v37  ;;  %v3718_v0 = vadd.f32 %v3716_v27, %v3708_v38  ;;  %v3790_v8 = vperm.slane %v3637_v14, 0  ;;  %v3799_v38 = vperm.slane %v3636_v7, 1 }
0x20d0   : > { %v3810_v17 = vperm.slane %v3637_v14, 2  ;;  %v3820_v18 = vperm.slane %v3637_v14, 3 }
0x20d1   : > { %v3797_v37 = vpop.permute.xlu0 %3796  ;;  %v3792_v31 = vmul.f32 %v3790_v8, %v3787_v32 }
0x20d2   : > { %v3801_v35 = vmul.f32 %v3799_v38, %v3797_v37 }
0x20d3   : > { %v3721_v44 = vpop.permute.xlu1 %3720 }
0x20d4   : > { %v3725_v58 = vmul.f32 %v3723_v51, %v3721_v44  ;;  %v3726_v54 = vmul.f32 %v3724_v20, %v3721_v44  ;;  %v3800_v51 = vperm.slane %v3637_v14, 1  ;;  %v3791_v20 = vmul.f32 %v3789_v55, %v3787_v32 }
0x20d6   : > { %v3727_v39 = vadd.f32 %v3725_v58, %v3717_v52  ;;  %v3728_v62 = vadd.f32 %v3726_v54, %v3718_v0  ;;  %v3802_v27 = vmul.f32 %v3800_v51, %v3797_v37  ;;  %v3817_v52 = vpop.permute.xlu2 %3816 }
0x20d8   : > { %v3737_v15 = vadd.f32 %v3735_v13, %v3727_v39  ;;  %v3738_v21 = vadd.f32 %v3736_v41, %v3728_v62  ;;  %v3821_v39 = vmul.f32 %v3819_v30, %v3817_v52  ;;  %v3822_v62 = vmul.f32 %v3820_v18, %v3817_v52 }
0x20da   : > { %v3751_v16 = vadd.f32 %v3749_v5, %v3738_v21  ;;  %v3750_v43 = vadd.f32 %v3748_v46, %v3737_v15 }
0x20dc   : > { %v3754_v25 = vpop.permute.xlu1 %3753 }
0x20dd   : > { %v3758_v2 = vmul.f32 %v3756_v19, %v3754_v25  ;;  %v3759_v36 = vmul.f32 %v3757_v3, %v3754_v25 }
0x20df   : > { %v3760_v49 = vadd.f32 %v3758_v2, %v3750_v43  ;;  %v3761_v42 = vadd.f32 %v3759_v36, %v3751_v16 }
0x20e1   : > { %v3771_v45 = vadd.f32 %v3769_v1, %v3761_v42  ;;  %v3770_v61 = vadd.f32 %v3768_v9, %v3760_v49 }
0x20e5   : > { %v3774_v11 = vpop.permute.xlu1 %3773 }
0x20e6   : > { %v3778_v57 = vmul.f32 %v3776_v23, %v3774_v11  ;;  %v3779_v50 = vmul.f32 %v3777_v10, %v3774_v11 }
0x20e8   : > { %v3780_v60 = vadd.f32 %v3778_v57, %v3770_v61  ;;  %v3781_v44 = vadd.f32 %v3779_v50, %v3771_v45 }
0x20ea   : > { %v3793_v58 = vadd.f32 %v3791_v20, %v3780_v60  ;;  %v3794_v54 = vadd.f32 %v3792_v31, %v3781_v44 }
0x20ec   : > { %v3804_v56 = vadd.f32 %v3802_v27, %v3794_v54  ;;  %v3803_v6 = vadd.f32 %v3801_v35, %v3793_v58 }
0x20ee   : > { %v3807_v0 = vpop.permute.xlu1 %3806 }
0x20ef   : > { %v3811_v48 = vmul.f32 %v3809_v53, %v3807_v0  ;;  %v3812_v24 = vmul.f32 %v3810_v17, %v3807_v0 }
0x20f1   : > { %v3813_v33 = vadd.f32 %v3811_v48, %v3803_v6  ;;  %v3814_v40 = vadd.f32 %v3812_v24, %v3804_v56 }
0x20f3   : > { %v3824_v13 = vadd.f32 %v3822_v62, %v3814_v40  ;;  %v3823_v41 = vadd.f32 %v3821_v39, %v3813_v33 }
0x20f7   : > { %v3830_v4 = vpop.permute.xlu1 %3829 }
0x20f8   : > { %v3832_v22 = vadd.f32 %v3830_v4, %v3823_v41  ;;  %v3833_v47 = vadd.f32 %v3830_v4, %v3824_v13 }
0x20fa   : > { %v3834_v34 = vadd.f32 %v3832_v22, %v3636_v7  ;;  %v3835_v59 = vadd.f32 %v3833_v47, %v3637_v14 }
0x20fc   : > { %v3838_v29 = vrot.slane %v3835_v59, 4 }
0x20fe   : > { %v3840_v15 = vsel %vm3839_vm13, %v3834_v34, %v3838_v29 }
0x20ff   : > { %3842 = vst [vmem:[%s251_s18] sm:$0xff] %v3840_v15 }
0x2100 PF: > { %s16_s21 = sadd.s32 1, %s4192_s21  }
0x2101   : > { %p13_p4 = scmp.ge.s32.totalorder %s16_s21, 4  }
0x2103   :  { %15 = sbr.rel (!%p13_p4) target bundleno = 1 (0x1), region = 131 }

</bundles_post_ra>
